<compile_context>
chip_gen: v7x
topology: tpu7x:2x2x1
jax: 0.10.0
libtpu: 0.0.40
codegen_flags: <defaults>
</compile_context>

<pallas_src>
import functools

import jax
import jax.numpy as jnp
from jax.experimental import pallas as pl
from jax.experimental.pallas import tpu as pltpu


def _round_up(x, m):
    return ((x + m - 1) // m) * m


def _fused_cnn_kernel(*refs, layer_dims, L, Wp, FRONT):
    """Fully fused CNN forward; all activations stay in VMEM.

    Ref layout (inputs..., outputs..., scratch...):
      refs[0]            x_ref    (Cin0, WIDTH)  lane-flattened padded input,
                                                 data starts at lane FRONT
      refs[1]            mask_ref (1, L)         1.0 at valid (non-halo) pos
      refs[2 + 2l]       w_ref_l  (9, Cout_l, Cin_l)  taps ordered ky*3 + kx
      refs[3 + 2l]       b_ref_l  (Cout_l, 1)
      refs[2 + 2n]       o_ref    (Cout_last, L)
      refs[3 + 2n ...]   buf0, buf1 (C_buf, WIDTH) ping-pong VMEM scratch
    """
    n_layers = len(layer_dims)
    x_ref = refs[0]
    mask_ref = refs[1]
    w_refs = [refs[2 + 2 * l] for l in range(n_layers)]
    b_refs = [refs[3 + 2 * l] for l in range(n_layers)]
    o_ref = refs[2 + 2 * n_layers]
    bufs = [refs[3 + 2 * n_layers], refs[4 + 2 * n_layers]]

    # Margins / halo lanes must read as zero ('same' conv zero padding).
    bufs[0][...] = jnp.zeros_like(bufs[0])
    bufs[1][...] = jnp.zeros_like(bufs[1])

    mask = mask_ref[...]  # (1, L), broadcasts over channel sublanes

    for l, (cin, cout) in enumerate(layer_dims):
        src = x_ref if l == 0 else bufs[(l - 1) % 2]
        # Accumulator starts as the broadcast bias (no separate bias add).
        acc = jnp.broadcast_to(b_refs[l][...], (cout, L)).astype(jnp.float32)
        for tap in range(9):
            ky, kx = tap // 3, tap % 3
            start = FRONT + (ky - 1) * Wp + (kx - 1)   # static lane offset
            win = src[0:cin, start:start + L]          # (cin, L)
            acc = acc + jnp.dot(w_refs[l][tap], win,
                                preferred_element_type=jnp.float32)
        if l < n_layers - 1:
            # Fused ReLU, then zero the halo ring so the next layer sees
            # proper 'same' zero padding; single lane-aligned store.
            acc = jnp.maximum(acc, 0.0) * mask
            bufs[l % 2][0:cout, FRONT:FRONT + L] = acc
        else:
            o_ref[...] = acc


def simple_spectral_operator_cnn(x_nchw, params, K_input_resolution,
                                 K_output_resolution):
    """Forward pass matching SimpleSpectralOperatorCNN.forward (NCHW in/out)."""
    if K_output_resolution > K_input_resolution:
        raise ValueError("K_output_resolution cannot exceed K_input_resolution")

    N, cin0, H, W = x_nchw.shape
    Hp, Wp = H + 2, W + 2
    L = N * Hp * Wp                       # flattened padded spatial, all batches
    FRONT = _round_up(Wp + 1, 128)        # lane-aligned start of the activation
    WIDTH = _round_up(FRONT + L + Wp + 1, 128)

    # ---- glue: pack NCHW input as (C, lane-flattened padded spatial) ----
    x = jnp.transpose(x_nchw, (1, 0, 2, 3)).astype(jnp.float32)  # (C, N, H, W)
    x = jnp.pad(x, ((0, 0), (0, 0), (1, 1), (1, 1)))             # (C, N, Hp, Wp)
    x = x.reshape(cin0, L)
    x = jnp.pad(x, ((0, 0), (FRONT, WIDTH - FRONT - L)))         # (C, WIDTH)

    mask = jnp.pad(jnp.ones((N, H, W), jnp.float32),
                   ((0, 0), (1, 1), (1, 1))).reshape(1, L)

    layer_dims = []
    flat_inputs = [x, mask]
    in_specs = [
        pl.BlockSpec((cin0, WIDTH), lambda i: (0, 0)),
        pl.BlockSpec((1, L), lambda i: (0, 0)),
    ]
    for (w, b) in params:                 # w: (3, 3, Cin, Cout) HWIO, b: (Cout,)
        cin, cout = int(w.shape[2]), int(w.shape[3])
        layer_dims.append((cin, cout))
        w_taps = jnp.transpose(w.reshape(9, cin, cout), (0, 2, 1))  # (9,Cout,Cin)
        flat_inputs += [w_taps, b.reshape(cout, 1)]
        in_specs += [
            pl.BlockSpec((9, cout, cin), lambda i: (0, 0, 0)),
            pl.BlockSpec((cout, 1), lambda i: (0, 0)),
        ]
    cout_last = layer_dims[-1][1]
    c_buf = _round_up(max(c for _, c in layer_dims[:-1]), 8)

    kernel = functools.partial(_fused_cnn_kernel, layer_dims=tuple(layer_dims),
                               L=L, Wp=Wp, FRONT=FRONT)
    out = pl.pallas_call(
        kernel,
        out_shape=jax.ShapeDtypeStruct((cout_last, L), jnp.float32),
        grid_spec=pltpu.PrefetchScalarGridSpec(
            num_scalar_prefetch=0,
            grid=(1,),
            in_specs=in_specs,
            out_specs=pl.BlockSpec((cout_last, L), lambda i: (0, 0)),
            scratch_shapes=[pltpu.VMEM((c_buf, WIDTH), jnp.float32),
                            pltpu.VMEM((c_buf, WIDTH), jnp.float32)],
        ),
        compiler_params=pltpu.CompilerParams(
            dimension_semantics=("arbitrary",)),
    )(*flat_inputs)

    # ---- glue: unpack (C, L) -> NCHW and center-crop (tiny, ~5 KB) ----
    y = out.reshape(cout_last, N, Hp, Wp)
    y = jnp.transpose(y, (1, 0, 2, 3))                    # (N, C, Hp, Wp)
    start = K_input_resolution // 2 - K_output_resolution // 2
    r0 = 1 + start
    return y[:, :, r0:r0 + K_output_resolution, r0:r0 + K_output_resolution]


def init_params(key, hidden_channels=32, num_hidden_layers=3):
    """Deterministic parameter init (shapes mirror the torch module, HWIO)."""
    chans = [2] + [hidden_channels] * (num_hidden_layers + 1) + [2]
    params = []
    for i in range(len(chans) - 1):
        cin, cout = chans[i], chans[i + 1]
        key, kw, kb = jax.random.split(key, 3)
        fan_in = cin * 9
        bound = (1.0 / fan_in) ** 0.5
        w = jax.random.uniform(kw, (3, 3, cin, cout), jnp.float32,
                               -bound, bound)
        b = jax.random.uniform(kb, (cout,), jnp.float32, -bound, bound)
        params.append((w, b))
    return params


def _reference_forward(x_nchw, params, K_in, K_out):
    """Pure-JAX reference (lax conv) for a correctness sanity check."""
    x = x_nchw
    n_layers = len(params)
    for i, (w, b) in enumerate(params):
        y = jax.lax.conv_general_dilated(
            x, w, window_strides=(1, 1), padding="SAME",
            dimension_numbers=("NCHW", "HWIO", "NCHW"))
        y = y + b.reshape(1, -1, 1, 1)
        if i < n_layers - 1:
            y = jnp.maximum(y, 0.0)
        x = y
    if K_in == K_out:
        return x
    start = K_in // 2 - K_out // 2
    return x[:, :, start:start + K_out, start:start + K_out]


if __name__ == "__main__":
    K_in, K_out = 16, 8
    hidden_channels, num_hidden_layers = 32, 3
    batch = 2

    key = jax.random.PRNGKey(0)
    key, kx = jax.random.split(key)
    x = jax.random.normal(kx, (batch, 2, K_in, K_in), dtype=jnp.float32)
    params = init_params(key, hidden_channels, num_hidden_layers)

    fwd = jax.jit(simple_spectral_operator_cnn, static_argnums=(2, 3))
    out = fwd(x, params, K_in, K_out)
    out = jax.block_until_ready(out)

    assert out.shape == (batch, 2, K_out, K_out), out.shape

    ref = _reference_forward(x, params, K_in, K_out)
    assert jnp.allclose(out, ref, rtol=1e-3, atol=1e-4), (
        float(jnp.max(jnp.abs(out - ref))))

    print("KERNEL_OK")
</pallas_src>

<mosaic_0001>
module attributes {stable_mosaic.version = 11 : i64} {
  func.func @_fused_cnn_kernel(%arg0: i32, %arg1: memref<2x896xf32, #tpu.memory_space<vmem>>, %arg2: memref<1x648xf32, #tpu.memory_space<vmem>>, %arg3: memref<9x32x2xf32, #tpu.memory_space<vmem>>, %arg4: memref<32x1xf32, #tpu.memory_space<vmem>>, %arg5: memref<9x32x32xf32, #tpu.memory_space<vmem>>, %arg6: memref<32x1xf32, #tpu.memory_space<vmem>>, %arg7: memref<9x32x32xf32, #tpu.memory_space<vmem>>, %arg8: memref<32x1xf32, #tpu.memory_space<vmem>>, %arg9: memref<9x32x32xf32, #tpu.memory_space<vmem>>, %arg10: memref<32x1xf32, #tpu.memory_space<vmem>>, %arg11: memref<9x2x32xf32, #tpu.memory_space<vmem>>, %arg12: memref<2x1xf32, #tpu.memory_space<vmem>>, %arg13: memref<2x648xf32, #tpu.memory_space<vmem>>, %arg14: memref<32x896xf32, #tpu.memory_space<vmem>>, %arg15: memref<32x896xf32, #tpu.memory_space<vmem>>) attributes {dimension_semantics = [#tpu.dimension_semantics<arbitrary>], iteration_bounds = array<i64: 1>, scalar_prefetch = 0 : i64, scratch_operands = 2 : i64, tpu.core_type = #tpu.core_type<tc>, window_params = [{pipeline_mode = #tpu.pipeline_mode<synchronous>, transform_indices = @transform_0, window_bounds = array<i64: 2, 896>}, {pipeline_mode = #tpu.pipeline_mode<synchronous>, transform_indices = @transform_1, window_bounds = array<i64: 1, 648>}, {pipeline_mode = #tpu.pipeline_mode<synchronous>, transform_indices = @transform_2, window_bounds = array<i64: 9, 32, 2>}, {pipeline_mode = #tpu.pipeline_mode<synchronous>, transform_indices = @transform_3, window_bounds = array<i64: 32, 1>}, {pipeline_mode = #tpu.pipeline_mode<synchronous>, transform_indices = @transform_4, window_bounds = array<i64: 9, 32, 32>}, {pipeline_mode = #tpu.pipeline_mode<synchronous>, transform_indices = @transform_5, window_bounds = array<i64: 32, 1>}, {pipeline_mode = #tpu.pipeline_mode<synchronous>, transform_indices = @transform_6, window_bounds = array<i64: 9, 32, 32>}, {pipeline_mode = #tpu.pipeline_mode<synchronous>, transform_indices = @transform_7, window_bounds = array<i64: 32, 1>}, {pipeline_mode = #tpu.pipeline_mode<synchronous>, transform_indices = @transform_8, window_bounds = array<i64: 9, 32, 32>}, {pipeline_mode = #tpu.pipeline_mode<synchronous>, transform_indices = @transform_9, window_bounds = array<i64: 32, 1>}, {pipeline_mode = #tpu.pipeline_mode<synchronous>, transform_indices = @transform_10, window_bounds = array<i64: 9, 2, 32>}, {pipeline_mode = #tpu.pipeline_mode<synchronous>, transform_indices = @transform_11, window_bounds = array<i64: 2, 1>}, {pipeline_mode = #tpu.pipeline_mode<synchronous>, transform_indices = @transform_12, window_bounds = array<i64: 2, 648>}]} {
    %cst = arith.constant 0.000000e+00 : f32
    %0 = vector.broadcast %cst : f32 to vector<32x896xf32>
    %c0 = arith.constant 0 : index
    %c0_0 = arith.constant 0 : index
    %1 = vector.load %arg14[%c0, %c0_0] : memref<32x896xf32, #tpu.memory_space<vmem>>, vector<32x896xf32>
    tpu.vector_store %arg14[%c0, %c0_0], %0 {strides = array<i32>} : memref<32x896xf32, #tpu.memory_space<vmem>>, vector<32x896xf32>,
    %cst_1 = arith.constant 0.000000e+00 : f32
    %2 = vector.broadcast %cst_1 : f32 to vector<32x896xf32>
    %c0_2 = arith.constant 0 : index
    %c0_3 = arith.constant 0 : index
    %3 = vector.load %arg15[%c0_2, %c0_3] : memref<32x896xf32, #tpu.memory_space<vmem>>, vector<32x896xf32>
    tpu.vector_store %arg15[%c0_2, %c0_3], %2 {strides = array<i32>} : memref<32x896xf32, #tpu.memory_space<vmem>>, vector<32x896xf32>,
    %c0_4 = arith.constant 0 : index
    %c0_5 = arith.constant 0 : index
    %4 = vector.load %arg2[%c0_4, %c0_5] : memref<1x648xf32, #tpu.memory_space<vmem>>, vector<1x648xf32>
    %c0_6 = arith.constant 0 : index
    %c0_7 = arith.constant 0 : index
    %5 = vector.load %arg4[%c0_6, %c0_7] : memref<32x1xf32, #tpu.memory_space<vmem>>, vector<32x1xf32>
    %6 = vector.shape_cast %5 : vector<32x1xf32> to vector<32x1xf32>
    %7 = vector.broadcast %6 : vector<32x1xf32> to vector<32x648xf32>
    %c0_8 = arith.constant 0 : index
    %c109 = arith.constant 109 : index
    %8 = vector.load %arg1[%c0_8, %c109] : memref<2x896xf32, #tpu.memory_space<vmem>>, vector<2x648xf32>
    %c0_9 = arith.constant 0 : index
    %c0_10 = arith.constant 0 : index
    %c0_11 = arith.constant 0 : index
    %9 = vector.load %arg3[%c0_9, %c0_10, %c0_11] : memref<9x32x2xf32, #tpu.memory_space<vmem>>, vector<1x32x2xf32>
    %10 = vector.shape_cast %9 : vector<1x32x2xf32> to vector<32x2xf32>
    %cst_12 = arith.constant dense<0.000000e+00> : vector<32x648xf32>
    %11 = tpu.matmul %10, %8, %cst_12 {dimension_numbers = #tpu.dot_dimension_numbers<[1], [0], [0], [1], [0, 0, 1, 1], [], []>} : vector<32x2xf32>, vector<2x648xf32>, vector<32x648xf32> -> vector<32x648xf32>
    %12 = arith.addf %7, %11 : vector<32x648xf32>
    %c0_13 = arith.constant 0 : index
    %c110 = arith.constant 110 : index
    %13 = vector.load %arg1[%c0_13, %c110] : memref<2x896xf32, #tpu.memory_space<vmem>>, vector<2x648xf32>
    %c1 = arith.constant 1 : index
    %c0_14 = arith.constant 0 : index
    %c0_15 = arith.constant 0 : index
    %14 = vector.load %arg3[%c1, %c0_14, %c0_15] : memref<9x32x2xf32, #tpu.memory_space<vmem>>, vector<1x32x2xf32>
    %15 = vector.shape_cast %14 : vector<1x32x2xf32> to vector<32x2xf32>
    %cst_16 = arith.constant dense<0.000000e+00> : vector<32x648xf32>
    %16 = tpu.matmul %15, %13, %cst_16 {dimension_numbers = #tpu.dot_dimension_numbers<[1], [0], [0], [1], [0, 0, 1, 1], [], []>} : vector<32x2xf32>, vector<2x648xf32>, vector<32x648xf32> -> vector<32x648xf32>
    %17 = arith.addf %12, %16 : vector<32x648xf32>
    %c0_17 = arith.constant 0 : index
    %c111 = arith.constant 111 : index
    %18 = vector.load %arg1[%c0_17, %c111] : memref<2x896xf32, #tpu.memory_space<vmem>>, vector<2x648xf32>
    %c2 = arith.constant 2 : index
    %c0_18 = arith.constant 0 : index
    %c0_19 = arith.constant 0 : index
    %19 = vector.load %arg3[%c2, %c0_18, %c0_19] : memref<9x32x2xf32, #tpu.memory_space<vmem>>, vector<1x32x2xf32>
    %20 = vector.shape_cast %19 : vector<1x32x2xf32> to vector<32x2xf32>
    %cst_20 = arith.constant dense<0.000000e+00> : vector<32x648xf32>
    %21 = tpu.matmul %20, %18, %cst_20 {dimension_numbers = #tpu.dot_dimension_numbers<[1], [0], [0], [1], [0, 0, 1, 1], [], []>} : vector<32x2xf32>, vector<2x648xf32>, vector<32x648xf32> -> vector<32x648xf32>
    %22 = arith.addf %17, %21 : vector<32x648xf32>
    %c0_21 = arith.constant 0 : index
    %c127 = arith.constant 127 : index
    %23 = vector.load %arg1[%c0_21, %c127] : memref<2x896xf32, #tpu.memory_space<vmem>>, vector<2x648xf32>
    %c3 = arith.constant 3 : index
    %c0_22 = arith.constant 0 : index
    %c0_23 = arith.constant 0 : index
    %24 = vector.load %arg3[%c3, %c0_22, %c0_23] : memref<9x32x2xf32, #tpu.memory_space<vmem>>, vector<1x32x2xf32>
    %25 = vector.shape_cast %24 : vector<1x32x2xf32> to vector<32x2xf32>
    %cst_24 = arith.constant dense<0.000000e+00> : vector<32x648xf32>
    %26 = tpu.matmul %25, %23, %cst_24 {dimension_numbers = #tpu.dot_dimension_numbers<[1], [0], [0], [1], [0, 0, 1, 1], [], []>} : vector<32x2xf32>, vector<2x648xf32>, vector<32x648xf32> -> vector<32x648xf32>
    %27 = arith.addf %22, %26 : vector<32x648xf32>
    %c0_25 = arith.constant 0 : index
    %c128 = arith.constant 128 : index
    %28 = vector.load %arg1[%c0_25, %c128] : memref<2x896xf32, #tpu.memory_space<vmem>>, vector<2x648xf32>
    %c4 = arith.constant 4 : index
    %c0_26 = arith.constant 0 : index
    %c0_27 = arith.constant 0 : index
    %29 = vector.load %arg3[%c4, %c0_26, %c0_27] : memref<9x32x2xf32, #tpu.memory_space<vmem>>, vector<1x32x2xf32>
    %30 = vector.shape_cast %29 : vector<1x32x2xf32> to vector<32x2xf32>
    %cst_28 = arith.constant dense<0.000000e+00> : vector<32x648xf32>
    %31 = tpu.matmul %30, %28, %cst_28 {dimension_numbers = #tpu.dot_dimension_numbers<[1], [0], [0], [1], [0, 0, 1, 1], [], []>} : vector<32x2xf32>, vector<2x648xf32>, vector<32x648xf32> -> vector<32x648xf32>
    %32 = arith.addf %27, %31 : vector<32x648xf32>
    %c0_29 = arith.constant 0 : index
    %c129 = arith.constant 129 : index
    %33 = vector.load %arg1[%c0_29, %c129] : memref<2x896xf32, #tpu.memory_space<vmem>>, vector<2x648xf32>
    %c5 = arith.constant 5 : index
    %c0_30 = arith.constant 0 : index
    %c0_31 = arith.constant 0 : index
    %34 = vector.load %arg3[%c5, %c0_30, %c0_31] : memref<9x32x2xf32, #tpu.memory_space<vmem>>, vector<1x32x2xf32>
    %35 = vector.shape_cast %34 : vector<1x32x2xf32> to vector<32x2xf32>
    %cst_32 = arith.constant dense<0.000000e+00> : vector<32x648xf32>
    %36 = tpu.matmul %35, %33, %cst_32 {dimension_numbers = #tpu.dot_dimension_numbers<[1], [0], [0], [1], [0, 0, 1, 1], [], []>} : vector<32x2xf32>, vector<2x648xf32>, vector<32x648xf32> -> vector<32x648xf32>
    %37 = arith.addf %32, %36 : vector<32x648xf32>
    %c0_33 = arith.constant 0 : index
    %c145 = arith.constant 145 : index
    %38 = vector.load %arg1[%c0_33, %c145] : memref<2x896xf32, #tpu.memory_space<vmem>>, vector<2x648xf32>
    %c6 = arith.constant 6 : index
    %c0_34 = arith.constant 0 : index
    %c0_35 = arith.constant 0 : index
    %39 = vector.load %arg3[%c6, %c0_34, %c0_35] : memref<9x32x2xf32, #tpu.memory_space<vmem>>, vector<1x32x2xf32>
    %40 = vector.shape_cast %39 : vector<1x32x2xf32> to vector<32x2xf32>
    %cst_36 = arith.constant dense<0.000000e+00> : vector<32x648xf32>
    %41 = tpu.matmul %40, %38, %cst_36 {dimension_numbers = #tpu.dot_dimension_numbers<[1], [0], [0], [1], [0, 0, 1, 1], [], []>} : vector<32x2xf32>, vector<2x648xf32>, vector<32x648xf32> -> vector<32x648xf32>
    %42 = arith.addf %37, %41 : vector<32x648xf32>
    %c0_37 = arith.constant 0 : index
    %c146 = arith.constant 146 : index
    %43 = vector.load %arg1[%c0_37, %c146] : memref<2x896xf32, #tpu.memory_space<vmem>>, vector<2x648xf32>
    %c7 = arith.constant 7 : index
    %c0_38 = arith.constant 0 : index
    %c0_39 = arith.constant 0 : index
    %44 = vector.load %arg3[%c7, %c0_38, %c0_39] : memref<9x32x2xf32, #tpu.memory_space<vmem>>, vector<1x32x2xf32>
    %45 = vector.shape_cast %44 : vector<1x32x2xf32> to vector<32x2xf32>
    %cst_40 = arith.constant dense<0.000000e+00> : vector<32x648xf32>
    %46 = tpu.matmul %45, %43, %cst_40 {dimension_numbers = #tpu.dot_dimension_numbers<[1], [0], [0], [1], [0, 0, 1, 1], [], []>} : vector<32x2xf32>, vector<2x648xf32>, vector<32x648xf32> -> vector<32x648xf32>
    %47 = arith.addf %42, %46 : vector<32x648xf32>
    %c0_41 = arith.constant 0 : index
    %c147 = arith.constant 147 : index
    %48 = vector.load %arg1[%c0_41, %c147] : memref<2x896xf32, #tpu.memory_space<vmem>>, vector<2x648xf32>
    %c8 = arith.constant 8 : index
    %c0_42 = arith.constant 0 : index
    %c0_43 = arith.constant 0 : index
    %49 = vector.load %arg3[%c8, %c0_42, %c0_43] : memref<9x32x2xf32, #tpu.memory_space<vmem>>, vector<1x32x2xf32>
    %50 = vector.shape_cast %49 : vector<1x32x2xf32> to vector<32x2xf32>
    %cst_44 = arith.constant dense<0.000000e+00> : vector<32x648xf32>
    %51 = tpu.matmul %50, %48, %cst_44 {dimension_numbers = #tpu.dot_dimension_numbers<[1], [0], [0], [1], [0, 0, 1, 1], [], []>} : vector<32x2xf32>, vector<2x648xf32>, vector<32x648xf32> -> vector<32x648xf32>
    %52 = arith.addf %47, %51 : vector<32x648xf32>
    %cst_45 = arith.constant 0.000000e+00 : f32
    %53 = vector.broadcast %cst_45 : f32 to vector<32x648xf32>
    %54 = arith.maximumf %52, %53 : vector<32x648xf32>
    %55 = vector.broadcast %4 : vector<1x648xf32> to vector<32x648xf32>
    %56 = arith.mulf %54, %55 : vector<32x648xf32>
    %c0_46 = arith.constant 0 : index
    %c128_47 = arith.constant 128 : index
    %57 = vector.load %arg14[%c0_46, %c128_47] : memref<32x896xf32, #tpu.memory_space<vmem>>, vector<32x648xf32>
    tpu.vector_store %arg14[%c0_46, %c128_47], %56 {strides = array<i32>} : memref<32x896xf32, #tpu.memory_space<vmem>>, vector<32x648xf32>,
    %c0_48 = arith.constant 0 : index
    %c0_49 = arith.constant 0 : index
    %58 = vector.load %arg6[%c0_48, %c0_49] : memref<32x1xf32, #tpu.memory_space<vmem>>, vector<32x1xf32>
    %59 = vector.shape_cast %58 : vector<32x1xf32> to vector<32x1xf32>
    %60 = vector.broadcast %59 : vector<32x1xf32> to vector<32x648xf32>
    %c0_50 = arith.constant 0 : index
    %c109_51 = arith.constant 109 : index
    %61 = vector.load %arg14[%c0_50, %c109_51] : memref<32x896xf32, #tpu.memory_space<vmem>>, vector<32x648xf32>
    %c0_52 = arith.constant 0 : index
    %c0_53 = arith.constant 0 : index
    %c0_54 = arith.constant 0 : index
    %62 = vector.load %arg5[%c0_52, %c0_53, %c0_54] : memref<9x32x32xf32, #tpu.memory_space<vmem>>, vector<1x32x32xf32>
    %63 = vector.shape_cast %62 : vector<1x32x32xf32> to vector<32x32xf32>
    %cst_55 = arith.constant dense<0.000000e+00> : vector<32x648xf32>
    %64 = tpu.matmul %63, %61, %cst_55 {dimension_numbers = #tpu.dot_dimension_numbers<[1], [0], [0], [1], [0, 0, 1, 1], [], []>} : vector<32x32xf32>, vector<32x648xf32>, vector<32x648xf32> -> vector<32x648xf32>
    %65 = arith.addf %60, %64 : vector<32x648xf32>
    %c0_56 = arith.constant 0 : index
    %c110_57 = arith.constant 110 : index
    %66 = vector.load %arg14[%c0_56, %c110_57] : memref<32x896xf32, #tpu.memory_space<vmem>>, vector<32x648xf32>
    %c1_58 = arith.constant 1 : index
    %c0_59 = arith.constant 0 : index
    %c0_60 = arith.constant 0 : index
    %67 = vector.load %arg5[%c1_58, %c0_59, %c0_60] : memref<9x32x32xf32, #tpu.memory_space<vmem>>, vector<1x32x32xf32>
    %68 = vector.shape_cast %67 : vector<1x32x32xf32> to vector<32x32xf32>
    %cst_61 = arith.constant dense<0.000000e+00> : vector<32x648xf32>
    %69 = tpu.matmul %68, %66, %cst_61 {dimension_numbers = #tpu.dot_dimension_numbers<[1], [0], [0], [1], [0, 0, 1, 1], [], []>} : vector<32x32xf32>, vector<32x648xf32>, vector<32x648xf32> -> vector<32x648xf32>
    %70 = arith.addf %65, %69 : vector<32x648xf32>
    %c0_62 = arith.constant 0 : index
    %c111_63 = arith.constant 111 : index
    %71 = vector.load %arg14[%c0_62, %c111_63] : memref<32x896xf32, #tpu.memory_space<vmem>>, vector<32x648xf32>
    %c2_64 = arith.constant 2 : index
    %c0_65 = arith.constant 0 : index
    %c0_66 = arith.constant 0 : index
    %72 = vector.load %arg5[%c2_64, %c0_65, %c0_66] : memref<9x32x32xf32, #tpu.memory_space<vmem>>, vector<1x32x32xf32>
    %73 = vector.shape_cast %72 : vector<1x32x32xf32> to vector<32x32xf32>
    %cst_67 = arith.constant dense<0.000000e+00> : vector<32x648xf32>
    %74 = tpu.matmul %73, %71, %cst_67 {dimension_numbers = #tpu.dot_dimension_numbers<[1], [0], [0], [1], [0, 0, 1, 1], [], []>} : vector<32x32xf32>, vector<32x648xf32>, vector<32x648xf32> -> vector<32x648xf32>
    %75 = arith.addf %70, %74 : vector<32x648xf32>
    %c0_68 = arith.constant 0 : index
    %c127_69 = arith.constant 127 : index
    %76 = vector.load %arg14[%c0_68, %c127_69] : memref<32x896xf32, #tpu.memory_space<vmem>>, vector<32x648xf32>
    %c3_70 = arith.constant 3 : index
    %c0_71 = arith.constant 0 : index
    %c0_72 = arith.constant 0 : index
    %77 = vector.load %arg5[%c3_70, %c0_71, %c0_72] : memref<9x32x32xf32, #tpu.memory_space<vmem>>, vector<1x32x32xf32>
    %78 = vector.shape_cast %77 : vector<1x32x32xf32> to vector<32x32xf32>
    %cst_73 = arith.constant dense<0.000000e+00> : vector<32x648xf32>
    %79 = tpu.matmul %78, %76, %cst_73 {dimension_numbers = #tpu.dot_dimension_numbers<[1], [0], [0], [1], [0, 0, 1, 1], [], []>} : vector<32x32xf32>, vector<32x648xf32>, vector<32x648xf32> -> vector<32x648xf32>
    %80 = arith.addf %75, %79 : vector<32x648xf32>
    %c0_74 = arith.constant 0 : index
    %c128_75 = arith.constant 128 : index
    %81 = vector.load %arg14[%c0_74, %c128_75] : memref<32x896xf32, #tpu.memory_space<vmem>>, vector<32x648xf32>
    %c4_76 = arith.constant 4 : index
    %c0_77 = arith.constant 0 : index
    %c0_78 = arith.constant 0 : index
    %82 = vector.load %arg5[%c4_76, %c0_77, %c0_78] : memref<9x32x32xf32, #tpu.memory_space<vmem>>, vector<1x32x32xf32>
    %83 = vector.shape_cast %82 : vector<1x32x32xf32> to vector<32x32xf32>
    %cst_79 = arith.constant dense<0.000000e+00> : vector<32x648xf32>
    %84 = tpu.matmul %83, %81, %cst_79 {dimension_numbers = #tpu.dot_dimension_numbers<[1], [0], [0], [1], [0, 0, 1, 1], [], []>} : vector<32x32xf32>, vector<32x648xf32>, vector<32x648xf32> -> vector<32x648xf32>
    %85 = arith.addf %80, %84 : vector<32x648xf32>
    %c0_80 = arith.constant 0 : index
    %c129_81 = arith.constant 129 : index
    %86 = vector.load %arg14[%c0_80, %c129_81] : memref<32x896xf32, #tpu.memory_space<vmem>>, vector<32x648xf32>
    %c5_82 = arith.constant 5 : index
    %c0_83 = arith.constant 0 : index
    %c0_84 = arith.constant 0 : index
    %87 = vector.load %arg5[%c5_82, %c0_83, %c0_84] : memref<9x32x32xf32, #tpu.memory_space<vmem>>, vector<1x32x32xf32>
    %88 = vector.shape_cast %87 : vector<1x32x32xf32> to vector<32x32xf32>
    %cst_85 = arith.constant dense<0.000000e+00> : vector<32x648xf32>
    %89 = tpu.matmul %88, %86, %cst_85 {dimension_numbers = #tpu.dot_dimension_numbers<[1], [0], [0], [1], [0, 0, 1, 1], [], []>} : vector<32x32xf32>, vector<32x648xf32>, vector<32x648xf32> -> vector<32x648xf32>
    %90 = arith.addf %85, %89 : vector<32x648xf32>
    %c0_86 = arith.constant 0 : index
    %c145_87 = arith.constant 145 : index
    %91 = vector.load %arg14[%c0_86, %c145_87] : memref<32x896xf32, #tpu.memory_space<vmem>>, vector<32x648xf32>
    %c6_88 = arith.constant 6 : index
    %c0_89 = arith.constant 0 : index
    %c0_90 = arith.constant 0 : index
    %92 = vector.load %arg5[%c6_88, %c0_89, %c0_90] : memref<9x32x32xf32, #tpu.memory_space<vmem>>, vector<1x32x32xf32>
    %93 = vector.shape_cast %92 : vector<1x32x32xf32> to vector<32x32xf32>
    %cst_91 = arith.constant dense<0.000000e+00> : vector<32x648xf32>
    %94 = tpu.matmul %93, %91, %cst_91 {dimension_numbers = #tpu.dot_dimension_numbers<[1], [0], [0], [1], [0, 0, 1, 1], [], []>} : vector<32x32xf32>, vector<32x648xf32>, vector<32x648xf32> -> vector<32x648xf32>
    %95 = arith.addf %90, %94 : vector<32x648xf32>
    %c0_92 = arith.constant 0 : index
    %c146_93 = arith.constant 146 : index
    %96 = vector.load %arg14[%c0_92, %c146_93] : memref<32x896xf32, #tpu.memory_space<vmem>>, vector<32x648xf32>
    %c7_94 = arith.constant 7 : index
    %c0_95 = arith.constant 0 : index
    %c0_96 = arith.constant 0 : index
    %97 = vector.load %arg5[%c7_94, %c0_95, %c0_96] : memref<9x32x32xf32, #tpu.memory_space<vmem>>, vector<1x32x32xf32>
    %98 = vector.shape_cast %97 : vector<1x32x32xf32> to vector<32x32xf32>
    %cst_97 = arith.constant dense<0.000000e+00> : vector<32x648xf32>
    %99 = tpu.matmul %98, %96, %cst_97 {dimension_numbers = #tpu.dot_dimension_numbers<[1], [0], [0], [1], [0, 0, 1, 1], [], []>} : vector<32x32xf32>, vector<32x648xf32>, vector<32x648xf32> -> vector<32x648xf32>
    %100 = arith.addf %95, %99 : vector<32x648xf32>
    %c0_98 = arith.constant 0 : index
    %c147_99 = arith.constant 147 : index
    %101 = vector.load %arg14[%c0_98, %c147_99] : memref<32x896xf32, #tpu.memory_space<vmem>>, vector<32x648xf32>
    %c8_100 = arith.constant 8 : index
    %c0_101 = arith.constant 0 : index
    %c0_102 = arith.constant 0 : index
    %102 = vector.load %arg5[%c8_100, %c0_101, %c0_102] : memref<9x32x32xf32, #tpu.memory_space<vmem>>, vector<1x32x32xf32>
    %103 = vector.shape_cast %102 : vector<1x32x32xf32> to vector<32x32xf32>
    %cst_103 = arith.constant dense<0.000000e+00> : vector<32x648xf32>
    %104 = tpu.matmul %103, %101, %cst_103 {dimension_numbers = #tpu.dot_dimension_numbers<[1], [0], [0], [1], [0, 0, 1, 1], [], []>} : vector<32x32xf32>, vector<32x648xf32>, vector<32x648xf32> -> vector<32x648xf32>
    %105 = arith.addf %100, %104 : vector<32x648xf32>
    %cst_104 = arith.constant 0.000000e+00 : f32
    %106 = vector.broadcast %cst_104 : f32 to vector<32x648xf32>
    %107 = arith.maximumf %105, %106 : vector<32x648xf32>
    %108 = vector.broadcast %4 : vector<1x648xf32> to vector<32x648xf32>
    %109 = arith.mulf %107, %108 : vector<32x648xf32>
    %c0_105 = arith.constant 0 : index
    %c128_106 = arith.constant 128 : index
    %110 = vector.load %arg15[%c0_105, %c128_106] : memref<32x896xf32, #tpu.memory_space<vmem>>, vector<32x648xf32>
    tpu.vector_store %arg15[%c0_105, %c128_106], %109 {strides = array<i32>} : memref<32x896xf32, #tpu.memory_space<vmem>>, vector<32x648xf32>,
    %c0_107 = arith.constant 0 : index
    %c0_108 = arith.constant 0 : index
    %111 = vector.load %arg8[%c0_107, %c0_108] : memref<32x1xf32, #tpu.memory_space<vmem>>, vector<32x1xf32>
    %112 = vector.shape_cast %111 : vector<32x1xf32> to vector<32x1xf32>
    %113 = vector.broadcast %112 : vector<32x1xf32> to vector<32x648xf32>
    %c0_109 = arith.constant 0 : index
    %c109_110 = arith.constant 109 : index
    %114 = vector.load %arg15[%c0_109, %c109_110] : memref<32x896xf32, #tpu.memory_space<vmem>>, vector<32x648xf32>
    %c0_111 = arith.constant 0 : index
    %c0_112 = arith.constant 0 : index
    %c0_113 = arith.constant 0 : index
    %115 = vector.load %arg7[%c0_111, %c0_112, %c0_113] : memref<9x32x32xf32, #tpu.memory_space<vmem>>, vector<1x32x32xf32>
    %116 = vector.shape_cast %115 : vector<1x32x32xf32> to vector<32x32xf32>
    %cst_114 = arith.constant dense<0.000000e+00> : vector<32x648xf32>
    %117 = tpu.matmul %116, %114, %cst_114 {dimension_numbers = #tpu.dot_dimension_numbers<[1], [0], [0], [1], [0, 0, 1, 1], [], []>} : vector<32x32xf32>, vector<32x648xf32>, vector<32x648xf32> -> vector<32x648xf32>
    %118 = arith.addf %113, %117 : vector<32x648xf32>
    %c0_115 = arith.constant 0 : index
    %c110_116 = arith.constant 110 : index
    %119 = vector.load %arg15[%c0_115, %c110_116] : memref<32x896xf32, #tpu.memory_space<vmem>>, vector<32x648xf32>
    %c1_117 = arith.constant 1 : index
    %c0_118 = arith.constant 0 : index
    %c0_119 = arith.constant 0 : index
    %120 = vector.load %arg7[%c1_117, %c0_118, %c0_119] : memref<9x32x32xf32, #tpu.memory_space<vmem>>, vector<1x32x32xf32>
    %121 = vector.shape_cast %120 : vector<1x32x32xf32> to vector<32x32xf32>
    %cst_120 = arith.constant dense<0.000000e+00> : vector<32x648xf32>
    %122 = tpu.matmul %121, %119, %cst_120 {dimension_numbers = #tpu.dot_dimension_numbers<[1], [0], [0], [1], [0, 0, 1, 1], [], []>} : vector<32x32xf32>, vector<32x648xf32>, vector<32x648xf32> -> vector<32x648xf32>
    %123 = arith.addf %118, %122 : vector<32x648xf32>
    %c0_121 = arith.constant 0 : index
    %c111_122 = arith.constant 111 : index
    %124 = vector.load %arg15[%c0_121, %c111_122] : memref<32x896xf32, #tpu.memory_space<vmem>>, vector<32x648xf32>
    %c2_123 = arith.constant 2 : index
    %c0_124 = arith.constant 0 : index
    %c0_125 = arith.constant 0 : index
    %125 = vector.load %arg7[%c2_123, %c0_124, %c0_125] : memref<9x32x32xf32, #tpu.memory_space<vmem>>, vector<1x32x32xf32>
    %126 = vector.shape_cast %125 : vector<1x32x32xf32> to vector<32x32xf32>
    %cst_126 = arith.constant dense<0.000000e+00> : vector<32x648xf32>
    %127 = tpu.matmul %126, %124, %cst_126 {dimension_numbers = #tpu.dot_dimension_numbers<[1], [0], [0], [1], [0, 0, 1, 1], [], []>} : vector<32x32xf32>, vector<32x648xf32>, vector<32x648xf32> -> vector<32x648xf32>
    %128 = arith.addf %123, %127 : vector<32x648xf32>
    %c0_127 = arith.constant 0 : index
    %c127_128 = arith.constant 127 : index
    %129 = vector.load %arg15[%c0_127, %c127_128] : memref<32x896xf32, #tpu.memory_space<vmem>>, vector<32x648xf32>
    %c3_129 = arith.constant 3 : index
    %c0_130 = arith.constant 0 : index
    %c0_131 = arith.constant 0 : index
    %130 = vector.load %arg7[%c3_129, %c0_130, %c0_131] : memref<9x32x32xf32, #tpu.memory_space<vmem>>, vector<1x32x32xf32>
    %131 = vector.shape_cast %130 : vector<1x32x32xf32> to vector<32x32xf32>
    %cst_132 = arith.constant dense<0.000000e+00> : vector<32x648xf32>
    %132 = tpu.matmul %131, %129, %cst_132 {dimension_numbers = #tpu.dot_dimension_numbers<[1], [0], [0], [1], [0, 0, 1, 1], [], []>} : vector<32x32xf32>, vector<32x648xf32>, vector<32x648xf32> -> vector<32x648xf32>
    %133 = arith.addf %128, %132 : vector<32x648xf32>
    %c0_133 = arith.constant 0 : index
    %c128_134 = arith.constant 128 : index
    %134 = vector.load %arg15[%c0_133, %c128_134] : memref<32x896xf32, #tpu.memory_space<vmem>>, vector<32x648xf32>
    %c4_135 = arith.constant 4 : index
    %c0_136 = arith.constant 0 : index
    %c0_137 = arith.constant 0 : index
    %135 = vector.load %arg7[%c4_135, %c0_136, %c0_137] : memref<9x32x32xf32, #tpu.memory_space<vmem>>, vector<1x32x32xf32>
    %136 = vector.shape_cast %135 : vector<1x32x32xf32> to vector<32x32xf32>
    %cst_138 = arith.constant dense<0.000000e+00> : vector<32x648xf32>
    %137 = tpu.matmul %136, %134, %cst_138 {dimension_numbers = #tpu.dot_dimension_numbers<[1], [0], [0], [1], [0, 0, 1, 1], [], []>} : vector<32x32xf32>, vector<32x648xf32>, vector<32x648xf32> -> vector<32x648xf32>
    %138 = arith.addf %133, %137 : vector<32x648xf32>
    %c0_139 = arith.constant 0 : index
    %c129_140 = arith.constant 129 : index
    %139 = vector.load %arg15[%c0_139, %c129_140] : memref<32x896xf32, #tpu.memory_space<vmem>>, vector<32x648xf32>
    %c5_141 = arith.constant 5 : index
    %c0_142 = arith.constant 0 : index
    %c0_143 = arith.constant 0 : index
    %140 = vector.load %arg7[%c5_141, %c0_142, %c0_143] : memref<9x32x32xf32, #tpu.memory_space<vmem>>, vector<1x32x32xf32>
    %141 = vector.shape_cast %140 : vector<1x32x32xf32> to vector<32x32xf32>
    %cst_144 = arith.constant dense<0.000000e+00> : vector<32x648xf32>
    %142 = tpu.matmul %141, %139, %cst_144 {dimension_numbers = #tpu.dot_dimension_numbers<[1], [0], [0], [1], [0, 0, 1, 1], [], []>} : vector<32x32xf32>, vector<32x648xf32>, vector<32x648xf32> -> vector<32x648xf32>
    %143 = arith.addf %138, %142 : vector<32x648xf32>
    %c0_145 = arith.constant 0 : index
    %c145_146 = arith.constant 145 : index
    %144 = vector.load %arg15[%c0_145, %c145_146] : memref<32x896xf32, #tpu.memory_space<vmem>>, vector<32x648xf32>
    %c6_147 = arith.constant 6 : index
    %c0_148 = arith.constant 0 : index
    %c0_149 = arith.constant 0 : index
    %145 = vector.load %arg7[%c6_147, %c0_148, %c0_149] : memref<9x32x32xf32, #tpu.memory_space<vmem>>, vector<1x32x32xf32>
    %146 = vector.shape_cast %145 : vector<1x32x32xf32> to vector<32x32xf32>
    %cst_150 = arith.constant dense<0.000000e+00> : vector<32x648xf32>
    %147 = tpu.matmul %146, %144, %cst_150 {dimension_numbers = #tpu.dot_dimension_numbers<[1], [0], [0], [1], [0, 0, 1, 1], [], []>} : vector<32x32xf32>, vector<32x648xf32>, vector<32x648xf32> -> vector<32x648xf32>
    %148 = arith.addf %143, %147 : vector<32x648xf32>
    %c0_151 = arith.constant 0 : index
    %c146_152 = arith.constant 146 : index
    %149 = vector.load %arg15[%c0_151, %c146_152] : memref<32x896xf32, #tpu.memory_space<vmem>>, vector<32x648xf32>
    %c7_153 = arith.constant 7 : index
    %c0_154 = arith.constant 0 : index
    %c0_155 = arith.constant 0 : index
    %150 = vector.load %arg7[%c7_153, %c0_154, %c0_155] : memref<9x32x32xf32, #tpu.memory_space<vmem>>, vector<1x32x32xf32>
    %151 = vector.shape_cast %150 : vector<1x32x32xf32> to vector<32x32xf32>
    %cst_156 = arith.constant dense<0.000000e+00> : vector<32x648xf32>
    %152 = tpu.matmul %151, %149, %cst_156 {dimension_numbers = #tpu.dot_dimension_numbers<[1], [0], [0], [1], [0, 0, 1, 1], [], []>} : vector<32x32xf32>, vector<32x648xf32>, vector<32x648xf32> -> vector<32x648xf32>
    %153 = arith.addf %148, %152 : vector<32x648xf32>
    %c0_157 = arith.constant 0 : index
    %c147_158 = arith.constant 147 : index
    %154 = vector.load %arg15[%c0_157, %c147_158] : memref<32x896xf32, #tpu.memory_space<vmem>>, vector<32x648xf32>
    %c8_159 = arith.constant 8 : index
    %c0_160 = arith.constant 0 : index
    %c0_161 = arith.constant 0 : index
    %155 = vector.load %arg7[%c8_159, %c0_160, %c0_161] : memref<9x32x32xf32, #tpu.memory_space<vmem>>, vector<1x32x32xf32>
    %156 = vector.shape_cast %155 : vector<1x32x32xf32> to vector<32x32xf32>
    %cst_162 = arith.constant dense<0.000000e+00> : vector<32x648xf32>
    %157 = tpu.matmul %156, %154, %cst_162 {dimension_numbers = #tpu.dot_dimension_numbers<[1], [0], [0], [1], [0, 0, 1, 1], [], []>} : vector<32x32xf32>, vector<32x648xf32>, vector<32x648xf32> -> vector<32x648xf32>
    %158 = arith.addf %153, %157 : vector<32x648xf32>
    %cst_163 = arith.constant 0.000000e+00 : f32
    %159 = vector.broadcast %cst_163 : f32 to vector<32x648xf32>
    %160 = arith.maximumf %158, %159 : vector<32x648xf32>
    %161 = vector.broadcast %4 : vector<1x648xf32> to vector<32x648xf32>
    %162 = arith.mulf %160, %161 : vector<32x648xf32>
    %c0_164 = arith.constant 0 : index
    %c128_165 = arith.constant 128 : index
    %163 = vector.load %arg14[%c0_164, %c128_165] : memref<32x896xf32, #tpu.memory_space<vmem>>, vector<32x648xf32>
    tpu.vector_store %arg14[%c0_164, %c128_165], %162 {strides = array<i32>} : memref<32x896xf32, #tpu.memory_space<vmem>>, vector<32x648xf32>,
    %c0_166 = arith.constant 0 : index
    %c0_167 = arith.constant 0 : index
    %164 = vector.load %arg10[%c0_166, %c0_167] : memref<32x1xf32, #tpu.memory_space<vmem>>, vector<32x1xf32>
    %165 = vector.shape_cast %164 : vector<32x1xf32> to vector<32x1xf32>
    %166 = vector.broadcast %165 : vector<32x1xf32> to vector<32x648xf32>
    %c0_168 = arith.constant 0 : index
    %c109_169 = arith.constant 109 : index
    %167 = vector.load %arg14[%c0_168, %c109_169] : memref<32x896xf32, #tpu.memory_space<vmem>>, vector<32x648xf32>
    %c0_170 = arith.constant 0 : index
    %c0_171 = arith.constant 0 : index
    %c0_172 = arith.constant 0 : index
    %168 = vector.load %arg9[%c0_170, %c0_171, %c0_172] : memref<9x32x32xf32, #tpu.memory_space<vmem>>, vector<1x32x32xf32>
    %169 = vector.shape_cast %168 : vector<1x32x32xf32> to vector<32x32xf32>
    %cst_173 = arith.constant dense<0.000000e+00> : vector<32x648xf32>
    %170 = tpu.matmul %169, %167, %cst_173 {dimension_numbers = #tpu.dot_dimension_numbers<[1], [0], [0], [1], [0, 0, 1, 1], [], []>} : vector<32x32xf32>, vector<32x648xf32>, vector<32x648xf32> -> vector<32x648xf32>
    %171 = arith.addf %166, %170 : vector<32x648xf32>
    %c0_174 = arith.constant 0 : index
    %c110_175 = arith.constant 110 : index
    %172 = vector.load %arg14[%c0_174, %c110_175] : memref<32x896xf32, #tpu.memory_space<vmem>>, vector<32x648xf32>
    %c1_176 = arith.constant 1 : index
    %c0_177 = arith.constant 0 : index
    %c0_178 = arith.constant 0 : index
    %173 = vector.load %arg9[%c1_176, %c0_177, %c0_178] : memref<9x32x32xf32, #tpu.memory_space<vmem>>, vector<1x32x32xf32>
    %174 = vector.shape_cast %173 : vector<1x32x32xf32> to vector<32x32xf32>
    %cst_179 = arith.constant dense<0.000000e+00> : vector<32x648xf32>
    %175 = tpu.matmul %174, %172, %cst_179 {dimension_numbers = #tpu.dot_dimension_numbers<[1], [0], [0], [1], [0, 0, 1, 1], [], []>} : vector<32x32xf32>, vector<32x648xf32>, vector<32x648xf32> -> vector<32x648xf32>
    %176 = arith.addf %171, %175 : vector<32x648xf32>
    %c0_180 = arith.constant 0 : index
    %c111_181 = arith.constant 111 : index
    %177 = vector.load %arg14[%c0_180, %c111_181] : memref<32x896xf32, #tpu.memory_space<vmem>>, vector<32x648xf32>
    %c2_182 = arith.constant 2 : index
    %c0_183 = arith.constant 0 : index
    %c0_184 = arith.constant 0 : index
    %178 = vector.load %arg9[%c2_182, %c0_183, %c0_184] : memref<9x32x32xf32, #tpu.memory_space<vmem>>, vector<1x32x32xf32>
    %179 = vector.shape_cast %178 : vector<1x32x32xf32> to vector<32x32xf32>
    %cst_185 = arith.constant dense<0.000000e+00> : vector<32x648xf32>
    %180 = tpu.matmul %179, %177, %cst_185 {dimension_numbers = #tpu.dot_dimension_numbers<[1], [0], [0], [1], [0, 0, 1, 1], [], []>} : vector<32x32xf32>, vector<32x648xf32>, vector<32x648xf32> -> vector<32x648xf32>
    %181 = arith.addf %176, %180 : vector<32x648xf32>
    %c0_186 = arith.constant 0 : index
    %c127_187 = arith.constant 127 : index
    %182 = vector.load %arg14[%c0_186, %c127_187] : memref<32x896xf32, #tpu.memory_space<vmem>>, vector<32x648xf32>
    %c3_188 = arith.constant 3 : index
    %c0_189 = arith.constant 0 : index
    %c0_190 = arith.constant 0 : index
    %183 = vector.load %arg9[%c3_188, %c0_189, %c0_190] : memref<9x32x32xf32, #tpu.memory_space<vmem>>, vector<1x32x32xf32>
    %184 = vector.shape_cast %183 : vector<1x32x32xf32> to vector<32x32xf32>
    %cst_191 = arith.constant dense<0.000000e+00> : vector<32x648xf32>
    %185 = tpu.matmul %184, %182, %cst_191 {dimension_numbers = #tpu.dot_dimension_numbers<[1], [0], [0], [1], [0, 0, 1, 1], [], []>} : vector<32x32xf32>, vector<32x648xf32>, vector<32x648xf32> -> vector<32x648xf32>
    %186 = arith.addf %181, %185 : vector<32x648xf32>
    %c0_192 = arith.constant 0 : index
    %c128_193 = arith.constant 128 : index
    %187 = vector.load %arg14[%c0_192, %c128_193] : memref<32x896xf32, #tpu.memory_space<vmem>>, vector<32x648xf32>
    %c4_194 = arith.constant 4 : index
    %c0_195 = arith.constant 0 : index
    %c0_196 = arith.constant 0 : index
    %188 = vector.load %arg9[%c4_194, %c0_195, %c0_196] : memref<9x32x32xf32, #tpu.memory_space<vmem>>, vector<1x32x32xf32>
    %189 = vector.shape_cast %188 : vector<1x32x32xf32> to vector<32x32xf32>
    %cst_197 = arith.constant dense<0.000000e+00> : vector<32x648xf32>
    %190 = tpu.matmul %189, %187, %cst_197 {dimension_numbers = #tpu.dot_dimension_numbers<[1], [0], [0], [1], [0, 0, 1, 1], [], []>} : vector<32x32xf32>, vector<32x648xf32>, vector<32x648xf32> -> vector<32x648xf32>
    %191 = arith.addf %186, %190 : vector<32x648xf32>
    %c0_198 = arith.constant 0 : index
    %c129_199 = arith.constant 129 : index
    %192 = vector.load %arg14[%c0_198, %c129_199] : memref<32x896xf32, #tpu.memory_space<vmem>>, vector<32x648xf32>
    %c5_200 = arith.constant 5 : index
    %c0_201 = arith.constant 0 : index
    %c0_202 = arith.constant 0 : index
    %193 = vector.load %arg9[%c5_200, %c0_201, %c0_202] : memref<9x32x32xf32, #tpu.memory_space<vmem>>, vector<1x32x32xf32>
    %194 = vector.shape_cast %193 : vector<1x32x32xf32> to vector<32x32xf32>
    %cst_203 = arith.constant dense<0.000000e+00> : vector<32x648xf32>
    %195 = tpu.matmul %194, %192, %cst_203 {dimension_numbers = #tpu.dot_dimension_numbers<[1], [0], [0], [1], [0, 0, 1, 1], [], []>} : vector<32x32xf32>, vector<32x648xf32>, vector<32x648xf32> -> vector<32x648xf32>
    %196 = arith.addf %191, %195 : vector<32x648xf32>
    %c0_204 = arith.constant 0 : index
    %c145_205 = arith.constant 145 : index
    %197 = vector.load %arg14[%c0_204, %c145_205] : memref<32x896xf32, #tpu.memory_space<vmem>>, vector<32x648xf32>
    %c6_206 = arith.constant 6 : index
    %c0_207 = arith.constant 0 : index
    %c0_208 = arith.constant 0 : index
    %198 = vector.load %arg9[%c6_206, %c0_207, %c0_208] : memref<9x32x32xf32, #tpu.memory_space<vmem>>, vector<1x32x32xf32>
    %199 = vector.shape_cast %198 : vector<1x32x32xf32> to vector<32x32xf32>
    %cst_209 = arith.constant dense<0.000000e+00> : vector<32x648xf32>
    %200 = tpu.matmul %199, %197, %cst_209 {dimension_numbers = #tpu.dot_dimension_numbers<[1], [0], [0], [1], [0, 0, 1, 1], [], []>} : vector<32x32xf32>, vector<32x648xf32>, vector<32x648xf32> -> vector<32x648xf32>
    %201 = arith.addf %196, %200 : vector<32x648xf32>
    %c0_210 = arith.constant 0 : index
    %c146_211 = arith.constant 146 : index
    %202 = vector.load %arg14[%c0_210, %c146_211] : memref<32x896xf32, #tpu.memory_space<vmem>>, vector<32x648xf32>
    %c7_212 = arith.constant 7 : index
    %c0_213 = arith.constant 0 : index
    %c0_214 = arith.constant 0 : index
    %203 = vector.load %arg9[%c7_212, %c0_213, %c0_214] : memref<9x32x32xf32, #tpu.memory_space<vmem>>, vector<1x32x32xf32>
    %204 = vector.shape_cast %203 : vector<1x32x32xf32> to vector<32x32xf32>
    %cst_215 = arith.constant dense<0.000000e+00> : vector<32x648xf32>
    %205 = tpu.matmul %204, %202, %cst_215 {dimension_numbers = #tpu.dot_dimension_numbers<[1], [0], [0], [1], [0, 0, 1, 1], [], []>} : vector<32x32xf32>, vector<32x648xf32>, vector<32x648xf32> -> vector<32x648xf32>
    %206 = arith.addf %201, %205 : vector<32x648xf32>
    %c0_216 = arith.constant 0 : index
    %c147_217 = arith.constant 147 : index
    %207 = vector.load %arg14[%c0_216, %c147_217] : memref<32x896xf32, #tpu.memory_space<vmem>>, vector<32x648xf32>
    %c8_218 = arith.constant 8 : index
    %c0_219 = arith.constant 0 : index
    %c0_220 = arith.constant 0 : index
    %208 = vector.load %arg9[%c8_218, %c0_219, %c0_220] : memref<9x32x32xf32, #tpu.memory_space<vmem>>, vector<1x32x32xf32>
    %209 = vector.shape_cast %208 : vector<1x32x32xf32> to vector<32x32xf32>
    %cst_221 = arith.constant dense<0.000000e+00> : vector<32x648xf32>
    %210 = tpu.matmul %209, %207, %cst_221 {dimension_numbers = #tpu.dot_dimension_numbers<[1], [0], [0], [1], [0, 0, 1, 1], [], []>} : vector<32x32xf32>, vector<32x648xf32>, vector<32x648xf32> -> vector<32x648xf32>
    %211 = arith.addf %206, %210 : vector<32x648xf32>
    %cst_222 = arith.constant 0.000000e+00 : f32
    %212 = vector.broadcast %cst_222 : f32 to vector<32x648xf32>
    %213 = arith.maximumf %211, %212 : vector<32x648xf32>
    %214 = vector.broadcast %4 : vector<1x648xf32> to vector<32x648xf32>
    %215 = arith.mulf %213, %214 : vector<32x648xf32>
    %c0_223 = arith.constant 0 : index
    %c128_224 = arith.constant 128 : index
    %216 = vector.load %arg15[%c0_223, %c128_224] : memref<32x896xf32, #tpu.memory_space<vmem>>, vector<32x648xf32>
    tpu.vector_store %arg15[%c0_223, %c128_224], %215 {strides = array<i32>} : memref<32x896xf32, #tpu.memory_space<vmem>>, vector<32x648xf32>,
    %c0_225 = arith.constant 0 : index
    %c0_226 = arith.constant 0 : index
    %217 = vector.load %arg12[%c0_225, %c0_226] : memref<2x1xf32, #tpu.memory_space<vmem>>, vector<2x1xf32>
    %218 = vector.shape_cast %217 : vector<2x1xf32> to vector<2x1xf32>
    %219 = vector.broadcast %218 : vector<2x1xf32> to vector<2x648xf32>
    %c0_227 = arith.constant 0 : index
    %c109_228 = arith.constant 109 : index
    %220 = vector.load %arg15[%c0_227, %c109_228] : memref<32x896xf32, #tpu.memory_space<vmem>>, vector<32x648xf32>
    %c0_229 = arith.constant 0 : index
    %c0_230 = arith.constant 0 : index
    %c0_231 = arith.constant 0 : index
    %221 = vector.load %arg11[%c0_229, %c0_230, %c0_231] : memref<9x2x32xf32, #tpu.memory_space<vmem>>, vector<1x2x32xf32>
    %222 = vector.shape_cast %221 : vector<1x2x32xf32> to vector<2x32xf32>
    %cst_232 = arith.constant dense<0.000000e+00> : vector<2x648xf32>
    %223 = tpu.matmul %222, %220, %cst_232 {dimension_numbers = #tpu.dot_dimension_numbers<[1], [0], [0], [1], [0, 0, 1, 1], [], []>} : vector<2x32xf32>, vector<32x648xf32>, vector<2x648xf32> -> vector<2x648xf32>
    %224 = arith.addf %219, %223 : vector<2x648xf32>
    %c0_233 = arith.constant 0 : index
    %c110_234 = arith.constant 110 : index
    %225 = vector.load %arg15[%c0_233, %c110_234] : memref<32x896xf32, #tpu.memory_space<vmem>>, vector<32x648xf32>
    %c1_235 = arith.constant 1 : index
    %c0_236 = arith.constant 0 : index
    %c0_237 = arith.constant 0 : index
    %226 = vector.load %arg11[%c1_235, %c0_236, %c0_237] : memref<9x2x32xf32, #tpu.memory_space<vmem>>, vector<1x2x32xf32>
    %227 = vector.shape_cast %226 : vector<1x2x32xf32> to vector<2x32xf32>
    %cst_238 = arith.constant dense<0.000000e+00> : vector<2x648xf32>
    %228 = tpu.matmul %227, %225, %cst_238 {dimension_numbers = #tpu.dot_dimension_numbers<[1], [0], [0], [1], [0, 0, 1, 1], [], []>} : vector<2x32xf32>, vector<32x648xf32>, vector<2x648xf32> -> vector<2x648xf32>
    %229 = arith.addf %224, %228 : vector<2x648xf32>
    %c0_239 = arith.constant 0 : index
    %c111_240 = arith.constant 111 : index
    %230 = vector.load %arg15[%c0_239, %c111_240] : memref<32x896xf32, #tpu.memory_space<vmem>>, vector<32x648xf32>
    %c2_241 = arith.constant 2 : index
    %c0_242 = arith.constant 0 : index
    %c0_243 = arith.constant 0 : index
    %231 = vector.load %arg11[%c2_241, %c0_242, %c0_243] : memref<9x2x32xf32, #tpu.memory_space<vmem>>, vector<1x2x32xf32>
    %232 = vector.shape_cast %231 : vector<1x2x32xf32> to vector<2x32xf32>
    %cst_244 = arith.constant dense<0.000000e+00> : vector<2x648xf32>
    %233 = tpu.matmul %232, %230, %cst_244 {dimension_numbers = #tpu.dot_dimension_numbers<[1], [0], [0], [1], [0, 0, 1, 1], [], []>} : vector<2x32xf32>, vector<32x648xf32>, vector<2x648xf32> -> vector<2x648xf32>
    %234 = arith.addf %229, %233 : vector<2x648xf32>
    %c0_245 = arith.constant 0 : index
    %c127_246 = arith.constant 127 : index
    %235 = vector.load %arg15[%c0_245, %c127_246] : memref<32x896xf32, #tpu.memory_space<vmem>>, vector<32x648xf32>
    %c3_247 = arith.constant 3 : index
    %c0_248 = arith.constant 0 : index
    %c0_249 = arith.constant 0 : index
    %236 = vector.load %arg11[%c3_247, %c0_248, %c0_249] : memref<9x2x32xf32, #tpu.memory_space<vmem>>, vector<1x2x32xf32>
    %237 = vector.shape_cast %236 : vector<1x2x32xf32> to vector<2x32xf32>
    %cst_250 = arith.constant dense<0.000000e+00> : vector<2x648xf32>
    %238 = tpu.matmul %237, %235, %cst_250 {dimension_numbers = #tpu.dot_dimension_numbers<[1], [0], [0], [1], [0, 0, 1, 1], [], []>} : vector<2x32xf32>, vector<32x648xf32>, vector<2x648xf32> -> vector<2x648xf32>
    %239 = arith.addf %234, %238 : vector<2x648xf32>
    %c0_251 = arith.constant 0 : index
    %c128_252 = arith.constant 128 : index
    %240 = vector.load %arg15[%c0_251, %c128_252] : memref<32x896xf32, #tpu.memory_space<vmem>>, vector<32x648xf32>
    %c4_253 = arith.constant 4 : index
    %c0_254 = arith.constant 0 : index
    %c0_255 = arith.constant 0 : index
    %241 = vector.load %arg11[%c4_253, %c0_254, %c0_255] : memref<9x2x32xf32, #tpu.memory_space<vmem>>, vector<1x2x32xf32>
    %242 = vector.shape_cast %241 : vector<1x2x32xf32> to vector<2x32xf32>
    %cst_256 = arith.constant dense<0.000000e+00> : vector<2x648xf32>
    %243 = tpu.matmul %242, %240, %cst_256 {dimension_numbers = #tpu.dot_dimension_numbers<[1], [0], [0], [1], [0, 0, 1, 1], [], []>} : vector<2x32xf32>, vector<32x648xf32>, vector<2x648xf32> -> vector<2x648xf32>
    %244 = arith.addf %239, %243 : vector<2x648xf32>
    %c0_257 = arith.constant 0 : index
    %c129_258 = arith.constant 129 : index
    %245 = vector.load %arg15[%c0_257, %c129_258] : memref<32x896xf32, #tpu.memory_space<vmem>>, vector<32x648xf32>
    %c5_259 = arith.constant 5 : index
    %c0_260 = arith.constant 0 : index
    %c0_261 = arith.constant 0 : index
    %246 = vector.load %arg11[%c5_259, %c0_260, %c0_261] : memref<9x2x32xf32, #tpu.memory_space<vmem>>, vector<1x2x32xf32>
    %247 = vector.shape_cast %246 : vector<1x2x32xf32> to vector<2x32xf32>
    %cst_262 = arith.constant dense<0.000000e+00> : vector<2x648xf32>
    %248 = tpu.matmul %247, %245, %cst_262 {dimension_numbers = #tpu.dot_dimension_numbers<[1], [0], [0], [1], [0, 0, 1, 1], [], []>} : vector<2x32xf32>, vector<32x648xf32>, vector<2x648xf32> -> vector<2x648xf32>
    %249 = arith.addf %244, %248 : vector<2x648xf32>
    %c0_263 = arith.constant 0 : index
    %c145_264 = arith.constant 145 : index
    %250 = vector.load %arg15[%c0_263, %c145_264] : memref<32x896xf32, #tpu.memory_space<vmem>>, vector<32x648xf32>
    %c6_265 = arith.constant 6 : index
    %c0_266 = arith.constant 0 : index
    %c0_267 = arith.constant 0 : index
    %251 = vector.load %arg11[%c6_265, %c0_266, %c0_267] : memref<9x2x32xf32, #tpu.memory_space<vmem>>, vector<1x2x32xf32>
    %252 = vector.shape_cast %251 : vector<1x2x32xf32> to vector<2x32xf32>
    %cst_268 = arith.constant dense<0.000000e+00> : vector<2x648xf32>
    %253 = tpu.matmul %252, %250, %cst_268 {dimension_numbers = #tpu.dot_dimension_numbers<[1], [0], [0], [1], [0, 0, 1, 1], [], []>} : vector<2x32xf32>, vector<32x648xf32>, vector<2x648xf32> -> vector<2x648xf32>
    %254 = arith.addf %249, %253 : vector<2x648xf32>
    %c0_269 = arith.constant 0 : index
    %c146_270 = arith.constant 146 : index
    %255 = vector.load %arg15[%c0_269, %c146_270] : memref<32x896xf32, #tpu.memory_space<vmem>>, vector<32x648xf32>
    %c7_271 = arith.constant 7 : index
    %c0_272 = arith.constant 0 : index
    %c0_273 = arith.constant 0 : index
    %256 = vector.load %arg11[%c7_271, %c0_272, %c0_273] : memref<9x2x32xf32, #tpu.memory_space<vmem>>, vector<1x2x32xf32>
    %257 = vector.shape_cast %256 : vector<1x2x32xf32> to vector<2x32xf32>
    %cst_274 = arith.constant dense<0.000000e+00> : vector<2x648xf32>
    %258 = tpu.matmul %257, %255, %cst_274 {dimension_numbers = #tpu.dot_dimension_numbers<[1], [0], [0], [1], [0, 0, 1, 1], [], []>} : vector<2x32xf32>, vector<32x648xf32>, vector<2x648xf32> -> vector<2x648xf32>
    %259 = arith.addf %254, %258 : vector<2x648xf32>
    %c0_275 = arith.constant 0 : index
    %c147_276 = arith.constant 147 : index
    %260 = vector.load %arg15[%c0_275, %c147_276] : memref<32x896xf32, #tpu.memory_space<vmem>>, vector<32x648xf32>
    %c8_277 = arith.constant 8 : index
    %c0_278 = arith.constant 0 : index
    %c0_279 = arith.constant 0 : index
    %261 = vector.load %arg11[%c8_277, %c0_278, %c0_279] : memref<9x2x32xf32, #tpu.memory_space<vmem>>, vector<1x2x32xf32>
    %262 = vector.shape_cast %261 : vector<1x2x32xf32> to vector<2x32xf32>
    %cst_280 = arith.constant dense<0.000000e+00> : vector<2x648xf32>
    %263 = tpu.matmul %262, %260, %cst_280 {dimension_numbers = #tpu.dot_dimension_numbers<[1], [0], [0], [1], [0, 0, 1, 1], [], []>} : vector<2x32xf32>, vector<32x648xf32>, vector<2x648xf32> -> vector<2x648xf32>
    %264 = arith.addf %259, %263 : vector<2x648xf32>
    %c0_281 = arith.constant 0 : index
    %c0_282 = arith.constant 0 : index
    %265 = vector.load %arg13[%c0_281, %c0_282] : memref<2x648xf32, #tpu.memory_space<vmem>>, vector<2x648xf32>
    tpu.vector_store %arg13[%c0_281, %c0_282], %264 {strides = array<i32>} : memref<2x648xf32, #tpu.memory_space<vmem>>, vector<2x648xf32>,
    return
  }
  func.func @transform_0(%arg0: i32) -> (i32, i32) {
    %c0_i32 = arith.constant 0 : i32
    %c0_i32_0 = arith.constant 0 : i32
    %c0_i32_1 = arith.constant 0 : i32
    return %c0_i32, %c0_i32_0 : i32, i32
  }
  func.func @transform_1(%arg0: i32) -> (i32, i32) {
    %c0_i32 = arith.constant 0 : i32
    %c0_i32_0 = arith.constant 0 : i32
    %c0_i32_1 = arith.constant 0 : i32
    return %c0_i32, %c0_i32_0 : i32, i32
  }
  func.func @transform_2(%arg0: i32) -> (i32, i32, i32) {
    %c0_i32 = arith.constant 0 : i32
    %c0_i32_0 = arith.constant 0 : i32
    %c0_i32_1 = arith.constant 0 : i32
    %c0_i32_2 = arith.constant 0 : i32
    return %c0_i32, %c0_i32_0, %c0_i32_1 : i32, i32, i32
  }
  func.func @transform_3(%arg0: i32) -> (i32, i32) {
    %c0_i32 = arith.constant 0 : i32
    %c0_i32_0 = arith.constant 0 : i32
    %c0_i32_1 = arith.constant 0 : i32
    return %c0_i32, %c0_i32_0 : i32, i32
  }
  func.func @transform_4(%arg0: i32) -> (i32, i32, i32) {
    %c0_i32 = arith.constant 0 : i32
    %c0_i32_0 = arith.constant 0 : i32
    %c0_i32_1 = arith.constant 0 : i32
    %c0_i32_2 = arith.constant 0 : i32
    return %c0_i32, %c0_i32_0, %c0_i32_1 : i32, i32, i32
  }
  func.func @transform_5(%arg0: i32) -> (i32, i32) {
    %c0_i32 = arith.constant 0 : i32
    %c0_i32_0 = arith.constant 0 : i32
    %c0_i32_1 = arith.constant 0 : i32
    return %c0_i32, %c0_i32_0 : i32, i32
  }
  func.func @transform_6(%arg0: i32) -> (i32, i32, i32) {
    %c0_i32 = arith.constant 0 : i32
    %c0_i32_0 = arith.constant 0 : i32
    %c0_i32_1 = arith.constant 0 : i32
    %c0_i32_2 = arith.constant 0 : i32
    return %c0_i32, %c0_i32_0, %c0_i32_1 : i32, i32, i32
  }
  func.func @transform_7(%arg0: i32) -> (i32, i32) {
    %c0_i32 = arith.constant 0 : i32
    %c0_i32_0 = arith.constant 0 : i32
    %c0_i32_1 = arith.constant 0 : i32
    return %c0_i32, %c0_i32_0 : i32, i32
  }
  func.func @transform_8(%arg0: i32) -> (i32, i32, i32) {
    %c0_i32 = arith.constant 0 : i32
    %c0_i32_0 = arith.constant 0 : i32
    %c0_i32_1 = arith.constant 0 : i32
    %c0_i32_2 = arith.constant 0 : i32
    return %c0_i32, %c0_i32_0, %c0_i32_1 : i32, i32, i32
  }
  func.func @transform_9(%arg0: i32) -> (i32, i32) {
    %c0_i32 = arith.constant 0 : i32
    %c0_i32_0 = arith.constant 0 : i32
    %c0_i32_1 = arith.constant 0 : i32
    return %c0_i32, %c0_i32_0 : i32, i32
  }
  func.func @transform_10(%arg0: i32) -> (i32, i32, i32) {
    %c0_i32 = arith.constant 0 : i32
    %c0_i32_0 = arith.constant 0 : i32
    %c0_i32_1 = arith.constant 0 : i32
    %c0_i32_2 = arith.constant 0 : i32
    return %c0_i32, %c0_i32_0, %c0_i32_1 : i32, i32, i32
  }
  func.func @transform_11(%arg0: i32) -> (i32, i32) {
    %c0_i32 = arith.constant 0 : i32
    %c0_i32_0 = arith.constant 0 : i32
    %c0_i32_1 = arith.constant 0 : i32
    return %c0_i32, %c0_i32_0 : i32, i32
  }
  func.func @transform_12(%arg0: i32) -> (i32, i32) {
    %c0_i32 = arith.constant 0 : i32
    %c0_i32_0 = arith.constant 0 : i32
    %c0_i32_1 = arith.constant 0 : i32
    return %c0_i32, %c0_i32_0 : i32, i32
  }
}

</mosaic_0001>

<bundles_post_ra>
// kernel: simple_spectral_operator_cnn.1
= control target key start
LH: loop header
LB: loop body
LE: loop exit
PB: predicated region body
PF: predicated region fallthrough
CT: control target
= control target key end

     0   :  { %v134_v0 = vlaneseq  ;;  %v22029_v2 = vmov 1983009808   ;;  %v22030_v8 = vmov 0.0   ;;  %s22031_s23 = smov 19   ;;  %s22032_s26 = smov 18   ;;  %vm167_vm0 = vcmask 154624   ;;  %s28069_s0 = inlined_call_operand.vmem [shape: f32[2,896], index: 0, kind: input, shape index: {}]   ;;  %s28070_s2 = inlined_call_operand.vmem [shape: f32[9,32,2], index: 2, kind: input, shape index: {}]   ;;  %s28071_s3 = inlined_call_operand.vmem [shape: f32[32,1], index: 3, kind: input, shape index: {}]   ;;  %s28072_s1 = inlined_call_operand.vmem [shape: f32[1,648], index: 1, kind: input, shape index: {}]   ;;  %s28073_s4 = inlined_call_operand.vmem [shape: f32[9,32,32], index: 4, kind: input, shape index: {}]   ;;  %s28074_s5 = inlined_call_operand.vmem [shape: f32[32,1], index: 5, kind: input, shape index: {}]   ;;  %s28075_s6 = inlined_call_operand.vmem [shape: f32[9,32,32], index: 6, kind: input, shape index: {}]   ;;  %s28076_s7 = inlined_call_operand.vmem [shape: f32[32,1], index: 7, kind: input, shape index: {}]   ;;  %s28077_s8 = inlined_call_operand.vmem [shape: f32[9,32,32], index: 8, kind: input, shape index: {}]   ;;  %s28078_s9 = inlined_call_operand.vmem [shape: f32[32,1], index: 9, kind: input, shape index: {}]   ;;  %s28079_s10 = inlined_call_operand.vmem [shape: f32[9,2,32], index: 10, kind: input, shape index: {}]   ;;  %s28080_s11 = inlined_call_operand.vmem [shape: f32[2,1], index: 11, kind: input, shape index: {}]   ;;  %s28081_s12 = inlined_call_operand.vmem [shape: f32[2,648], index: 12, kind: output, shape index: {}]  }
   0x1   :  { %v122_v1 = vld [vmem:[%s28069_s0] sm:$0xff]  ;;  %v132_v3 = vunpack.c.l.s4 %v22029_v2  ;;  %263 = vmatprep.mubr.f32.mxu0 %v22030_v8  ;;  %41 = vst [vmem:[#allocation2] sm:$0xff] %v22030_v8  ;;  %47 = vst [vmem:[#allocation2 + $0x30] sm:$0xff] %v22030_v8  ;;  %1092 = vmatprep.mubr.f32.mxu1 %v22030_v8  ;;  %s22033_s27 = smov 17   ;;  %v1225_v15 = vld [vmem:[%s28069_s0 + $0x8] sm:$0x3f] }
   0x2   :  { %v22108_v4 = vshrl.u32 %v134_v0, 7  ;;  %v130_v6 = vcombine.high %v122_v1, %v122_v1  ;;  %54 = vst [vmem:[#allocation2 + $0x68] sm:$0xff] %v22030_v8  ;;  %61 = vst [vmem:[#allocation2 + $0xa0] sm:$0xff] %v22030_v8  ;;  %s22034_s30 = smov 1   ;;  %v1951_v18 = vld [vmem:[%s28069_s0 + $0x2] sm:$0xff]  ;;  %v1250_v19 = vcombine.high %v1225_v15, %v1225_v15  ;;  %s22035_s15 = smov 127  }
   0x3   :  { %v133_v5 = vunpack.c.0.s8 %v132_v3  ;;  %68 = vst [vmem:[#allocation2 + $0xd8] sm:$0xff] %v22030_v8  ;;  %75 = vst [vmem:[#allocation3 + $0x30] sm:$0xff] %v22030_v8  ;;  %v17595_v13 = vld.sshfl [vmem:[%s28069_s0 + $0x8] sm:$0x33 pattern:$0x76325410]  ;;  %v1960_v20 = vcombine.high %v1951_v18, %v1951_v18 }
   0x4   :  { %82 = vst [vmem:[#allocation3 + $0x68] sm:$0xff] %v22030_v8  ;;  %89 = vst [vmem:[#allocation3 + $0xa0] sm:$0xff] %v22030_v8  ;;  %v154_v14 = vcombine.high %v17595_v13, %v17595_v13  ;;  %v22176_v25 = vld.sshfl [vmem:[%s28069_s0 + $0xa] sm:$0x33 pattern:$0x76325410] }
   0x5   :  { %v22111_v7 = vsub.s32 %v133_v5, %v22108_v4  ;;  %96 = vst [vmem:[#allocation3 + $0xd8] sm:$0xff] %v22030_v8  ;;  %v22184_v26 = vcombine.high %v22176_v25, %v22176_v25  ;;  %s22036_s0 = smov 111   ;;  %s22037_s18 = smov 110   ;;  %vm186_vm1 = vcmask 1041408   ;;  %v22237_v33 = vld [vmem:[%s28070_s2] sm:$0xff]  ;;  %vm173_vm2 = vcmask 15360  }
   0x6   :  { %s22038_s19 = smov 109   ;;  %v22249_v38 = vld [vmem:[%s28070_s2 + $0x8] sm:$0xff]  ;;  %v22263_v42 = vld [vmem:[%s28070_s2 + $0x10] sm:$0xff]  ;;  %v22273_v45 = vld [vmem:[%s28070_s2 + $0x18] sm:$0xff]  ;;  %vm536_vm3 = vcmask 146432   ;;  %vm903_vm4 = vcmask 138240  }
   0x7   :  { %28098 = vst [vmem:[#allocation4_spill] sm:$0xff] %v22111_v7  ;;  %v137_v9 = vrot.slane %v122_v1, %v22111_v7  ;;  %v144_v10 = vrot.slane %v130_v6, %v22111_v7  ;;  %v1257_v16 = vrot.slane %v1225_v15, %v22111_v7  ;;  %v1264_v21 = vrot.slane %v1250_v19, %v22111_v7  ;;  %v99_v56 = vld [vmem:[%s28071_s3 + $0x8] sm:$0xff]  ;;  %v98_v57 = vld [vmem:[%s28071_s3] sm:$0xff]  ;;  %v100_v62 = vld [vmem:[%s28071_s3 + $0x10] sm:$0xff] }
   0x8   :  { %v22160_v22 = vrot.slane %v1951_v18, %v22111_v7  ;;  %v22164_v23 = vrot.slane %v1960_v20, %v22111_v7  ;;  %v22039_v54 = vmov 0   ;;  %v22323_v61 = vld [vmem:[%s28070_s2 + $0x48] sm:$0xff]  ;;  %v22345_v1 = vld [vmem:[%s28070_s2 + $0x50] sm:$0xff]  ;;  %v101_v2 = vld [vmem:[%s28071_s3 + $0x18] sm:$0xff]  ;;  %vm1280_vm5 = vcmask 7168  }
   0x9   :  { %155 = vrot.lane.b32.xlu1 %v137_v9, %s22031_s23  ;;  %v145_v11 = vcombine.high %v137_v9, %v137_v9  ;;  %v146_v12 = vcombine.high %v144_v10, %v144_v10  ;;  %v1265_v17 = vcombine.high %v1257_v16, %v1257_v16  ;;  %20048 = vset.pattern.permute.xlu0 %v22039_v54  ;;  %vm1997_vm6 = vcmask 1039360  }
   0xa   :  { %v22169_v24 = vcombine.high %v22160_v22, %v22160_v22  ;;  %v22199_v27 = vcombine.high %v22164_v23, %v22164_v23  ;;  %20047 = vset.pattern.permute.xlu1 %v22039_v54  ;;  %vm2364_vm7 = vcmask 908288   ;;  %vm2731_vm8 = vcmask 900096  }
   0xb   :  { %157 = vrot.lane.b32.xlu0 %v145_v11, %s22031_s23  ;;  %vm3098_vm9 = vcmask 891904   ;;  %vm3503_vm10 = vcmask 64512   ;;  %vm3691_vm11 = vcmask 261120   ;;  %vm17588_vm12 = vcmask 60418  }
   0xc   :  { %vm17589_vm13 = vmor %vm17588_vm12, %vm186_vm1 }
   0xd   :  { %161 = vrot.lane.b32.xlu1 %v146_v12, %s22031_s23 }
   0xf   :  { %159 = vrot.lane.b32.xlu0 %v144_v10, %s22031_s23 }
  0x11   :  { %165 = vrot.lane.b32.xlu1 %v154_v14, %s22031_s23 }
  0x13   :  { %163 = vrot.lane.b32.xlu0 %v17595_v13, %s22031_s23 }
  0x15   :  { %528 = vrot.lane.b32.xlu1 %v144_v10, %s22032_s26 }
  0x17   :  { %526 = vrot.lane.b32.xlu0 %v145_v11, %s22032_s26 }
  0x19   :  { %530 = vrot.lane.b32.xlu1 %v146_v12, %s22032_s26 }
  0x1b   :  { %524 = vrot.lane.b32.xlu0 %v137_v9, %s22032_s26 }
  0x1d   :  { %534 = vrot.lane.b32.xlu1 %v154_v14, %s22032_s26 }
  0x1f   :  { %532 = vrot.lane.b32.xlu0 %v17595_v13, %s22032_s26 }
  0x21   :  { %895 = vrot.lane.b32.xlu1 %v144_v10, %s22033_s27 }
  0x23   :  { %893 = vrot.lane.b32.xlu0 %v145_v11, %s22033_s27 }
  0x25   :  { %897 = vrot.lane.b32.xlu1 %v146_v12, %s22033_s27 }
  0x27   :  { %891 = vrot.lane.b32.xlu0 %v137_v9, %s22033_s27 }
  0x29   :  { %901 = vrot.lane.b32.xlu1 %v154_v14, %s22033_s27 }
  0x2b   :  { %899 = vrot.lane.b32.xlu0 %v17595_v13, %s22033_s27 }
  0x2d   :  { %1270 = vrot.lane.b32.xlu1 %v144_v10, %s22034_s30  ;;  %v22367_v10 = vld [vmem:[%s28070_s2 + $0x58] sm:$0xff] }
  0x2f   :  { %1268 = vrot.lane.b32.xlu0 %v145_v11, %s22034_s30 }
  0x31   :  { %1276 = vrot.lane.b32.xlu1 %v1265_v17, %s22034_s30  ;;  %v22398_v17 = vld [vmem:[%s28070_s2 + $0x20] sm:$0xff] }
  0x33   :  { %1266 = vrot.lane.b32.xlu0 %v137_v9, %s22034_s30 }
  0x35   :  { %1274 = vrot.lane.b32.xlu1 %v1257_v16, %s22034_s30 }
  0x37   :  { %1278 = vrot.lane.b32.xlu0 %v1264_v21, %s22034_s30  ;;  %v22407_v21 = vld [vmem:[%s28070_s2 + $0x60] sm:$0xff] }
  0x39   :  { %1989 = vrot.lane.b32.xlu1 %v22164_v23, %s22035_s15 }
  0x3b   :  { %1987 = vrot.lane.b32.xlu0 %v22169_v24, %s22035_s15 }
  0x3d   :  { %1993 = vrot.lane.b32.xlu1 %v22176_v25, %s22035_s15 }
  0x3f   :  { %1985 = vrot.lane.b32.xlu0 %v22160_v22, %s22035_s15 }
  0x41   :  { %1272 = vrot.lane.b32.xlu1 %v146_v12, %s22034_s30 }
  0x43   :  { %1995 = vrot.lane.b32.xlu0 %v22184_v26, %s22035_s15 }
  0x45   :  { %2356 = vrot.lane.b32.xlu1 %v22164_v23, %s22036_s0 }
  0x47   :  { %2354 = vrot.lane.b32.xlu0 %v22169_v24, %s22036_s0 }
  0x49   :  { %2360 = vrot.lane.b32.xlu1 %v22176_v25, %s22036_s0 }
  0x4b   :  { %2352 = vrot.lane.b32.xlu0 %v22160_v22, %s22036_s0 }
  0x4d   :  { %1991 = vrot.lane.b32.xlu1 %v22199_v27, %s22035_s15 }
  0x4f   :  { %2362 = vrot.lane.b32.xlu0 %v22184_v26, %s22036_s0 }
  0x51   :  { %2723 = vrot.lane.b32.xlu1 %v22164_v23, %s22037_s18 }
  0x53   :  { %2721 = vrot.lane.b32.xlu0 %v22169_v24, %s22037_s18 }
  0x55   :  { %2358 = vrot.lane.b32.xlu1 %v22199_v27, %s22036_s0 }
  0x57   :  { %2719 = vrot.lane.b32.xlu0 %v22160_v22, %s22037_s18 }
  0x59   :  { %2729 = vrot.lane.b32.xlu1 %v22184_v26, %s22037_s18 }
  0x5b   :  { %2727 = vrot.lane.b32.xlu0 %v22176_v25, %s22037_s18 }
  0x5d   :  { %3088 = vrot.lane.b32.xlu1 %v22169_v24, %s22038_s19 }
  0x5f   :  { %2725 = vrot.lane.b32.xlu0 %v22199_v27, %s22037_s18 }
  0x61   :  { %3086 = vrot.lane.b32.xlu1 %v22160_v22, %s22038_s19 }
  0x63   :  { %3090 = vrot.lane.b32.xlu0 %v22164_v23, %s22038_s19 }
  0x65   :  { %3094 = vrot.lane.b32.xlu1 %v22176_v25, %s22038_s19 }
  0x67   :  { %3092 = vrot.lane.b32.xlu0 %v22199_v27, %s22038_s19 }
  0x69   :  { %104 = vperm.xlu1 %20047, %v98_v57  }
  0x6b   :  { %3096 = vrot.lane.b32.xlu0 %v22184_v26, %s22038_s19 }
  0x6d   :  { %114 = vperm.xlu1 %20047, %v100_v62  }
  0x6f   :  { %109 = vperm.xlu0 %20048, %v99_v56   ;;  %v22548_v56 = vld [vmem:[%s28070_s2 + $0x98] sm:$0xff] }
  0x71   :  { %119 = vperm.xlu1 %20047, %v101_v2  }
  0x7b   :  { %v156_v28 = vpop.permute.xlu1 %155 }
  0x7d   :  { %v158_v29 = vpop.permute.xlu0 %157 }
  0x7e   :  { %v168_v35 = vsel %vm167_vm0, %v156_v28, %v158_v29 }
  0x7f   :  { %v162_v30 = vpop.permute.xlu1 %161 }
  0x81   :  { %v160_v31 = vpop.permute.xlu0 %159 }
  0x82   :  { %v169_v32 = vsel %vm167_vm0, %v158_v29, %v160_v31  ;;  %v170_v39 = vsel %vm167_vm0, %v160_v31, %v162_v30 }
  0x83   :  { %17596 = vmatprep.subr.msk.mxu0 %vm186_vm1, %v169_v32  ;;  %v166_v34 = vpop.permute.xlu1 %165  ;;  %v22433_v32 = vld [vmem:[%s28070_s2 + $0x68] sm:$0xff] }
  0x84   :  { %17597 = vmatpush1.msk.msra.mxu0 %vm186_vm1, %v168_v35 }
  0x85   :  { %17598 = vmatmul.mubr.msk.f32.vlgmr.msra.gmra.mrb[0].mxu0 %vm173_vm2, %v22237_v33  ;;  %v164_v36 = vpop.permute.xlu0 %163 }
  0x86   :  { %v171_v37 = vsel %vm167_vm0, %v162_v30, %v164_v36  ;;  %269 = vmatprep.mubr.f32.mxu0 %v22030_v8  ;;  %v172_v50 = vsel %vm167_vm0, %v164_v36, %v166_v34  ;;  %v22422_v30 = vld [vmem:[%s28070_s2 + $0x28] sm:$0xff] }
  0x87   :  { %17602 = vmatprep.subr.msk.mxu0 %vm186_vm1, %v171_v37  ;;  %v22253_v40 = vpop.permute.xlu1 %528 }
  0x88   :  { %17603 = vmatpush1.msk.msra.mxu0 %vm186_vm1, %v170_v39 }
  0x89   :  { %17599 = vmatmul.mubr.msk.f32.gmra.mrb[2].mxu0 %vm173_vm2, %v22249_v38  ;;  %v527_v41 = vpop.permute.xlu0 %526  ;;  %17608 = vmatprep.subr.msk.mxu0 %vm186_vm1, %v166_v34  ;;  %v22447_v34 = vld [vmem:[%s28070_s2 + $0x30] sm:$0xff] }
  0x8a   :  { %275 = vmatprep.mubr.f32.mxu0 %v22030_v8  ;;  %v538_v49 = vsel %vm536_vm3, %v527_v41, %v22253_v40 }
  0x8b   :  { %v22265_v43 = vpop.permute.xlu1 %530 }
  0x8c   :  { %v539_v28 = vsel %vm536_vm3, %v22253_v40, %v22265_v43 }
  0x8d   :  { %17600 = vmatmul.mubr.msk.f32.gmra.mrb[4].mxu0 %vm173_vm2, %v22263_v42  ;;  %v525_v44 = vpop.permute.xlu0 %524 }
  0x8e   :  { %281 = vmatprep.mubr.f32.mxu0 %v22030_v8  ;;  %v537_v3 = vsel %vm536_vm3, %v525_v44, %v527_v41 }
  0x8f   :  { %v22275_v46 = vpop.permute.xlu1 %534 }
  0x91   :  { %17601 = vmatmul.mubr.msk.f32.gmra.mrb[6].mxu0 %vm173_vm2, %v22273_v45  ;;  %v22279_v47 = vpop.permute.xlu0 %532 }
  0x92   :  { %352 = vmatprep.mubr.f32.mxu0 %v22030_v8  ;;  %v540_v6 = vsel %vm536_vm3, %v22265_v43, %v22279_v47  ;;  %v541_v44 = vsel %vm536_vm3, %v22279_v47, %v22275_v46 }
  0x93   :  { %v22282_v48 = vpop.permute.xlu1 %895 }
  0x95   :  { %17604 = vmatmul.mubr.msk.f32.vlgmr.msra.gmra.mrb[8].mxu0 %vm173_vm2, %v22237_v33  ;;  %v22289_v51 = vpop.permute.xlu0 %893 }
  0x96   :  { %17609 = vmatpush1.msk.msra.mxu0 %vm186_vm1, %v172_v50  ;;  %358 = vmatprep.mubr.f32.mxu0 %v22030_v8  ;;  %v905_v43 = vsel %vm903_vm4, %v22289_v51, %v22282_v48 }
  0x97   :  { %v898_v52 = vpop.permute.xlu1 %897  ;;  %17619 = vmatprep.subr.msk.mxu0 %vm186_vm1, %v538_v49 }
  0x98   :  { %v22313_v59 = vsel %vm903_vm4, %v22282_v48, %v898_v52 }
  0x99   :  { %17605 = vmatmul.mubr.msk.f32.gmra.mrb[10].mxu0 %vm173_vm2, %v22249_v38  ;;  %v22296_v53 = vpop.permute.xlu0 %891 }
  0x9a   :  { %364 = vmatprep.mubr.f32.mxu0 %v22030_v8  ;;  %v904_v62 = vsel %vm903_vm4, %v22296_v53, %v22289_v51 }
  0x9b   :  { %v22299_v55 = vpop.permute.xlu1 %901 }
  0x9d   :  { %17606 = vmatmul.mubr.msk.f32.gmra.mrb[12].mxu0 %vm173_vm2, %v22263_v42  ;;  %v22309_v58 = vpop.permute.xlu0 %899 }
  0x9e   :  { %370 = vmatprep.mubr.f32.mxu0 %v22030_v8  ;;  %v22318_v60 = vsel %vm903_vm4, %v898_v52, %v22309_v58  ;;  %v22535_v52 = vld [vmem:[%s28070_s2 + $0x90] sm:$0xff] }
  0x9f   :  { %v22328_v63 = vpop.permute.xlu1 %1270  ;;  %19116 = vmatprep.subr.msk.mxu1 %vm186_vm1, %v22318_v60 }
  0xa0   :  { %19117 = vmatpush1.msk.msra.mxu1 %vm186_vm1, %v22313_v59 }
  0xa1   :  { %17607 = vmatmul.mubr.msk.f32.gmra.mrb[14].mxu0 %vm173_vm2, %v22273_v45  ;;  %17651 = vmatmul.mubr.msk.f32.vlgmr.msra.gmra.mrb[0].mxu1 %vm173_vm2, %v22323_v61  ;;  %v22338_v0 = vpop.permute.xlu0 %1268 }
  0xa2   :  { %441 = vmatprep.mubr.f32.mxu0 %v22030_v8  ;;  %1098 = vmatprep.mubr.f32.mxu1 %v22030_v8 }
  0xa3   :  { %v22351_v5 = vpop.permute.xlu1 %1276 }
  0xa5   :  { %17610 = vmatmul.mubr.msk.f32.vlgmr.msra.gmra.mrb[16].mxu0 %vm173_vm2, %v22237_v33  ;;  %17652 = vmatmul.mubr.msk.f32.gmra.mrb[2].mxu1 %vm173_vm2, %v22345_v1  ;;  %v22360_v9 = vpop.permute.xlu0 %1266 }
  0xa6   :  { %17620 = vmatpush1.msk.msra.mxu0 %vm186_vm1, %v537_v3  ;;  %447 = vmatprep.mubr.f32.mxu0 %v22030_v8  ;;  %v22564_v3 = vld [vmem:[%s28070_s2 + $0xa0] sm:$0xff] }
  0xa7   :  { %v22369_v11 = vpop.permute.xlu1 %1274  ;;  %1104 = vmatprep.mubr.f32.mxu1 %v22030_v8  ;;  %17625 = vmatprep.subr.msk.mxu0 %vm186_vm1, %v540_v6 }
  0xa9   :  { %17611 = vmatmul.mubr.msk.f32.gmra.mrb[18].mxu0 %vm173_vm2, %v22249_v38  ;;  %17653 = vmatmul.mubr.msk.f32.gmra.mrb[4].mxu1 %vm173_vm2, %v22367_v10  ;;  %v22377_v12 = vpop.permute.xlu0 %1278  ;;  %v22477_v38 = vld [vmem:[%s28070_s2 + $0x78] sm:$0xff] }
  0xaa   :  { %453 = vmatprep.mubr.f32.mxu0 %v22030_v8  ;;  %1464 = vmatprep.mubr.f32.mxu1 %v22030_v8 }
  0xab   :  { %v22381_v13 = vpop.permute.xlu1 %1989 }
  0xad   :  { %17612 = vmatmul.mubr.msk.f32.gmra.mrb[20].mxu0 %vm173_vm2, %v22263_v42  ;;  %v22385_v14 = vpop.permute.xlu0 %1987  ;;  %v22495_v42 = vld [vmem:[%s28070_s2 + $0x80] sm:$0xff] }
  0xae   :  { %459 = vmatprep.mubr.f32.mxu0 %v22030_v8 }
  0xaf   :  { %v22388_v15 = vpop.permute.xlu1 %1993 }
  0xb1   :  { %17613 = vmatmul.mubr.msk.f32.gmra.mrb[22].mxu0 %vm173_vm2, %v22273_v45  ;;  %v22392_v16 = vpop.permute.xlu0 %1985 }
  0xb2   :  { %630 = vmatprep.mubr.f32.mxu0 %v22030_v8 }
  0xb3   :  { %v1273_v18 = vpop.permute.xlu1 %1272 }
  0xb4   :  { %v1283_v19 = vsel %vm1280_vm5, %v22328_v63, %v1273_v18  ;;  %v1284_v20 = vsel %vm1280_vm5, %v1273_v18, %v22369_v11 }
  0xb5   :  { %17621 = vmatmul.mubr.msk.f32.vlgmr.msra.gmra.mrb[0].mxu0 %vm173_vm2, %v22398_v17  ;;  %17670 = vmatprep.subr.msk.mxu1 %vm186_vm1, %v1284_v20  ;;  %v22415_v29 = vpop.permute.xlu0 %1995  ;;  %v22612_v20 = vld [vmem:[%s28070_s2 + $0xb8] sm:$0xff] }
  0xb6   :  { %17626 = vmatpush1.msk.msra.mxu0 %vm186_vm1, %v539_v28  ;;  %17671 = vmatpush1.msk.msra.mxu1 %vm186_vm1, %v1283_v19  ;;  %v17637_v28 = vld [vmem:[%s28070_s2 + $0x40] sm:$0xff] }
  0xb7   :  { %17672 = vmatmul.mubr.msk.f32.vlgmr.msra.gmra.mrb[6].mxu1 %vm173_vm2, %v22407_v21  ;;  %636 = vmatprep.mubr.f32.mxu0 %v22030_v8  ;;  %v22427_v31 = vpop.permute.xlu1 %2356 }
  0xb8   :  { %1470 = vmatprep.mubr.f32.mxu1 %v22030_v8  ;;  %17631 = vmatprep.subr.msk.mxu0 %vm186_vm1, %v22275_v46  ;;  %v22518_v46 = vld [vmem:[%s28070_s2 + $0x88] sm:$0xff] }
  0xb9   :  { %17622 = vmatmul.mubr.msk.f32.gmra.mrb[2].mxu0 %vm173_vm2, %v22422_v30  ;;  %17693 = vmatprep.subr.msk.mxu1 %vm186_vm1, %v22199_v27  ;;  %v22441_v33 = vpop.permute.xlu0 %2354  ;;  %v22459_v27 = vld [vmem:[%s28070_s2 + $0x70] sm:$0xff] }
  0xba   :  { %642 = vmatprep.mubr.f32.mxu0 %v22030_v8  ;;  %17694 = vmatpush1.msk.msra.mxu1 %vm186_vm1, %v22164_v23  ;;  %v22469_v23 = vld [vmem:[%s28070_s2 + $0x38] sm:$0xff] }
  0xbb   :  { %17673 = vmatmul.mubr.msk.f32.gmra.mrb[0].mxu1 %vm173_vm2, %v22433_v32  ;;  %v22453_v35 = vpop.permute.xlu1 %2360 }
  0xbc   :  { %1476 = vmatprep.mubr.f32.mxu1 %v22030_v8 }
  0xbd   :  { %17623 = vmatmul.mubr.msk.f32.gmra.mrb[4].mxu0 %vm173_vm2, %v22447_v34  ;;  %v22463_v36 = vpop.permute.xlu0 %2352 }
  0xbe   :  { %648 = vmatprep.mubr.f32.mxu0 %v22030_v8 }
  0xbf   :  { %17674 = vmatmul.mubr.msk.f32.gmra.mrb[2].mxu1 %vm173_vm2, %v22459_v27  ;;  %v1992_v37 = vpop.permute.xlu1 %1991 }
  0xc0   :  { %1482 = vmatprep.mubr.f32.mxu1 %v22030_v8  ;;  %v2001_v39 = vsel %vm1997_vm6, %v1992_v37, %v22388_v15  ;;  %v2000_v45 = vsel %vm1997_vm6, %v22381_v13, %v1992_v37  ;;  %v22628_v37 = vld [vmem:[%s28070_s2 + $0xc0] sm:$0xff] }
  0xc1   :  { %17624 = vmatmul.mubr.msk.f32.gmra.mrb[6].mxu0 %vm173_vm2, %v22469_v23  ;;  %17716 = vmatprep.subr.msk.mxu1 %vm186_vm1, %v2001_v39  ;;  %v22484_v40 = vpop.permute.xlu0 %2362 }
  0xc2   :  { %719 = vmatprep.mubr.f32.mxu0 %v22030_v8 }
  0xc3   :  { %17675 = vmatmul.mubr.msk.f32.gmra.mrb[4].mxu1 %vm173_vm2, %v22477_v38  ;;  %v22489_v41 = vpop.permute.xlu1 %2723 }
  0xc4   :  { %1813 = vmatprep.mubr.f32.mxu1 %v22030_v8 }
  0xc5   :  { %17627 = vmatmul.mubr.msk.f32.vlgmr.msra.gmra.mrb[8].mxu0 %vm173_vm2, %v22398_v17  ;;  %v22507_v49 = vpop.permute.xlu0 %2721 }
  0xc6   :  { %17632 = vmatpush1.msk.msra.mxu0 %vm186_vm1, %v541_v44  ;;  %725 = vmatprep.mubr.f32.mxu0 %v22030_v8  ;;  %v22670_v44 = vld [vmem:[%s28070_s2 + $0xd8] sm:$0xff] }
  0xc7   :  { %17695 = vmatmul.mubr.msk.f32.vlgmr.msra.gmra.mrb[6].mxu1 %vm173_vm2, %v22495_v42  ;;  %17642 = vmatprep.subr.msk.mxu0 %vm186_vm1, %v905_v43  ;;  %v2359_v48 = vpop.permute.xlu1 %2358  ;;  %v22646_v43 = vld [vmem:[%s28070_s2 + $0xc8] sm:$0xff] }
  0xc8   :  { %1819 = vmatprep.mubr.f32.mxu1 %v22030_v8  ;;  %17717 = vmatpush1.msk.msra.mxu1 %vm186_vm1, %v2000_v45  ;;  %v2368_v47 = vsel %vm2364_vm7, %v2359_v48, %v22453_v35  ;;  %v2367_v6 = vsel %vm2364_vm7, %v22427_v31, %v2359_v48  ;;  %v22681_v45 = vld [vmem:[%s28070_s2 + $0xe0] sm:$0xff]  ;;  %v1282_v48 = vsel %vm1280_vm5, %v22338_v0, %v22328_v63  ;;  %v22720_v63 = vld [vmem:[%s28070_s2 + $0xf0] sm:$0xff] }
  0xc9   :  { %17628 = vmatmul.mubr.msk.f32.gmra.mrb[10].mxu0 %vm173_vm2, %v22422_v30  ;;  %17739 = vmatprep.subr.msk.mxu1 %vm186_vm1, %v2368_v47  ;;  %v22526_v50 = vpop.permute.xlu0 %2719  ;;  %v908_v47 = vsel %vm903_vm4, %v22309_v58, %v22299_v55  ;;  %v22707_v58 = vld [vmem:[%s28070_s2 + $0xe8] sm:$0xff] }
  0xca   :  { %731 = vmatprep.mubr.f32.mxu0 %v22030_v8 }
  0xcb   :  { %17696 = vmatmul.mubr.msk.f32.gmra.mrb[0].mxu1 %vm173_vm2, %v22518_v46  ;;  %v22552_v57 = vpop.permute.xlu1 %2729 }
  0xcc   :  { %1825 = vmatprep.mubr.f32.mxu1 %v22030_v8 }
  0xcd   :  { %17629 = vmatmul.mubr.msk.f32.gmra.mrb[12].mxu0 %vm173_vm2, %v22447_v34  ;;  %v22539_v54 = vpop.permute.xlu0 %2727 }
  0xce   :  { %737 = vmatprep.mubr.f32.mxu0 %v22030_v8 }
  0xcf   :  { %17697 = vmatmul.mubr.msk.f32.gmra.mrb[2].mxu1 %vm173_vm2, %v22535_v52  ;;  %v22578_v53 = vpop.permute.xlu1 %3088 }
  0xd0   :  { %1831 = vmatprep.mubr.f32.mxu1 %v22030_v8 }
  0xd1   :  { %17630 = vmatmul.mubr.msk.f32.gmra.mrb[14].mxu0 %vm173_vm2, %v22469_v23  ;;  %v2726_v2 = vpop.permute.xlu0 %2725 }
  0xd2   :  { %808 = vmatprep.mubr.f32.mxu0 %v22030_v8  ;;  %v2735_v51 = vsel %vm2731_vm8, %v2726_v2, %v22539_v54 }
  0xd3   :  { %17698 = vmatmul.mubr.msk.f32.gmra.mrb[4].mxu1 %vm173_vm2, %v22548_v56  ;;  %v22603_v19 = vpop.permute.xlu1 %3086 }
  0xd4   :  { %2180 = vmatprep.mubr.f32.mxu1 %v22030_v8 }
  0xd5   :  { %17633 = vmatmul.mubr.msk.f32.vlgmr.msra.gmra.mrb[16].mxu0 %vm173_vm2, %v22398_v17  ;;  %v22584_v17 = vld [vmem:[%s28070_s2 + $0xa8] sm:$0xff]  ;;  %v22601_v18 = vpop.permute.xlu0 %3090 }
  0xd6   :  { %17643 = vmatpush1.msk.msra.mxu0 %vm186_vm1, %v904_v62  ;;  %814 = vmatprep.mubr.f32.mxu0 %v22030_v8 }
  0xd7   :  { %17718 = vmatmul.mubr.msk.f32.vlgmr.msra.gmra.mrb[6].mxu1 %vm173_vm2, %v22564_v3  ;;  %17648 = vmatprep.subr.msk.mxu0 %vm186_vm1, %v22318_v60  ;;  %v22597_v60 = vld [vmem:[%s28070_s2 + $0xb0] sm:$0xff] }
  0xd8   :  { %2186 = vmatprep.mubr.f32.mxu1 %v22030_v8  ;;  %17740 = vmatpush1.msk.msra.mxu1 %vm186_vm1, %v2367_v6 }
  0xd9   :  { %17634 = vmatmul.mubr.msk.f32.gmra.mrb[18].mxu0 %vm173_vm2, %v22422_v30  ;;  %17762 = vmatprep.subr.msk.mxu1 %vm186_vm1, %v2735_v51  ;;  %v3093_v30 = vpop.permute.xlu0 %3092 }
  0xda   :  { %820 = vmatprep.mubr.f32.mxu0 %v22030_v8  ;;  %v3101_v62 = vsel %vm3098_vm9, %v22601_v18, %v3093_v30 }
  0xdb   :  { %17719 = vmatmul.mubr.msk.f32.gmra.mrb[0].mxu1 %vm173_vm2, %v22584_v17 }
  0xdc   :  { %2192 = vmatprep.mubr.f32.mxu1 %v22030_v8 }
  0xdd   :  { %17635 = vmatmul.mubr.msk.f32.gmra.mrb[20].mxu0 %vm173_vm2, %v22447_v34  ;;  %v22622_v34 = vpop.permute.xlu1 %3094 }
  0xde   :  { %826 = vmatprep.mubr.f32.mxu0 %v22030_v8  ;;  %v3102_v39 = vsel %vm3098_vm9, %v3093_v30, %v22622_v34 }
  0xdf   :  { %17720 = vmatmul.mubr.msk.f32.gmra.mrb[2].mxu1 %vm173_vm2, %v22597_v60 }
  0xe0   :  { %2198 = vmatprep.mubr.f32.mxu1 %v22030_v8 }
  0xe1   :  { %17636 = vmatmul.mubr.msk.f32.gmra.mrb[22].mxu0 %vm173_vm2, %v22469_v23  ;;  %v2734_v23 = vsel %vm2731_vm8, %v22489_v41, %v2726_v2  ;;  %v1281_v2 = vsel %vm1280_vm5, %v22360_v9, %v22338_v0  ;;  %v22731_v0 = vld [vmem:[%s28070_s2 + $0xf8] sm:$0xff]  ;;  %v22756_v9 = vld [vmem:[%s28070_s2 + $0x108] sm:$0xff] }
  0xe2   :  { %997 = vmatprep.mubr.f32.mxu0 %v22030_v8 }
  0xe3   :  { %17721 = vmatmul.mubr.msk.f32.gmra.mrb[4].mxu1 %vm173_vm2, %v22612_v20 }
  0xe4   :  { %2547 = vmatprep.mubr.f32.mxu1 %v22030_v8 }
  0xe5   :  { %17644 = vmatmul.mubr.msk.f32.vlgmr.msra.gmra.mrb[0].mxu0 %vm173_vm2, %v17637_v28 }
  0xe6   :  { %17649 = vmatpush1.msk.msra.mxu0 %vm186_vm1, %v22313_v59  ;;  %1003 = vmatprep.mubr.f32.mxu0 %v22030_v8  ;;  %v22659_v59 = vld [vmem:[%s28070_s2 + $0xd0] sm:$0xff] }
  0xe7   :  { %17741 = vmatmul.mubr.msk.f32.vlgmr.msra.gmra.mrb[6].mxu1 %vm173_vm2, %v22628_v37  ;;  %17654 = vmatprep.subr.msk.mxu0 %vm186_vm1, %v22299_v55  ;;  %v1286_v55 = vsel %vm1280_vm5, %v22351_v5, %v22377_v12  ;;  %v2369_v12 = vsel %vm2364_vm7, %v22453_v35, %v22484_v40 }
  0xe8   :  { %2553 = vmatprep.mubr.f32.mxu1 %v22030_v8  ;;  %17763 = vmatpush1.msk.msra.mxu1 %vm186_vm1, %v2734_v23 }
  0xe9   :  { %17645 = vmatmul.mubr.msk.f32.gmra.mrb[2].mxu0 %vm173_vm2, %v22323_v61  ;;  %17785 = vmatprep.subr.msk.mxu1 %vm186_vm1, %v3102_v39 }
  0xea   :  { %1009 = vmatprep.mubr.f32.mxu0 %v22030_v8 }
  0xeb   :  { %17742 = vmatmul.mubr.msk.f32.gmra.mrb[0].mxu1 %vm173_vm2, %v22646_v43 }
  0xec   :  { %2559 = vmatprep.mubr.f32.mxu1 %v22030_v8 }
  0xed   :  { %17646 = vmatmul.mubr.msk.f32.gmra.mrb[4].mxu0 %vm173_vm2, %v22345_v1 }
  0xee   :  { %1015 = vmatprep.mubr.f32.mxu0 %v22030_v8 }
  0xef   :  { %17743 = vmatmul.mubr.msk.f32.gmra.mrb[2].mxu1 %vm173_vm2, %v22659_v59 }
  0xf0   :  { %2565 = vmatprep.mubr.f32.mxu1 %v22030_v8 }
  0xf1   :  { %17647 = vmatmul.mubr.msk.f32.gmra.mrb[6].mxu0 %vm173_vm2, %v22367_v10 }
  0xf2   :  { %1086 = vmatprep.mubr.f32.mxu0 %v22030_v8 }
  0xf3   :  { %17744 = vmatmul.mubr.msk.f32.gmra.mrb[4].mxu1 %vm173_vm2, %v22670_v44 }
  0xf4   :  { %2914 = vmatprep.mubr.f32.mxu1 %v22030_v8 }
  0xf5   :  { %17650 = vmatmul.mubr.msk.f32.vlgmr.msra.gmra.mrb[8].mxu0 %vm173_vm2, %v17637_v28 }
  0xf6   :  { %17655 = vmatpush1.msk.msra.mxu0 %vm186_vm1, %v908_v47  ;;  %1175 = vmatprep.mubr.f32.mxu0 %v22030_v8 }
  0xf7   :  { %17764 = vmatmul.mubr.msk.f32.vlgmr.msra.gmra.mrb[6].mxu1 %vm173_vm2, %v22681_v45  ;;  %17664 = vmatprep.subr.msk.mxu0 %vm186_vm1, %v1282_v48 }
  0xf8   :  { %2920 = vmatprep.mubr.f32.mxu1 %v22030_v8  ;;  %17786 = vmatpush1.msk.msra.mxu1 %vm186_vm1, %v3101_v62  ;;  %v3446_v62 = vsub.s32 0, %v22108_v4 }
  0xf9   :  { %17656 = vmatmul.mubr.msk.f32.vlgmr.msra.gmra.mrb[16].mxu0 %vm173_vm2, %v17637_v28 }
  0xfa   :  { %17665 = vmatpush1.msk.msra.mxu0 %vm186_vm1, %v1281_v2  ;;  %1181 = vmatprep.mubr.f32.mxu0 %v22030_v8  ;;  %v3450_v2 = vsub.s32 1, %v22108_v4 }
  0xfb   :  { %17765 = vmatmul.mubr.msk.f32.gmra.mrb[0].mxu1 %vm173_vm2, %v22707_v58  ;;  %17676 = vmatprep.subr.msk.mxu0 %vm186_vm1, %v1286_v55  ;;  %v23029_v55 = vld [vmem:[%s28072_s1] sm:$0x3f] }
  0xfc   :  { %2926 = vmatprep.mubr.f32.mxu1 %v22030_v8 }
  0xfd   :  { %17657 = vmatmul.mubr.msk.f32.gmra.mrb[18].mxu0 %vm173_vm2, %v22323_v61  ;;  %v22742_v61 = vld [vmem:[%s28070_s2 + $0x100] sm:$0xff] }
  0xfe   :  { %1187 = vmatprep.mubr.f32.mxu0 %v22030_v8 }
  0xff   :  { %17766 = vmatmul.mubr.msk.f32.gmra.mrb[2].mxu1 %vm173_vm2, %v22720_v63 }
 0x100   :  { %2932 = vmatprep.mubr.f32.mxu1 %v22030_v8 }
 0x101   :  { %17658 = vmatmul.mubr.msk.f32.gmra.mrb[20].mxu0 %vm173_vm2, %v22345_v1  ;;  %v1285_v1 = vsel %vm1280_vm5, %v22369_v11, %v22351_v5  ;;  %v22770_v5 = vld [vmem:[%s28070_s2 + $0x110] sm:$0xff]  ;;  %v2365_v11 = vsel %vm2364_vm7, %v22463_v36, %v22441_v33 }
 0x102   :  { %1193 = vmatprep.mubr.f32.mxu0 %v22030_v8 }
 0x103   :  { %17767 = vmatmul.mubr.msk.f32.gmra.mrb[4].mxu1 %vm173_vm2, %v22731_v0 }
 0x104   :  { %3281 = vmatprep.mubr.f32.mxu1 %v22030_v8 }
 0x105   :  { %17659 = vmatmul.mubr.msk.f32.gmra.mrb[22].mxu0 %vm173_vm2, %v22367_v10  ;;  %v2366_v10 = vsel %vm2364_vm7, %v22441_v33, %v22427_v31 }
 0x106   :  { %1375 = vmatprep.mubr.f32.mxu0 %v22030_v8 }
 0x107   :  { %17787 = vmatmul.mubr.msk.f32.vlgmr.msra.gmra.mrb[6].mxu1 %vm173_vm2, %v22742_v61 }
 0x108   :  { %3287 = vmatprep.mubr.f32.mxu1 %v22030_v8 }
 0x109   :  { %17666 = vmatmul.mubr.msk.f32.vlgmr.msra.gmra.mrb[0].mxu0 %vm173_vm2, %v22407_v21 }
 0x10a   :  { %17677 = vmatpush1.msk.msra.mxu0 %vm186_vm1, %v1285_v1  ;;  %1381 = vmatprep.mubr.f32.mxu0 %v22030_v8 }
 0x10b   :  { %17788 = vmatmul.mubr.msk.f32.gmra.mrb[0].mxu1 %vm173_vm2, %v22756_v9  ;;  %17687 = vmatprep.subr.msk.mxu0 %vm186_vm1, %v22169_v24  ;;  %v22781_v24 = vld [vmem:[%s28070_s2 + $0x118] sm:$0xff] }
 0x10c   :  { %3293 = vmatprep.mubr.f32.mxu1 %v22030_v8 }
 0x10d   :  { %17667 = vmatmul.mubr.msk.f32.gmra.mrb[2].mxu0 %vm173_vm2, %v22433_v32 }
 0x10e   :  { %1387 = vmatprep.mubr.f32.mxu0 %v22030_v8 }
 0x10f   :  { %17789 = vmatmul.mubr.msk.f32.gmra.mrb[2].mxu1 %vm173_vm2, %v22770_v5 }
 0x110   :  { %3299 = vmatprep.mubr.f32.mxu1 %v22030_v8 }
 0x111   :  { %17668 = vmatmul.mubr.msk.f32.gmra.mrb[4].mxu0 %vm173_vm2, %v22459_v27 }
 0x112   :  { %1393 = vmatprep.mubr.f32.mxu0 %v22030_v8 }
 0x113   :  { %17790 = vmatmul.mubr.msk.f32.gmra.mrb[4].mxu1 %vm173_vm2, %v22781_v24 }
 0x114   :  { %3768 = vmatprep.mubr.f32.mxu1 %v22030_v8 }
 0x115   :  { %17669 = vmatmul.mubr.msk.f32.gmra.mrb[6].mxu0 %vm173_vm2, %v22477_v38 }
 0x116   :  { %1553 = vmatprep.mubr.f32.mxu0 %v22030_v8 }
 0x119   :  { %17678 = vmatmul.mubr.msk.f32.vlgmr.msra.gmra.mrb[16].mxu0 %vm173_vm2, %v22407_v21  ;;  %v3099_v21 = vsel %vm3098_vm9, %v22603_v19, %v22578_v53 }
 0x11a   :  { %1559 = vmatprep.mubr.f32.mxu0 %v22030_v8  ;;  %17688 = vmatpush1.msk.msra.mxu0 %vm186_vm1, %v22160_v22  ;;  %v1999_v22 = vsel %vm1997_vm6, %v22385_v14, %v22381_v13  ;;  %v2733_v13 = vsel %vm2731_vm8, %v22507_v49, %v22489_v41 }
 0x11b   :  { %17699 = vmatprep.subr.msk.mxu0 %vm186_vm1, %v22184_v26  ;;  %v2002_v26 = vsel %vm1997_vm6, %v22388_v15, %v22415_v29  ;;  %v2736_v15 = vsel %vm2731_vm8, %v22539_v54, %v22552_v57 }
 0x11d   :  { %17679 = vmatmul.mubr.msk.f32.gmra.mrb[18].mxu0 %vm173_vm2, %v22433_v32 }
 0x11e   :  { %1565 = vmatprep.mubr.f32.mxu0 %v22030_v8 }
 0x121   :  { %17680 = vmatmul.mubr.msk.f32.gmra.mrb[20].mxu0 %vm173_vm2, %v22459_v27 }
 0x122   :  { %1571 = vmatprep.mubr.f32.mxu0 %v22030_v8 }
 0x125   :  { %17681 = vmatmul.mubr.msk.f32.gmra.mrb[22].mxu0 %vm173_vm2, %v22477_v38 }
 0x126   :  { %1724 = vmatprep.mubr.f32.mxu0 %v22030_v8 }
 0x129   :  { %17689 = vmatmul.mubr.msk.f32.vlgmr.msra.gmra.mrb[0].mxu0 %vm173_vm2, %v22495_v42 }
 0x12a   :  { %1730 = vmatprep.mubr.f32.mxu0 %v22030_v8  ;;  %17700 = vmatpush1.msk.msra.mxu0 %vm186_vm1, %v22176_v25  ;;  %v1998_v25 = vsel %vm1997_vm6, %v22392_v16, %v22385_v14  ;;  %v2732_v14 = vsel %vm2731_vm8, %v22526_v50, %v22507_v49  ;;  %v3100_v16 = vsel %vm3098_vm9, %v22578_v53, %v22601_v18 }
 0x12b   :  { %17710 = vmatprep.subr.msk.mxu0 %vm186_vm1, %v1999_v22 }
 0x12d   :  { %17690 = vmatmul.mubr.msk.f32.gmra.mrb[2].mxu0 %vm173_vm2, %v22518_v46 }
 0x12e   :  { %1736 = vmatprep.mubr.f32.mxu0 %v22030_v8 }
 0x131   :  { %17691 = vmatmul.mubr.msk.f32.gmra.mrb[4].mxu0 %vm173_vm2, %v22535_v52 }
 0x132   :  { %1742 = vmatprep.mubr.f32.mxu0 %v22030_v8 }
 0x135   :  { %17692 = vmatmul.mubr.msk.f32.gmra.mrb[6].mxu0 %vm173_vm2, %v22548_v56 }
 0x136   :  { %1902 = vmatprep.mubr.f32.mxu0 %v22030_v8 }
 0x139   :  { %17701 = vmatmul.mubr.msk.f32.vlgmr.msra.gmra.mrb[16].mxu0 %vm173_vm2, %v22495_v42  ;;  %v22986_v42 = vpop.permute.xlu1 %104 }
 0x13a   :  { %17711 = vmatpush1.msk.msra.mxu0 %vm186_vm1, %v1998_v25  ;;  %1908 = vmatprep.mubr.f32.mxu0 %v22030_v8  ;;  %v3454_v25 = vsub.s32 2, %v22108_v4 }
 0x13b   :  { %17722 = vmatprep.subr.msk.mxu0 %vm186_vm1, %v22415_v29  ;;  %v3097_v29 = vpop.permute.xlu0 %3096 }
 0x13c   :  { %v3103_v38 = vsel %vm3098_vm9, %v22622_v34, %v3097_v29 }
 0x13d   :  { %17702 = vmatmul.mubr.msk.f32.gmra.mrb[18].mxu0 %vm173_vm2, %v22518_v46 }
 0x13e   :  { %1914 = vmatprep.mubr.f32.mxu0 %v22030_v8 }
 0x13f   :  { %v22989_v46 = vpop.permute.xlu0 %109 }
 0x141   :  { %17703 = vmatmul.mubr.msk.f32.gmra.mrb[20].mxu0 %vm173_vm2, %v22535_v52 }
 0x142   :  { %1920 = vmatprep.mubr.f32.mxu0 %v22030_v8 }
 0x145   :  { %17704 = vmatmul.mubr.msk.f32.gmra.mrb[22].mxu0 %vm173_vm2, %v22548_v56 }
 0x146   :  { %2091 = vmatprep.mubr.f32.mxu0 %v22030_v8 }
 0x149   :  { %17712 = vmatmul.mubr.msk.f32.vlgmr.msra.gmra.mrb[0].mxu0 %vm173_vm2, %v22564_v3 }
 0x14a   :  { %2097 = vmatprep.mubr.f32.mxu0 %v22030_v8  ;;  %17723 = vmatpush1.msk.msra.mxu0 %vm186_vm1, %v2002_v26 }
 0x14b   :  { %17733 = vmatprep.subr.msk.mxu0 %vm186_vm1, %v2366_v10 }
 0x14d   :  { %17713 = vmatmul.mubr.msk.f32.gmra.mrb[2].mxu0 %vm173_vm2, %v22584_v17 }
 0x14e   :  { %2103 = vmatprep.mubr.f32.mxu0 %v22030_v8 }
 0x151   :  { %17714 = vmatmul.mubr.msk.f32.gmra.mrb[4].mxu0 %vm173_vm2, %v22597_v60 }
 0x152   :  { %2109 = vmatprep.mubr.f32.mxu0 %v22030_v8 }
 0x155   :  { %17715 = vmatmul.mubr.msk.f32.gmra.mrb[6].mxu0 %vm173_vm2, %v22612_v20 }
 0x156   :  { %2269 = vmatprep.mubr.f32.mxu0 %v22030_v8 }
 0x159   :  { %17724 = vmatmul.mubr.msk.f32.vlgmr.msra.gmra.mrb[16].mxu0 %vm173_vm2, %v22564_v3 }
 0x15a   :  { %17734 = vmatpush1.msk.msra.mxu0 %vm186_vm1, %v2365_v11  ;;  %2275 = vmatprep.mubr.f32.mxu0 %v22030_v8 }
 0x15b   :  { %17745 = vmatprep.subr.msk.mxu0 %vm186_vm1, %v22484_v40  ;;  %v22974_v40 = vld [vmem:[#allocation2] sm:$0xff] }
 0x15c   :  { %v23020_v47 = vpack.i.bf16 %v22974_v40, %v22974_v40 }
 0x15d   :  { %17725 = vmatmul.mubr.msk.f32.gmra.mrb[18].mxu0 %vm173_vm2, %v22584_v17 }
 0x15e   :  { %2281 = vmatprep.mubr.f32.mxu0 %v22030_v8  ;;  %20050 = vrot.lane.b32.xlu0 %v23020_v47, %s22031_s23 }
 0x161   :  { %17726 = vmatmul.mubr.msk.f32.gmra.mrb[20].mxu0 %vm173_vm2, %v22597_v60 }
 0x162   :  { %2287 = vmatprep.mubr.f32.mxu0 %v22030_v8 }
 0x165   :  { %17727 = vmatmul.mubr.msk.f32.gmra.mrb[22].mxu0 %vm173_vm2, %v22612_v20 }
 0x166   :  { %2458 = vmatprep.mubr.f32.mxu0 %v22030_v8 }
 0x169   :  { %17735 = vmatmul.mubr.msk.f32.vlgmr.msra.gmra.mrb[0].mxu0 %vm173_vm2, %v22628_v37 }
 0x16a   :  { %2464 = vmatprep.mubr.f32.mxu0 %v22030_v8  ;;  %17746 = vmatpush1.msk.msra.mxu0 %vm186_vm1, %v2369_v12  ;;  %v3458_v12 = vsub.s32 3, %v22108_v4 }
 0x16b   :  { %17756 = vmatprep.subr.msk.mxu0 %vm186_vm1, %v2733_v13 }
 0x16d   :  { %17736 = vmatmul.mubr.msk.f32.gmra.mrb[2].mxu0 %vm173_vm2, %v22646_v43 }
 0x16e   :  { %2470 = vmatprep.mubr.f32.mxu0 %v22030_v8 }
 0x171   :  { %17737 = vmatmul.mubr.msk.f32.gmra.mrb[4].mxu0 %vm173_vm2, %v22659_v59 }
 0x172   :  { %2476 = vmatprep.mubr.f32.mxu0 %v22030_v8 }
 0x175   :  { %17738 = vmatmul.mubr.msk.f32.gmra.mrb[6].mxu0 %vm173_vm2, %v22670_v44 }
 0x176   :  { %2636 = vmatprep.mubr.f32.mxu0 %v22030_v8 }
 0x179   :  { %17747 = vmatmul.mubr.msk.f32.vlgmr.msra.gmra.mrb[16].mxu0 %vm173_vm2, %v22628_v37 }
 0x17a   :  { %17757 = vmatpush1.msk.msra.mxu0 %vm186_vm1, %v2732_v14  ;;  %2642 = vmatprep.mubr.f32.mxu0 %v22030_v8 }
 0x17b   :  { %17768 = vmatprep.subr.msk.mxu0 %vm186_vm1, %v22552_v57  ;;  %v22994_v57 = vpop.permute.xlu1 %114 }
 0x17d   :  { %17748 = vmatmul.mubr.msk.f32.gmra.mrb[18].mxu0 %vm173_vm2, %v22646_v43 }
 0x17e   :  { %2648 = vmatprep.mubr.f32.mxu0 %v22030_v8 }
 0x17f   :  { %v23006_v28 = vpop.permute.xlu1 %119 }
 0x181   :  { %17749 = vmatmul.mubr.msk.f32.gmra.mrb[20].mxu0 %vm173_vm2, %v22659_v59 }
 0x182   :  { %2654 = vmatprep.mubr.f32.mxu0 %v22030_v8 }
 0x185   :  { %17750 = vmatmul.mubr.msk.f32.gmra.mrb[22].mxu0 %vm173_vm2, %v22670_v44 }
 0x186   :  { %2825 = vmatprep.mubr.f32.mxu0 %v22030_v8 }
 0x189   :  { %17758 = vmatmul.mubr.msk.f32.vlgmr.msra.gmra.mrb[0].mxu0 %vm173_vm2, %v22681_v45 }
 0x18a   :  { %2831 = vmatprep.mubr.f32.mxu0 %v22030_v8  ;;  %17769 = vmatpush1.msk.msra.mxu0 %vm186_vm1, %v2736_v15 }
 0x18b   :  { %17779 = vmatprep.subr.msk.mxu0 %vm186_vm1, %v3100_v16 }
 0x18d   :  { %17759 = vmatmul.mubr.msk.f32.gmra.mrb[2].mxu0 %vm173_vm2, %v22707_v58 }
 0x18e   :  { %2837 = vmatprep.mubr.f32.mxu0 %v22030_v8 }
 0x191   :  { %17760 = vmatmul.mubr.msk.f32.gmra.mrb[4].mxu0 %vm173_vm2, %v22720_v63 }
 0x192   :  { %2843 = vmatprep.mubr.f32.mxu0 %v22030_v8 }
 0x195   :  { %17761 = vmatmul.mubr.msk.f32.gmra.mrb[6].mxu0 %vm173_vm2, %v22731_v0 }
 0x196   :  { %3003 = vmatprep.mubr.f32.mxu0 %v22030_v8 }
 0x199   :  { %17770 = vmatmul.mubr.msk.f32.vlgmr.msra.gmra.mrb[16].mxu0 %vm173_vm2, %v22681_v45 }
 0x19a   :  { %17780 = vmatpush1.msk.msra.mxu0 %vm186_vm1, %v3099_v21  ;;  %3009 = vmatprep.mubr.f32.mxu0 %v22030_v8 }
 0x19b   :  { %17791 = vmatprep.subr.msk.mxu0 %vm186_vm1, %v3097_v29 }
 0x19c   :  { %v727_v31 = vpop.f32.mrb[10].mxu0 }
 0x19d   :  { %v729_v32 = vpop.f32.mrb[11].mxu0  ;;  %17771 = vmatmul.mubr.msk.f32.gmra.mrb[18].mxu0 %vm173_vm2, %v22707_v58  ;;  %v19130_v6 = vadd.f32 %v727_v31, %v22989_v46  ;;  %v23054_v31 = vrot.slane %v23029_v55, %v3454_v25 }
 0x19e   :  { %3015 = vmatprep.mubr.f32.mxu0 %v22030_v8  ;;  %v19132_v51 = vadd.f32 %v729_v32, %v22989_v46 }
 0x1a0   :  { %v733_v33 = vpop.f32.mrb[12].mxu0 }
 0x1a1   :  { %v735_v35 = vpop.f32.mrb[13].mxu0  ;;  %17772 = vmatmul.mubr.msk.f32.gmra.mrb[20].mxu0 %vm173_vm2, %v22720_v63  ;;  %v19134_v19 = vadd.f32 %v733_v33, %v22994_v57 }
 0x1a2   :  { %3021 = vmatprep.mubr.f32.mxu0 %v22030_v8  ;;  %v19136_v20 = vadd.f32 %v735_v35, %v22994_v57 }
 0x1a4   :  { %v739_v27 = vpop.f32.mrb[14].mxu0 }
 0x1a5   :  { %v741_v36 = vpop.f32.mrb[15].mxu0  ;;  %17773 = vmatmul.mubr.msk.f32.gmra.mrb[22].mxu0 %vm173_vm2, %v22731_v0  ;;  %v19138_v39 = vadd.f32 %v739_v27, %v23006_v28  ;;  %v23033_v0 = vrot.slane %v23029_v55, %v3446_v62 }
 0x1a6   :  { %3192 = vmatprep.mubr.f32.mxu0 %v22030_v8  ;;  %v19140_v43 = vadd.f32 %v741_v36, %v23006_v28  ;;  %v23062_v36 = vrot.slane %v23029_v55, %v3458_v12 }
 0x1a9   :  { %17781 = vmatmul.mubr.msk.f32.vlgmr.msra.gmra.mrb[0].mxu0 %vm173_vm2, %v22742_v61 }
 0x1aa   :  { %3198 = vmatprep.mubr.f32.mxu0 %v22030_v8  ;;  %17792 = vmatpush1.msk.msra.mxu0 %vm186_vm1, %v3103_v38 }
 0x1ad   :  { %17782 = vmatmul.mubr.msk.f32.gmra.mrb[2].mxu0 %vm173_vm2, %v22756_v9 }
 0x1ae   :  { %3204 = vmatprep.mubr.f32.mxu0 %v22030_v8 }
 0x1b1   :  { %17783 = vmatmul.mubr.msk.f32.gmra.mrb[4].mxu0 %vm173_vm2, %v22770_v5 }
 0x1b2   :  { %3210 = vmatprep.mubr.f32.mxu0 %v22030_v8 }
 0x1b5   :  { %17784 = vmatmul.mubr.msk.f32.gmra.mrb[6].mxu0 %vm173_vm2, %v22781_v24 }
 0x1b6   :  { %3370 = vmatprep.mubr.f32.mxu0 %v22030_v8 }
 0x1b9   :  { %17793 = vmatmul.mubr.msk.f32.vlgmr.msra.gmra.mrb[16].mxu0 %vm173_vm2, %v22742_v61 }
 0x1ba   :  { %3376 = vmatprep.mubr.f32.mxu0 %v22974_v40 }
 0x1bd   :  { %17794 = vmatmul.mubr.msk.f32.gmra.mrb[18].mxu0 %vm173_vm2, %v22756_v9  ;;  %v23037_v9 = vrot.slane %v23029_v55, %v3450_v2 }
 0x1be   :  { %3382 = vmatprep.mubr.f32.mxu0 %v22974_v40 }
 0x1c1   :  { %17795 = vmatmul.mubr.msk.f32.gmra.mrb[20].mxu0 %vm173_vm2, %v22770_v5 }
 0x1c2   :  { %3388 = vmatprep.mubr.f32.mxu0 %v22974_v40 }
 0x1c5   :  { %17796 = vmatmul.mubr.msk.f32.gmra.mrb[22].mxu0 %vm173_vm2, %v22781_v24 }
 0x1c6   :  { %7487 = vmatprep.mubr.f32.mxu0 %v22974_v40 }
 0x1c8   :  { %v1088_v8 = vpop.f32.mrb[8].mxu0 }
 0x1c9   :  { %v1090_v41 = vpop.f32.mrb[9].mxu0  ;;  %v19126_v49 = vadd.f32 %v1088_v8, %v22986_v42 }
 0x1ca   :  { %v19128_v50 = vadd.f32 %v1090_v41, %v22986_v42 }
 0x1da   :  { %v3283_v52 = vpop.f32.mrb[6].mxu1 }
 0x1db   :  { %v22992_v54 = vadd.f32 %v19126_v49, %v3283_v52  ;;  %v3285_v56 = vpop.f32.mrb[7].mxu1 }
 0x1dc   :  { %v22996_v3 = vadd.f32 %v19128_v50, %v3285_v56 }
 0x1dd   :  { %v3421_v27 = vmax.f32 %v22992_v54, 0.0 }
 0x1de   :  { %v3289_v53 = vpop.f32.mrb[0].mxu1  ;;  %v3422_v41 = vmax.f32 %v22996_v3, 0.0 }
 0x1df   :  { %v23000_v17 = vadd.f32 %v19130_v6, %v3289_v53  ;;  %v3291_v60 = vpop.f32.mrb[1].mxu1 }
 0x1e0   :  { %v23002_v18 = vadd.f32 %v19132_v51, %v3291_v60 }
 0x1e1   :  { %v3427_v54 = vmax.f32 %v23000_v17, 0.0 }
 0x1e2   :  { %v3295_v30 = vpop.f32.mrb[2].mxu1  ;;  %v3428_v3 = vmax.f32 %v23002_v18, 0.0 }
 0x1e3   :  { %v23008_v34 = vadd.f32 %v19134_v19, %v3295_v30  ;;  %v3297_v37 = vpop.f32.mrb[3].mxu1 }
 0x1e4   :  { %v23010_v23 = vadd.f32 %v19136_v20, %v3297_v37  ;;  %v3466_v37 = vsub.s32 5, %v22108_v4 }
 0x1e6   :  { %v3301_v59 = vpop.f32.mrb[4].mxu1 }
 0x1e7   :  { %v23014_v44 = vadd.f32 %v19138_v39, %v3301_v59  ;;  %v3303_v45 = vpop.f32.mrb[5].mxu1  ;;  %v23097_v39 = vmul.f32 %v23054_v31, %v3421_v27  ;;  %v23103_v59 = vmul.f32 %v23054_v31, %v3427_v54 }
 0x1e8   :  { %v23016_v48 = vadd.f32 %v19140_v43, %v3303_v45  ;;  %v23100_v43 = vmul.f32 %v23062_v36, %v3422_v41 }
 0x1e9   :  { %v3439_v12 = vmax.f32 %v23014_v44, 0.0 }
 0x1eb   :  { %v23167_v54 = vmul.f32 %v23054_v31, %v3439_v12 }
 0x27c   :  { %v3194_v58 = vpop.f32.mrb[0].mxu0 }
 0x27d   :  { %v19118_v63 = vadd.f32 %v3194_v58, %v22986_v42  ;;  %v3196_v61 = vpop.f32.mrb[1].mxu0  ;;  %v23110_v58 = vmul.f32 %v23062_v36, %v3428_v3 }
 0x27e   :  { %v19119_v1 = vadd.f32 %v3196_v61, %v22986_v42 }
 0x27f   :  { %v3419_v5 = vmax.f32 %v19118_v63, 0.0 }
 0x280   :  { %v3420_v24 = vmax.f32 %v19119_v1, 0.0  ;;  %v3200_v22 = vpop.f32.mrb[2].mxu0  ;;  %v3462_v1 = vsub.s32 4, %v22108_v4 }
 0x281   :  { %v23041_v26 = vmul.f32 %v23033_v0, %v3419_v5  ;;  %v19120_v10 = vadd.f32 %v3200_v22, %v22989_v46  ;;  %v3202_v11 = vpop.f32.mrb[3].mxu0 }
 0x282   :  { %v23046_v13 = vmul.f32 %v23037_v9, %v3420_v24  ;;  %v19121_v14 = vadd.f32 %v3202_v11, %v22989_v46  ;;  %v3433_v24 = vmax.f32 %v23008_v34, 0.0  ;;  %v3434_v11 = vmax.f32 %v23010_v23, 0.0 }
 0x283   :  { %v3425_v15 = vmax.f32 %v19120_v10, 0.0  ;;  %v23123_v10 = vrot.slane %v23029_v55, %v3466_v37  ;;  %v23143_v44 = vrot.slane %v23029_v55, %v3462_v1  ;;  %v23157_v55 = vpack.i.bf16 %v23110_v58, %v23103_v59 }
 0x284   :  { %v3426_v16 = vmax.f32 %v19121_v14, 0.0  ;;  %v3206_v21 = vpop.f32.mrb[4].mxu0  ;;  %v23051_v29 = vpack.i.bf16 %v23046_v13, %v23041_v26  ;;  %v3440_v14 = vmax.f32 %v23016_v48, 0.0 }
 0x285   :  { %v23057_v32 = vmul.f32 %v23033_v0, %v3425_v15  ;;  %v19122_v33 = vadd.f32 %v3206_v21, %v22994_v57  ;;  %v3208_v35 = vpop.f32.mrb[5].mxu0  ;;  %28099 = vst [vmem:[#allocation5_spill] sm:$0xff] %v23123_v10  ;;  %28100 = vst [vmem:[#allocation6_spill] sm:$0xff] %v23143_v44 }
 0x286   :  { %v23065_v38 = vmul.f32 %v23037_v9, %v3426_v16  ;;  %v19123_v8 = vadd.f32 %v3208_v35, %v22994_v57  ;;  %20055 = vrot.lane.b32.xlu0 %v23051_v29, %s22031_s23 }
 0x287   :  { %v3431_v49 = vmax.f32 %v19122_v33, 0.0  ;;  %v23073_v50 = vpack.i.bf16 %v23057_v32, %v23041_v26 }
 0x288   :  { %v3432_v56 = vmax.f32 %v19123_v8, 0.0  ;;  %v3212_v6 = vpop.f32.mrb[6].mxu0  ;;  %v23080_v51 = vpack.i.bf16 %v23065_v38, %v23057_v32  ;;  %v23153_v8 = vmul.f32 %v23054_v31, %v3433_v24 }
 0x289   :  { %v23086_v60 = vmul.f32 %v23033_v0, %v3431_v49  ;;  %v19124_v19 = vadd.f32 %v3212_v6, %v23006_v28  ;;  %v3214_v20 = vpop.f32.mrb[7].mxu0  ;;  %v23161_v49 = vpack.i.bf16 %v23100_v43, %v23097_v39 }
 0x28a   :  { %v23090_v30 = vmul.f32 %v23037_v9, %v3432_v56  ;;  %v19125_v17 = vadd.f32 %v3214_v20, %v23006_v28  ;;  %20060 = vrot.lane.b32.xlu1 %v23080_v51, %s22031_s23  ;;  %v23170_v56 = vmul.f32 %v23062_v36, %v3440_v14 }
 0x28b   :  { %v3437_v18 = vmax.f32 %v19124_v19, 0.0 }
 0x28c   :  { %v3438_v45 = vmax.f32 %v19125_v17, 0.0  ;;  %v3372_v62 = vpop.f32.mrb[16].mxu0  ;;  %v23107_v2 = vpack.i.bf16 %v23090_v30, %v23086_v60  ;;  %v20094_v24 = vpack.i.bf16 %v23170_v56, %v23167_v54 }
 0x28d   :  { %v23113_v63 = vmul.f32 %v23033_v0, %v3437_v18  ;;  %v19142_v61 = vadd.f32 %v3372_v62, %v22986_v42  ;;  %v3374_v5 = vpop.f32.mrb[17].mxu0 }
 0x28e   :  { %v23119_v22 = vmul.f32 %v23037_v9, %v3438_v45  ;;  %v19143_v25 = vadd.f32 %v3374_v5, %v22986_v42  ;;  %20065 = vrot.lane.b32.xlu1 %v23107_v2, %s22031_s23 }
 0x28f   :  { %v23131_v4 = vpack.i.bf16 %v23113_v63, %v23086_v60  ;;  %v3423_v21 = vmax.f32 %v19142_v61, 0.0 }
 0x290   :  { %v3424_v42 = vmax.f32 %v19143_v25, 0.0  ;;  %v3378_v15 = vpop.f32.mrb[18].mxu0  ;;  %v23138_v16 = vpack.i.bf16 %v23119_v22, %v23113_v63 }
 0x291   :  { %v19144_v33 = vadd.f32 %v3378_v15, %v22989_v46  ;;  %v3380_v35 = vpop.f32.mrb[19].mxu0  ;;  %v23174_v19 = vmul.f32 %v23143_v44, %v3423_v21 }
 0x292   :  { %v3479_v27 = vmul.f32 %v23123_v10, %v3424_v42  ;;  %v19145_v48 = vadd.f32 %v3380_v35, %v22989_v46  ;;  %20075 = vrot.lane.b32.xlu1 %v23020_v47, %s22031_s23  ;;  %20070 = vrot.lane.b32.xlu0 %v23138_v16, %s22031_s23  ;;  %v23164_v46 = vmul.f32 %v23062_v36, %v3434_v11 }
 0x293   :  { %v3429_v41 = vmax.f32 %v19144_v33, 0.0 }
 0x294   :  { %3504 = vst.msk [vmem:[#allocation2 + $0x30] sm:$0xff] %vm3503_vm10, %v3479_v27  ;;  %v3430_v6 = vmax.f32 %v19145_v48, 0.0  ;;  %v3384_v3 = vpop.f32.mrb[20].mxu0 }
 0x295   :  { %v23177_v20 = vmul.f32 %v23143_v44, %v3429_v41  ;;  %v19146_v17 = vadd.f32 %v3384_v3, %v22994_v57  ;;  %v3386_v37 = vpop.f32.mrb[21].mxu0  ;;  %v23289_v3 = vpack.i.bf16 %v23103_v59, %v23065_v38 }
 0x296   :  { %v3485_v18 = vmul.f32 %v23123_v10, %v3430_v6  ;;  %v19147_v45 = vadd.f32 %v3386_v37, %v22994_v57  ;;  %20085 = vrot.lane.b32.xlu1 %v23157_v55, %s22031_s23  ;;  %20080 = vrot.lane.b32.xlu0 %v23161_v49, %s22031_s23  ;;  %v20089_v57 = vpack.i.bf16 %v23164_v46, %v23153_v8 }
 0x297   :  { %v20099_v62 = vpack.i.bf16 %v23177_v20, %v23174_v19  ;;  %v3435_v25 = vmax.f32 %v19146_v17, 0.0  ;;  %v20051_v17 = vpop.permute.xlu0 %20050  ;;  %v23297_v37 = vpack.i.bf16 %v23153_v8, %v23090_v30 }
 0x298   :  { %3510 = vst.msk [vmem:[#allocation2 + $0x68] sm:$0xff] %vm3503_vm10, %v3485_v18  ;;  %v3436_v1 = vmax.f32 %v19147_v45, 0.0  ;;  %v3390_v5 = vpop.f32.mrb[22].mxu0  ;;  %v23301_v18 = vpack.i.bf16 %v23167_v54, %v23119_v22 }
 0x299   :  { %v19148_v11 = vadd.f32 %v3390_v5, %v23006_v28  ;;  %v3392_v12 = vpop.f32.mrb[23].mxu0  ;;  %v23202_v33 = vmul.f32 %v23143_v44, %v3435_v25  ;;  %v20052_v5 = vunpack.i.l.bf16 %v20051_v17  ;;  %v23317_v25 = vpack.i.bf16 %v23177_v20, %v23110_v58 }
 0x29a   :  { %v3491_v14 = vmul.f32 %v23123_v10, %v3436_v1  ;;  %v19149_v42 = vadd.f32 %v3392_v12, %v23006_v28  ;;  %20095 = vrot.lane.b32.xlu1 %v20094_v24, %s22031_s23  ;;  %20090 = vrot.lane.b32.xlu0 %v20089_v57, %s22031_s23  ;;  %v20053_v1 = vunpack.i.h.bf16 %v20051_v17 }
 0x29b   :  { %v3441_v15 = vmax.f32 %v19148_v11, 0.0  ;;  %v23321_v12 = vpack.i.bf16 %v23202_v33, %v23164_v46 }
 0x29c   :  { %3516 = vst.msk [vmem:[#allocation2 + $0xa0] sm:$0xff] %vm3503_vm10, %v3491_v14  ;;  %v3442_v21 = vmax.f32 %v19149_v42, 0.0 }
 0x29d   :  { %v23205_v35 = vmul.f32 %v23143_v44, %v3441_v15 }
 0x29e   :  { %v3497_v27 = vmul.f32 %v23123_v10, %v3442_v21  ;;  %20100 = vrot.lane.b32.xlu0 %v20099_v62, %s22031_s23 }
 0x29f   :  { %v20104_v28 = vpack.i.bf16 %v23205_v35, %v23202_v33  ;;  %v4808_v41 = vld [vmem:[#allocation2 + $0x68] sm:$0xff]  ;;  %v23329_v15 = vpack.i.bf16 %v23205_v35, %v23170_v56 }
 0x2a0   :  { %3522 = vst.msk [vmem:[#allocation2 + $0xd8] sm:$0xff] %vm3503_vm10, %v3497_v27 }
 0x2a1   :  { %20105 = vrot.lane.b32.xlu1 %v20104_v28, %s22031_s23 }
 0x2a2   :  { %20110 = vrot.lane.b32.xlu0 %v23051_v29, %s22032_s26 }
 0x2a5   :  { %20115 = vrot.lane.b32.xlu1 %v23080_v51, %s22032_s26 }
 0x2a6   :  { %20120 = vrot.lane.b32.xlu0 %v23020_v47, %s22032_s26 }
 0x2a7   :  { %v4822_v6 = vld [vmem:[#allocation2 + $0xd8] sm:$0xff] }
 0x2a9   :  { %20125 = vrot.lane.b32.xlu1 %v23107_v2, %s22032_s26 }
 0x2aa   :  { %20130 = vrot.lane.b32.xlu0 %v23138_v16, %s22032_s26 }
 0x2ad   :  { %20135 = vrot.lane.b32.xlu1 %v23020_v47, %s22032_s26 }
 0x2ae   :  { %20140 = vrot.lane.b32.xlu0 %v23161_v49, %s22032_s26 }
 0x2b1   :  { %20145 = vrot.lane.b32.xlu1 %v23157_v55, %s22032_s26 }
 0x2b2   :  { %20150 = vrot.lane.b32.xlu0 %v20089_v57, %s22032_s26 }
 0x2b5   :  { %20155 = vrot.lane.b32.xlu1 %v20094_v24, %s22032_s26 }
 0x2b6   :  { %20160 = vrot.lane.b32.xlu0 %v20099_v62, %s22032_s26 }
 0x2b9   :  { %20165 = vrot.lane.b32.xlu1 %v20104_v28, %s22032_s26 }
 0x2ba   :  { %20170 = vrot.lane.b32.xlu0 %v23051_v29, %s22033_s27 }
 0x2bd   :  { %20175 = vrot.lane.b32.xlu1 %v23080_v51, %s22033_s27 }
 0x2be   :  { %20180 = vrot.lane.b32.xlu0 %v23020_v47, %s22033_s27 }
 0x2c1   :  { %20185 = vrot.lane.b32.xlu1 %v23107_v2, %s22033_s27 }
 0x2c2   :  { %20190 = vrot.lane.b32.xlu0 %v23138_v16, %s22033_s27 }
 0x2c5   :  { %20195 = vrot.lane.b32.xlu1 %v23020_v47, %s22033_s27 }
 0x2c6   :  { %20200 = vrot.lane.b32.xlu0 %v23161_v49, %s22033_s27 }
 0x2c9   :  { %20205 = vrot.lane.b32.xlu1 %v23157_v55, %s22033_s27 }
 0x2ca   :  { %20210 = vrot.lane.b32.xlu0 %v20089_v57, %s22033_s27 }
 0x2cd   :  { %20215 = vrot.lane.b32.xlu1 %v20094_v24, %s22033_s27 }
 0x2ce   :  { %20220 = vrot.lane.b32.xlu0 %v20099_v62, %s22033_s27  ;;  %v23309_v62 = vpack.i.bf16 %v23174_v19, %v23100_v43 }
 0x2d1   :  { %20225 = vrot.lane.b32.xlu1 %v20104_v28, %s22033_s27 }
 0x2d2   :  { %20230 = vrot.lane.b32.xlu0 %v23051_v29, %s22034_s30  ;;  %v4801_v29 = vld [vmem:[#allocation2 + $0x30] sm:$0xff] }
 0x2d5   :  { %20235 = vrot.lane.b32.xlu1 %v23080_v51, %s22034_s30  ;;  %v20279_v51 = vpack.i.bf16 %v4801_v29, %v23174_v19 }
 0x2d6   :  { %20240 = vrot.lane.b32.xlu0 %v23020_v47, %s22034_s30 }
 0x2d9   :  { %20245 = vrot.lane.b32.xlu1 %v23107_v2, %s22034_s30  ;;  %v4815_v2 = vld [vmem:[#allocation2 + $0xa0] sm:$0xff] }
 0x2da   :  { %20250 = vrot.lane.b32.xlu0 %v23138_v16, %s22034_s30  ;;  %v20284_v16 = vpack.i.bf16 %v4808_v41, %v23177_v20 }
 0x2dd   :  { %20255 = vrot.lane.b32.xlu1 %v23020_v47, %s22034_s30  ;;  %v20289_v47 = vpack.i.bf16 %v4815_v2, %v23202_v33 }
 0x2de   :  { %20260 = vrot.lane.b32.xlu0 %v23161_v49, %s22034_s30  ;;  %v23282_v49 = vpack.i.bf16 %v23097_v39, %v23046_v13 }
 0x2e1   :  { %20265 = vrot.lane.b32.xlu1 %v23157_v55, %s22034_s30  ;;  %v20294_v55 = vpack.i.bf16 %v4822_v6, %v23205_v35 }
 0x2e2   :  { %20270 = vrot.lane.b32.xlu0 %v20089_v57, %s22034_s30 }
 0x2e5   :  { %20275 = vrot.lane.b32.xlu1 %v20094_v24, %s22034_s30 }
 0x2e6   :  { %20280 = vrot.lane.b32.xlu0 %v20279_v51, %s22034_s30 }
 0x2e9   :  { %20285 = vrot.lane.b32.xlu1 %v20284_v16, %s22034_s30 }
 0x2ea   :  { %20290 = vrot.lane.b32.xlu0 %v20289_v47, %s22034_s30  ;;  %v23335_v47 = vpack.i.bf16 %v4808_v41, %v4801_v29 }
 0x2ed   :  { %20295 = vrot.lane.b32.xlu1 %v20294_v55, %s22034_s30 }
 0x2ee   :  { %20300 = vrot.lane.b32.xlu0 %v23282_v49, %s22035_s15 }
 0x2f1   :  { %20305 = vrot.lane.b32.xlu1 %v23289_v3, %s22035_s15 }
 0x2f2   :  { %20310 = vrot.lane.b32.xlu0 %v23073_v50, %s22035_s15 }
 0x2f5   :  { %20315 = vrot.lane.b32.xlu1 %v23297_v37, %s22035_s15 }
 0x2f6   :  { %20320 = vrot.lane.b32.xlu0 %v23301_v18, %s22035_s15 }
 0x2f8   :  { %v20056_v45 = vpop.permute.xlu0 %20055 }
 0x2f9   :  { %20325 = vrot.lane.b32.xlu1 %v23131_v4, %s22035_s15  ;;  %v20058_v24 = vunpack.i.h.bf16 %v20056_v45  ;;  %v20057_v57 = vunpack.i.l.bf16 %v20056_v45 }
 0x2fa   :  { %20330 = vrot.lane.b32.xlu0 %v23309_v62, %s22035_s15 }
 0x2fb   :  { %v3647_v21 = vsel %vm167_vm0, %v20052_v5, %v20057_v57  ;;  %v3648_v28 = vsel %vm167_vm0, %v20057_v57, %v20058_v24 }
 0x2fc   :  { %v20061_v11 = vpop.permute.xlu1 %20060 }
 0x2fd   :  { %v20063_v14 = vunpack.i.h.bf16 %v20061_v11  ;;  %v20062_v42 = vunpack.i.l.bf16 %v20061_v11  ;;  %20335 = vrot.lane.b32.xlu1 %v23317_v25, %s22035_s15 }
 0x2fe   :  { %20340 = vrot.lane.b32.xlu0 %v23321_v12, %s22035_s15 }
 0x2ff   :  { %v3652_v27 = vsel %vm167_vm0, %v20053_v1, %v20062_v42  ;;  %v3653_v51 = vsel %vm167_vm0, %v20062_v42, %v20063_v14  ;;  %v23341_v1 = vpack.i.bf16 %v4822_v6, %v4815_v2 }
 0x300   :  { %v20066_v16 = vpop.permute.xlu1 %20065  ;;  %v18252_v55 = vpack.c.bf16 %v3653_v51, %v3648_v28  ;;  %v18254_v17 = vpack.c.bf16 %v3652_v27, %v3647_v21 }
 0x301   :  { %20345 = vrot.lane.b32.xlu1 %v23329_v15, %s22035_s15  ;;  %v20068_v45 = vunpack.i.h.bf16 %v20066_v16  ;;  %v20067_v5 = vunpack.i.l.bf16 %v20066_v16 }
 0x302   :  { %20350 = vrot.lane.b32.xlu0 %v23335_v47, %s22035_s15  ;;  %18253 = vmatprep.subr.bf16.mxu1 %v18252_v55 }
 0x303   :  { %18255 = vmatpush1.bf16.msra.mxu1 %v18254_v17  ;;  %v3658_v28 = vsel %vm167_vm0, %v20067_v5, %v20068_v45 }
 0x304   :  { %v20071_v57 = vpop.permute.xlu0 %20070  ;;  %v20076_v11 = vpop.permute.xlu1 %20075 }
 0x305   :  { %v20073_v42 = vunpack.i.h.bf16 %v20071_v57  ;;  %v20072_v48 = vunpack.i.l.bf16 %v20071_v57  ;;  %v20078_v29 = vunpack.i.h.bf16 %v20076_v11  ;;  %v20077_v41 = vunpack.i.l.bf16 %v20076_v11  ;;  %20355 = vrot.lane.b32.xlu1 %v23341_v1, %s22035_s15 }
 0x306   :  { %20360 = vrot.lane.b32.xlu0 %v23282_v49, %s22036_s0 }
 0x307   :  { %v3662_v21 = vsel %vm167_vm0, %v20078_v29, %v20072_v48  ;;  %v3657_v27 = vsel %vm167_vm0, %v20077_v41, %v20067_v5  ;;  %v3663_v2 = vsel %vm167_vm0, %v20072_v48, %v20073_v42  ;;  %v23368_v41 = vld [vmem:[%s28073_s4] sm:$0xff] }
 0x308   :  { %v23351_v6 = vpop.permute.xlu0 %20080  ;;  %v23353_v51 = vpop.permute.xlu1 %20085  ;;  %v18256_v16 = vpack.c.bf16 %v3663_v2, %v3658_v28  ;;  %v18258_v55 = vpack.c.bf16 %v3662_v21, %v3657_v27 }
 0x309   :  { %v20083_v17 = vunpack.i.h.bf16 %v23351_v6  ;;  %v20082_v57 = vunpack.i.l.bf16 %v23351_v6  ;;  %v20088_v11 = vunpack.i.h.bf16 %v23353_v51  ;;  %v20087_v29 = vunpack.i.l.bf16 %v23353_v51  ;;  %20365 = vrot.lane.b32.xlu1 %v23289_v3, %s22036_s0 }
 0x30a   :  { %20370 = vrot.lane.b32.xlu0 %v23073_v50, %s22036_s0  ;;  %18257 = vmatprep.subr.bf16.mxu1 %v18256_v16 }
 0x30b   :  { %v3649_v48 = vsel %vm167_vm0, %v20058_v24, %v20082_v57  ;;  %v3654_v5 = vsel %vm167_vm0, %v20063_v14, %v20087_v29  ;;  %18259 = vmatpush1.bf16.msra.mxu1 %v18258_v55  ;;  %v3650_v21 = vsel %vm167_vm0, %v20082_v57, %v20083_v17  ;;  %v3655_v27 = vsel %vm167_vm0, %v20087_v29, %v20088_v11  ;;  %v23384_v57 = vld [vmem:[%s28073_s4 + $0x8] sm:$0xff] }
 0x30c   :  { %v20091_v28 = vpop.permute.xlu0 %20090  ;;  %v20096_v2 = vpop.permute.xlu1 %20095  ;;  %v18260_v6 = vpack.c.bf16 %v3655_v27, %v3650_v21  ;;  %v18262_v51 = vpack.c.bf16 %v3654_v5, %v3649_v48 }
 0x30d   :  { %v20093_v16 = vunpack.i.h.bf16 %v20091_v28  ;;  %v20092_v61 = vunpack.i.l.bf16 %v20091_v28  ;;  %v20098_v34 = vunpack.i.h.bf16 %v20096_v2  ;;  %v20097_v24 = vunpack.i.l.bf16 %v20096_v2  ;;  %20375 = vrot.lane.b32.xlu1 %v23297_v37, %s22036_s0  ;;  %v23398_v2 = vld [vmem:[%s28073_s4 + $0x10] sm:$0xff] }
 0x30e   :  { %20380 = vrot.lane.b32.xlu0 %v23301_v18, %s22036_s0  ;;  %17797 = vmatmul.mubr.msk.f32.vlgmr.msra.gmra.mrb[8].mxu1 %vm3691_vm11, %v23368_v41 }
 0x30f   :  { %v3659_v14 = vsel %vm167_vm0, %v20068_v45, %v20092_v61  ;;  %v3664_v55 = vsel %vm167_vm0, %v20073_v42, %v20097_v24  ;;  %18261 = vmatprep.subr.bf16.mxu1 %v18260_v6  ;;  %3774 = vmatprep.mubr.f32.mxu1 %v22974_v40  ;;  %v3660_v29 = vsel %vm167_vm0, %v20092_v61, %v20093_v16 }
 0x310   :  { %18263 = vmatpush1.bf16.msra.mxu1 %v18262_v51  ;;  %v20101_v48 = vpop.permute.xlu0 %20100  ;;  %v3665_v5 = vsel %vm167_vm0, %v20097_v24, %v20098_v34  ;;  %v18266_v21 = vpack.c.bf16 %v3664_v55, %v3659_v14  ;;  %v23412_v51 = vld [vmem:[%s28073_s4 + $0x18] sm:$0xff] }
 0x311   :  { %v20103_v27 = vunpack.i.h.bf16 %v20101_v48  ;;  %v20102_v28 = vunpack.i.l.bf16 %v20101_v48  ;;  %20385 = vrot.lane.b32.xlu1 %v23131_v4, %s22036_s0  ;;  %v18264_v45 = vpack.c.bf16 %v3665_v5, %v3660_v29 }
 0x312   :  { %20390 = vrot.lane.b32.xlu0 %v23309_v62, %s22036_s0  ;;  %17798 = vmatmul.mubr.msk.f32.gmra.mrb[10].mxu1 %vm3691_vm11, %v23384_v57 }
 0x313   :  { %18265 = vmatprep.subr.bf16.mxu1 %v18264_v45  ;;  %v20106_v42 = vpop.permute.xlu1 %20105  ;;  %3780 = vmatprep.mubr.f32.mxu1 %v22974_v40  ;;  %v18268_v61 = vpack.c.bf16 %v20103_v27, %v20102_v28  ;;  %v3651_v14 = vsel %vm167_vm0, %v20083_v17, %v20102_v28  ;;  %v3656_v55 = vsel %vm167_vm0, %v20088_v11, %v20103_v27 }
 0x314   :  { %18267 = vmatpush1.bf16.msra.mxu1 %v18266_v21  ;;  %v23414_v24 = vpop.permute.xlu0 %20110  ;;  %v20108_v29 = vunpack.i.h.bf16 %v20106_v42  ;;  %v20107_v48 = vunpack.i.l.bf16 %v20106_v42  ;;  %v18270_v27 = vpack.c.bf16 %v3656_v55, %v3651_v14 }
 0x315   :  { %20395 = vrot.lane.b32.xlu1 %v23317_v25, %s22036_s0  ;;  %18269 = vmatprep.subr.bf16.mxu1 %v18268_v61  ;;  %v28082_v17 = vunpack.i.h.bf16 %v23414_v24  ;;  %v20112_v11 = vunpack.i.l.bf16 %v23414_v24 }
 0x316   :  { %20400 = vrot.lane.b32.xlu0 %v23321_v12, %s22036_s0  ;;  %17799 = vmatmul.mubr.msk.f32.gmra.mrb[12].mxu1 %vm3691_vm11, %v23398_v2  ;;  %v3661_v28 = vsel %vm167_vm0, %v20093_v16, %v20107_v48  ;;  %v3666_v42 = vsel %vm167_vm0, %v20098_v34, %v20108_v29  ;;  %v18272_v23 = vpack.c.bf16 %v20108_v29, %v20107_v48 }
 0x317   :  { %v23406_v6 = vpop.permute.xlu1 %20115  ;;  %3786 = vmatprep.mubr.f32.mxu1 %v22974_v40  ;;  %v18274_v34 = vpack.c.bf16 %v3666_v42, %v3661_v28  ;;  %v4049_v16 = vsel %vm536_vm3, %v20112_v11, %v28082_v17 }
 0x318   :  { %v28083_v5 = vunpack.i.h.bf16 %v23406_v6  ;;  %v20117_v21 = vunpack.i.l.bf16 %v23406_v6  ;;  %v20121_v61 = vpop.permute.xlu0 %20120 }
 0x319   :  { %20405 = vrot.lane.b32.xlu1 %v23329_v15, %s22036_s0  ;;  %v20123_v29 = vunpack.i.h.bf16 %v20121_v61  ;;  %v20122_v48 = vunpack.i.l.bf16 %v20121_v61 }
 0x31a   :  { %20410 = vrot.lane.b32.xlu0 %v23335_v47, %s22036_s0  ;;  %17800 = vmatmul.mubr.msk.f32.gmra.mrb[14].mxu1 %vm3691_vm11, %v23412_v51  ;;  %v4054_v52 = vsel %vm536_vm3, %v20117_v21, %v28083_v5 }
 0x31b   :  { %3857 = vmatprep.mubr.f32.mxu1 %v22974_v40  ;;  %v23427_v45 = vpop.permute.xlu1 %20125  ;;  %v18276_v55 = vpack.c.bf16 %v4054_v52, %v4049_v16  ;;  %v4048_v61 = vsel %vm536_vm3, %v20122_v48, %v20112_v11  ;;  %v4053_v16 = vsel %vm536_vm3, %v20123_v29, %v20117_v21 }
 0x31c   :  { %v20127_v52 = vunpack.i.l.bf16 %v23427_v45  ;;  %v18278_v48 = vpack.c.bf16 %v4053_v16, %v4048_v61 }
 0x31d   :  { %20415 = vrot.lane.b32.xlu1 %v23341_v1, %s22036_s0 }
 0x31e   :  { %20420 = vrot.lane.b32.xlu0 %v23282_v49, %s22037_s18  ;;  %17801 = vmatmul.mubr.msk.f32.vlgmr.msra.gmra.mrb[16].mxu1 %vm3691_vm11, %v23368_v41 }
 0x31f   :  { %18271 = vmatpush1.bf16.msra.mxu1 %v18270_v27  ;;  %3863 = vmatprep.mubr.f32.mxu1 %v22974_v40  ;;  %v20136_v14 = vpop.permute.xlu1 %20135  ;;  %v28086_v27 = vunpack.i.h.bf16 %v23427_v45 }
 0x320   :  { %18273 = vmatprep.subr.bf16.mxu1 %v18272_v23  ;;  %v23453_v23 = vpop.permute.xlu0 %20130  ;;  %v20137_v53 = vunpack.i.l.bf16 %v20136_v14 }
 0x321   :  { %20425 = vrot.lane.b32.xlu1 %v23289_v3, %s22037_s18  ;;  %v20133_v28 = vunpack.i.h.bf16 %v23453_v23  ;;  %v20132_v42 = vunpack.i.l.bf16 %v23453_v23  ;;  %v4059_v21 = vsel %vm536_vm3, %v20127_v52, %v28086_v27 }
 0x322   :  { %20430 = vrot.lane.b32.xlu0 %v23073_v50, %s22037_s18  ;;  %17802 = vmatmul.mubr.msk.f32.gmra.mrb[18].mxu1 %vm3691_vm11, %v23384_v57  ;;  %v4058_v7 = vsel %vm536_vm3, %v20137_v53, %v20127_v52 }
 0x323   :  { %18275 = vmatpush1.bf16.msra.mxu1 %v18274_v34  ;;  %3869 = vmatprep.mubr.f32.mxu1 %v22974_v40  ;;  %v23466_v34 = vpop.permute.xlu1 %20145  ;;  %v4064_v11 = vsel %vm536_vm3, %v20132_v42, %v20133_v28 }
 0x324   :  { %18277 = vmatprep.subr.bf16.mxu1 %v18276_v55  ;;  %v20138_v55 = vunpack.i.h.bf16 %v20136_v14  ;;  %v23472_v17 = vpop.permute.xlu0 %20140  ;;  %v20147_v5 = vunpack.i.l.bf16 %v23466_v34  ;;  %v18280_v27 = vpack.c.bf16 %v4064_v11, %v4059_v21  ;;  %v28101_v14 = vunpack.i.h.bf16 %v23466_v34 }
 0x325   :  { %20435 = vrot.lane.b32.xlu1 %v23297_v37, %s22037_s18  ;;  %v20142_v29 = vunpack.i.l.bf16 %v23472_v17  ;;  %v28102_v53 = vunpack.i.h.bf16 %v23472_v17 }
 0x326   :  { %20440 = vrot.lane.b32.xlu0 %v23301_v18, %s22037_s18  ;;  %17803 = vmatmul.mubr.msk.f32.gmra.mrb[20].mxu1 %vm3691_vm11, %v23398_v2  ;;  %v4063_v23 = vsel %vm536_vm3, %v20138_v55, %v20132_v42  ;;  %v4056_v10 = vsel %vm536_vm3, %v20147_v5, %v28101_v14  ;;  %v28103_v55 = vunpack.i.h.bf16 %v23406_v6  ;;  %v28104_v6 = vunpack.i.h.bf16 %v23414_v24 }
 0x327   :  { %3875 = vmatprep.mubr.f32.mxu1 %v22974_v40  ;;  %v18282_v42 = vpack.c.bf16 %v4063_v23, %v4058_v7  ;;  %v4051_v52 = vsel %vm536_vm3, %v20142_v29, %v28102_v53  ;;  %v23509_v61 = vpop.permute.xlu1 %20155  ;;  %v23537_v23 = vld [vmem:[%s28073_s4 + $0x20] sm:$0xff]  ;;  %v28105_v24 = vunpack.i.h.bf16 %v23427_v45  ;;  %v23572_v45 = vld [vmem:[%s28073_s4 + $0x30] sm:$0xff] }
 0x328   :  { %v20158_v7 = vunpack.i.h.bf16 %v23509_v61 }
 0x329   :  { %20445 = vrot.lane.b32.xlu1 %v23131_v4, %s22037_s18 }
 0x32a   :  { %20450 = vrot.lane.b32.xlu0 %v23309_v62, %s22037_s18  ;;  %17804 = vmatmul.mubr.msk.f32.gmra.mrb[22].mxu1 %vm3691_vm11, %v23412_v51 }
 0x32b   :  { %3946 = vmatprep.mubr.f32.mxu1 %v22974_v40 }
 0x32d   :  { %20455 = vrot.lane.b32.xlu1 %v23317_v25, %s22037_s18 }
 0x32e   :  { %20460 = vrot.lane.b32.xlu0 %v23321_v12, %s22037_s18  ;;  %17805 = vmatmul.mubr.msk.f32.vlgmr.msra.gmra.mrb[24].mxu1 %vm3691_vm11, %v23368_v41  ;;  %v18284_v41 = vpack.c.bf16 %v4056_v10, %v4051_v52  ;;  %v20157_v10 = vunpack.i.l.bf16 %v23509_v61 }
 0x32f   :  { %18279 = vmatpush1.bf16.msra.mxu1 %v18278_v48  ;;  %3952 = vmatprep.mubr.f32.mxu1 %v22974_v40 }
 0x330   :  { %18281 = vmatprep.subr.bf16.mxu1 %v18280_v27  ;;  %v23511_v27 = vpop.permute.xlu0 %20150  ;;  %v4065_v21 = vsel %vm536_vm3, %v20133_v28, %v20157_v10 }
 0x331   :  { %20465 = vrot.lane.b32.xlu1 %v23329_v15, %s22037_s18  ;;  %v20152_v16 = vunpack.i.l.bf16 %v23511_v27 }
 0x332   :  { %20470 = vrot.lane.b32.xlu0 %v23335_v47, %s22037_s18  ;;  %17806 = vmatmul.mubr.msk.f32.gmra.mrb[26].mxu1 %vm3691_vm11, %v23384_v57  ;;  %v20153_v57 = vunpack.i.h.bf16 %v23511_v27 }
 0x333   :  { %18283 = vmatpush1.bf16.msra.mxu1 %v18282_v42  ;;  %3958 = vmatprep.mubr.f32.mxu1 %v22974_v40  ;;  %v4060_v28 = vsel %vm536_vm3, %v28105_v24, %v20152_v16 }
 0x334   :  { %18285 = vmatprep.subr.bf16.mxu1 %v18284_v41 }
 0x335   :  { %20475 = vrot.lane.b32.xlu1 %v23341_v1, %s22037_s18 }
 0x336   :  { %20480 = vrot.lane.b32.xlu0 %v23282_v49, %s22038_s19  ;;  %17807 = vmatmul.mubr.msk.f32.gmra.mrb[28].mxu1 %vm3691_vm11, %v23398_v2  ;;  %v4055_v49 = vsel %vm536_vm3, %v28103_v55, %v20147_v5  ;;  %v20161_v2 = vpop.permute.xlu0 %20160  ;;  %v4050_v5 = vsel %vm536_vm3, %v28104_v6, %v20142_v29  ;;  %v20166_v29 = vpop.permute.xlu1 %20165 }
 0x337   :  { %3964 = vmatprep.mubr.f32.mxu1 %v22974_v40  ;;  %v20163_v11 = vunpack.i.h.bf16 %v20161_v2  ;;  %v20162_v14 = vunpack.i.l.bf16 %v20161_v2  ;;  %v20168_v27 = vunpack.i.h.bf16 %v20166_v29 }
 0x339   :  { %20485 = vrot.lane.b32.xlu1 %v23289_v3, %s22038_s19  ;;  %v4066_v3 = vsel %vm536_vm3, %v20157_v10, %v20158_v7  ;;  %v18292_v42 = vpack.c.bf16 %v20163_v11, %v20162_v14  ;;  %v20167_v10 = vunpack.i.l.bf16 %v20166_v29 }
 0x33a   :  { %20490 = vrot.lane.b32.xlu0 %v23073_v50, %s22038_s19  ;;  %17808 = vmatmul.mubr.msk.f32.gmra.mrb[30].mxu1 %vm3691_vm11, %v23412_v51  ;;  %v18286_v50 = vpack.c.bf16 %v4055_v49, %v4050_v5  ;;  %v4061_v51 = vsel %vm536_vm3, %v20152_v16, %v20153_v57  ;;  %v23588_v53 = vpop.permute.xlu0 %20170 }
 0x33b   :  { %4168 = vmatprep.mubr.f32.mxu1 %v22974_v40  ;;  %v18288_v48 = vpack.c.bf16 %v4066_v3, %v4061_v51  ;;  %v20173_v55 = vunpack.i.h.bf16 %v23588_v53  ;;  %v20172_v49 = vunpack.i.l.bf16 %v23588_v53  ;;  %v4062_v2 = vsel %vm536_vm3, %v20153_v57, %v20167_v10  ;;  %v23699_v53 = vld [vmem:[%s28073_s4 + $0x48] sm:$0xff] }
 0x33c   :  { %v4067_v3 = vsel %vm536_vm3, %v20158_v7, %v20168_v27  ;;  %v18296_v5 = vpack.c.bf16 %v20168_v27, %v20167_v10 }
 0x33d   :  { %20495 = vrot.lane.b32.xlu1 %v23297_v37, %s22038_s19  ;;  %v23557_v37 = vld [vmem:[%s28073_s4 + $0x28] sm:$0xff]  ;;  %v18298_v7 = vpack.c.bf16 %v4067_v3, %v4062_v2  ;;  %v4449_v57 = vsel %vm903_vm4, %v20172_v49, %v20173_v55 }
 0x33e   :  { %20500 = vrot.lane.b32.xlu0 %v23301_v18, %s22038_s19  ;;  %17813 = vmatmul.mubr.msk.f32.vlgmr.msra.gmra.mrb[8].mxu1 %vm3691_vm11, %v23537_v23  ;;  %v18290_v18 = vpack.c.bf16 %v4065_v21, %v4060_v28  ;;  %v20181_v6 = vpop.permute.xlu0 %20180 }
 0x33f   :  { %18287 = vmatpush1.bf16.msra.mxu1 %v18286_v50  ;;  %4174 = vmatprep.mubr.f32.mxu1 %v22974_v40  ;;  %v3524_v50 = vld [vmem:[%s28074_s5 + $0x8] sm:$0xff]  ;;  %v20182_v24 = vunpack.i.l.bf16 %v20181_v6 }
 0x340   :  { %18289 = vmatprep.subr.bf16.mxu1 %v18288_v48  ;;  %v20183_v48 = vunpack.i.h.bf16 %v20181_v6 }
 0x341   :  { %20505 = vrot.lane.b32.xlu1 %v23131_v4, %s22038_s19  ;;  %v23576_v4 = vpop.permute.xlu1 %20175 }
 0x342   :  { %20510 = vrot.lane.b32.xlu0 %v23309_v62, %s22038_s19  ;;  %17814 = vmatmul.mubr.msk.f32.gmra.mrb[10].mxu1 %vm3691_vm11, %v23557_v37  ;;  %v23586_v62 = vld [vmem:[%s28073_s4 + $0x38] sm:$0xff]  ;;  %v20178_v16 = vunpack.i.h.bf16 %v23576_v4 }
 0x343   :  { %18291 = vmatpush1.bf16.msra.mxu1 %v18290_v18  ;;  %4180 = vmatprep.mubr.f32.mxu1 %v22974_v40 }
 0x344   :  { %18293 = vmatprep.subr.bf16.mxu1 %v18292_v42 }
 0x345   :  { %20515 = vrot.lane.b32.xlu1 %v23317_v25, %s22038_s19  ;;  %v28106_v25 = vunpack.i.h.bf16 %v23472_v17  ;;  %v3523_v17 = vld [vmem:[%s28074_s5] sm:$0xff] }
 0x346   :  { %20520 = vrot.lane.b32.xlu0 %v23321_v12, %s22038_s19  ;;  %17815 = vmatmul.mubr.msk.f32.gmra.mrb[12].mxu1 %vm3691_vm11, %v23572_v45  ;;  %v28107_v12 = vunpack.i.h.bf16 %v23466_v34  ;;  %v23608_v34 = vpop.permute.xlu1 %20185 }
 0x347   :  { %4186 = vmatprep.mubr.f32.mxu1 %v22974_v40  ;;  %v4052_v52 = vsel %vm536_vm3, %v28106_v25, %v20162_v14  ;;  %v20191_v14 = vpop.permute.xlu0 %20190  ;;  %v20188_v28 = vunpack.i.h.bf16 %v23608_v34  ;;  %v20187_v29 = vunpack.i.l.bf16 %v23608_v34  ;;  %v23643_v25 = vld [vmem:[#allocation2] sm:$0xff] }
 0x348   :  { %v4057_v41 = vsel %vm536_vm3, %v28107_v12, %v20163_v11  ;;  %v3526_v11 = vld [vmem:[%s28074_s5 + $0x18] sm:$0xff]  ;;  %v20193_v18 = vunpack.i.h.bf16 %v20191_v14  ;;  %v20192_v42 = vunpack.i.l.bf16 %v20191_v14 }
 0x349   :  { %20525 = vrot.lane.b32.xlu1 %v23329_v15, %s22038_s19  ;;  %v20177_v15 = vunpack.i.l.bf16 %v23576_v4 }
 0x34a   :  { %20530 = vrot.lane.b32.xlu0 %v23335_v47, %s22038_s19  ;;  %17816 = vmatmul.mubr.msk.f32.gmra.mrb[14].mxu1 %vm3691_vm11, %v23586_v62  ;;  %v18294_v47 = vpack.c.bf16 %v4057_v41, %v4052_v52  ;;  %v20196_v51 = vpop.permute.xlu1 %20195  ;;  %v4464_v2 = vsel %vm903_vm4, %v20192_v42, %v20193_v18 }
 0x34b   :  { %4257 = vmatprep.mubr.f32.mxu1 %v22974_v40  ;;  %v4454_v61 = vsel %vm903_vm4, %v20177_v15, %v20178_v16  ;;  %v4453_v12 = vsel %vm903_vm4, %v20183_v48, %v20177_v15  ;;  %v20198_v41 = vunpack.i.h.bf16 %v20196_v51  ;;  %v20197_v27 = vunpack.i.l.bf16 %v20196_v51  ;;  %v23650_v10 = vpop.permute.xlu0 %20200 }
 0x34c   :  { %v18300_v21 = vpack.c.bf16 %v4454_v61, %v4449_v57  ;;  %v20202_v15 = vunpack.i.l.bf16 %v23650_v10 }
 0x34d   :  { %20535 = vrot.lane.b32.xlu1 %v23341_v1, %s22038_s19  ;;  %v3525_v1 = vld [vmem:[%s28074_s5 + $0x10] sm:$0xff]  ;;  %v4463_v6 = vsel %vm903_vm4, %v20198_v41, %v20192_v42 }
 0x34e   :  { %3529 = vperm.xlu0 %20048, %v3523_v17   ;;  %17817 = vmatmul.mubr.msk.f32.vlgmr.msra.gmra.mrb[16].mxu1 %vm3691_vm11, %v23537_v23  ;;  %v23646_v52 = vpop.permute.xlu1 %20205  ;;  %v4450_v42 = vsel %vm903_vm4, %v20173_v55, %v20202_v15 }
 0x34f   :  { %18295 = vmatpush1.bf16.msra.mxu1 %v18294_v47  ;;  %4263 = vmatprep.mubr.f32.mxu1 %v22974_v40  ;;  %v20208_v17 = vunpack.i.h.bf16 %v23646_v52  ;;  %v20207_v34 = vunpack.i.l.bf16 %v23646_v52  ;;  %v4459_v47 = vsel %vm903_vm4, %v20187_v29, %v20188_v28  ;;  %v20211_v51 = vpop.permute.xlu0 %20210 }
 0x350   :  { %18297 = vmatprep.subr.bf16.mxu1 %v18296_v5  ;;  %v4458_v5 = vsel %vm903_vm4, %v20197_v27, %v20187_v29  ;;  %v20213_v14 = vunpack.i.h.bf16 %v20211_v51  ;;  %v20212_v48 = vunpack.i.l.bf16 %v20211_v51 }
 0x351   :  { %3534 = vperm.xlu1 %20047, %v3524_v50   ;;  %v18304_v50 = vpack.c.bf16 %v4464_v2, %v4459_v47  ;;  %v18306_v61 = vpack.c.bf16 %v4463_v6, %v4458_v5 }
 0x352   :  { %3539 = vperm.xlu0 %20048, %v3525_v1   ;;  %17818 = vmatmul.mubr.msk.f32.gmra.mrb[18].mxu1 %vm3691_vm11, %v23557_v37  ;;  %v4456_v1 = vsel %vm903_vm4, %v20207_v34, %v20208_v17  ;;  %v4460_v55 = vsel %vm903_vm4, %v20188_v28, %v20212_v48  ;;  %v23718_v28 = vld [vmem:[%s28073_s4 + $0x58] sm:$0xff] }
 0x353   :  { %18299 = vmatpush1.bf16.msra.mxu1 %v18298_v7  ;;  %4269 = vmatprep.mubr.f32.mxu1 %v22974_v40  ;;  %v4448_v40 = vsel %vm903_vm4, %v20182_v24, %v20172_v49  ;;  %v20203_v49 = vunpack.i.h.bf16 %v23650_v10  ;;  %v20221_v24 = vpop.permute.xlu0 %20220 }
 0x354   :  { %18301 = vmatprep.subr.bf16.mxu1 %v18300_v21  ;;  %v18302_v3 = vpack.c.bf16 %v4453_v12, %v4448_v40  ;;  %v20222_v12 = vunpack.i.l.bf16 %v20221_v24 }
 0x355   :  { %3544 = vperm.xlu1 %20047, %v3526_v11   ;;  %v4451_v7 = vsel %vm903_vm4, %v20202_v15, %v20203_v49 }
 0x356   :  { %17819 = vmatmul.mubr.msk.f32.gmra.mrb[20].mxu1 %vm3691_vm11, %v23572_v45  ;;  %v18308_v57 = vpack.c.bf16 %v4456_v1, %v4451_v7  ;;  %v4452_v15 = vsel %vm903_vm4, %v20203_v49, %v20222_v12 }
 0x357   :  { %4275 = vmatprep.mubr.f32.mxu1 %v23643_v25  ;;  %v23720_v2 = vpop.permute.xlu0 %20230 }
 0x358   :  { %v20233_v7 = vunpack.i.h.bf16 %v23720_v2  ;;  %v20232_v49 = vunpack.i.l.bf16 %v23720_v2 }
 0x35a   :  { %17820 = vmatmul.mubr.msk.f32.gmra.mrb[22].mxu1 %vm3691_vm11, %v23586_v62 }
 0x35b   :  { %4346 = vmatprep.mubr.f32.mxu1 %v23643_v25 }
 0x35e   :  { %17821 = vmatmul.mubr.msk.f32.vlgmr.msra.gmra.mrb[24].mxu1 %vm3691_vm11, %v23537_v23  ;;  %v20216_v23 = vpop.permute.xlu1 %20215 }
 0x35f   :  { %18303 = vmatpush1.bf16.msra.mxu1 %v18302_v3  ;;  %4352 = vmatprep.mubr.f32.mxu1 %v23643_v25  ;;  %v20218_v21 = vunpack.i.h.bf16 %v20216_v23  ;;  %v20217_v11 = vunpack.i.l.bf16 %v20216_v23  ;;  %v20241_v23 = vpop.permute.xlu0 %20240 }
 0x360   :  { %18305 = vmatprep.subr.bf16.mxu1 %v18304_v50 }
 0x361   :  { %v4466_v29 = vsel %vm903_vm4, %v20217_v11, %v20218_v21  ;;  %v4465_v40 = vsel %vm903_vm4, %v20193_v18, %v20217_v11 }
 0x362   :  { %17822 = vmatmul.mubr.msk.f32.gmra.mrb[26].mxu1 %vm3691_vm11, %v23557_v37  ;;  %v4455_v37 = vsel %vm903_vm4, %v20178_v16, %v20207_v34  ;;  %v4461_v16 = vsel %vm903_vm4, %v20212_v48, %v20213_v14  ;;  %v20226_v27 = vpop.permute.xlu1 %20225  ;;  %v18314_v10 = vpack.c.bf16 %v4465_v40, %v4460_v55  ;;  %v23708_v34 = vld [vmem:[%s28073_s4 + $0x50] sm:$0xff] }
 0x363   :  { %18307 = vmatpush1.bf16.msra.mxu1 %v18306_v61  ;;  %4358 = vmatprep.mubr.f32.mxu1 %v23643_v25  ;;  %v18310_v4 = vpack.c.bf16 %v4455_v37, %v4450_v42  ;;  %v18312_v41 = vpack.c.bf16 %v4466_v29, %v4461_v16  ;;  %v20228_v6 = vunpack.i.h.bf16 %v20226_v27  ;;  %v20227_v5 = vunpack.i.l.bf16 %v20226_v27 }
 0x364   :  { %18309 = vmatprep.subr.bf16.mxu1 %v18308_v57  ;;  %v20243_v29 = vunpack.i.h.bf16 %v20241_v23  ;;  %v20242_v42 = vunpack.i.l.bf16 %v20241_v23 }
 0x365   :  { %v4467_v57 = vsel %vm903_vm4, %v20218_v21, %v20228_v6  ;;  %v18320_v51 = vpack.c.bf16 %v20228_v6, %v20227_v5 }
 0x366   :  { %17823 = vmatmul.mubr.msk.f32.gmra.mrb[28].mxu1 %vm3691_vm11, %v23572_v45  ;;  %v23685_v45 = vld [vmem:[%s28073_s4 + $0x40] sm:$0xff]  ;;  %v23710_v47 = vpop.permute.xlu1 %20235 }
 0x367   :  { %4364 = vmatprep.mubr.f32.mxu1 %v23643_v25  ;;  %v20238_v50 = vunpack.i.h.bf16 %v23710_v47  ;;  %v20237_v1 = vunpack.i.l.bf16 %v23710_v47 }
 0x369   :  { %v4919_v11 = vsel %vm1280_vm5, %v20237_v1, %v20238_v50  ;;  %v4918_v55 = vsel %vm1280_vm5, %v20243_v29, %v20237_v1 }
 0x36a   :  { %17824 = vmatmul.mubr.msk.f32.gmra.mrb[30].mxu1 %vm3691_vm11, %v23586_v62  ;;  %v20223_v62 = vunpack.i.h.bf16 %v20221_v24  ;;  %v23731_v61 = vpop.permute.xlu1 %20245  ;;  %v23749_v24 = vpop.permute.xlu0 %20250 }
 0x36b   :  { %4568 = vmatprep.mubr.f32.mxu1 %v23643_v25  ;;  %v20247_v16 = vunpack.i.l.bf16 %v23731_v61  ;;  %v20253_v40 = vunpack.i.h.bf16 %v23749_v24 }
 0x36c   :  { %v18316_v18 = vpack.c.bf16 %v20223_v62, %v20222_v12  ;;  %v4457_v3 = vsel %vm903_vm4, %v20208_v17, %v20223_v62  ;;  %v4462_v17 = vsel %vm903_vm4, %v20213_v14, %v20227_v5  ;;  %v4913_v14 = vsel %vm1280_vm5, %v20232_v49, %v20233_v7 }
 0x36d   :  { %v18318_v52 = vpack.c.bf16 %v4457_v3, %v4452_v15  ;;  %v18322_v48 = vpack.c.bf16 %v4467_v57, %v4462_v17  ;;  %v18324_v21 = vpack.c.bf16 %v4919_v11, %v4913_v14  ;;  %v20252_v62 = vunpack.i.l.bf16 %v23749_v24 }
 0x36e   :  { %17829 = vmatmul.mubr.msk.f32.vlgmr.msra.gmra.mrb[8].mxu1 %vm3691_vm11, %v23685_v45  ;;  %v20256_v37 = vpop.permute.xlu1 %20255 }
 0x36f   :  { %18311 = vmatpush1.bf16.msra.mxu1 %v18310_v4  ;;  %4574 = vmatprep.mubr.f32.mxu1 %v23643_v25  ;;  %v20248_v4 = vunpack.i.h.bf16 %v23731_v61  ;;  %v20258_v27 = vunpack.i.h.bf16 %v20256_v37  ;;  %v4931_v5 = vsel %vm1280_vm5, %v20252_v62, %v20253_v40 }
 0x370   :  { %18313 = vmatprep.subr.bf16.mxu1 %v18312_v41  ;;  %v4912_v41 = vsel %vm1280_vm5, %v20242_v42, %v20232_v49 }
 0x371   :  { %v4925_v6 = vsel %vm1280_vm5, %v20247_v16, %v20248_v4  ;;  %v4930_v17 = vsel %vm1280_vm5, %v20258_v27, %v20252_v62 }
 0x372   :  { %17830 = vmatmul.mubr.msk.f32.gmra.mrb[10].mxu1 %vm3691_vm11, %v23699_v53  ;;  %v23758_v12 = vpop.permute.xlu1 %20265  ;;  %v18328_v23 = vpack.c.bf16 %v4931_v5, %v4925_v6 }
 0x373   :  { %18315 = vmatpush1.bf16.msra.mxu1 %v18314_v10  ;;  %4580 = vmatprep.mubr.f32.mxu1 %v23643_v25  ;;  %v20257_v10 = vunpack.i.l.bf16 %v20256_v37  ;;  %v20268_v15 = vunpack.i.h.bf16 %v23758_v12  ;;  %v20267_v3 = vunpack.i.l.bf16 %v23758_v12 }
 0x374   :  { %18317 = vmatprep.subr.bf16.mxu1 %v18316_v18  ;;  %v23762_v18 = vpop.permute.xlu0 %20260 }
 0x375   :  { %v20263_v1 = vunpack.i.h.bf16 %v23762_v18  ;;  %v20262_v49 = vunpack.i.l.bf16 %v23762_v18  ;;  %v4924_v57 = vsel %vm1280_vm5, %v20257_v10, %v20247_v16  ;;  %v28108_v18 = vpack.c.bf16 %v23065_v38, %v23046_v13 }
 0x376   :  { %17831 = vmatmul.mubr.msk.f32.gmra.mrb[12].mxu1 %vm3691_vm11, %v23708_v34  ;;  %v18330_v11 = vpack.c.bf16 %v4930_v17, %v4924_v57  ;;  %v20276_v14 = vpop.permute.xlu1 %20275  ;;  %v17843_v57 = vld [vmem:[%s28073_s4 + $0x70] sm:$0xff]  ;;  %v28110_v13 = vpack.c.bf16 %v23119_v22, %v23090_v30  ;;  %v18356_v38 = vpack.c.bf16 %v23110_v58, %v23100_v43  ;;  %v23884_v30 = vld [vmem:[%s28073_s4 + $0x88] sm:$0xff]  ;;  %v18362_v43 = vpack.c.bf16 %v23167_v54, %v23153_v8  ;;  %v23904_v8 = vld [vmem:[%s28073_s4 + $0x98] sm:$0xff] }
 0x377   :  { %4586 = vmatprep.mubr.f32.mxu1 %v23643_v25  ;;  %v20277_v24 = vunpack.i.l.bf16 %v20276_v14  ;;  %v4914_v47 = vsel %vm1280_vm5, %v20233_v7, %v20262_v49 }
 0x37a   :  { %17832 = vmatmul.mubr.msk.f32.gmra.mrb[14].mxu1 %vm3691_vm11, %v23718_v28  ;;  %v20286_v29 = vpop.permute.xlu1 %20285 }
 0x37b   :  { %4657 = vmatprep.mubr.f32.mxu1 %v23643_v25 }
 0x37e   :  { %17833 = vmatmul.mubr.msk.f32.vlgmr.msra.gmra.mrb[16].mxu1 %vm3691_vm11, %v23685_v45 }
 0x37f   :  { %18319 = vmatpush1.bf16.msra.mxu1 %v18318_v52  ;;  %4663 = vmatprep.mubr.f32.mxu1 %v23643_v25  ;;  %v18326_v52 = vpack.c.bf16 %v4918_v55, %v4912_v41  ;;  %v20288_v41 = vunpack.i.h.bf16 %v20286_v29  ;;  %v20287_v55 = vunpack.i.l.bf16 %v20286_v29 }
 0x380   :  { %18321 = vmatprep.subr.bf16.mxu1 %v18320_v51  ;;  %v4921_v51 = vsel %vm1280_vm5, %v20267_v3, %v20268_v15 }
 0x381   :  { %v4923_v2 = vsel %vm1280_vm5, %v20287_v55, %v20288_v41 }
 0x382   :  { %17834 = vmatmul.mubr.msk.f32.gmra.mrb[18].mxu1 %vm3691_vm11, %v23699_v53 }
 0x383   :  { %18323 = vmatpush1.bf16.msra.mxu1 %v18322_v48  ;;  %4669 = vmatprep.mubr.f32.mxu1 %v23643_v25  ;;  %v4915_v48 = vsel %vm1280_vm5, %v20262_v49, %v20263_v1 }
 0x384   :  { %18325 = vmatprep.subr.bf16.mxu1 %v18324_v21  ;;  %v18332_v37 = vpack.c.bf16 %v4921_v51, %v4915_v48  ;;  %v20278_v21 = vunpack.i.h.bf16 %v20276_v14 }
 0x386   :  { %17835 = vmatmul.mubr.msk.f32.gmra.mrb[20].mxu1 %vm3691_vm11, %v23708_v34  ;;  %v4933_v27 = vsel %vm1280_vm5, %v20277_v24, %v20278_v21 }
 0x387   :  { %4675 = vmatprep.mubr.f32.mxu1 %v23643_v25 }
 0x38a   :  { %17836 = vmatmul.mubr.msk.f32.gmra.mrb[22].mxu1 %vm3691_vm11, %v23718_v28 }
 0x38b   :  { %4746 = vmatprep.mubr.f32.mxu1 %v23643_v25 }
 0x38e   :  { %17837 = vmatmul.mubr.msk.f32.vlgmr.msra.gmra.mrb[24].mxu1 %vm3691_vm11, %v23685_v45  ;;  %v20271_v45 = vpop.permute.xlu0 %20270 }
 0x38f   :  { %18327 = vmatpush1.bf16.msra.mxu1 %v18326_v52  ;;  %4752 = vmatprep.mubr.f32.mxu1 %v23643_v25  ;;  %v20273_v42 = vunpack.i.h.bf16 %v20271_v45  ;;  %v20272_v16 = vunpack.i.l.bf16 %v20271_v45  ;;  %v17842_v52 = vld [vmem:[%s28073_s4 + $0x68] sm:$0xff] }
 0x390   :  { %18329 = vmatprep.subr.bf16.mxu1 %v18328_v23  ;;  %v20296_v23 = vpop.permute.xlu1 %20295 }
 0x391   :  { %v4927_v6 = vsel %vm1280_vm5, %v20272_v16, %v20273_v42  ;;  %v4926_v7 = vsel %vm1280_vm5, %v20248_v4, %v20272_v16  ;;  %v20298_v61 = vunpack.i.h.bf16 %v20296_v23  ;;  %v20297_v4 = vunpack.i.l.bf16 %v20296_v23 }
 0x392   :  { %17838 = vmatmul.mubr.msk.f32.gmra.mrb[26].mxu1 %vm3691_vm11, %v23699_v53  ;;  %v4920_v53 = vsel %vm1280_vm5, %v20238_v50, %v20267_v3  ;;  %v20281_v62 = vpop.permute.xlu0 %20280  ;;  %v18336_v5 = vpack.c.bf16 %v4933_v27, %v4927_v6  ;;  %v22016_v27 = vld [vmem:[#allocation2 + $0xa0] sm:$0xff] }
 0x393   :  { %18331 = vmatpush1.bf16.msra.mxu1 %v18330_v11  ;;  %4758 = vmatprep.mubr.f32.mxu1 %v23643_v25  ;;  %v20283_v10 = vunpack.i.h.bf16 %v20281_v62  ;;  %v20282_v50 = vunpack.i.l.bf16 %v20281_v62  ;;  %v18334_v3 = vpack.c.bf16 %v4920_v53, %v4914_v47  ;;  %v17844_v11 = vld [vmem:[%s28073_s4 + $0x78] sm:$0xff]  ;;  %v4935_v45 = vsel %vm1280_vm5, %v20297_v4, %v20298_v61 }
 0x394   :  { %18333 = vmatprep.subr.bf16.mxu1 %v18332_v37  ;;  %v4922_v37 = vsel %vm1280_vm5, %v20268_v15, %v20287_v55  ;;  %v4934_v53 = vsel %vm1280_vm5, %v20278_v21, %v20297_v4  ;;  %v28111_v21 = vpack.c.bf16 %v23113_v63, %v23086_v60  ;;  %v18360_v60 = vpack.c.bf16 %v23170_v56, %v23164_v46  ;;  %v23894_v63 = vld [vmem:[%s28073_s4 + $0x90] sm:$0xff]  ;;  %v23896_v22 = vpop.permute.xlu1 %20305  ;;  %v22017_v47 = vld [vmem:[#allocation2 + $0xd8] sm:$0xff] }
 0x395   :  { %v20308_v54 = vunpack.i.h.bf16 %v23896_v22  ;;  %v20307_v56 = vunpack.i.l.bf16 %v23896_v22 }
 0x396   :  { %17839 = vmatmul.mubr.msk.f32.gmra.mrb[28].mxu1 %vm3691_vm11, %v23708_v34  ;;  %v17841_v34 = vld [vmem:[%s28073_s4 + $0x60] sm:$0xff]  ;;  %v20291_v51 = vpop.permute.xlu0 %20290 }
 0x397   :  { %4764 = vmatprep.mubr.f32.mxu1 %v23643_v25  ;;  %v20293_v48 = vunpack.i.h.bf16 %v20291_v51  ;;  %v20292_v14 = vunpack.i.l.bf16 %v20291_v51 }
 0x399   :  { %v4929_v16 = vsel %vm1280_vm5, %v20292_v14, %v20293_v48  ;;  %v4928_v15 = vsel %vm1280_vm5, %v20273_v42, %v20292_v14  ;;  %v23913_v42 = vpop.permute.xlu1 %20315 }
 0x39a   :  { %17840 = vmatmul.mubr.msk.f32.gmra.mrb[30].mxu1 %vm3691_vm11, %v23718_v28  ;;  %v4932_v28 = vsel %vm1280_vm5, %v20253_v40, %v20277_v24  ;;  %v4917_v40 = vsel %vm1280_vm5, %v20282_v50, %v20283_v10  ;;  %v4916_v24 = vsel %vm1280_vm5, %v20263_v1, %v20282_v50  ;;  %v18344_v12 = vpack.c.bf16 %v4935_v45, %v4929_v16  ;;  %v23906_v46 = vpop.permute.xlu0 %20300 }
 0x39b   :  { %5036 = vmatprep.mubr.f32.mxu1 %v23643_v25  ;;  %v18338_v49 = vpack.c.bf16 %v4932_v28, %v4926_v7  ;;  %v18340_v17 = vpack.c.bf16 %v4923_v2, %v4917_v40  ;;  %v18342_v29 = vpack.c.bf16 %v4922_v37, %v4916_v24  ;;  %v18346_v62 = vpack.c.bf16 %v4934_v53, %v4928_v15 }
 0x39c   :  { %v28109_v1 = vpack.c.bf16 %v23057_v32, %v23041_v26  ;;  %v23872_v26 = vld [vmem:[%s28073_s4 + $0x80] sm:$0xff]  ;;  %v18358_v32 = vpack.c.bf16 %v23103_v59, %v23097_v39  ;;  %v22014_v39 = vld [vmem:[#allocation2 + $0x30] sm:$0xff]  ;;  %v22015_v59 = vld [vmem:[#allocation2 + $0x68] sm:$0xff]  ;;  %v20303_v41 = vunpack.i.h.bf16 %v23906_v46  ;;  %v20302_v55 = vunpack.i.l.bf16 %v23906_v46 }
 0x39d   :  { %v18364_v58 = vpack.c.bf16 %v22015_v59, %v22014_v39  ;;  %v18368_v10 = vpack.c.bf16 %v22017_v47, %v22016_v27  ;;  %v28112_v50 = vpack.c.bf16 %v23177_v20, %v23174_v19  ;;  %v20326_v28 = vpop.permute.xlu1 %20325  ;;  %v28113_v19 = vpack.c.bf16 %v23205_v35, %v23202_v33  ;;  %v23993_v46 = vld [vmem:[%s28073_s4 + $0xa8] sm:$0xff]  ;;  %v24002_v27 = vld [vmem:[%s28073_s4 + $0xb0] sm:$0xff] }
 0x39e   :  { %17845 = vmatmul.mubr.msk.f32.vlgmr.msra.gmra.mrb[8].mxu1 %vm3691_vm11, %v17841_v34  ;;  %v5625_v6 = vsel %vm1997_vm6, %v20302_v55, %v20303_v41  ;;  %v20318_v7 = vunpack.i.h.bf16 %v23913_v42  ;;  %v20328_v23 = vunpack.i.h.bf16 %v20326_v28  ;;  %v20327_v51 = vunpack.i.l.bf16 %v20326_v28 }
 0x39f   :  { %18335 = vmatpush1.bf16.msra.mxu1 %v18334_v3  ;;  %5042 = vmatprep.mubr.f32.mxu1 %v23643_v25  ;;  %v5630_v3 = vsel %vm1997_vm6, %v20307_v56, %v20308_v54 }
 0x3a0   :  { %18337 = vmatprep.subr.bf16.mxu1 %v18336_v5  ;;  %v18372_v5 = vpack.c.bf16 %v5630_v3, %v5625_v6 }
 0x3a2   :  { %17846 = vmatmul.mubr.msk.f32.gmra.mrb[10].mxu1 %vm3691_vm11, %v17842_v52 }
 0x3a3   :  { %18339 = vmatpush1.bf16.msra.mxu1 %v18338_v49  ;;  %5048 = vmatprep.mubr.f32.mxu1 %v23643_v25  ;;  %v20317_v49 = vunpack.i.l.bf16 %v23913_v42 }
 0x3a4   :  { %18341 = vmatprep.subr.bf16.mxu1 %v18340_v17 }
 0x3a5   :  { %v5635_v48 = vsel %vm1997_vm6, %v20317_v49, %v20318_v7  ;;  %v5634_v16 = vsel %vm1997_vm6, %v20327_v51, %v20317_v49 }
 0x3a6   :  { %17847 = vmatmul.mubr.msk.f32.gmra.mrb[12].mxu1 %vm3691_vm11, %v17843_v57 }
 0x3a7   :  { %5054 = vmatprep.mubr.f32.mxu1 %v23643_v25 }
 0x3aa   :  { %17848 = vmatmul.mubr.msk.f32.gmra.mrb[14].mxu1 %vm3691_vm11, %v17844_v11 }
 0x3ab   :  { %5125 = vmatprep.mubr.f32.mxu1 %v23643_v25 }
 0x3ae   :  { %17849 = vmatmul.mubr.msk.f32.vlgmr.msra.gmra.mrb[16].mxu1 %vm3691_vm11, %v17841_v34 }
 0x3af   :  { %18343 = vmatpush1.bf16.msra.mxu1 %v18342_v29  ;;  %5131 = vmatprep.mubr.f32.mxu1 %v23643_v25 }
 0x3b0   :  { %18345 = vmatprep.subr.bf16.mxu1 %v18344_v12 }
 0x3b2   :  { %17850 = vmatmul.mubr.msk.f32.gmra.mrb[18].mxu1 %vm3691_vm11, %v17842_v52 }
 0x3b3   :  { %18347 = vmatpush1.bf16.msra.mxu1 %v18346_v62  ;;  %5137 = vmatprep.mubr.f32.mxu1 %v23643_v25 }
 0x3b4   :  { %18349 = vmatprep.subr.bf16.mxu1 %v28108_v18 }
 0x3b6   :  { %17851 = vmatmul.mubr.msk.f32.gmra.mrb[20].mxu1 %vm3691_vm11, %v17843_v57 }
 0x3b7   :  { %5143 = vmatprep.mubr.f32.mxu1 %v23643_v25 }
 0x3ba   :  { %17852 = vmatmul.mubr.msk.f32.gmra.mrb[22].mxu1 %vm3691_vm11, %v17844_v11 }
 0x3bb   :  { %5214 = vmatprep.mubr.f32.mxu1 %v23643_v25 }
 0x3be   :  { %17853 = vmatmul.mubr.msk.f32.vlgmr.msra.gmra.mrb[24].mxu1 %vm3691_vm11, %v17841_v34  ;;  %v20311_v34 = vpop.permute.xlu0 %20310 }
 0x3bf   :  { %18351 = vmatpush1.bf16.msra.mxu1 %v28109_v1  ;;  %5220 = vmatprep.mubr.f32.mxu1 %v23643_v25  ;;  %v20312_v2 = vunpack.i.l.bf16 %v20311_v34 }
 0x3c0   :  { %18353 = vmatprep.subr.bf16.mxu1 %v28110_v13 }
 0x3c1   :  { %v5624_v33 = vsel %vm1997_vm6, %v20312_v2, %v20302_v55 }
 0x3c2   :  { %17854 = vmatmul.mubr.msk.f32.gmra.mrb[26].mxu1 %vm3691_vm11, %v17842_v52  ;;  %v20321_v20 = vpop.permute.xlu0 %20320  ;;  %v20313_v52 = vunpack.i.h.bf16 %v20311_v34 }
 0x3c3   :  { %18355 = vmatpush1.bf16.msra.mxu1 %v28111_v21  ;;  %5226 = vmatprep.mubr.f32.mxu1 %v23643_v25  ;;  %v20323_v40 = vunpack.i.h.bf16 %v20321_v20  ;;  %v20322_v17 = vunpack.i.l.bf16 %v20321_v20 }
 0x3c4   :  { %18357 = vmatprep.subr.bf16.mxu1 %v18356_v38  ;;  %v5629_v35 = vsel %vm1997_vm6, %v20313_v52, %v20307_v56 }
 0x3c5   :  { %v5640_v14 = vsel %vm1997_vm6, %v20322_v17, %v20323_v40  ;;  %v18374_v24 = vpack.c.bf16 %v5629_v35, %v5624_v33  ;;  %v5639_v29 = vsel %vm1997_vm6, %v20328_v23, %v20322_v17 }
 0x3c6   :  { %17855 = vmatmul.mubr.msk.f32.gmra.mrb[28].mxu1 %vm3691_vm11, %v17843_v57  ;;  %v23940_v57 = vpop.permute.xlu1 %20335  ;;  %v23944_v61 = vpop.permute.xlu0 %20330  ;;  %v18376_v53 = vpack.c.bf16 %v5640_v14, %v5635_v48  ;;  %v18378_v15 = vpack.c.bf16 %v5639_v29, %v5634_v16 }
 0x3c7   :  { %5232 = vmatprep.mubr.f32.mxu1 %v23643_v25  ;;  %v20338_v4 = vunpack.i.h.bf16 %v23940_v57  ;;  %v20333_v37 = vunpack.i.h.bf16 %v23944_v61  ;;  %v20332_v45 = vunpack.i.l.bf16 %v23944_v61 }
 0x3c9   :  { %v5627_v62 = vsel %vm1997_vm6, %v20332_v45, %v20333_v37  ;;  %v5626_v59 = vsel %vm1997_vm6, %v20303_v41, %v20332_v45 }
 0x3ca   :  { %17856 = vmatmul.mubr.msk.f32.gmra.mrb[30].mxu1 %vm3691_vm11, %v17844_v11  ;;  %v20337_v11 = vunpack.i.l.bf16 %v23940_v57  ;;  %v20346_v1 = vpop.permute.xlu1 %20345  ;;  %v20341_v13 = vpop.permute.xlu0 %20340 }
 0x3cb   :  { %5344 = vmatprep.mubr.f32.mxu1 %v23643_v25  ;;  %v20348_v38 = vunpack.i.h.bf16 %v20346_v1  ;;  %v20347_v21 = vunpack.i.l.bf16 %v20346_v1 }
 0x3cc   :  { %v5632_v12 = vsel %vm1997_vm6, %v20337_v11, %v20338_v4 }
 0x3cd   :  { %v18380_v18 = vpack.c.bf16 %v5632_v12, %v5627_v62  ;;  %v5642_v39 = vsel %vm1997_vm6, %v20347_v21, %v20348_v38  ;;  %v5641_v22 = vsel %vm1997_vm6, %v20323_v40, %v20347_v21 }
 0x3ce   :  { %17861 = vmatmul.mubr.msk.f32.vlgmr.msra.gmra.mrb[8].mxu1 %vm3691_vm11, %v23872_v26  ;;  %v20356_v41 = vpop.permute.xlu1 %20355 }
 0x3cf   :  { %18359 = vmatpush1.bf16.msra.mxu1 %v18358_v32  ;;  %5350 = vmatprep.mubr.f32.mxu1 %v23643_v25  ;;  %v20342_v32 = vunpack.i.l.bf16 %v20341_v13  ;;  %v20358_v28 = vunpack.i.h.bf16 %v20356_v41 }
 0x3d0   :  { %18361 = vmatprep.subr.bf16.mxu1 %v18360_v60  ;;  %v5631_v60 = vsel %vm1997_vm6, %v20308_v54, %v20337_v11 }
 0x3d1   :  { %v5636_v42 = vsel %vm1997_vm6, %v20318_v7, %v20342_v32  ;;  %v5643_v17 = vsel %vm1997_vm6, %v20348_v38, %v20358_v28 }
 0x3d2   :  { %17862 = vmatmul.mubr.msk.f32.gmra.mrb[10].mxu1 %vm3691_vm11, %v23884_v30  ;;  %v18386_v55 = vpack.c.bf16 %v5641_v22, %v5636_v42  ;;  %v24004_v47 = vpop.permute.xlu1 %20365 }
 0x3d3   :  { %18363 = vmatpush1.bf16.msra.mxu1 %v18362_v43  ;;  %5356 = vmatprep.mubr.f32.mxu1 %v23643_v25  ;;  %v23979_v43 = vld [vmem:[%s28073_s4 + $0xa0] sm:$0xff]  ;;  %v20367_v20 = vunpack.i.l.bf16 %v24004_v47 }
 0x3d4   :  { %18365 = vmatprep.subr.bf16.mxu1 %v18364_v58  ;;  %v18382_v58 = vpack.c.bf16 %v5631_v60, %v5626_v59 }
 0x3d6   :  { %17863 = vmatmul.mubr.msk.f32.gmra.mrb[12].mxu1 %vm3691_vm11, %v23894_v63  ;;  %v24025_v52 = vpop.permute.xlu1 %20375 }
 0x3d7   :  { %5362 = vmatprep.mubr.f32.mxu1 %v23643_v25  ;;  %v20377_v45 = vunpack.i.l.bf16 %v24025_v52 }
 0x3da   :  { %17864 = vmatmul.mubr.msk.f32.gmra.mrb[14].mxu1 %vm3691_vm11, %v23904_v8  ;;  %v20386_v61 = vpop.permute.xlu1 %20385 }
 0x3db   :  { %5433 = vmatprep.mubr.f32.mxu1 %v23643_v25  ;;  %v20387_v62 = vunpack.i.l.bf16 %v20386_v61 }
 0x3de   :  { %17865 = vmatmul.mubr.msk.f32.vlgmr.msra.gmra.mrb[16].mxu1 %vm3691_vm11, %v23872_v26  ;;  %v24048_v16 = vpop.permute.xlu1 %20395 }
 0x3df   :  { %18367 = vmatpush1.bf16.msra.mxu1 %v28112_v50  ;;  %5439 = vmatprep.mubr.f32.mxu1 %v23643_v25  ;;  %v20398_v1 = vunpack.i.h.bf16 %v24048_v16 }
 0x3e0   :  { %18369 = vmatprep.subr.bf16.mxu1 %v18368_v10  ;;  %v24012_v10 = vld [vmem:[%s28073_s4 + $0xb8] sm:$0xff] }
 0x3e2   :  { %17866 = vmatmul.mubr.msk.f32.gmra.mrb[18].mxu1 %vm3691_vm11, %v23884_v30 }
 0x3e3   :  { %18371 = vmatpush1.bf16.msra.mxu1 %v28113_v19  ;;  %5445 = vmatprep.mubr.f32.mxu1 %v23643_v25  ;;  %v20368_v19 = vunpack.i.h.bf16 %v24004_v47 }
 0x3e4   :  { %18373 = vmatprep.subr.bf16.mxu1 %v18372_v5  ;;  %v20357_v5 = vunpack.i.l.bf16 %v20356_v41 }
 0x3e5   :  { %v6030_v35 = vsel %vm2364_vm7, %v20367_v20, %v20368_v19 }
 0x3e6   :  { %17867 = vmatmul.mubr.msk.f32.gmra.mrb[20].mxu1 %vm3691_vm11, %v23894_v63  ;;  %v18392_v33 = vpack.c.bf16 %v20358_v28, %v20357_v5 }
 0x3e7   :  { %5451 = vmatprep.mubr.f32.mxu1 %v23643_v25 }
 0x3ea   :  { %17868 = vmatmul.mubr.msk.f32.gmra.mrb[22].mxu1 %vm3691_vm11, %v23904_v8 }
 0x3eb   :  { %5522 = vmatprep.mubr.f32.mxu1 %v23643_v25 }
 0x3ee   :  { %17869 = vmatmul.mubr.msk.f32.vlgmr.msra.gmra.mrb[24].mxu1 %vm3691_vm11, %v23872_v26  ;;  %v20343_v26 = vunpack.i.h.bf16 %v20341_v13  ;;  %v20397_v13 = vunpack.i.l.bf16 %v24048_v16 }
 0x3ef   :  { %18375 = vmatpush1.bf16.msra.mxu1 %v18374_v24  ;;  %5528 = vmatprep.mubr.f32.mxu1 %v23643_v25 }
 0x3f0   :  { %18377 = vmatprep.subr.bf16.mxu1 %v18376_v53  ;;  %v5638_v40 = vsel %vm1997_vm6, %v20343_v26, %v20357_v5 }
 0x3f1   :  { %v18394_v23 = vpack.c.bf16 %v5643_v17, %v5638_v40  ;;  %v24110_v40 = vld [vmem:[%s28073_s4 + $0xd0] sm:$0xff] }
 0x3f2   :  { %17870 = vmatmul.mubr.msk.f32.gmra.mrb[26].mxu1 %vm3691_vm11, %v23884_v30  ;;  %v20351_v30 = vpop.permute.xlu0 %20350 }
 0x3f3   :  { %18379 = vmatpush1.bf16.msra.mxu1 %v18378_v15  ;;  %5534 = vmatprep.mubr.f32.mxu1 %v23643_v25  ;;  %v20352_v54 = vunpack.i.l.bf16 %v20351_v30  ;;  %v20388_v15 = vunpack.i.h.bf16 %v20386_v61 }
 0x3f4   :  { %18381 = vmatprep.subr.bf16.mxu1 %v18380_v18 }
 0x3f5   :  { %v5628_v3 = vsel %vm1997_vm6, %v20333_v37, %v20352_v54  ;;  %v20378_v37 = vunpack.i.h.bf16 %v24025_v52 }
 0x3f6   :  { %17871 = vmatmul.mubr.msk.f32.gmra.mrb[28].mxu1 %vm3691_vm11, %v23894_v63  ;;  %v5637_v63 = vsel %vm1997_vm6, %v20342_v32, %v20343_v26  ;;  %v24014_v50 = vpop.permute.xlu0 %20360 }
 0x3f7   :  { %5540 = vmatprep.mubr.f32.mxu1 %v23643_v25  ;;  %v18384_v56 = vpack.c.bf16 %v5642_v39, %v5637_v63  ;;  %v20363_v2 = vunpack.i.h.bf16 %v24014_v50  ;;  %v20362_v7 = vunpack.i.l.bf16 %v24014_v50  ;;  %v6035_v38 = vsel %vm2364_vm7, %v20377_v45, %v20378_v37  ;;  %v24101_v50 = vld [vmem:[%s28073_s4 + $0xc8] sm:$0xff] }
 0x3f8   :  { %v6034_v39 = vsel %vm2364_vm7, %v20387_v62, %v20377_v45 }
 0x3f9   :  { %v6025_v51 = vsel %vm2364_vm7, %v20362_v7, %v20363_v2 }
 0x3fa   :  { %17872 = vmatmul.mubr.msk.f32.gmra.mrb[30].mxu1 %vm3691_vm11, %v23904_v8  ;;  %v20353_v8 = vunpack.i.h.bf16 %v20351_v30  ;;  %v20371_v57 = vpop.permute.xlu0 %20370 }
 0x3fb   :  { %5744 = vmatprep.mubr.f32.mxu1 %v23643_v25  ;;  %v20373_v48 = vunpack.i.h.bf16 %v20371_v57  ;;  %v20372_v14 = vunpack.i.l.bf16 %v20371_v57  ;;  %v24120_v57 = vld [vmem:[%s28073_s4 + $0xd8] sm:$0xff] }
 0x3fc   :  { %v18388_v34 = vpack.c.bf16 %v20353_v8, %v20352_v54  ;;  %v5633_v6 = vsel %vm1997_vm6, %v20338_v4, %v20353_v8  ;;  %v18396_v4 = vpack.c.bf16 %v6030_v35, %v6025_v51 }
 0x3fd   :  { %v18390_v49 = vpack.c.bf16 %v5633_v6, %v5628_v3  ;;  %v6024_v53 = vsel %vm2364_vm7, %v20372_v14, %v20362_v7  ;;  %v6029_v12 = vsel %vm2364_vm7, %v20373_v48, %v20367_v20 }
 0x3fe   :  { %17877 = vmatmul.mubr.msk.f32.vlgmr.msra.gmra.mrb[8].mxu1 %vm3691_vm11, %v23979_v43  ;;  %v20381_v11 = vpop.permute.xlu0 %20380  ;;  %v18398_v60 = vpack.c.bf16 %v6029_v12, %v6024_v53 }
 0x3ff   :  { %18383 = vmatpush1.bf16.msra.mxu1 %v18382_v58  ;;  %5750 = vmatprep.mubr.f32.mxu1 %v23643_v25  ;;  %v20383_v24 = vunpack.i.h.bf16 %v20381_v11  ;;  %v20382_v29 = vunpack.i.l.bf16 %v20381_v11  ;;  %v6032_v58 = vsel %vm2364_vm7, %v20397_v13, %v20398_v1 }
 0x400   :  { %18385 = vmatprep.subr.bf16.mxu1 %v18384_v56 }
 0x401   :  { %v6040_v21 = vsel %vm2364_vm7, %v20382_v29, %v20383_v24  ;;  %v6039_v30 = vsel %vm2364_vm7, %v20388_v15, %v20382_v29 }
 0x402   :  { %17878 = vmatmul.mubr.msk.f32.gmra.mrb[10].mxu1 %vm3691_vm11, %v23993_v46  ;;  %v24052_v18 = vpop.permute.xlu0 %20390  ;;  %v18400_v59 = vpack.c.bf16 %v6040_v21, %v6035_v38  ;;  %v18402_v63 = vpack.c.bf16 %v6039_v30, %v6034_v39 }
 0x403   :  { %18387 = vmatpush1.bf16.msra.mxu1 %v18386_v55  ;;  %5756 = vmatprep.mubr.f32.mxu1 %v23643_v25  ;;  %v20393_v26 = vunpack.i.h.bf16 %v24052_v18  ;;  %v20392_v32 = vunpack.i.l.bf16 %v24052_v18 }
 0x404   :  { %18389 = vmatprep.subr.bf16.mxu1 %v18388_v34 }
 0x405   :  { %v6027_v22 = vsel %vm2364_vm7, %v20392_v32, %v20393_v26  ;;  %v6026_v6 = vsel %vm2364_vm7, %v20363_v2, %v20392_v32 }
 0x406   :  { %17879 = vmatmul.mubr.msk.f32.gmra.mrb[12].mxu1 %vm3691_vm11, %v24002_v27  ;;  %v18404_v8 = vpack.c.bf16 %v6032_v58, %v6027_v22  ;;  %v20401_v54 = vpop.permute.xlu0 %20400 }
 0x407   :  { %5762 = vmatprep.mubr.f32.mxu1 %v23643_v25  ;;  %v20403_v41 = vunpack.i.h.bf16 %v20401_v54  ;;  %v20402_v55 = vunpack.i.l.bf16 %v20401_v54 }
 0x409   :  { %v6037_v28 = vsel %vm2364_vm7, %v20402_v55, %v20403_v41  ;;  %v6036_v52 = vsel %vm2364_vm7, %v20378_v37, %v20402_v55 }
 0x40a   :  { %17880 = vmatmul.mubr.msk.f32.gmra.mrb[14].mxu1 %vm3691_vm11, %v24012_v10  ;;  %v20411_v34 = vpop.permute.xlu0 %20410 }
 0x40b   :  { %5833 = vmatprep.mubr.f32.mxu1 %v23643_v25 }
 0x40e   :  { %17881 = vmatmul.mubr.msk.f32.vlgmr.msra.gmra.mrb[16].mxu1 %vm3691_vm11, %v23979_v43 }
 0x40f   :  { %18391 = vmatpush1.bf16.msra.mxu1 %v18390_v49  ;;  %5839 = vmatprep.mubr.f32.mxu1 %v23643_v25 }
 0x410   :  { %18393 = vmatprep.subr.bf16.mxu1 %v18392_v33  ;;  %v24122_v33 = vpop.permute.xlu0 %20420 }
 0x411   :  { %v20423_v14 = vunpack.i.h.bf16 %v24122_v33  ;;  %v20422_v37 = vunpack.i.l.bf16 %v24122_v33  ;;  %v24211_v33 = vld [vmem:[%s28073_s4 + $0xe8] sm:$0xff] }
 0x412   :  { %17882 = vmatmul.mubr.msk.f32.gmra.mrb[18].mxu1 %vm3691_vm11, %v23993_v46 }
 0x413   :  { %18395 = vmatpush1.bf16.msra.mxu1 %v18394_v23  ;;  %5845 = vmatprep.mubr.f32.mxu1 %v23643_v25  ;;  %v6425_v62 = vsel %vm2731_vm8, %v20422_v37, %v20423_v14 }
 0x414   :  { %18397 = vmatprep.subr.bf16.mxu1 %v18396_v4  ;;  %v20431_v16 = vpop.permute.xlu0 %20430 }
 0x415   :  { %v20433_v38 = vunpack.i.h.bf16 %v20431_v16  ;;  %v20432_v21 = vunpack.i.l.bf16 %v20431_v16  ;;  %v24230_v16 = vld [vmem:[%s28073_s4 + $0xf8] sm:$0xff] }
 0x416   :  { %17883 = vmatmul.mubr.msk.f32.gmra.mrb[20].mxu1 %vm3691_vm11, %v24002_v27 }
 0x417   :  { %5851 = vmatprep.mubr.f32.mxu1 %v23643_v25 }
 0x41a   :  { %17884 = vmatmul.mubr.msk.f32.gmra.mrb[22].mxu1 %vm3691_vm11, %v24012_v10 }
 0x41b   :  { %5922 = vmatprep.mubr.f32.mxu1 %v23643_v25 }
 0x41e   :  { %17885 = vmatmul.mubr.msk.f32.vlgmr.msra.gmra.mrb[24].mxu1 %vm3691_vm11, %v23979_v43  ;;  %v20406_v43 = vpop.permute.xlu1 %20405 }
 0x41f   :  { %18399 = vmatpush1.bf16.msra.mxu1 %v18398_v60  ;;  %5928 = vmatprep.mubr.f32.mxu1 %v23643_v25  ;;  %v20408_v56 = vunpack.i.h.bf16 %v20406_v43  ;;  %v20407_v42 = vunpack.i.l.bf16 %v20406_v43 }
 0x420   :  { %18401 = vmatprep.subr.bf16.mxu1 %v18400_v59  ;;  %v6424_v59 = vsel %vm2731_vm8, %v20432_v21, %v20422_v37 }
 0x421   :  { %v6042_v3 = vsel %vm2364_vm7, %v20407_v42, %v20408_v56  ;;  %v6041_v5 = vsel %vm2364_vm7, %v20383_v24, %v20407_v42 }
 0x422   :  { %17886 = vmatmul.mubr.msk.f32.gmra.mrb[26].mxu1 %vm3691_vm11, %v23993_v46  ;;  %v6031_v46 = vsel %vm2364_vm7, %v20368_v19, %v20397_v13  ;;  %v20412_v19 = vunpack.i.l.bf16 %v20411_v34  ;;  %v18408_v20 = vpack.c.bf16 %v6042_v3, %v6037_v28  ;;  %v20416_v2 = vpop.permute.xlu1 %20415  ;;  %v18410_v7 = vpack.c.bf16 %v6041_v5, %v6036_v52  ;;  %v20441_v13 = vpop.permute.xlu0 %20440 }
 0x423   :  { %18403 = vmatpush1.bf16.msra.mxu1 %v18402_v63  ;;  %5934 = vmatprep.mubr.f32.mxu1 %v23643_v25  ;;  %v18406_v47 = vpack.c.bf16 %v6031_v46, %v6026_v6  ;;  %v20418_v51 = vunpack.i.h.bf16 %v20416_v2  ;;  %v20417_v61 = vunpack.i.l.bf16 %v20416_v2  ;;  %v20443_v60 = vunpack.i.h.bf16 %v20441_v13 }
 0x424   :  { %18405 = vmatprep.subr.bf16.mxu1 %v18404_v8  ;;  %v6028_v35 = vsel %vm2364_vm7, %v20393_v26, %v20412_v19  ;;  %v20442_v30 = vunpack.i.l.bf16 %v20441_v13 }
 0x425   :  { %v6038_v24 = vsel %vm2364_vm7, %v20403_v41, %v20417_v61  ;;  %v6043_v29 = vsel %vm2364_vm7, %v20408_v56, %v20418_v51  ;;  %v18416_v53 = vpack.c.bf16 %v20418_v51, %v20417_v61 }
 0x426   :  { %17887 = vmatmul.mubr.msk.f32.gmra.mrb[28].mxu1 %vm3691_vm11, %v24002_v27  ;;  %v24087_v27 = vld [vmem:[%s28073_s4 + $0xc0] sm:$0xff]  ;;  %v24112_v17 = vpop.permute.xlu1 %20425  ;;  %v18418_v15 = vpack.c.bf16 %v6043_v29, %v6038_v24  ;;  %v24160_v8 = vpop.permute.xlu0 %20450  ;;  %v6440_v42 = vsel %vm2731_vm8, %v20442_v30, %v20443_v60  ;;  %v24220_v24 = vld [vmem:[%s28073_s4 + $0xf0] sm:$0xff] }
 0x427   :  { %5940 = vmatprep.mubr.f32.mxu1 %v23643_v25  ;;  %v20428_v4 = vunpack.i.h.bf16 %v24112_v17  ;;  %v20427_v11 = vunpack.i.l.bf16 %v24112_v17  ;;  %v20453_v41 = vunpack.i.h.bf16 %v24160_v8  ;;  %v20452_v55 = vunpack.i.l.bf16 %v24160_v8 }
 0x429   :  { %v6430_v12 = vsel %vm2731_vm8, %v20427_v11, %v20428_v4  ;;  %v6429_v58 = vsel %vm2731_vm8, %v20433_v38, %v20427_v11  ;;  %v6427_v5 = vsel %vm2731_vm8, %v20452_v55, %v20453_v41 }
 0x42a   :  { %17888 = vmatmul.mubr.msk.f32.gmra.mrb[30].mxu1 %vm3691_vm11, %v24012_v10  ;;  %v20413_v10 = vunpack.i.h.bf16 %v20411_v34  ;;  %v24133_v48 = vpop.permute.xlu1 %20435  ;;  %v18422_v46 = vpack.c.bf16 %v6429_v58, %v6424_v59 }
 0x42b   :  { %6144 = vmatprep.mubr.f32.mxu1 %v23643_v25  ;;  %v20438_v26 = vunpack.i.h.bf16 %v24133_v48  ;;  %v20437_v32 = vunpack.i.l.bf16 %v24133_v48 }
 0x42c   :  { %v18412_v49 = vpack.c.bf16 %v20413_v10, %v20412_v19  ;;  %v6033_v23 = vsel %vm2364_vm7, %v20398_v1, %v20413_v10  ;;  %v18420_v1 = vpack.c.bf16 %v6430_v12, %v6425_v62  ;;  %v24182_v19 = vld [vmem:[#allocation2] sm:$0xff] }
 0x42d   :  { %v18414_v45 = vpack.c.bf16 %v6033_v23, %v6028_v35  ;;  %v6435_v56 = vsel %vm2731_vm8, %v20437_v32, %v20438_v26  ;;  %v6426_v23 = vsel %vm2731_vm8, %v20423_v14, %v20452_v55 }
 0x42e   :  { %17893 = vmatmul.mubr.msk.f32.vlgmr.msra.gmra.mrb[8].mxu1 %vm3691_vm11, %v24087_v27  ;;  %v20446_v18 = vpop.permute.xlu1 %20445  ;;  %v18424_v6 = vpack.c.bf16 %v6440_v42, %v6435_v56 }
 0x42f   :  { %18407 = vmatpush1.bf16.msra.mxu1 %v18406_v47  ;;  %6150 = vmatprep.mubr.f32.mxu1 %v23643_v25  ;;  %v20448_v63 = vunpack.i.h.bf16 %v20446_v18  ;;  %v20447_v22 = vunpack.i.l.bf16 %v20446_v18 }
 0x430   :  { %18409 = vmatprep.subr.bf16.mxu1 %v18408_v20 }
 0x431   :  { %v6439_v34 = vsel %vm2731_vm8, %v20448_v63, %v20442_v30  ;;  %v6434_v3 = vsel %vm2731_vm8, %v20447_v22, %v20437_v32 }
 0x432   :  { %17894 = vmatmul.mubr.msk.f32.gmra.mrb[10].mxu1 %vm3691_vm11, %v24101_v50  ;;  %v24156_v39 = vpop.permute.xlu1 %20455  ;;  %v18426_v28 = vpack.c.bf16 %v6439_v34, %v6434_v3 }
 0x433   :  { %18411 = vmatpush1.bf16.msra.mxu1 %v18410_v7  ;;  %6156 = vmatprep.mubr.f32.mxu1 %v23643_v25  ;;  %v20458_v43 = vunpack.i.h.bf16 %v24156_v39  ;;  %v20457_v54 = vunpack.i.l.bf16 %v24156_v39 }
 0x434   :  { %18413 = vmatprep.subr.bf16.mxu1 %v18412_v49 }
 0x435   :  { %v6432_v47 = vsel %vm2731_vm8, %v20457_v54, %v20458_v43 }
 0x436   :  { %17895 = vmatmul.mubr.msk.f32.gmra.mrb[12].mxu1 %vm3691_vm11, %v24110_v40  ;;  %v18428_v10 = vpack.c.bf16 %v6432_v47, %v6427_v5 }
 0x437   :  { %6162 = vmatprep.mubr.f32.mxu1 %v23643_v25 }
 0x43a   :  { %17896 = vmatmul.mubr.msk.f32.gmra.mrb[14].mxu1 %vm3691_vm11, %v24120_v57 }
 0x43b   :  { %6233 = vmatprep.mubr.f32.mxu1 %v23643_v25 }
 0x43e   :  { %17897 = vmatmul.mubr.msk.f32.vlgmr.msra.gmra.mrb[16].mxu1 %vm3691_vm11, %v24087_v27 }
 0x43f   :  { %18415 = vmatpush1.bf16.msra.mxu1 %v18414_v45  ;;  %6239 = vmatprep.mubr.f32.mxu1 %v23643_v25 }
 0x440   :  { %18417 = vmatprep.subr.bf16.mxu1 %v18416_v53 }
 0x442   :  { %17898 = vmatmul.mubr.msk.f32.gmra.mrb[18].mxu1 %vm3691_vm11, %v24101_v50 }
 0x443   :  { %18419 = vmatpush1.bf16.msra.mxu1 %v18418_v15  ;;  %6245 = vmatprep.mubr.f32.mxu1 %v23643_v25 }
 0x444   :  { %18421 = vmatprep.subr.bf16.mxu1 %v18420_v1 }
 0x446   :  { %17899 = vmatmul.mubr.msk.f32.gmra.mrb[20].mxu1 %vm3691_vm11, %v24110_v40 }
 0x447   :  { %6251 = vmatprep.mubr.f32.mxu1 %v23643_v25 }
 0x44a   :  { %17900 = vmatmul.mubr.msk.f32.gmra.mrb[22].mxu1 %vm3691_vm11, %v24120_v57 }
 0x44b   :  { %6322 = vmatprep.mubr.f32.mxu1 %v23643_v25 }
 0x44e   :  { %17901 = vmatmul.mubr.msk.f32.vlgmr.msra.gmra.mrb[24].mxu1 %vm3691_vm11, %v24087_v27  ;;  %v20466_v27 = vpop.permute.xlu1 %20465 }
 0x44f   :  { %18423 = vmatpush1.bf16.msra.mxu1 %v18422_v46  ;;  %6328 = vmatprep.mubr.f32.mxu1 %v23643_v25  ;;  %v20461_v25 = vpop.permute.xlu0 %20460  ;;  %v20468_v20 = vunpack.i.h.bf16 %v20466_v27  ;;  %v20467_v52 = vunpack.i.l.bf16 %v20466_v27 }
 0x450   :  { %18425 = vmatprep.subr.bf16.mxu1 %v18424_v6  ;;  %v20463_v2 = vunpack.i.h.bf16 %v20461_v25  ;;  %v20462_v7 = vunpack.i.l.bf16 %v20461_v25 }
 0x451   :  { %v6442_v35 = vsel %vm2731_vm8, %v20467_v52, %v20468_v20  ;;  %v6441_v61 = vsel %vm2731_vm8, %v20443_v60, %v20467_v52 }
 0x452   :  { %17902 = vmatmul.mubr.msk.f32.gmra.mrb[26].mxu1 %vm3691_vm11, %v24101_v50  ;;  %v6431_v50 = vsel %vm2731_vm8, %v20428_v4, %v20457_v54  ;;  %v6437_v51 = vsel %vm2731_vm8, %v20462_v7, %v20463_v2  ;;  %v6436_v48 = vsel %vm2731_vm8, %v20438_v26, %v20462_v7  ;;  %v20476_v14 = vpop.permute.xlu1 %20475 }
 0x453   :  { %18427 = vmatpush1.bf16.msra.mxu1 %v18426_v28  ;;  %6334 = vmatprep.mubr.f32.mxu1 %v24182_v19  ;;  %v20471_v49 = vpop.permute.xlu0 %20470  ;;  %v18430_v17 = vpack.c.bf16 %v6431_v50, %v6426_v23  ;;  %v18432_v11 = vpack.c.bf16 %v6442_v35, %v6437_v51  ;;  %v18434_v37 = vpack.c.bf16 %v6441_v61, %v6436_v48  ;;  %v20478_v62 = vunpack.i.h.bf16 %v20476_v14 }
 0x454   :  { %18429 = vmatprep.subr.bf16.mxu1 %v18428_v10  ;;  %v20472_v4 = vunpack.i.l.bf16 %v20471_v49  ;;  %v20477_v18 = vunpack.i.l.bf16 %v20476_v14 }
 0x455   :  { %v6443_v30 = vsel %vm2731_vm8, %v20468_v20, %v20478_v62 }
 0x456   :  { %17903 = vmatmul.mubr.msk.f32.gmra.mrb[28].mxu1 %vm3691_vm11, %v24110_v40  ;;  %v24197_v40 = vld [vmem:[%s28073_s4 + $0xe0] sm:$0xff]  ;;  %v24222_v29 = vpop.permute.xlu1 %20485  ;;  %v6428_v12 = vsel %vm2731_vm8, %v20453_v41, %v20472_v4  ;;  %v6438_v60 = vsel %vm2731_vm8, %v20463_v2, %v20477_v18  ;;  %v18440_v59 = vpack.c.bf16 %v20478_v62, %v20477_v18 }
 0x457   :  { %6340 = vmatprep.mubr.f32.mxu1 %v24182_v19  ;;  %v24232_v53 = vpop.permute.xlu0 %20480  ;;  %v20488_v1 = vunpack.i.h.bf16 %v24222_v29  ;;  %v20487_v13 = vunpack.i.l.bf16 %v24222_v29  ;;  %v18442_v63 = vpack.c.bf16 %v6443_v30, %v6438_v60  ;;  %v17924_v30 = vld [vmem:[%s28073_s4 + $0x118] sm:$0xff] }
 0x458   :  { %v20483_v21 = vunpack.i.h.bf16 %v24232_v53  ;;  %v20482_v26 = vunpack.i.l.bf16 %v24232_v53 }
 0x459   :  { %v6830_v58 = vsel %vm3098_vm9, %v20487_v13, %v20488_v1 }
 0x45a   :  { %17904 = vmatmul.mubr.msk.f32.gmra.mrb[30].mxu1 %vm3691_vm11, %v24120_v57  ;;  %v20473_v57 = vunpack.i.h.bf16 %v20471_v49  ;;  %v24243_v38 = vpop.permute.xlu1 %20495  ;;  %v6825_v22 = vsel %vm3098_vm9, %v20482_v26, %v20483_v21 }
 0x45b   :  { %6544 = vmatprep.mubr.f32.mxu1 %v24182_v19  ;;  %v20491_v39 = vpop.permute.xlu0 %20490  ;;  %v20498_v41 = vunpack.i.h.bf16 %v24243_v38  ;;  %v20497_v55 = vunpack.i.l.bf16 %v24243_v38  ;;  %v17922_v38 = vld [vmem:[%s28073_s4 + $0x108] sm:$0xff] }
 0x45c   :  { %v18436_v45 = vpack.c.bf16 %v20473_v57, %v20472_v4  ;;  %v6433_v15 = vsel %vm2731_vm8, %v20458_v43, %v20473_v57  ;;  %v18444_v43 = vpack.c.bf16 %v6830_v58, %v6825_v22  ;;  %v20493_v56 = vunpack.i.h.bf16 %v20491_v39 }
 0x45d   :  { %v18438_v32 = vpack.c.bf16 %v6433_v15, %v6428_v12  ;;  %v20492_v42 = vunpack.i.l.bf16 %v20491_v39  ;;  %v6835_v20 = vsel %vm3098_vm9, %v20497_v55, %v20498_v41 }
 0x45e   :  { %17909 = vmatmul.mubr.msk.f32.vlgmr.msra.gmra.mrb[8].mxu1 %vm3691_vm11, %v24197_v40  ;;  %v20506_v8 = vpop.permute.xlu1 %20505  ;;  %v6829_v47 = vsel %vm3098_vm9, %v20493_v56, %v20487_v13 }
 0x45f   :  { %18431 = vmatpush1.bf16.msra.mxu1 %v18430_v17  ;;  %6550 = vmatprep.mubr.f32.mxu1 %v24182_v19  ;;  %v20501_v54 = vpop.permute.xlu0 %20500  ;;  %v6824_v6 = vsel %vm3098_vm9, %v20492_v42, %v20482_v26  ;;  %v20508_v28 = vunpack.i.h.bf16 %v20506_v8  ;;  %v20507_v5 = vunpack.i.l.bf16 %v20506_v8  ;;  %v24353_v42 = vpack.i.bf16 %v24182_v19, %v24182_v19 }
 0x460   :  { %18433 = vmatprep.subr.bf16.mxu1 %v18432_v11  ;;  %v20503_v46 = vunpack.i.h.bf16 %v20501_v54  ;;  %v20502_v34 = vunpack.i.l.bf16 %v20501_v54  ;;  %v18446_v50 = vpack.c.bf16 %v6829_v47, %v6824_v6 }
 0x461   :  { %v6834_v35 = vsel %vm3098_vm9, %v20507_v5, %v20497_v55  ;;  %20540 = vrot.lane.b32.xlu0 %v24353_v42, %s22031_s23 }
 0x462   :  { %17910 = vmatmul.mubr.msk.f32.gmra.mrb[10].mxu1 %vm3691_vm11, %v24211_v33  ;;  %v24266_v3 = vpop.permute.xlu1 %20515  ;;  %v6840_v52 = vsel %vm3098_vm9, %v20502_v34, %v20503_v46  ;;  %v6839_v49 = vsel %vm3098_vm9, %v20508_v28, %v20502_v34 }
 0x463   :  { %18435 = vmatpush1.bf16.msra.mxu1 %v18434_v37  ;;  %6556 = vmatprep.mubr.f32.mxu1 %v24182_v19  ;;  %v24270_v10 = vpop.permute.xlu0 %20510  ;;  %v20518_v27 = vunpack.i.h.bf16 %v24266_v3  ;;  %v20517_v25 = vunpack.i.l.bf16 %v24266_v3  ;;  %v18448_v23 = vpack.c.bf16 %v6840_v52, %v6835_v20  ;;  %v18450_v51 = vpack.c.bf16 %v6839_v49, %v6834_v35 }
 0x464   :  { %18437 = vmatprep.subr.bf16.mxu1 %v18436_v45  ;;  %v20513_v2 = vunpack.i.h.bf16 %v24270_v10  ;;  %v20512_v7 = vunpack.i.l.bf16 %v24270_v10 }
 0x465   :  { %v6832_v17 = vsel %vm3098_vm9, %v20517_v25, %v20518_v27 }
 0x466   :  { %17911 = vmatmul.mubr.msk.f32.gmra.mrb[12].mxu1 %vm3691_vm11, %v24220_v24  ;;  %v6827_v61 = vsel %vm3098_vm9, %v20512_v7, %v20513_v2  ;;  %v6826_v15 = vsel %vm3098_vm9, %v20483_v21, %v20512_v7 }
 0x467   :  { %6562 = vmatprep.mubr.f32.mxu1 %v24182_v19  ;;  %v18452_v57 = vpack.c.bf16 %v6832_v17, %v6827_v61  ;;  %v20521_v4 = vpop.permute.xlu0 %20520 }
 0x468   :  { %v20523_v14 = vunpack.i.h.bf16 %v20521_v4  ;;  %v20522_v37 = vunpack.i.l.bf16 %v20521_v4 }
 0x46a   :  { %17912 = vmatmul.mubr.msk.f32.gmra.mrb[14].mxu1 %vm3691_vm11, %v24230_v16  ;;  %v6837_v29 = vsel %vm3098_vm9, %v20522_v37, %v20523_v14  ;;  %v6836_v53 = vsel %vm3098_vm9, %v20498_v41, %v20522_v37 }
 0x46b   :  { %6633 = vmatprep.mubr.f32.mxu1 %v24182_v19  ;;  %v20531_v45 = vpop.permute.xlu0 %20530 }
 0x46e   :  { %17913 = vmatmul.mubr.msk.f32.vlgmr.msra.gmra.mrb[16].mxu1 %vm3691_vm11, %v24197_v40 }
 0x46f   :  { %18439 = vmatpush1.bf16.msra.mxu1 %v18438_v32  ;;  %6639 = vmatprep.mubr.f32.mxu1 %v24182_v19  ;;  %v17923_v32 = vld [vmem:[%s28073_s4 + $0x110] sm:$0xff]  ;;  %v24357_v41 = vpop.permute.xlu0 %3529 }
 0x470   :  { %18441 = vmatprep.subr.bf16.mxu1 %v18440_v59 }
 0x472   :  { %17914 = vmatmul.mubr.msk.f32.gmra.mrb[18].mxu1 %vm3691_vm11, %v24211_v33 }
 0x473   :  { %18443 = vmatpush1.bf16.msra.mxu1 %v18442_v63  ;;  %6645 = vmatprep.mubr.f32.mxu1 %v24182_v19  ;;  %v24371_v7 = vpop.permute.xlu0 %3539 }
 0x474   :  { %18445 = vmatprep.subr.bf16.mxu1 %v18444_v43 }
 0x476   :  { %17915 = vmatmul.mubr.msk.f32.gmra.mrb[20].mxu1 %vm3691_vm11, %v24220_v24 }
 0x477   :  { %6651 = vmatprep.mubr.f32.mxu1 %v24182_v19 }
 0x47a   :  { %17916 = vmatmul.mubr.msk.f32.gmra.mrb[22].mxu1 %vm3691_vm11, %v24230_v16 }
 0x47b   :  { %6722 = vmatprep.mubr.f32.mxu1 %v24182_v19 }
 0x47e   :  { %17917 = vmatmul.mubr.msk.f32.vlgmr.msra.gmra.mrb[24].mxu1 %vm3691_vm11, %v24197_v40  ;;  %v20526_v40 = vpop.permute.xlu1 %20525 }
 0x47f   :  { %18447 = vmatpush1.bf16.msra.mxu1 %v18446_v50  ;;  %6728 = vmatprep.mubr.f32.mxu1 %v24182_v19  ;;  %v20528_v11 = vunpack.i.h.bf16 %v20526_v40  ;;  %v20527_v48 = vunpack.i.l.bf16 %v20526_v40 }
 0x480   :  { %18449 = vmatprep.subr.bf16.mxu1 %v18448_v23 }
 0x481   :  { %v6842_v12 = vsel %vm3098_vm9, %v20527_v48, %v20528_v11  ;;  %v6841_v18 = vsel %vm3098_vm9, %v20503_v46, %v20527_v48 }
 0x482   :  { %17918 = vmatmul.mubr.msk.f32.gmra.mrb[26].mxu1 %vm3691_vm11, %v24211_v33  ;;  %v6831_v33 = vsel %vm3098_vm9, %v20488_v1, %v20517_v25  ;;  %v20533_v1 = vunpack.i.h.bf16 %v20531_v45  ;;  %v18456_v13 = vpack.c.bf16 %v6842_v12, %v6837_v29  ;;  %v18458_v21 = vpack.c.bf16 %v6841_v18, %v6836_v53  ;;  %v20536_v60 = vpop.permute.xlu1 %20535 }
 0x483   :  { %18451 = vmatpush1.bf16.msra.mxu1 %v18450_v51  ;;  %6734 = vmatprep.mubr.f32.mxu1 %v24182_v19  ;;  %v18454_v62 = vpack.c.bf16 %v6831_v33, %v6826_v15  ;;  %v20538_v58 = vunpack.i.h.bf16 %v20536_v60  ;;  %v20537_v63 = vunpack.i.l.bf16 %v20536_v60 }
 0x484   :  { %18453 = vmatprep.subr.bf16.mxu1 %v18452_v57  ;;  %v6833_v59 = vsel %vm3098_vm9, %v20518_v27, %v20533_v1 }
 0x485   :  { %v6838_v8 = vsel %vm3098_vm9, %v20523_v14, %v20537_v63  ;;  %v6843_v43 = vsel %vm3098_vm9, %v20528_v11, %v20538_v58  ;;  %v18464_v54 = vpack.c.bf16 %v20538_v58, %v20537_v63 }
 0x486   :  { %17919 = vmatmul.mubr.msk.f32.gmra.mrb[28].mxu1 %vm3691_vm11, %v24220_v24  ;;  %v17921_v24 = vld [vmem:[%s28073_s4 + $0x100] sm:$0xff]  ;;  %v18466_v56 = vpack.c.bf16 %v6843_v43, %v6838_v8  ;;  %v24361_v47 = vpop.permute.xlu1 %3534 }
 0x487   :  { %6740 = vmatprep.mubr.f32.mxu1 %v24182_v19 }
 0x48a   :  { %17920 = vmatmul.mubr.msk.f32.gmra.mrb[30].mxu1 %vm3691_vm11, %v24230_v16  ;;  %v20532_v16 = vunpack.i.l.bf16 %v20531_v45  ;;  %v24393_v48 = vpop.permute.xlu1 %3544 }
 0x48b   :  { %6944 = vmatprep.mubr.f32.mxu1 %v24182_v19 }
 0x48c   :  { %v18460_v26 = vpack.c.bf16 %v20533_v1, %v20532_v16  ;;  %v6828_v39 = vsel %vm3098_vm9, %v20513_v2, %v20532_v16 }
 0x48d   :  { %v18462_v22 = vpack.c.bf16 %v6833_v59, %v6828_v39 }
 0x48e   :  { %17925 = vmatmul.mubr.msk.f32.vlgmr.msra.gmra.mrb[8].mxu1 %vm3691_vm11, %v17921_v24 }
 0x48f   :  { %18455 = vmatpush1.bf16.msra.mxu1 %v18454_v62  ;;  %6950 = vmatprep.mubr.f32.mxu1 %v24182_v19 }
 0x490   :  { %18457 = vmatprep.subr.bf16.mxu1 %v18456_v13 }
 0x492   :  { %17926 = vmatmul.mubr.msk.f32.gmra.mrb[10].mxu1 %vm3691_vm11, %v17922_v38 }
 0x493   :  { %18459 = vmatpush1.bf16.msra.mxu1 %v18458_v21  ;;  %6956 = vmatprep.mubr.f32.mxu1 %v24182_v19 }
 0x494   :  { %18461 = vmatprep.subr.bf16.mxu1 %v18460_v26 }
 0x496   :  { %17927 = vmatmul.mubr.msk.f32.gmra.mrb[12].mxu1 %vm3691_vm11, %v17923_v32 }
 0x497   :  { %6962 = vmatprep.mubr.f32.mxu1 %v24182_v19 }
 0x49a   :  { %17928 = vmatmul.mubr.msk.f32.gmra.mrb[14].mxu1 %vm3691_vm11, %v17924_v30 }
 0x49b   :  { %7033 = vmatprep.mubr.f32.mxu1 %v24182_v19 }
 0x49e   :  { %17929 = vmatmul.mubr.msk.f32.vlgmr.msra.gmra.mrb[16].mxu1 %vm3691_vm11, %v17921_v24 }
 0x49f   :  { %18463 = vmatpush1.bf16.msra.mxu1 %v18462_v22  ;;  %7039 = vmatprep.mubr.f32.mxu1 %v24182_v19 }
 0x4a0   :  { %18465 = vmatprep.subr.bf16.mxu1 %v18464_v54 }
 0x4a2   :  { %17930 = vmatmul.mubr.msk.f32.gmra.mrb[18].mxu1 %vm3691_vm11, %v17922_v38 }
 0x4a3   :  { %18467 = vmatpush1.bf16.msra.mxu1 %v18466_v56  ;;  %7045 = vmatprep.mubr.f32.mxu1 %v24182_v19 }
 0x4a6   :  { %17931 = vmatmul.mubr.msk.f32.gmra.mrb[20].mxu1 %vm3691_vm11, %v17923_v32 }
 0x4a7   :  { %7051 = vmatprep.mubr.f32.mxu1 %v24182_v19 }
 0x4aa   :  { %17932 = vmatmul.mubr.msk.f32.gmra.mrb[22].mxu1 %vm3691_vm11, %v17924_v30 }
 0x4ab   :  { %7122 = vmatprep.mubr.f32.mxu1 %v24182_v19 }
 0x4ae   :  { %17933 = vmatmul.mubr.msk.f32.vlgmr.msra.gmra.mrb[24].mxu1 %vm3691_vm11, %v17921_v24 }
 0x4af   :  { %7128 = vmatprep.mubr.f32.mxu1 %v24182_v19 }
 0x4b2   :  { %17934 = vmatmul.mubr.msk.f32.gmra.mrb[26].mxu1 %vm3691_vm11, %v17922_v38 }
 0x4b3   :  { %7134 = vmatprep.mubr.f32.mxu1 %v24182_v19 }
 0x4b6   :  { %17935 = vmatmul.mubr.msk.f32.gmra.mrb[28].mxu1 %vm3691_vm11, %v17923_v32 }
 0x4b7   :  { %7140 = vmatprep.mubr.f32.mxu1 %v24182_v19 }
 0x4ba   :  { %17936 = vmatmul.mubr.msk.f32.gmra.mrb[30].mxu1 %vm3691_vm11, %v17924_v30 }
 0x4bb   :  { %11206 = vmatprep.mubr.f32.mxu1 %v24182_v19 }
 0x561   :  { %v6946_v55 = vpop.f32.mrb[8].mxu1 }
 0x562   :  { %v19150_v46 = vadd.f32 %v6946_v55, %v24357_v41  ;;  %v6948_v34 = vpop.f32.mrb[9].mxu1 }
 0x563   :  { %v19151_v3 = vadd.f32 %v6948_v34, %v24357_v41 }
 0x564   :  { %v7171_v6 = vmax.f32 %v19150_v46, 0.0 }
 0x565   :  { %v7172_v28 = vmax.f32 %v19151_v3, 0.0  ;;  %v6952_v5 = vpop.f32.mrb[10].mxu1 }
 0x566   :  { %v24364_v10 = vmul.f32 %v7171_v6, %v23033_v0  ;;  %v19152_v27 = vadd.f32 %v6952_v5, %v24361_v47  ;;  %v6954_v25 = vpop.f32.mrb[11].mxu1 }
 0x567   :  { %v24368_v20 = vmul.f32 %v7172_v28, %v23037_v9  ;;  %v19153_v52 = vadd.f32 %v6954_v25, %v24361_v47 }
 0x568   :  { %v7177_v2 = vmax.f32 %v19152_v27, 0.0 }
 0x569   :  { %v7178_v50 = vmax.f32 %v19153_v52, 0.0  ;;  %v6958_v49 = vpop.f32.mrb[12].mxu1  ;;  %v24375_v35 = vpack.i.bf16 %v24368_v20, %v24364_v10 }
 0x56a   :  { %v24378_v23 = vmul.f32 %v7177_v2, %v23033_v0  ;;  %v19154_v17 = vadd.f32 %v6958_v49, %v24371_v7  ;;  %v6960_v51 = vpop.f32.mrb[13].mxu1 }
 0x56b   :  { %v24382_v61 = vmul.f32 %v7178_v50, %v23037_v9  ;;  %v19155_v57 = vadd.f32 %v6960_v51, %v24371_v7  ;;  %20545 = vrot.lane.b32.xlu0 %v24375_v35, %s22031_s23 }
 0x56c   :  { %v7183_v40 = vmax.f32 %v19154_v17, 0.0  ;;  %v24389_v4 = vpack.i.bf16 %v24378_v23, %v24364_v10 }
 0x56d   :  { %v7184_v14 = vmax.f32 %v19155_v57, 0.0  ;;  %v6964_v37 = vpop.f32.mrb[14].mxu1  ;;  %v24397_v33 = vpack.i.bf16 %v24382_v61, %v24378_v23 }
 0x56e   :  { %v24402_v24 = vmul.f32 %v7183_v40, %v23033_v0  ;;  %v19156_v12 = vadd.f32 %v6964_v37, %v24393_v48  ;;  %v6966_v15 = vpop.f32.mrb[15].mxu1 }
 0x56f   :  { %v24406_v62 = vmul.f32 %v7184_v14, %v23037_v9  ;;  %v19157_v29 = vadd.f32 %v6966_v15, %v24393_v48  ;;  %20550 = vrot.lane.b32.xlu1 %v24397_v33, %s22031_s23 }
 0x570   :  { %v7189_v18 = vmax.f32 %v19156_v12, 0.0 }
 0x571   :  { %v7190_v1 = vmax.f32 %v19157_v29, 0.0  ;;  %v7035_v16 = vpop.f32.mrb[16].mxu1  ;;  %v24413_v13 = vpack.i.bf16 %v24406_v62, %v24402_v24 }
 0x572   :  { %v24416_v38 = vmul.f32 %v7189_v18, %v23033_v0  ;;  %v19158_v53 = vadd.f32 %v7035_v16, %v24357_v41  ;;  %v7037_v21 = vpop.f32.mrb[17].mxu1 }
 0x573   :  { %v24420_v26 = vmul.f32 %v7190_v1, %v23037_v9  ;;  %v19159_v32 = vadd.f32 %v7037_v21, %v24357_v41  ;;  %20555 = vrot.lane.b32.xlu1 %v24413_v13, %s22031_s23 }
 0x574   :  { %v7173_v60 = vmax.f32 %v19158_v53, 0.0  ;;  %v24427_v30 = vpack.i.bf16 %v24416_v38, %v24402_v24 }
 0x575   :  { %v7174_v59 = vmax.f32 %v19159_v32, 0.0  ;;  %v7041_v58 = vpop.f32.mrb[18].mxu1  ;;  %v24433_v63 = vpack.i.bf16 %v24420_v26, %v24416_v38 }
 0x576   :  { %v24438_v8 = vmul.f32 %v7173_v60, %v23054_v31  ;;  %v19160_v43 = vadd.f32 %v7041_v58, %v24361_v47  ;;  %v7043_v54 = vpop.f32.mrb[19].mxu1 }
 0x577   :  { %v24442_v56 = vmul.f32 %v7174_v59, %v23062_v36  ;;  %v19161_v55 = vadd.f32 %v7043_v54, %v24361_v47  ;;  %20565 = vrot.lane.b32.xlu1 %v24353_v42, %s22031_s23  ;;  %20560 = vrot.lane.b32.xlu0 %v24433_v63, %s22031_s23 }
 0x578   :  { %v7179_v46 = vmax.f32 %v19160_v43, 0.0  ;;  %v24451_v34 = vpack.i.bf16 %v24438_v8, %v24368_v20 }
 0x579   :  { %v7180_v3 = vmax.f32 %v19161_v55, 0.0  ;;  %v7047_v6 = vpop.f32.mrb[20].mxu1  ;;  %v24455_v28 = vpack.i.bf16 %v24442_v56, %v24438_v8 }
 0x57a   :  { %v24458_v5 = vmul.f32 %v7179_v46, %v23054_v31  ;;  %v19162_v27 = vadd.f32 %v7047_v6, %v24371_v7  ;;  %v7049_v25 = vpop.f32.mrb[21].mxu1 }
 0x57b   :  { %v24462_v52 = vmul.f32 %v7180_v3, %v23062_v36  ;;  %v19163_v2 = vadd.f32 %v7049_v25, %v24371_v7  ;;  %20570 = vrot.lane.b32.xlu0 %v24455_v28, %s22031_s23 }
 0x57c   :  { %v7185_v50 = vmax.f32 %v19162_v27, 0.0  ;;  %v24469_v49 = vpack.i.bf16 %v24458_v5, %v24382_v61 }
 0x57d   :  { %v7186_v51 = vmax.f32 %v19163_v2, 0.0  ;;  %v7053_v57 = vpop.f32.mrb[22].mxu1  ;;  %v24475_v40 = vpack.i.bf16 %v24462_v52, %v24458_v5 }
 0x57e   :  { %v24480_v37 = vmul.f32 %v7185_v50, %v23054_v31  ;;  %v19164_v12 = vadd.f32 %v7053_v57, %v24393_v48  ;;  %v7055_v15 = vpop.f32.mrb[23].mxu1  ;;  %v28114_v57 = vld [vmem:[#allocation5_spill] sm:$0xff] }
 0x57f   :  { %v24484_v29 = vmul.f32 %v7186_v51, %v23062_v36  ;;  %v19165_v18 = vadd.f32 %v7055_v15, %v24393_v48  ;;  %20575 = vrot.lane.b32.xlu1 %v24475_v40, %s22031_s23 }
 0x580   :  { %v7191_v1 = vmax.f32 %v19164_v12, 0.0  ;;  %v24491_v16 = vpack.i.bf16 %v24480_v37, %v24406_v62 }
 0x581   :  { %v7192_v53 = vmax.f32 %v19165_v18, 0.0  ;;  %v7124_v21 = vpop.f32.mrb[24].mxu1  ;;  %v24495_v32 = vpack.i.bf16 %v24484_v29, %v24480_v37 }
 0x582   :  { %v24498_v60 = vmul.f32 %v7191_v1, %v23054_v31  ;;  %v19166_v59 = vadd.f32 %v7124_v21, %v24357_v41  ;;  %v7126_v58 = vpop.f32.mrb[25].mxu1 }
 0x583   :  { %v24502_v43 = vmul.f32 %v7192_v53, %v23062_v36  ;;  %v19167_v54 = vadd.f32 %v7126_v58, %v24357_v41  ;;  %20580 = vrot.lane.b32.xlu0 %v24495_v32, %s22031_s23 }
 0x584   :  { %v7175_v55 = vmax.f32 %v19166_v59, 0.0  ;;  %v24509_v46 = vpack.i.bf16 %v24498_v60, %v24420_v26 }
 0x585   :  { %v7176_v6 = vmax.f32 %v19167_v54, 0.0  ;;  %v7130_v27 = vpop.f32.mrb[26].mxu1  ;;  %v24515_v25 = vpack.i.bf16 %v24502_v43, %v24498_v60 }
 0x586   :  { %v24520_v2 = vmul.f32 %v7175_v55, %v23143_v44  ;;  %v19168_v50 = vadd.f32 %v7130_v27, %v24361_v47  ;;  %v7132_v51 = vpop.f32.mrb[27].mxu1 }
 0x587   :  { %v7200_v12 = vmul.f32 %v7176_v6, %v28114_v57  ;;  %v19169_v15 = vadd.f32 %v7132_v51, %v24361_v47  ;;  %20585 = vrot.lane.b32.xlu1 %v24515_v25, %s22031_s23 }
 0x588   :  { %v7181_v18 = vmax.f32 %v19168_v50, 0.0  ;;  %v24529_v1 = vpack.i.bf16 %v24520_v2, %v24442_v56 }
 0x589   :  { %7224 = vst.msk [vmem:[#allocation3 + $0x30] sm:$0xff] %vm3503_vm10, %v7200_v12  ;;  %v7182_v53 = vmax.f32 %v19169_v15, 0.0  ;;  %v7136_v21 = vpop.f32.mrb[28].mxu1 }
 0x58a   :  { %v24533_v59 = vmul.f32 %v7181_v18, %v23143_v44  ;;  %v19170_v58 = vadd.f32 %v7136_v21, %v24371_v7  ;;  %v7138_v54 = vpop.f32.mrb[29].mxu1 }
 0x58b   :  { %v7206_v47 = vmul.f32 %v7182_v53, %v28114_v57  ;;  %v19171_v55 = vadd.f32 %v7138_v54, %v24371_v7 }
 0x58c   :  { %v7187_v6 = vmax.f32 %v19170_v58, 0.0  ;;  %v20589_v27 = vpack.i.bf16 %v24533_v59, %v24520_v2  ;;  %v24542_v50 = vpack.i.bf16 %v24533_v59, %v24462_v52 }
 0x58d   :  { %7230 = vst.msk [vmem:[#allocation3 + $0x68] sm:$0xff] %vm3503_vm10, %v7206_v47  ;;  %v7188_v12 = vmax.f32 %v19171_v55, 0.0  ;;  %v7142_v15 = vpop.f32.mrb[30].mxu1 }
 0x58e   :  { %v24548_v18 = vmul.f32 %v7187_v6, %v23143_v44  ;;  %v19172_v7 = vadd.f32 %v7142_v15, %v24393_v48  ;;  %v7144_v53 = vpop.f32.mrb[31].mxu1  ;;  %20590 = vrot.lane.b32.xlu0 %v20589_v27, %s22031_s23 }
 0x58f   :  { %v7212_v21 = vmul.f32 %v7188_v12, %v28114_v57  ;;  %v19173_v58 = vadd.f32 %v7144_v53, %v24393_v48 }
 0x590   :  { %v7193_v54 = vmax.f32 %v19172_v7, 0.0  ;;  %v24556_v51 = vpack.i.bf16 %v24548_v18, %v24484_v29 }
 0x591   :  { %7236 = vst.msk [vmem:[#allocation3 + $0xa0] sm:$0xff] %vm3503_vm10, %v7212_v21  ;;  %v7194_v47 = vmax.f32 %v19173_v58, 0.0 }
 0x592   :  { %v24560_v55 = vmul.f32 %v7193_v54, %v23143_v44  ;;  %20600 = vrot.lane.b32.xlu0 %v24375_v35, %s22032_s26 }
 0x593   :  { %v7218_v6 = vmul.f32 %v7194_v47, %v28114_v57 }
 0x594   :  { %v20594_v12 = vpack.i.bf16 %v24560_v55, %v24548_v18  ;;  %v24569_v48 = vpack.i.bf16 %v24560_v55, %v24502_v43 }
 0x595   :  { %7242 = vst.msk [vmem:[#allocation3 + $0xd8] sm:$0xff] %vm3503_vm10, %v7218_v6 }
 0x596   :  { %20610 = vrot.lane.b32.xlu0 %v24353_v42, %s22032_s26  ;;  %20595 = vrot.lane.b32.xlu1 %v20594_v12, %s22031_s23 }
 0x598   :  { %v24634_v7 = vld [vmem:[#allocation3 + $0xa0] sm:$0xff] }
 0x59a   :  { %20620 = vrot.lane.b32.xlu0 %v24433_v63, %s22032_s26  ;;  %20605 = vrot.lane.b32.xlu1 %v24397_v33, %s22032_s26 }
 0x59e   :  { %20630 = vrot.lane.b32.xlu0 %v24455_v28, %s22032_s26  ;;  %20615 = vrot.lane.b32.xlu1 %v24413_v13, %s22032_s26 }
 0x5a2   :  { %20640 = vrot.lane.b32.xlu0 %v24495_v32, %s22032_s26  ;;  %20625 = vrot.lane.b32.xlu1 %v24353_v42, %s22032_s26 }
 0x5a6   :  { %20650 = vrot.lane.b32.xlu0 %v20589_v27, %s22032_s26  ;;  %20635 = vrot.lane.b32.xlu1 %v24475_v40, %s22032_s26 }
 0x5aa   :  { %20660 = vrot.lane.b32.xlu0 %v24375_v35, %s22033_s27  ;;  %20645 = vrot.lane.b32.xlu1 %v24515_v25, %s22032_s26 }
 0x5ae   :  { %20670 = vrot.lane.b32.xlu0 %v24353_v42, %s22033_s27  ;;  %20655 = vrot.lane.b32.xlu1 %v20594_v12, %s22032_s26 }
 0x5b2   :  { %20680 = vrot.lane.b32.xlu0 %v24433_v63, %s22033_s27  ;;  %20665 = vrot.lane.b32.xlu1 %v24397_v33, %s22033_s27 }
 0x5b6   :  { %20690 = vrot.lane.b32.xlu0 %v24455_v28, %s22033_s27  ;;  %20675 = vrot.lane.b32.xlu1 %v24413_v13, %s22033_s27 }
 0x5ba   :  { %20700 = vrot.lane.b32.xlu0 %v24495_v32, %s22033_s27  ;;  %20685 = vrot.lane.b32.xlu1 %v24353_v42, %s22033_s27 }
 0x5be   :  { %20710 = vrot.lane.b32.xlu0 %v20589_v27, %s22033_s27  ;;  %20695 = vrot.lane.b32.xlu1 %v24475_v40, %s22033_s27 }
 0x5c2   :  { %20720 = vrot.lane.b32.xlu0 %v24375_v35, %s22034_s30  ;;  %20705 = vrot.lane.b32.xlu1 %v24515_v25, %s22033_s27  ;;  %v8520_v35 = vld [vmem:[#allocation3 + $0x30] sm:$0xff] }
 0x5c3   :  { %v20769_v27 = vpack.i.bf16 %v8520_v35, %v24520_v2 }
 0x5c6   :  { %20730 = vrot.lane.b32.xlu0 %v24353_v42, %s22034_s30  ;;  %20715 = vrot.lane.b32.xlu1 %v20594_v12, %s22033_s27 }
 0x5ca   :  { %20740 = vrot.lane.b32.xlu0 %v24433_v63, %s22034_s30  ;;  %20725 = vrot.lane.b32.xlu1 %v24397_v33, %s22034_s30  ;;  %v20541_v33 = vpop.permute.xlu0 %20540  ;;  %v8527_v63 = vld [vmem:[#allocation3 + $0x68] sm:$0xff] }
 0x5cb   :  { %v20542_v53 = vunpack.i.l.bf16 %v20541_v33 }
 0x5ce   :  { %20750 = vrot.lane.b32.xlu0 %v24455_v28, %s22034_s30  ;;  %20735 = vrot.lane.b32.xlu1 %v24413_v13, %s22034_s30  ;;  %v20779_v13 = vpack.i.bf16 %v24634_v7, %v24548_v18 }
 0x5d2   :  { %20760 = vrot.lane.b32.xlu0 %v24495_v32, %s22034_s30  ;;  %20745 = vrot.lane.b32.xlu1 %v24353_v42, %s22034_s30  ;;  %v20774_v42 = vpack.i.bf16 %v8527_v63, %v24533_v59  ;;  %v24645_v32 = vld [vmem:[#allocation3 + $0xd8] sm:$0xff] }
 0x5d3   :  { %v20784_v54 = vpack.i.bf16 %v24645_v32, %v24560_v55 }
 0x5d6   :  { %20770 = vrot.lane.b32.xlu0 %v20769_v27, %s22034_s30  ;;  %20755 = vrot.lane.b32.xlu1 %v24475_v40, %s22034_s30  ;;  %v20543_v40 = vunpack.i.h.bf16 %v20541_v33 }
 0x5da   :  { %20780 = vrot.lane.b32.xlu0 %v20779_v13, %s22034_s30  ;;  %20765 = vrot.lane.b32.xlu1 %v24515_v25, %s22034_s30 }
 0x5dd   :  { %v20546_v28 = vpop.permute.xlu0 %20545 }
 0x5de   :  { %20790 = vrot.lane.b32.xlu0 %v24451_v34, %s22035_s15  ;;  %20775 = vrot.lane.b32.xlu1 %v20774_v42, %s22034_s30  ;;  %v20548_v21 = vunpack.i.h.bf16 %v20546_v28  ;;  %v20547_v58 = vunpack.i.l.bf16 %v20546_v28 }
 0x5e0   :  { %v7367_v12 = vsel %vm167_vm0, %v20542_v53, %v20547_v58  ;;  %v7368_v13 = vsel %vm167_vm0, %v20547_v58, %v20548_v21 }
 0x5e1   :  { %v20551_v47 = vpop.permute.xlu1 %20550 }
 0x5e2   :  { %v20553_v6 = vunpack.i.h.bf16 %v20551_v47  ;;  %v20552_v25 = vunpack.i.l.bf16 %v20551_v47  ;;  %20800 = vrot.lane.b32.xlu0 %v24389_v4, %s22035_s15  ;;  %20785 = vrot.lane.b32.xlu1 %v20784_v54, %s22034_s30 }
 0x5e4   :  { %v7372_v27 = vsel %vm167_vm0, %v20543_v40, %v20552_v25  ;;  %v7373_v33 = vsel %vm167_vm0, %v20552_v25, %v20553_v6 }
 0x5e5   :  { %v24659_v42 = vpop.permute.xlu1 %20555  ;;  %v18468_v28 = vpack.c.bf16 %v7373_v33, %v7368_v13  ;;  %v18470_v15 = vpack.c.bf16 %v7372_v27, %v7367_v12 }
 0x5e6   :  { %20810 = vrot.lane.b32.xlu0 %v24509_v46, %s22035_s15  ;;  %20795 = vrot.lane.b32.xlu1 %v24469_v49, %s22035_s15  ;;  %v20558_v54 = vunpack.i.h.bf16 %v24659_v42  ;;  %v20557_v53 = vunpack.i.l.bf16 %v24659_v42 }
 0x5e7   :  { %18469 = vmatprep.subr.bf16.mxu0 %v18468_v28 }
 0x5e8   :  { %18471 = vmatpush1.bf16.msra.mxu0 %v18470_v15  ;;  %v7378_v13 = vsel %vm167_vm0, %v20557_v53, %v20558_v54 }
 0x5e9   :  { %v20566_v40 = vpop.permute.xlu1 %20565  ;;  %v20561_v58 = vpop.permute.xlu0 %20560 }
 0x5ea   :  { %v20568_v47 = vunpack.i.h.bf16 %v20566_v40  ;;  %v20567_v25 = vunpack.i.l.bf16 %v20566_v40  ;;  %v20563_v3 = vunpack.i.h.bf16 %v20561_v58  ;;  %v20562_v41 = vunpack.i.l.bf16 %v20561_v58  ;;  %20820 = vrot.lane.b32.xlu0 %v24529_v1, %s22035_s15  ;;  %20805 = vrot.lane.b32.xlu1 %v24491_v16, %s22035_s15 }
 0x5ec   :  { %v7377_v12 = vsel %vm167_vm0, %v20567_v25, %v20557_v53  ;;  %v7382_v27 = vsel %vm167_vm0, %v20568_v47, %v20562_v41  ;;  %v7383_v15 = vsel %vm167_vm0, %v20562_v41, %v20563_v3  ;;  %v24683_v47 = vpack.i.bf16 %v8527_v63, %v8520_v35  ;;  %v24688_v41 = vld [vmem:[%s28075_s6] sm:$0xff] }
 0x5ed   :  { %v24675_v33 = vpop.permute.xlu0 %20570  ;;  %v18472_v42 = vpack.c.bf16 %v7383_v15, %v7378_v13  ;;  %v18474_v28 = vpack.c.bf16 %v7382_v27, %v7377_v12  ;;  %v24702_v27 = vld [vmem:[%s28075_s6 + $0x8] sm:$0xff] }
 0x5ee   :  { %20830 = vrot.lane.b32.xlu0 %v24556_v51, %s22035_s15  ;;  %20815 = vrot.lane.b32.xlu1 %v24427_v30, %s22035_s15  ;;  %v20573_v40 = vunpack.i.h.bf16 %v24675_v33  ;;  %v20572_v58 = vunpack.i.l.bf16 %v24675_v33 }
 0x5ef   :  { %18473 = vmatprep.subr.bf16.mxu0 %v18472_v42 }
 0x5f0   :  { %18475 = vmatpush1.bf16.msra.mxu0 %v18474_v28  ;;  %v7369_v35 = vsel %vm167_vm0, %v20548_v21, %v20572_v58  ;;  %v7370_v13 = vsel %vm167_vm0, %v20572_v58, %v20573_v40  ;;  %v24715_v58 = vpack.i.bf16 %v24645_v32, %v24634_v7 }
 0x5f1   :  { %v20576_v53 = vpop.permute.xlu1 %20575 }
 0x5f2   :  { %v20578_v25 = vunpack.i.h.bf16 %v20576_v53  ;;  %v20577_v12 = vunpack.i.l.bf16 %v20576_v53  ;;  %20840 = vrot.lane.b32.xlu0 %v24683_v47, %s22035_s15  ;;  %20825 = vrot.lane.b32.xlu1 %v24542_v50, %s22035_s15  ;;  %v24720_v53 = vld [vmem:[%s28075_s6 + $0x10] sm:$0xff] }
 0x5f3   :  { %17937 = vmatmul.mubr.msk.f32.vlgmr.msra.gmra.mrb[24].mxu0 %vm3691_vm11, %v24688_v41 }
 0x5f4   :  { %v7374_v63 = vsel %vm167_vm0, %v20553_v6, %v20577_v12  ;;  %7493 = vmatprep.mubr.f32.mxu0 %v24182_v19  ;;  %v7375_v15 = vsel %vm167_vm0, %v20577_v12, %v20578_v25 }
 0x5f5   :  { %v20581_v33 = vpop.permute.xlu0 %20580  ;;  %v18476_v42 = vpack.c.bf16 %v7375_v15, %v7370_v13  ;;  %v18478_v28 = vpack.c.bf16 %v7374_v63, %v7369_v35  ;;  %v24734_v13 = vld [vmem:[%s28075_s6 + $0x18] sm:$0xff] }
 0x5f6   :  { %20850 = vrot.lane.b32.xlu0 %v24451_v34, %s22036_s0  ;;  %20835 = vrot.lane.b32.xlu1 %v24569_v48, %s22035_s15  ;;  %v20583_v21 = vunpack.i.h.bf16 %v20581_v33  ;;  %v20582_v6 = vunpack.i.l.bf16 %v20581_v33 }
 0x5f7   :  { %17938 = vmatmul.mubr.msk.f32.gmra.mrb[26].mxu0 %vm3691_vm11, %v24702_v27  ;;  %18477 = vmatprep.subr.bf16.mxu0 %v18476_v42 }
 0x5f8   :  { %18479 = vmatpush1.bf16.msra.mxu0 %v18478_v28  ;;  %7499 = vmatprep.mubr.f32.mxu0 %v24182_v19  ;;  %v7379_v7 = vsel %vm167_vm0, %v20558_v54, %v20582_v6  ;;  %v7380_v15 = vsel %vm167_vm0, %v20582_v6, %v20583_v21 }
 0x5f9   :  { %v20586_v12 = vpop.permute.xlu1 %20585 }
 0x5fa   :  { %v20588_v35 = vunpack.i.h.bf16 %v20586_v12  ;;  %v20587_v63 = vunpack.i.l.bf16 %v20586_v12  ;;  %20860 = vrot.lane.b32.xlu0 %v24389_v4, %s22036_s0  ;;  %20845 = vrot.lane.b32.xlu1 %v24715_v58, %s22035_s15 }
 0x5fb   :  { %17939 = vmatmul.mubr.msk.f32.gmra.mrb[28].mxu0 %vm3691_vm11, %v24720_v53 }
 0x5fc   :  { %v7384_v32 = vsel %vm167_vm0, %v20563_v3, %v20587_v63  ;;  %7505 = vmatprep.mubr.f32.mxu0 %v24182_v19  ;;  %v7385_v33 = vsel %vm167_vm0, %v20587_v63, %v20588_v35 }
 0x5fd   :  { %v18480_v42 = vpack.c.bf16 %v7385_v33, %v7380_v15  ;;  %v18482_v28 = vpack.c.bf16 %v7384_v32, %v7379_v7 }
 0x5fe   :  { %20870 = vrot.lane.b32.xlu0 %v24509_v46, %s22036_s0  ;;  %20855 = vrot.lane.b32.xlu1 %v24469_v49, %s22036_s0 }
 0x5ff   :  { %17940 = vmatmul.mubr.msk.f32.gmra.mrb[30].mxu0 %vm3691_vm11, %v24734_v13  ;;  %18481 = vmatprep.subr.bf16.mxu0 %v18480_v42 }
 0x600   :  { %18483 = vmatpush1.bf16.msra.mxu0 %v18482_v28  ;;  %v20591_v3 = vpop.permute.xlu0 %20590  ;;  %7576 = vmatprep.mubr.f32.mxu0 %v24182_v19 }
 0x601   :  { %v20593_v54 = vunpack.i.h.bf16 %v20591_v3  ;;  %v20592_v6 = vunpack.i.l.bf16 %v20591_v3 }
 0x602   :  { %20880 = vrot.lane.b32.xlu0 %v24529_v1, %s22036_s0  ;;  %20865 = vrot.lane.b32.xlu1 %v24491_v16, %s22036_s0 }
 0x603   :  { %v7376_v12 = vsel %vm167_vm0, %v20578_v25, %v20593_v54  ;;  %v7371_v63 = vsel %vm167_vm0, %v20573_v40, %v20592_v6  ;;  %17941 = vmatmul.mubr.msk.f32.vlgmr.msra.gmra.mrb[32].mxu0 %vm3691_vm11, %v24688_v41  ;;  %v18484_v7 = vpack.c.bf16 %v20593_v54, %v20592_v6 }
 0x604   :  { %v24753_v32 = vpop.permute.xlu0 %20600  ;;  %7582 = vmatprep.mubr.f32.mxu0 %v24182_v19  ;;  %v18486_v15 = vpack.c.bf16 %v7376_v12, %v7371_v63 }
 0x605   :  { %18485 = vmatprep.subr.bf16.mxu0 %v18484_v7  ;;  %v20603_v28 = vunpack.i.h.bf16 %v24753_v32  ;;  %v20602_v3 = vunpack.i.l.bf16 %v24753_v32 }
 0x606   :  { %18487 = vmatpush1.bf16.msra.mxu0 %v18486_v15  ;;  %20890 = vrot.lane.b32.xlu0 %v24556_v51, %s22036_s0 }
 0x607   :  { %20875 = vrot.lane.b32.xlu1 %v24427_v30, %s22036_s0  ;;  %17942 = vmatmul.mubr.msk.f32.gmra.mrb[34].mxu0 %vm3691_vm11, %v24702_v27 }
 0x608   :  { %v20611_v40 = vpop.permute.xlu0 %20610  ;;  %v20596_v25 = vpop.permute.xlu1 %20595  ;;  %7588 = vmatprep.mubr.f32.mxu0 %v24182_v19 }
 0x609   :  { %v20598_v33 = vunpack.i.h.bf16 %v20596_v25  ;;  %v20597_v42 = vunpack.i.l.bf16 %v20596_v25  ;;  %v20613_v54 = vunpack.i.h.bf16 %v20611_v40  ;;  %v20612_v63 = vunpack.i.l.bf16 %v20611_v40 }
 0x60a   :  { %20900 = vrot.lane.b32.xlu0 %v24683_v47, %s22036_s0 }
 0x60b   :  { %v7386_v6 = vsel %vm167_vm0, %v20588_v35, %v20598_v33  ;;  %v7381_v12 = vsel %vm167_vm0, %v20583_v21, %v20597_v42  ;;  %20885 = vrot.lane.b32.xlu1 %v24542_v50, %s22036_s0  ;;  %17943 = vmatmul.mubr.msk.f32.gmra.mrb[36].mxu0 %vm3691_vm11, %v24720_v53  ;;  %v18488_v25 = vpack.c.bf16 %v20598_v33, %v20597_v42 }
 0x60c   :  { %v24773_v7 = vpop.permute.xlu0 %20620  ;;  %v24775_v15 = vpop.permute.xlu1 %20605  ;;  %7594 = vmatprep.mubr.f32.mxu0 %v24182_v19  ;;  %v18490_v17 = vpack.c.bf16 %v7386_v6, %v7381_v12  ;;  %v7768_v21 = vsel %vm536_vm3, %v20602_v3, %v20603_v28  ;;  %v7767_v42 = vsel %vm536_vm3, %v20612_v63, %v20602_v3 }
 0x60d   :  { %v20608_v14 = vunpack.i.h.bf16 %v24775_v15  ;;  %v20607_v35 = vunpack.i.l.bf16 %v24775_v15  ;;  %18489 = vmatprep.subr.bf16.mxu0 %v18488_v25  ;;  %v20623_v40 = vunpack.i.h.bf16 %v24773_v7  ;;  %v20622_v39 = vunpack.i.l.bf16 %v24773_v7 }
 0x60e   :  { %20910 = vrot.lane.b32.xlu0 %v24451_v34, %s22037_s18  ;;  %18491 = vmatpush1.bf16.msra.mxu0 %v18490_v17  ;;  %v24800_v17 = vld [vmem:[#allocation2] sm:$0xff] }
 0x60f   :  { %v7772_v33 = vsel %vm536_vm3, %v20613_v54, %v20607_v35  ;;  %20895 = vrot.lane.b32.xlu1 %v24569_v48, %s22036_s0  ;;  %v7773_v19 = vsel %vm536_vm3, %v20607_v35, %v20608_v14  ;;  %17944 = vmatmul.mubr.msk.f32.gmra.mrb[38].mxu0 %vm3691_vm11, %v24734_v13  ;;  %v7783_v63 = vsel %vm536_vm3, %v20622_v39, %v20623_v40 }
 0x610   :  { %v24796_v6 = vpop.permute.xlu1 %20615  ;;  %v18492_v12 = vpack.c.bf16 %v7773_v19, %v7768_v21  ;;  %7665 = vmatprep.mubr.f32.mxu0 %v24800_v17  ;;  %v18494_v22 = vpack.c.bf16 %v7772_v33, %v7767_v42  ;;  %v24813_v35 = vpop.permute.xlu0 %20630 }
 0x611   :  { %v28089_v25 = vunpack.i.h.bf16 %v24796_v6  ;;  %v20617_v54 = vunpack.i.l.bf16 %v24796_v6  ;;  %v20632_v11 = vunpack.i.l.bf16 %v24813_v35 }
 0x612   :  { %20920 = vrot.lane.b32.xlu0 %v24389_v4, %s22037_s18  ;;  %18493 = vmatprep.subr.bf16.mxu0 %v18492_v12  ;;  %v20633_v12 = vunpack.i.h.bf16 %v24813_v35 }
 0x613   :  { %20905 = vrot.lane.b32.xlu1 %v24715_v58, %s22036_s0  ;;  %v7778_v3 = vsel %vm536_vm3, %v20617_v54, %v28089_v25  ;;  %17945 = vmatmul.mubr.msk.f32.vlgmr.msra.gmra.mrb[40].mxu0 %vm3691_vm11, %v24688_v41  ;;  %v7769_v15 = vsel %vm536_vm3, %v20603_v28, %v20632_v11  ;;  %v28115_v28 = vunpack.i.h.bf16 %v24796_v6  ;;  %v24902_v6 = vld [vmem:[%s28075_s6 + $0x30] sm:$0xff] }
 0x614   :  { %v20626_v21 = vpop.permute.xlu1 %20625  ;;  %v18496_v33 = vpack.c.bf16 %v7783_v63, %v7778_v3  ;;  %18495 = vmatpush1.bf16.msra.mxu0 %v18494_v22  ;;  %7671 = vmatprep.mubr.f32.mxu0 %v24800_v17 }
 0x615   :  { %v20628_v19 = vunpack.i.h.bf16 %v20626_v21  ;;  %v20627_v42 = vunpack.i.l.bf16 %v20626_v21 }
 0x616   :  { %20930 = vrot.lane.b32.xlu0 %v24509_v46, %s22037_s18  ;;  %18497 = vmatprep.subr.bf16.mxu0 %v18496_v33 }
 0x617   :  { %v7782_v45 = vsel %vm536_vm3, %v20628_v19, %v20622_v39  ;;  %v7777_v25 = vsel %vm536_vm3, %v20627_v42, %v20617_v54  ;;  %20915 = vrot.lane.b32.xlu1 %v24469_v49, %s22037_s18  ;;  %17946 = vmatmul.mubr.msk.f32.gmra.mrb[42].mxu0 %vm3691_vm11, %v24702_v27  ;;  %v24835_v39 = vpop.permute.xlu0 %20640  ;;  %v7770_v27 = vsel %vm536_vm3, %v20632_v11, %v20633_v12  ;;  %v24887_v11 = vld [vmem:[%s28075_s6 + $0x28] sm:$0xff] }
 0x618   :  { %v24828_v22 = vpop.permute.xlu1 %20635  ;;  %v18498_v41 = vpack.c.bf16 %v7782_v45, %v7777_v25  ;;  %7677 = vmatprep.mubr.f32.mxu0 %v24800_v17  ;;  %v20643_v19 = vunpack.i.h.bf16 %v24835_v39  ;;  %v20642_v42 = vunpack.i.l.bf16 %v24835_v39 }
 0x619   :  { %v20638_v3 = vunpack.i.h.bf16 %v24828_v22  ;;  %v20637_v63 = vunpack.i.l.bf16 %v24828_v22 }
 0x61a   :  { %20940 = vrot.lane.b32.xlu0 %v24529_v1, %s22037_s18  ;;  %18499 = vmatpush1.bf16.msra.mxu0 %v18498_v41  ;;  %v24865_v41 = vld [vmem:[%s28075_s6 + $0x20] sm:$0xff] }
 0x61b   :  { %20925 = vrot.lane.b32.xlu1 %v24491_v16, %s22037_s18  ;;  %v7775_v45 = vsel %vm536_vm3, %v20637_v63, %v20638_v3  ;;  %17947 = vmatmul.mubr.msk.f32.gmra.mrb[44].mxu0 %vm3691_vm11, %v24720_v53  ;;  %v7774_v53 = vsel %vm536_vm3, %v20608_v14, %v20637_v63  ;;  %v20651_v22 = vpop.permute.xlu0 %20650 }
 0x61c   :  { %v24845_v25 = vpop.permute.xlu1 %20645  ;;  %v18500_v54 = vpack.c.bf16 %v7775_v45, %v7770_v27  ;;  %7683 = vmatprep.mubr.f32.mxu0 %v24800_v17  ;;  %v18502_v14 = vpack.c.bf16 %v7774_v53, %v7769_v15  ;;  %v20653_v63 = vunpack.i.h.bf16 %v20651_v22  ;;  %v20652_v27 = vunpack.i.l.bf16 %v20651_v22 }
 0x61d   :  { %v20648_v21 = vunpack.i.h.bf16 %v24845_v25  ;;  %v20647_v33 = vunpack.i.l.bf16 %v24845_v25 }
 0x61e   :  { %20950 = vrot.lane.b32.xlu0 %v24556_v51, %s22037_s18  ;;  %18501 = vmatprep.subr.bf16.mxu0 %v18500_v54  ;;  %v7779_v54 = vsel %vm536_vm3, %v28115_v28, %v20642_v42  ;;  %v7776_v22 = vsel %vm536_vm3, %v20638_v3, %v20653_v63 }
 0x61f   :  { %20935 = vrot.lane.b32.xlu1 %v24427_v30, %s22037_s18  ;;  %17948 = vmatmul.mubr.msk.f32.gmra.mrb[46].mxu0 %vm3691_vm11, %v24734_v13  ;;  %v7785_v39 = vsel %vm536_vm3, %v20647_v33, %v20648_v21  ;;  %v7780_v13 = vsel %vm536_vm3, %v20642_v42, %v20643_v19  ;;  %v7784_v45 = vsel %vm536_vm3, %v20623_v40, %v20647_v33  ;;  %v24916_v33 = vld [vmem:[%s28075_s6 + $0x38] sm:$0xff]  ;;  %v24918_v42 = vpop.permute.xlu0 %20660 }
 0x620   :  { %7887 = vmatprep.mubr.f32.mxu0 %v24800_v17  ;;  %v18504_v32 = vpack.c.bf16 %v7785_v39, %v7780_v13  ;;  %v20656_v53 = vpop.permute.xlu1 %20655  ;;  %v18506_v7 = vpack.c.bf16 %v7784_v45, %v7779_v54  ;;  %v18508_v40 = vpack.c.bf16 %v20653_v63, %v20652_v27  ;;  %v20662_v35 = vunpack.i.l.bf16 %v24918_v42 }
 0x621   :  { %v20658_v39 = vunpack.i.h.bf16 %v20656_v53  ;;  %v20657_v15 = vunpack.i.l.bf16 %v20656_v53 }
 0x622   :  { %20960 = vrot.lane.b32.xlu0 %v24683_v47, %s22037_s18 }
 0x623   :  { %20945 = vrot.lane.b32.xlu1 %v24542_v50, %s22037_s18  ;;  %17953 = vmatmul.mubr.msk.f32.vlgmr.msra.gmra.mrb[24].mxu0 %vm3691_vm11, %v24865_v41  ;;  %v20671_v3 = vpop.permute.xlu0 %20670  ;;  %v7781_v63 = vsel %vm536_vm3, %v20643_v19, %v20657_v15  ;;  %v18512_v45 = vpack.c.bf16 %v20658_v39, %v20657_v15 }
 0x624   :  { %18503 = vmatpush1.bf16.msra.mxu0 %v18502_v14  ;;  %7893 = vmatprep.mubr.f32.mxu0 %v24800_v17  ;;  %v20672_v53 = vunpack.i.l.bf16 %v20671_v3 }
 0x625   :  { %18505 = vmatprep.subr.bf16.mxu0 %v18504_v32 }
 0x626   :  { %20970 = vrot.lane.b32.xlu0 %v24451_v34, %s22038_s19  ;;  %v24908_v34 = vpop.permute.xlu1 %20665 }
 0x627   :  { %20955 = vrot.lane.b32.xlu1 %v24569_v48, %s22037_s18  ;;  %17954 = vmatmul.mubr.msk.f32.gmra.mrb[26].mxu0 %vm3691_vm11, %v24887_v11  ;;  %v20668_v14 = vunpack.i.h.bf16 %v24908_v34  ;;  %v20667_v13 = vunpack.i.l.bf16 %v24908_v34  ;;  %v24961_v32 = vpop.permute.xlu0 %20680 }
 0x628   :  { %18507 = vmatpush1.bf16.msra.mxu0 %v18506_v7  ;;  %7899 = vmatprep.mubr.f32.mxu0 %v24800_v17 }
 0x629   :  { %18509 = vmatprep.subr.bf16.mxu0 %v18508_v40  ;;  %v7245_v40 = vld [vmem:[%s28076_s7 + $0x10] sm:$0xff] }
 0x62a   :  { %20980 = vrot.lane.b32.xlu0 %v24389_v4, %s22038_s19  ;;  %v7771_v4 = vsel %vm536_vm3, %v20633_v12, %v20652_v27  ;;  %v7786_v27 = vsel %vm536_vm3, %v20648_v21, %v20658_v39 }
 0x62b   :  { %20965 = vrot.lane.b32.xlu1 %v24715_v58, %s22037_s18  ;;  %17955 = vmatmul.mubr.msk.f32.gmra.mrb[28].mxu0 %vm3691_vm11, %v24902_v6  ;;  %v18510_v12 = vpack.c.bf16 %v7776_v22, %v7771_v4  ;;  %v24985_v22 = vpop.permute.xlu0 %20690 }
 0x62c   :  { %7905 = vmatprep.mubr.f32.mxu0 %v24800_v17 }
 0x62e   :  { %20990 = vrot.lane.b32.xlu0 %v24509_v46, %s22038_s19  ;;  %v24933_v46 = vpop.permute.xlu1 %20675 }
 0x62f   :  { %20975 = vrot.lane.b32.xlu1 %v24469_v49, %s22038_s19  ;;  %17956 = vmatmul.mubr.msk.f32.gmra.mrb[30].mxu0 %vm3691_vm11, %v24916_v33  ;;  %v20663_v49 = vunpack.i.h.bf16 %v24918_v42  ;;  %v20678_v28 = vunpack.i.h.bf16 %v24933_v46  ;;  %v20677_v54 = vunpack.i.l.bf16 %v24933_v46  ;;  %v25047_v42 = vld [vmem:[%s28075_s6 + $0x48] sm:$0xff]  ;;  %v25068_v46 = vld [vmem:[%s28075_s6 + $0x58] sm:$0xff] }
 0x630   :  { %7976 = vmatprep.mubr.f32.mxu0 %v24800_v17 }
 0x631   :  { %v8168_v25 = vsel %vm903_vm4, %v20662_v35, %v20663_v49 }
 0x632   :  { %21000 = vrot.lane.b32.xlu0 %v24529_v1, %s22038_s19  ;;  %v8173_v1 = vsel %vm903_vm4, %v20667_v13, %v20668_v14  ;;  %v20686_v21 = vpop.permute.xlu1 %20685 }
 0x633   :  { %20985 = vrot.lane.b32.xlu1 %v24491_v16, %s22038_s19  ;;  %17957 = vmatmul.mubr.msk.f32.vlgmr.msra.gmra.mrb[32].mxu0 %vm3691_vm11, %v24865_v41  ;;  %v18514_v16 = vpack.c.bf16 %v7786_v27, %v7781_v63  ;;  %v18516_v19 = vpack.c.bf16 %v8173_v1, %v8168_v25  ;;  %v20688_v39 = vunpack.i.h.bf16 %v20686_v21  ;;  %v20687_v15 = vunpack.i.l.bf16 %v20686_v21 }
 0x634   :  { %18511 = vmatpush1.bf16.msra.mxu0 %v18510_v12  ;;  %7982 = vmatprep.mubr.f32.mxu0 %v24800_v17  ;;  %v8167_v63 = vsel %vm903_vm4, %v20672_v53, %v20662_v35  ;;  %v20692_v27 = vunpack.i.l.bf16 %v24985_v22  ;;  %v7244_v35 = vld [vmem:[%s28076_s7 + $0x8] sm:$0xff] }
 0x635   :  { %18513 = vmatprep.subr.bf16.mxu0 %v18512_v45  ;;  %v8177_v25 = vsel %vm903_vm4, %v20687_v15, %v20677_v54 }
 0x636   :  { %21010 = vrot.lane.b32.xlu0 %v24556_v51, %s22038_s19  ;;  %v20673_v51 = vunpack.i.h.bf16 %v20671_v3  ;;  %v24975_v7 = vpop.permute.xlu1 %20695 }
 0x637   :  { %20995 = vrot.lane.b32.xlu1 %v24427_v30, %s22038_s19  ;;  %17958 = vmatmul.mubr.msk.f32.gmra.mrb[34].mxu0 %vm3691_vm11, %v24887_v11  ;;  %v7243_v30 = vld [vmem:[%s28076_s7] sm:$0xff]  ;;  %v20698_v12 = vunpack.i.h.bf16 %v24975_v7  ;;  %v20697_v3 = vunpack.i.l.bf16 %v24975_v7 }
 0x638   :  { %18515 = vmatpush1.bf16.msra.mxu0 %v18514_v16  ;;  %7988 = vmatprep.mubr.f32.mxu0 %v24800_v17  ;;  %v8172_v4 = vsel %vm903_vm4, %v20673_v51, %v20667_v13  ;;  %v20693_v13 = vunpack.i.h.bf16 %v24985_v22 }
 0x639   :  { %18517 = vmatprep.subr.bf16.mxu0 %v18516_v19  ;;  %v18518_v45 = vpack.c.bf16 %v8172_v4, %v8167_v63  ;;  %v8174_v4 = vsel %vm903_vm4, %v20668_v14, %v20697_v3 }
 0x63a   :  { %21020 = vrot.lane.b32.xlu0 %v24683_v47, %s22038_s19  ;;  %v20682_v47 = vunpack.i.l.bf16 %v24961_v32  ;;  %v20706_v51 = vpop.permute.xlu1 %20705 }
 0x63b   :  { %21005 = vrot.lane.b32.xlu1 %v24542_v50, %s22038_s19  ;;  %17959 = vmatmul.mubr.msk.f32.gmra.mrb[36].mxu0 %vm3691_vm11, %v24902_v6  ;;  %v20683_v50 = vunpack.i.h.bf16 %v24961_v32  ;;  %v8170_v32 = vsel %vm903_vm4, %v20692_v27, %v20693_v13  ;;  %v20708_v53 = vunpack.i.h.bf16 %v20706_v51 }
 0x63c   :  { %7994 = vmatprep.mubr.f32.mxu0 %v24800_v17  ;;  %v8182_v16 = vsel %vm903_vm4, %v20688_v39, %v20682_v47 }
 0x63d   :  { %v8183_v1 = vsel %vm903_vm4, %v20682_v47, %v20683_v50  ;;  %v18522_v19 = vpack.c.bf16 %v8182_v16, %v8177_v25  ;;  %v20707_v47 = vunpack.i.l.bf16 %v20706_v51  ;;  %v25058_v16 = vld [vmem:[%s28075_s6 + $0x50] sm:$0xff] }
 0x63e   :  { %7249 = vperm.xlu0 %20048, %v7243_v30   ;;  %v7246_v30 = vld [vmem:[%s28076_s7 + $0x18] sm:$0xff] }
 0x63f   :  { %21015 = vrot.lane.b32.xlu1 %v24569_v48, %s22038_s19  ;;  %17960 = vmatmul.mubr.msk.f32.gmra.mrb[38].mxu0 %vm3691_vm11, %v24916_v33  ;;  %v8178_v48 = vsel %vm903_vm4, %v20677_v54, %v20678_v28  ;;  %v20701_v54 = vpop.permute.xlu0 %20700  ;;  %v8185_v15 = vsel %vm903_vm4, %v20707_v47, %v20708_v53 }
 0x640   :  { %8065 = vmatprep.mubr.f32.mxu0 %v24800_v17  ;;  %v18520_v21 = vpack.c.bf16 %v8183_v1, %v8178_v48  ;;  %v8169_v48 = vsel %vm903_vm4, %v20663_v49, %v20692_v27  ;;  %v20716_v27 = vpop.permute.xlu1 %20715 }
 0x641   :  { %v18526_v34 = vpack.c.bf16 %v8174_v4, %v8169_v48 }
 0x642   :  { %7259 = vperm.xlu0 %20048, %v7245_v40   ;;  %v20702_v40 = vunpack.i.l.bf16 %v20701_v54 }
 0x643   :  { %21025 = vrot.lane.b32.xlu1 %v24715_v58, %s22038_s19  ;;  %17961 = vmatmul.mubr.msk.f32.vlgmr.msra.gmra.mrb[40].mxu0 %vm3691_vm11, %v24865_v41  ;;  %v8175_v58 = vsel %vm903_vm4, %v20697_v3, %v20698_v12  ;;  %v20711_v39 = vpop.permute.xlu0 %20710 }
 0x644   :  { %18519 = vmatpush1.bf16.msra.mxu0 %v18518_v45  ;;  %8071 = vmatprep.mubr.f32.mxu0 %v24800_v17  ;;  %v18524_v41 = vpack.c.bf16 %v8175_v58, %v8170_v32  ;;  %v20713_v3 = vunpack.i.h.bf16 %v20711_v39  ;;  %v20712_v63 = vunpack.i.l.bf16 %v20711_v39  ;;  %v8179_v49 = vsel %vm903_vm4, %v20678_v28, %v20702_v40  ;;  %v25060_v25 = vpop.permute.xlu1 %20725 }
 0x645   :  { %18521 = vmatprep.subr.bf16.mxu0 %v18520_v21  ;;  %v20718_v58 = vunpack.i.h.bf16 %v20716_v27  ;;  %v20728_v32 = vunpack.i.h.bf16 %v25060_v25 }
 0x646   :  { %v8171_v21 = vsel %vm903_vm4, %v20693_v13, %v20712_v63 }
 0x647   :  { %7254 = vperm.xlu1 %20047, %v7244_v35   ;;  %17962 = vmatmul.mubr.msk.f32.gmra.mrb[42].mxu0 %vm3691_vm11, %v24887_v11  ;;  %v20703_v11 = vunpack.i.h.bf16 %v20701_v54  ;;  %v25070_v28 = vpop.permute.xlu0 %20720  ;;  %v8176_v35 = vsel %vm903_vm4, %v20698_v12, %v20713_v3  ;;  %v8186_v54 = vsel %vm903_vm4, %v20708_v53, %v20718_v58 }
 0x648   :  { %18523 = vmatpush1.bf16.msra.mxu0 %v18522_v19  ;;  %8077 = vmatprep.mubr.f32.mxu0 %v24800_v17  ;;  %v20717_v19 = vunpack.i.l.bf16 %v20716_v27  ;;  %v20723_v22 = vunpack.i.h.bf16 %v25070_v28  ;;  %v20722_v13 = vunpack.i.l.bf16 %v25070_v28  ;;  %v18534_v7 = vpack.c.bf16 %v8176_v35, %v8171_v21 }
 0x649   :  { %18525 = vmatprep.subr.bf16.mxu0 %v18524_v41  ;;  %v8180_v14 = vsel %vm903_vm4, %v20702_v40, %v20703_v11  ;;  %v20727_v41 = vunpack.i.l.bf16 %v25060_v25 }
 0x64a   :  { %v18528_v45 = vpack.c.bf16 %v8185_v15, %v8180_v14  ;;  %v8181_v12 = vsel %vm903_vm4, %v20703_v11, %v20717_v19  ;;  %v8632_v39 = vsel %vm1280_vm5, %v20722_v13, %v20723_v22 }
 0x64b   :  { %7264 = vperm.xlu1 %20047, %v7246_v30   ;;  %17963 = vmatmul.mubr.msk.f32.gmra.mrb[44].mxu0 %vm3691_vm11, %v24902_v6  ;;  %v25033_v6 = vld [vmem:[%s28075_s6 + $0x40] sm:$0xff]  ;;  %v25083_v30 = vpop.permute.xlu1 %20735  ;;  %v20731_v51 = vpop.permute.xlu0 %20730  ;;  %v8638_v40 = vsel %vm1280_vm5, %v20727_v41, %v20728_v32  ;;  %v18538_v4 = vpack.c.bf16 %v8186_v54, %v8181_v12 }
 0x64c   :  { %8083 = vmatprep.mubr.f32.mxu0 %v24800_v17  ;;  %v18540_v53 = vpack.c.bf16 %v8638_v40, %v8632_v39  ;;  %v20733_v48 = vunpack.i.h.bf16 %v20731_v51  ;;  %v20737_v14 = vunpack.i.l.bf16 %v25083_v30 }
 0x64f   :  { %17964 = vmatmul.mubr.msk.f32.gmra.mrb[46].mxu0 %vm3691_vm11, %v24916_v33  ;;  %v8184_v33 = vsel %vm903_vm4, %v20683_v50, %v20707_v47  ;;  %v18532_v50 = vpack.c.bf16 %v20713_v3, %v20712_v63  ;;  %v18536_v47 = vpack.c.bf16 %v20718_v58, %v20717_v19  ;;  %v20746_v11 = vpop.permute.xlu1 %20745  ;;  %v25101_v15 = vpop.permute.xlu0 %20740  ;;  %v20732_v3 = vunpack.i.l.bf16 %v20731_v51 }
 0x650   :  { %8287 = vmatprep.mubr.f32.mxu0 %v24800_v17  ;;  %v18530_v1 = vpack.c.bf16 %v8184_v33, %v8179_v49  ;;  %v20743_v33 = vunpack.i.h.bf16 %v25101_v15  ;;  %v8637_v49 = vsel %vm1280_vm5, %v20733_v48, %v20727_v41 }
 0x651   :  { %v8631_v19 = vsel %vm1280_vm5, %v20732_v3, %v20722_v13 }
 0x652   :  { %v18542_v51 = vpack.c.bf16 %v8637_v49, %v8631_v19 }
 0x653   :  { %17969 = vmatmul.mubr.msk.f32.vlgmr.msra.gmra.mrb[24].mxu0 %vm3691_vm11, %v25033_v6  ;;  %v25108_v63 = vpop.permute.xlu1 %20755  ;;  %v25113_v27 = vpop.permute.xlu0 %20750 }
 0x654   :  { %18527 = vmatpush1.bf16.msra.mxu0 %v18526_v34  ;;  %8293 = vmatprep.mubr.f32.mxu0 %v24800_v17  ;;  %v20738_v34 = vunpack.i.h.bf16 %v25083_v30  ;;  %v20758_v21 = vunpack.i.h.bf16 %v25108_v63  ;;  %v20757_v35 = vunpack.i.l.bf16 %v25108_v63  ;;  %v20753_v41 = vunpack.i.h.bf16 %v25113_v27 }
 0x655   :  { %18529 = vmatprep.subr.bf16.mxu0 %v18528_v45  ;;  %v20742_v45 = vunpack.i.l.bf16 %v25101_v15 }
 0x656   :  { %v8644_v58 = vsel %vm1280_vm5, %v20737_v14, %v20738_v34  ;;  %v8640_v13 = vsel %vm1280_vm5, %v20757_v35, %v20758_v21 }
 0x657   :  { %17970 = vmatmul.mubr.msk.f32.gmra.mrb[26].mxu0 %vm3691_vm11, %v25047_v42  ;;  %v8650_v12 = vsel %vm1280_vm5, %v20742_v45, %v20743_v33 }
 0x658   :  { %18531 = vmatpush1.bf16.msra.mxu0 %v18530_v1  ;;  %8299 = vmatprep.mubr.f32.mxu0 %v24800_v17  ;;  %v20748_v1 = vunpack.i.h.bf16 %v20746_v11  ;;  %v18544_v40 = vpack.c.bf16 %v8650_v12, %v8644_v58 }
 0x659   :  { %18533 = vmatprep.subr.bf16.mxu0 %v18532_v50  ;;  %v20747_v50 = vunpack.i.l.bf16 %v20746_v11  ;;  %v20766_v11 = vpop.permute.xlu1 %20765 }
 0x65a   :  { %v8649_v54 = vsel %vm1280_vm5, %v20748_v1, %v20742_v45  ;;  %v20768_v15 = vunpack.i.h.bf16 %v20766_v11  ;;  %v20767_v48 = vunpack.i.l.bf16 %v20766_v11 }
 0x65b   :  { %17971 = vmatmul.mubr.msk.f32.gmra.mrb[28].mxu0 %vm3691_vm11, %v25058_v16 }
 0x65c   :  { %8305 = vmatprep.mubr.f32.mxu0 %v24800_v17  ;;  %v8652_v58 = vsel %vm1280_vm5, %v20767_v48, %v20768_v15 }
 0x65f   :  { %17972 = vmatmul.mubr.msk.f32.gmra.mrb[30].mxu0 %vm3691_vm11, %v25068_v46 }
 0x660   :  { %8376 = vmatprep.mubr.f32.mxu0 %v24800_v17 }
 0x663   :  { %17973 = vmatmul.mubr.msk.f32.vlgmr.msra.gmra.mrb[32].mxu0 %vm3691_vm11, %v25033_v6 }
 0x664   :  { %18535 = vmatpush1.bf16.msra.mxu0 %v18534_v7  ;;  %8382 = vmatprep.mubr.f32.mxu0 %v24800_v17  ;;  %v20752_v7 = vunpack.i.l.bf16 %v25113_v27  ;;  %v28116_v27 = vpack.c.bf16 %v24382_v61, %v24368_v20  ;;  %v28118_v20 = vpack.c.bf16 %v24420_v26, %v24406_v62  ;;  %v28119_v61 = vpack.c.bf16 %v24416_v38, %v24402_v24  ;;  %v25236_v24 = vld [vmem:[%s28075_s6 + $0x88] sm:$0xff]  ;;  %v22020_v38 = vld [vmem:[#allocation3 + $0x30] sm:$0xff] }
 0x665   :  { %18537 = vmatprep.subr.bf16.mxu0 %v18536_v47  ;;  %v8643_v47 = vsel %vm1280_vm5, %v20747_v50, %v20737_v14  ;;  %v20776_v14 = vpop.permute.xlu1 %20775  ;;  %v28122_v62 = vpack.c.bf16 %v24502_v43, %v24484_v29  ;;  %v22021_v26 = vld [vmem:[#allocation3 + $0x68] sm:$0xff] }
 0x666   :  { %v8634_v39 = vsel %vm1280_vm5, %v20752_v7, %v20753_v41  ;;  %v20778_v1 = vunpack.i.h.bf16 %v20776_v14  ;;  %v20777_v50 = vunpack.i.l.bf16 %v20776_v14  ;;  %v8633_v19 = vsel %vm1280_vm5, %v20723_v22, %v20752_v7 }
 0x667   :  { %17974 = vmatmul.mubr.msk.f32.gmra.mrb[34].mxu0 %vm3691_vm11, %v25047_v42 }
 0x668   :  { %18539 = vmatpush1.bf16.msra.mxu0 %v18538_v4  ;;  %8388 = vmatprep.mubr.f32.mxu0 %v24800_v17  ;;  %v18546_v4 = vpack.c.bf16 %v8649_v54, %v8643_v47  ;;  %v17982_v54 = vld [vmem:[%s28075_s6 + $0x68] sm:$0xff]  ;;  %v8642_v28 = vsel %vm1280_vm5, %v20777_v50, %v20778_v1 }
 0x669   :  { %18541 = vmatprep.subr.bf16.mxu0 %v18540_v53  ;;  %v18548_v53 = vpack.c.bf16 %v8640_v13, %v8634_v39  ;;  %v20786_v13 = vpop.permute.xlu1 %20785  ;;  %v17984_v39 = vld [vmem:[%s28075_s6 + $0x78] sm:$0xff] }
 0x66a   :  { %v20788_v30 = vunpack.i.h.bf16 %v20786_v13 }
 0x66b   :  { %17975 = vmatmul.mubr.msk.f32.gmra.mrb[36].mxu0 %vm3691_vm11, %v25058_v16 }
 0x66c   :  { %8394 = vmatprep.mubr.f32.mxu0 %v24800_v17 }
 0x66f   :  { %17976 = vmatmul.mubr.msk.f32.gmra.mrb[38].mxu0 %vm3691_vm11, %v25068_v46 }
 0x670   :  { %8465 = vmatprep.mubr.f32.mxu0 %v24800_v17 }
 0x673   :  { %17977 = vmatmul.mubr.msk.f32.vlgmr.msra.gmra.mrb[40].mxu0 %vm3691_vm11, %v25033_v6  ;;  %v20761_v6 = vpop.permute.xlu0 %20760 }
 0x674   :  { %18543 = vmatpush1.bf16.msra.mxu0 %v18542_v51  ;;  %8471 = vmatprep.mubr.f32.mxu0 %v24800_v17  ;;  %v20763_v3 = vunpack.i.h.bf16 %v20761_v6  ;;  %v20762_v45 = vunpack.i.l.bf16 %v20761_v6  ;;  %v8641_v6 = vsel %vm1280_vm5, %v20758_v21, %v20777_v50 }
 0x675   :  { %18545 = vmatprep.subr.bf16.mxu0 %v18544_v40  ;;  %v17983_v40 = vld [vmem:[%s28075_s6 + $0x70] sm:$0xff] }
 0x676   :  { %v8645_v22 = vsel %vm1280_vm5, %v20738_v34, %v20762_v45  ;;  %v20787_v34 = vunpack.i.l.bf16 %v20786_v13 }
 0x677   :  { %17978 = vmatmul.mubr.msk.f32.gmra.mrb[42].mxu0 %vm3691_vm11, %v25047_v42  ;;  %v20771_v49 = vpop.permute.xlu0 %20770  ;;  %v8639_v42 = vsel %vm1280_vm5, %v20728_v32, %v20757_v35  ;;  %v8646_v35 = vsel %vm1280_vm5, %v20762_v45, %v20763_v3 }
 0x678   :  { %18547 = vmatpush1.bf16.msra.mxu0 %v18546_v4  ;;  %8477 = vmatprep.mubr.f32.mxu0 %v24800_v17  ;;  %v20773_v25 = vunpack.i.h.bf16 %v20771_v49  ;;  %v20772_v51 = vunpack.i.l.bf16 %v20771_v49  ;;  %v18550_v32 = vpack.c.bf16 %v8639_v42, %v8633_v19  ;;  %v18552_v12 = vpack.c.bf16 %v8652_v58, %v8646_v35  ;;  %v22022_v19 = vld [vmem:[#allocation3 + $0xa0] sm:$0xff] }
 0x679   :  { %18549 = vmatprep.subr.bf16.mxu0 %v18548_v53  ;;  %v8653_v42 = vsel %vm1280_vm5, %v20768_v15, %v20787_v34  ;;  %v28120_v15 = vpack.c.bf16 %v24462_v52, %v24442_v56  ;;  %v18580_v56 = vpack.c.bf16 %v22021_v26, %v22020_v38  ;;  %v25252_v52 = vpop.permute.xlu1 %20795  ;;  %v25337_v26 = vld [vmem:[%s28075_s6 + $0xa0] sm:$0xff] }
 0x67a   :  { %v8635_v14 = vsel %vm1280_vm5, %v20753_v41, %v20772_v51  ;;  %v28117_v41 = vpack.c.bf16 %v24378_v23, %v24364_v10  ;;  %v25225_v10 = vld [vmem:[%s28075_s6 + $0x80] sm:$0xff]  ;;  %v28121_v23 = vpack.c.bf16 %v24458_v5, %v24438_v8  ;;  %v28123_v8 = vpack.c.bf16 %v24498_v60, %v24480_v37  ;;  %v25250_v5 = vld [vmem:[%s28075_s6 + $0x90] sm:$0xff]  ;;  %v25260_v37 = vld [vmem:[%s28075_s6 + $0x98] sm:$0xff] }
 0x67b   :  { %17979 = vmatmul.mubr.msk.f32.gmra.mrb[44].mxu0 %vm3691_vm11, %v25058_v16  ;;  %v17981_v16 = vld [vmem:[%s28075_s6 + $0x60] sm:$0xff]  ;;  %v20781_v4 = vpop.permute.xlu0 %20780  ;;  %v18558_v45 = vpack.c.bf16 %v8641_v6, %v8635_v14  ;;  %v20798_v60 = vunpack.i.h.bf16 %v25252_v52  ;;  %v20797_v43 = vunpack.i.l.bf16 %v25252_v52 }
 0x67c   :  { %8483 = vmatprep.mubr.f32.mxu0 %v24800_v17  ;;  %v20783_v11 = vunpack.i.h.bf16 %v20781_v4  ;;  %v20782_v53 = vunpack.i.l.bf16 %v20781_v4 }
 0x67d   :  { %v9349_v35 = vsel %vm1997_vm6, %v20797_v43, %v20798_v60 }
 0x67e   :  { %v8648_v49 = vsel %vm1280_vm5, %v20782_v53, %v20783_v11  ;;  %v8647_v21 = vsel %vm1280_vm5, %v20763_v3, %v20782_v53  ;;  %v25269_v3 = vpop.permute.xlu1 %20805 }
 0x67f   :  { %17980 = vmatmul.mubr.msk.f32.gmra.mrb[46].mxu0 %vm3691_vm11, %v25068_v46  ;;  %v8651_v46 = vsel %vm1280_vm5, %v20743_v33, %v20767_v48  ;;  %v8636_v33 = vsel %vm1280_vm5, %v20772_v51, %v20773_v25  ;;  %v8654_v48 = vsel %vm1280_vm5, %v20787_v34, %v20788_v30  ;;  %v18562_v1 = vpack.c.bf16 %v8653_v42, %v8647_v21  ;;  %v25262_v29 = vpop.permute.xlu0 %20790  ;;  %v22023_v25 = vld [vmem:[#allocation3 + $0xd8] sm:$0xff] }
 0x680   :  { %8755 = vmatprep.mubr.f32.mxu0 %v24800_v17  ;;  %v18554_v7 = vpack.c.bf16 %v8651_v46, %v8645_v22  ;;  %v18556_v47 = vpack.c.bf16 %v8642_v28, %v8636_v33  ;;  %v18560_v63 = vpack.c.bf16 %v8654_v48, %v8648_v49  ;;  %v20793_v50 = vunpack.i.h.bf16 %v25262_v29 }
 0x681   :  { %v18584_v51 = vpack.c.bf16 %v22023_v25, %v22022_v19  ;;  %v20808_v28 = vunpack.i.h.bf16 %v25269_v3  ;;  %v20807_v22 = vunpack.i.l.bf16 %v25269_v3  ;;  %v25372_v3 = vld [vmem:[%s28075_s6 + $0xb8] sm:$0xff] }
 0x683   :  { %17985 = vmatmul.mubr.msk.f32.vlgmr.msra.gmra.mrb[24].mxu0 %vm3691_vm11, %v17981_v16  ;;  %v20801_v58 = vpop.permute.xlu0 %20800  ;;  %v9354_v11 = vsel %vm1997_vm6, %v20807_v22, %v20808_v28 }
 0x684   :  { %18551 = vmatpush1.bf16.msra.mxu0 %v18550_v32  ;;  %8761 = vmatprep.mubr.f32.mxu0 %v24800_v17  ;;  %v28124_v32 = vpack.c.bf16 %v24533_v59, %v24520_v2  ;;  %v28125_v2 = vpack.c.bf16 %v24560_v55, %v24548_v18  ;;  %v20802_v33 = vunpack.i.l.bf16 %v20801_v58 }
 0x685   :  { %18553 = vmatprep.subr.bf16.mxu0 %v18552_v12  ;;  %v20816_v12 = vpop.permute.xlu1 %20815 }
 0x686   :  { %v20818_v4 = vunpack.i.h.bf16 %v20816_v12  ;;  %v20817_v30 = vunpack.i.l.bf16 %v20816_v12 }
 0x687   :  { %17986 = vmatmul.mubr.msk.f32.gmra.mrb[26].mxu0 %vm3691_vm11, %v17982_v54  ;;  %v20811_v59 = vpop.permute.xlu0 %20810 }
 0x688   :  { %18555 = vmatpush1.bf16.msra.mxu0 %v18554_v7  ;;  %8767 = vmatprep.mubr.f32.mxu0 %v24800_v17  ;;  %v20803_v7 = vunpack.i.h.bf16 %v20801_v58  ;;  %v20812_v18 = vunpack.i.l.bf16 %v20811_v59  ;;  %v9353_v42 = vsel %vm1997_vm6, %v20817_v30, %v20807_v22 }
 0x689   :  { %18557 = vmatprep.subr.bf16.mxu0 %v18556_v47  ;;  %v25296_v47 = vpop.permute.xlu1 %20825 }
 0x68a   :  { %v9348_v55 = vsel %vm1997_vm6, %v20803_v7, %v20797_v43  ;;  %v20828_v34 = vunpack.i.h.bf16 %v25296_v47  ;;  %v9358_v49 = vsel %vm1997_vm6, %v20818_v4, %v20812_v18 }
 0x68b   :  { %17987 = vmatmul.mubr.msk.f32.gmra.mrb[28].mxu0 %vm3691_vm11, %v17983_v40  ;;  %v25299_v13 = vpop.permute.xlu0 %20820 }
 0x68c   :  { %8773 = vmatprep.mubr.f32.mxu0 %v24800_v17  ;;  %v20823_v6 = vunpack.i.h.bf16 %v25299_v13  ;;  %v20822_v48 = vunpack.i.l.bf16 %v25299_v13 }
 0x68f   :  { %17988 = vmatmul.mubr.msk.f32.gmra.mrb[30].mxu0 %vm3691_vm11, %v17984_v39 }
 0x690   :  { %8844 = vmatprep.mubr.f32.mxu0 %v24800_v17 }
 0x693   :  { %17989 = vmatmul.mubr.msk.f32.vlgmr.msra.gmra.mrb[32].mxu0 %vm3691_vm11, %v17981_v16 }
 0x694   :  { %18559 = vmatpush1.bf16.msra.mxu0 %v18558_v45  ;;  %8850 = vmatprep.mubr.f32.mxu0 %v24800_v17 }
 0x695   :  { %18561 = vmatprep.subr.bf16.mxu0 %v18560_v63 }
 0x697   :  { %17990 = vmatmul.mubr.msk.f32.gmra.mrb[34].mxu0 %vm3691_vm11, %v17982_v54 }
 0x698   :  { %18563 = vmatpush1.bf16.msra.mxu0 %v18562_v1  ;;  %8856 = vmatprep.mubr.f32.mxu0 %v24800_v17  ;;  %v18594_v1 = vpack.c.bf16 %v9358_v49, %v9353_v42 }
 0x699   :  { %18565 = vmatprep.subr.bf16.mxu0 %v28116_v27  ;;  %v9346_v27 = vsel %vm1997_vm6, %v20822_v48, %v20823_v6 }
 0x69b   :  { %17991 = vmatmul.mubr.msk.f32.gmra.mrb[36].mxu0 %vm3691_vm11, %v17983_v40 }
 0x69c   :  { %8862 = vmatprep.mubr.f32.mxu0 %v24800_v17 }
 0x69f   :  { %17992 = vmatmul.mubr.msk.f32.gmra.mrb[38].mxu0 %vm3691_vm11, %v17984_v39 }
 0x6a0   :  { %8933 = vmatprep.mubr.f32.mxu0 %v24800_v17 }
 0x6a3   :  { %17993 = vmatmul.mubr.msk.f32.vlgmr.msra.gmra.mrb[40].mxu0 %vm3691_vm11, %v17981_v16  ;;  %v20792_v16 = vunpack.i.l.bf16 %v25262_v29  ;;  %v25351_v29 = vld [vmem:[%s28075_s6 + $0xa8] sm:$0xff] }
 0x6a4   :  { %18567 = vmatpush1.bf16.msra.mxu0 %v28117_v41  ;;  %8939 = vmatprep.mubr.f32.mxu0 %v24800_v17 }
 0x6a5   :  { %18569 = vmatprep.subr.bf16.mxu0 %v28118_v20  ;;  %v9344_v46 = vsel %vm1997_vm6, %v20792_v16, %v20793_v50  ;;  %v9343_v53 = vsel %vm1997_vm6, %v20802_v33, %v20792_v16  ;;  %v20836_v20 = vpop.permute.xlu1 %20835 }
 0x6a6   :  { %v18590_v14 = vpack.c.bf16 %v9348_v55, %v9343_v53 }
 0x6a7   :  { %17994 = vmatmul.mubr.msk.f32.gmra.mrb[42].mxu0 %vm3691_vm11, %v17982_v54  ;;  %v18588_v54 = vpack.c.bf16 %v9349_v35, %v9344_v46 }
 0x6a8   :  { %18571 = vmatpush1.bf16.msra.mxu0 %v28119_v61  ;;  %8945 = vmatprep.mubr.f32.mxu0 %v24800_v17  ;;  %v20831_v61 = vpop.permute.xlu0 %20830 }
 0x6a9   :  { %18573 = vmatprep.subr.bf16.mxu0 %v28120_v15  ;;  %v20838_v15 = vunpack.i.h.bf16 %v20836_v20  ;;  %v20846_v58 = vpop.permute.xlu1 %20845 }
 0x6ab   :  { %17995 = vmatmul.mubr.msk.f32.gmra.mrb[44].mxu0 %vm3691_vm11, %v17983_v40  ;;  %v20813_v40 = vunpack.i.h.bf16 %v20811_v59 }
 0x6ac   :  { %8951 = vmatprep.mubr.f32.mxu0 %v24800_v17  ;;  %v20841_v38 = vpop.permute.xlu0 %20840 }
 0x6ad   :  { %v9359_v45 = vsel %vm1997_vm6, %v20812_v18, %v20813_v40  ;;  %v20842_v43 = vunpack.i.l.bf16 %v20841_v38 }
 0x6ae   :  { %v18592_v63 = vpack.c.bf16 %v9359_v45, %v9354_v11 }
 0x6af   :  { %17996 = vmatmul.mubr.msk.f32.gmra.mrb[46].mxu0 %vm3691_vm11, %v17984_v39  ;;  %v20827_v39 = vunpack.i.l.bf16 %v25296_v47  ;;  %v9347_v46 = vsel %vm1997_vm6, %v20823_v6, %v20842_v43 }
 0x6b0   :  { %9063 = vmatprep.mubr.f32.mxu0 %v24800_v17  ;;  %v25374_v35 = vpop.permute.xlu0 %20850 }
 0x6b1   :  { %v9351_v21 = vsel %vm1997_vm6, %v20827_v39, %v20828_v34  ;;  %v20853_v7 = vunpack.i.h.bf16 %v25374_v35  ;;  %v20852_v33 = vunpack.i.l.bf16 %v25374_v35  ;;  %v25465_v35 = vld [vmem:[%s28075_s6 + $0xc8] sm:$0xff] }
 0x6b2   :  { %v18596_v41 = vpack.c.bf16 %v9351_v21, %v9346_v27 }
 0x6b3   :  { %18001 = vmatmul.mubr.msk.f32.vlgmr.msra.gmra.mrb[24].mxu0 %vm3691_vm11, %v25225_v10 }
 0x6b4   :  { %18575 = vmatpush1.bf16.msra.mxu0 %v28121_v23  ;;  %9069 = vmatprep.mubr.f32.mxu0 %v24800_v17  ;;  %v20833_v23 = vunpack.i.h.bf16 %v20831_v61 }
 0x6b5   :  { %18577 = vmatprep.subr.bf16.mxu0 %v28122_v62  ;;  %v20832_v62 = vunpack.i.l.bf16 %v20831_v61 }
 0x6b7   :  { %18002 = vmatmul.mubr.msk.f32.gmra.mrb[26].mxu0 %vm3691_vm11, %v25236_v24  ;;  %v9356_v52 = vsel %vm1997_vm6, %v20832_v62, %v20833_v23 }
 0x6b8   :  { %18579 = vmatpush1.bf16.msra.mxu0 %v28123_v8  ;;  %9075 = vmatprep.mubr.f32.mxu0 %v24800_v17  ;;  %v9345_v8 = vsel %vm1997_vm6, %v20793_v50, %v20822_v48  ;;  %v9355_v50 = vsel %vm1997_vm6, %v20808_v28, %v20832_v62 }
 0x6b9   :  { %18581 = vmatprep.subr.bf16.mxu0 %v18580_v56 }
 0x6bb   :  { %18003 = vmatmul.mubr.msk.f32.gmra.mrb[28].mxu0 %vm3691_vm11, %v25250_v5 }
 0x6bc   :  { %9081 = vmatprep.mubr.f32.mxu0 %v24800_v17 }
 0x6bf   :  { %18004 = vmatmul.mubr.msk.f32.gmra.mrb[30].mxu0 %vm3691_vm11, %v25260_v37 }
 0x6c0   :  { %9152 = vmatprep.mubr.f32.mxu0 %v24800_v17 }
 0x6c3   :  { %18005 = vmatmul.mubr.msk.f32.vlgmr.msra.gmra.mrb[32].mxu0 %vm3691_vm11, %v25225_v10 }
 0x6c4   :  { %18583 = vmatpush1.bf16.msra.mxu0 %v28124_v32  ;;  %9158 = vmatprep.mubr.f32.mxu0 %v24800_v17  ;;  %v25364_v32 = vpop.permute.xlu1 %20855 }
 0x6c5   :  { %18585 = vmatprep.subr.bf16.mxu0 %v18584_v51  ;;  %v25362_v51 = vld [vmem:[%s28075_s6 + $0xb0] sm:$0xff]  ;;  %v20858_v59 = vunpack.i.h.bf16 %v25364_v32  ;;  %v20857_v28 = vunpack.i.l.bf16 %v25364_v32 }
 0x6c7   :  { %18006 = vmatmul.mubr.msk.f32.gmra.mrb[34].mxu0 %vm3691_vm11, %v25236_v24  ;;  %v9749_v4 = vsel %vm2364_vm7, %v20857_v28, %v20858_v59 }
 0x6c8   :  { %18587 = vmatpush1.bf16.msra.mxu0 %v28125_v2  ;;  %9164 = vmatprep.mubr.f32.mxu0 %v24800_v17  ;;  %v20847_v2 = vunpack.i.l.bf16 %v20846_v58  ;;  %v25385_v22 = vpop.permute.xlu1 %20865 }
 0x6c9   :  { %18589 = vmatprep.subr.bf16.mxu0 %v18588_v54  ;;  %v20848_v54 = vunpack.i.h.bf16 %v20846_v58  ;;  %v20868_v6 = vunpack.i.h.bf16 %v25385_v22  ;;  %v20867_v48 = vunpack.i.l.bf16 %v25385_v22  ;;  %v25486_v22 = vld [vmem:[%s28075_s6 + $0xd8] sm:$0xff] }
 0x6ca   :  { %v9357_v18 = vsel %vm1997_vm6, %v20833_v23, %v20847_v2 }
 0x6cb   :  { %18007 = vmatmul.mubr.msk.f32.gmra.mrb[36].mxu0 %vm3691_vm11, %v25250_v5  ;;  %v9362_v55 = vsel %vm1997_vm6, %v20838_v15, %v20848_v54  ;;  %v18608_v13 = vpack.c.bf16 %v20848_v54, %v20847_v2 }
 0x6cc   :  { %9170 = vmatprep.mubr.f32.mxu0 %v24800_v17  ;;  %v18610_v30 = vpack.c.bf16 %v9362_v55, %v9357_v18  ;;  %v25476_v55 = vld [vmem:[%s28075_s6 + $0xd0] sm:$0xff] }
 0x6cf   :  { %18008 = vmatmul.mubr.msk.f32.gmra.mrb[38].mxu0 %vm3691_vm11, %v25260_v37 }
 0x6d0   :  { %9241 = vmatprep.mubr.f32.mxu0 %v24800_v17 }
 0x6d3   :  { %18009 = vmatmul.mubr.msk.f32.vlgmr.msra.gmra.mrb[40].mxu0 %vm3691_vm11, %v25225_v10  ;;  %v20837_v10 = vunpack.i.l.bf16 %v20836_v20 }
 0x6d4   :  { %18591 = vmatpush1.bf16.msra.mxu0 %v18590_v14  ;;  %9247 = vmatprep.mubr.f32.mxu0 %v24800_v17  ;;  %v25407_v14 = vld [vmem:[#allocation2] sm:$0xff] }
 0x6d5   :  { %18593 = vmatprep.subr.bf16.mxu0 %v18592_v63  ;;  %v9361_v56 = vsel %vm1997_vm6, %v20837_v10, %v20838_v15  ;;  %v9754_v15 = vsel %vm2364_vm7, %v20867_v48, %v20868_v6 }
 0x6d6   :  { %v18600_v16 = vpack.c.bf16 %v9361_v56, %v9356_v52 }
 0x6d7   :  { %18010 = vmatmul.mubr.msk.f32.gmra.mrb[42].mxu0 %vm3691_vm11, %v25236_v24  ;;  %v9350_v24 = vsel %vm1997_vm6, %v20798_v60, %v20827_v39  ;;  %v20843_v60 = vunpack.i.h.bf16 %v20841_v38  ;;  %v20876_v39 = vpop.permute.xlu1 %20875 }
 0x6d8   :  { %18595 = vmatpush1.bf16.msra.mxu0 %v18594_v1  ;;  %9253 = vmatprep.mubr.f32.mxu0 %v24800_v17  ;;  %v20878_v27 = vunpack.i.h.bf16 %v20876_v39 }
 0x6d9   :  { %18597 = vmatprep.subr.bf16.mxu0 %v18596_v41  ;;  %v18604_v25 = vpack.c.bf16 %v20843_v60, %v20842_v43  ;;  %v9352_v12 = vsel %vm1997_vm6, %v20828_v34, %v20843_v60  ;;  %v9744_v34 = vsel %vm2364_vm7, %v20852_v33, %v20853_v7  ;;  %v20877_v41 = vunpack.i.l.bf16 %v20876_v39 }
 0x6da   :  { %v18606_v47 = vpack.c.bf16 %v9352_v12, %v9347_v46  ;;  %v18612_v11 = vpack.c.bf16 %v9749_v4, %v9744_v34 }
 0x6db   :  { %18011 = vmatmul.mubr.msk.f32.gmra.mrb[44].mxu0 %vm3691_vm11, %v25250_v5  ;;  %v18598_v5 = vpack.c.bf16 %v9350_v24, %v9345_v8  ;;  %v25410_v42 = vpop.permute.xlu1 %20885  ;;  %v9753_v8 = vsel %vm2364_vm7, %v20877_v41, %v20867_v48 }
 0x6dc   :  { %9259 = vmatprep.mubr.f32.mxu0 %v24800_v17  ;;  %v20888_v20 = vunpack.i.h.bf16 %v25410_v42  ;;  %v20887_v61 = vunpack.i.l.bf16 %v25410_v42 }
 0x6de   :  { %v9751_v52 = vsel %vm2364_vm7, %v20887_v61, %v20888_v20 }
 0x6df   :  { %18012 = vmatmul.mubr.msk.f32.gmra.mrb[46].mxu0 %vm3691_vm11, %v25260_v37  ;;  %v9360_v37 = vsel %vm1997_vm6, %v20813_v40, %v20837_v10  ;;  %v20861_v40 = vpop.permute.xlu0 %20860 }
 0x6e0   :  { %9463 = vmatprep.mubr.f32.mxu0 %v24800_v17  ;;  %v18602_v19 = vpack.c.bf16 %v9360_v37, %v9355_v50  ;;  %v20863_v45 = vunpack.i.h.bf16 %v20861_v40  ;;  %v20862_v49 = vunpack.i.l.bf16 %v20861_v40 }
 0x6e2   :  { %v9743_v10 = vsel %vm2364_vm7, %v20862_v49, %v20852_v33 }
 0x6e3   :  { %18017 = vmatmul.mubr.msk.f32.vlgmr.msra.gmra.mrb[24].mxu0 %vm3691_vm11, %v25337_v26  ;;  %v20871_v53 = vpop.permute.xlu0 %20870 }
 0x6e4   :  { %18599 = vmatpush1.bf16.msra.mxu0 %v18598_v5  ;;  %9469 = vmatprep.mubr.f32.mxu0 %v24800_v17  ;;  %v20873_v63 = vunpack.i.h.bf16 %v20871_v53  ;;  %v20872_v21 = vunpack.i.l.bf16 %v20871_v53 }
 0x6e5   :  { %18601 = vmatprep.subr.bf16.mxu0 %v18600_v16 }
 0x6e6   :  { %v9759_v38 = vsel %vm2364_vm7, %v20872_v21, %v20873_v63  ;;  %v9758_v56 = vsel %vm2364_vm7, %v20878_v27, %v20872_v21 }
 0x6e7   :  { %18018 = vmatmul.mubr.msk.f32.gmra.mrb[26].mxu0 %vm3691_vm11, %v25351_v29  ;;  %v25413_v1 = vpop.permute.xlu0 %20880  ;;  %v18616_v5 = vpack.c.bf16 %v9759_v38, %v9754_v15  ;;  %v18618_v60 = vpack.c.bf16 %v9758_v56, %v9753_v8 }
 0x6e8   :  { %18603 = vmatpush1.bf16.msra.mxu0 %v18602_v19  ;;  %9475 = vmatprep.mubr.f32.mxu0 %v24800_v17  ;;  %v20883_v23 = vunpack.i.h.bf16 %v25413_v1  ;;  %v20882_v62 = vunpack.i.l.bf16 %v25413_v1 }
 0x6e9   :  { %18605 = vmatprep.subr.bf16.mxu0 %v18604_v25 }
 0x6ea   :  { %v9746_v43 = vsel %vm2364_vm7, %v20882_v62, %v20883_v23  ;;  %v9745_v54 = vsel %vm2364_vm7, %v20853_v7, %v20882_v62 }
 0x6eb   :  { %18019 = vmatmul.mubr.msk.f32.gmra.mrb[28].mxu0 %vm3691_vm11, %v25362_v51  ;;  %v18620_v37 = vpack.c.bf16 %v9751_v52, %v9746_v43  ;;  %v20891_v16 = vpop.permute.xlu0 %20890 }
 0x6ec   :  { %9481 = vmatprep.mubr.f32.mxu0 %v24800_v17  ;;  %v20893_v19 = vunpack.i.h.bf16 %v20891_v16  ;;  %v20892_v25 = vunpack.i.l.bf16 %v20891_v16 }
 0x6ee   :  { %v9756_v2 = vsel %vm2364_vm7, %v20892_v25, %v20893_v19  ;;  %v9755_v7 = vsel %vm2364_vm7, %v20868_v6, %v20892_v25 }
 0x6ef   :  { %18020 = vmatmul.mubr.msk.f32.gmra.mrb[30].mxu0 %vm3691_vm11, %v25372_v3  ;;  %v20901_v46 = vpop.permute.xlu0 %20900 }
 0x6f0   :  { %9552 = vmatprep.mubr.f32.mxu0 %v24800_v17 }
 0x6f3   :  { %18021 = vmatmul.mubr.msk.f32.vlgmr.msra.gmra.mrb[32].mxu0 %vm3691_vm11, %v25337_v26  ;;  %v25488_v4 = vpop.permute.xlu0 %20910 }
 0x6f4   :  { %18607 = vmatpush1.bf16.msra.mxu0 %v18606_v47  ;;  %9558 = vmatprep.mubr.f32.mxu0 %v24800_v17  ;;  %v20912_v49 = vunpack.i.l.bf16 %v25488_v4 }
 0x6f5   :  { %18609 = vmatprep.subr.bf16.mxu0 %v18608_v13 }
 0x6f7   :  { %18022 = vmatmul.mubr.msk.f32.gmra.mrb[34].mxu0 %vm3691_vm11, %v25351_v29 }
 0x6f8   :  { %18611 = vmatpush1.bf16.msra.mxu0 %v18610_v30  ;;  %9564 = vmatprep.mubr.f32.mxu0 %v24800_v17  ;;  %v9748_v17 = vsel %vm2364_vm7, %v20863_v45, %v20857_v28  ;;  %v20902_v28 = vunpack.i.l.bf16 %v20901_v46  ;;  %v20913_v45 = vunpack.i.h.bf16 %v25488_v4  ;;  %v25577_v4 = vld [vmem:[%s28075_s6 + $0xe8] sm:$0xff] }
 0x6f9   :  { %18613 = vmatprep.subr.bf16.mxu0 %v18612_v11  ;;  %v18614_v24 = vpack.c.bf16 %v9748_v17, %v9743_v10 }
 0x6fa   :  { %v9747_v30 = vsel %vm2364_vm7, %v20883_v23, %v20902_v28 }
 0x6fb   :  { %18023 = vmatmul.mubr.msk.f32.gmra.mrb[36].mxu0 %vm3691_vm11, %v25362_v51 }
 0x6fc   :  { %9570 = vmatprep.mubr.f32.mxu0 %v25407_v14 }
 0x6ff   :  { %18024 = vmatmul.mubr.msk.f32.gmra.mrb[38].mxu0 %vm3691_vm11, %v25372_v3 }
 0x700   :  { %9641 = vmatprep.mubr.f32.mxu0 %v25407_v14 }
 0x703   :  { %18025 = vmatmul.mubr.msk.f32.vlgmr.msra.gmra.mrb[40].mxu0 %vm3691_vm11, %v25337_v26  ;;  %v20896_v26 = vpop.permute.xlu1 %20895 }
 0x704   :  { %18615 = vmatpush1.bf16.msra.mxu0 %v18614_v24  ;;  %9647 = vmatprep.mubr.f32.mxu0 %v25407_v14  ;;  %v20898_v50 = vunpack.i.h.bf16 %v20896_v26  ;;  %v20897_v58 = vunpack.i.l.bf16 %v20896_v26 }
 0x705   :  { %18617 = vmatprep.subr.bf16.mxu0 %v18616_v5 }
 0x706   :  { %v9761_v12 = vsel %vm2364_vm7, %v20897_v58, %v20898_v50 }
 0x707   :  { %18026 = vmatmul.mubr.msk.f32.gmra.mrb[42].mxu0 %vm3691_vm11, %v25351_v29  ;;  %v9750_v29 = vsel %vm2364_vm7, %v20858_v59, %v20887_v61  ;;  %v20903_v59 = vunpack.i.h.bf16 %v20901_v46  ;;  %v18624_v33 = vpack.c.bf16 %v9761_v12, %v9756_v2  ;;  %v20906_v47 = vpop.permute.xlu1 %20905 }
 0x708   :  { %18619 = vmatpush1.bf16.msra.mxu0 %v18618_v60  ;;  %9653 = vmatprep.mubr.f32.mxu0 %v25407_v14  ;;  %v18622_v32 = vpack.c.bf16 %v9750_v29, %v9745_v54  ;;  %v20908_v39 = vunpack.i.h.bf16 %v20906_v47  ;;  %v20907_v11 = vunpack.i.l.bf16 %v20906_v47 }
 0x709   :  { %18621 = vmatprep.subr.bf16.mxu0 %v18620_v37  ;;  %v18628_v18 = vpack.c.bf16 %v20903_v59, %v20902_v28  ;;  %v9752_v34 = vsel %vm2364_vm7, %v20888_v20, %v20903_v59  ;;  %v10144_v20 = vsel %vm2731_vm8, %v20912_v49, %v20913_v45 }
 0x70a   :  { %v18630_v42 = vpack.c.bf16 %v9752_v34, %v9747_v30  ;;  %v9757_v21 = vsel %vm2364_vm7, %v20893_v19, %v20907_v11  ;;  %v9762_v17 = vsel %vm2364_vm7, %v20898_v50, %v20908_v39  ;;  %v18632_v1 = vpack.c.bf16 %v20908_v39, %v20907_v11 }
 0x70b   :  { %18027 = vmatmul.mubr.msk.f32.gmra.mrb[44].mxu0 %vm3691_vm11, %v25362_v51  ;;  %v25451_v51 = vld [vmem:[%s28075_s6 + $0xc0] sm:$0xff]  ;;  %v25478_v13 = vpop.permute.xlu1 %20915  ;;  %v18634_v41 = vpack.c.bf16 %v9762_v17, %v9757_v21  ;;  %v25588_v17 = vld [vmem:[%s28075_s6 + $0xf0] sm:$0xff] }
 0x70c   :  { %9659 = vmatprep.mubr.f32.mxu0 %v25407_v14  ;;  %v20918_v53 = vunpack.i.h.bf16 %v25478_v13  ;;  %v20917_v6 = vunpack.i.l.bf16 %v25478_v13 }
 0x70e   :  { %v10149_v27 = vsel %vm2731_vm8, %v20917_v6, %v20918_v53 }
 0x70f   :  { %18028 = vmatmul.mubr.msk.f32.gmra.mrb[46].mxu0 %vm3691_vm11, %v25372_v3  ;;  %v9760_v3 = vsel %vm2364_vm7, %v20873_v63, %v20897_v58  ;;  %v25499_v48 = vpop.permute.xlu1 %20925  ;;  %v20921_v63 = vpop.permute.xlu0 %20920  ;;  %v18636_v15 = vpack.c.bf16 %v10149_v27, %v10144_v20 }
 0x710   :  { %9863 = vmatprep.mubr.f32.mxu0 %v25407_v14  ;;  %v18626_v40 = vpack.c.bf16 %v9760_v3, %v9755_v7  ;;  %v20928_v23 = vunpack.i.h.bf16 %v25499_v48  ;;  %v20927_v62 = vunpack.i.l.bf16 %v25499_v48  ;;  %v20923_v24 = vunpack.i.h.bf16 %v20921_v63  ;;  %v25598_v48 = vld [vmem:[%s28075_s6 + $0xf8] sm:$0xff] }
 0x711   :  { %v20922_v38 = vunpack.i.l.bf16 %v20921_v63 }
 0x712   :  { %v10148_v52 = vsel %vm2731_vm8, %v20923_v24, %v20917_v6  ;;  %v10154_v50 = vsel %vm2731_vm8, %v20927_v62, %v20928_v23 }
 0x713   :  { %18033 = vmatmul.mubr.msk.f32.vlgmr.msra.gmra.mrb[24].mxu0 %vm3691_vm11, %v25451_v51  ;;  %v20936_v61 = vpop.permute.xlu1 %20935  ;;  %v20931_v10 = vpop.permute.xlu0 %20930  ;;  %v10143_v58 = vsel %vm2731_vm8, %v20922_v38, %v20912_v49 }
 0x714   :  { %18623 = vmatpush1.bf16.msra.mxu0 %v18622_v32  ;;  %9869 = vmatprep.mubr.f32.mxu0 %v25407_v14  ;;  %v20933_v8 = vunpack.i.h.bf16 %v20931_v10  ;;  %v20932_v5 = vunpack.i.l.bf16 %v20931_v10  ;;  %v20938_v43 = vunpack.i.h.bf16 %v20936_v61  ;;  %v20937_v37 = vunpack.i.l.bf16 %v20936_v61 }
 0x715   :  { %18625 = vmatprep.subr.bf16.mxu0 %v18624_v33  ;;  %v18638_v29 = vpack.c.bf16 %v10148_v52, %v10143_v58 }
 0x716   :  { %v10159_v46 = vsel %vm2731_vm8, %v20932_v5, %v20933_v8  ;;  %v10158_v12 = vsel %vm2731_vm8, %v20938_v43, %v20932_v5  ;;  %v10153_v54 = vsel %vm2731_vm8, %v20937_v37, %v20927_v62 }
 0x717   :  { %18034 = vmatmul.mubr.msk.f32.gmra.mrb[26].mxu0 %vm3691_vm11, %v25465_v35  ;;  %v25522_v56 = vpop.permute.xlu1 %20945  ;;  %v25525_v60 = vpop.permute.xlu0 %20940  ;;  %v18640_v32 = vpack.c.bf16 %v10159_v46, %v10154_v50  ;;  %v18642_v59 = vpack.c.bf16 %v10158_v12, %v10153_v54 }
 0x718   :  { %18627 = vmatpush1.bf16.msra.mxu0 %v18626_v40  ;;  %9875 = vmatprep.mubr.f32.mxu0 %v25407_v14  ;;  %v20948_v26 = vunpack.i.h.bf16 %v25522_v56  ;;  %v20947_v16 = vunpack.i.l.bf16 %v25522_v56  ;;  %v20943_v19 = vunpack.i.h.bf16 %v25525_v60  ;;  %v20942_v25 = vunpack.i.l.bf16 %v25525_v60 }
 0x719   :  { %18629 = vmatprep.subr.bf16.mxu0 %v18628_v18 }
 0x71a   :  { %v10151_v2 = vsel %vm2731_vm8, %v20947_v16, %v20948_v26  ;;  %v10146_v28 = vsel %vm2731_vm8, %v20942_v25, %v20943_v19  ;;  %v10145_v39 = vsel %vm2731_vm8, %v20913_v45, %v20942_v25 }
 0x71b   :  { %18035 = vmatmul.mubr.msk.f32.gmra.mrb[28].mxu0 %vm3691_vm11, %v25476_v55  ;;  %v18644_v3 = vpack.c.bf16 %v10151_v2, %v10146_v28  ;;  %v20951_v33 = vpop.permute.xlu0 %20950 }
 0x71c   :  { %9881 = vmatprep.mubr.f32.mxu0 %v25407_v14  ;;  %v20953_v40 = vunpack.i.h.bf16 %v20951_v33  ;;  %v20952_v18 = vunpack.i.l.bf16 %v20951_v33 }
 0x71e   :  { %v10156_v11 = vsel %vm2731_vm8, %v20952_v18, %v20953_v40  ;;  %v10155_v45 = vsel %vm2731_vm8, %v20928_v23, %v20952_v18 }
 0x71f   :  { %18036 = vmatmul.mubr.msk.f32.gmra.mrb[30].mxu0 %vm3691_vm11, %v25486_v22  ;;  %v20961_v30 = vpop.permute.xlu0 %20960 }
 0x720   :  { %9952 = vmatprep.mubr.f32.mxu0 %v25407_v14  ;;  %v20962_v6 = vunpack.i.l.bf16 %v20961_v30 }
 0x723   :  { %18037 = vmatmul.mubr.msk.f32.vlgmr.msra.gmra.mrb[32].mxu0 %vm3691_vm11, %v25451_v51  ;;  %v25600_v27 = vpop.permute.xlu0 %20970 }
 0x724   :  { %18631 = vmatpush1.bf16.msra.mxu0 %v18630_v42  ;;  %9958 = vmatprep.mubr.f32.mxu0 %v25407_v14  ;;  %v20973_v24 = vunpack.i.h.bf16 %v25600_v27  ;;  %v20972_v38 = vunpack.i.l.bf16 %v25600_v27 }
 0x725   :  { %18633 = vmatprep.subr.bf16.mxu0 %v18632_v1 }
 0x727   :  { %18038 = vmatmul.mubr.msk.f32.gmra.mrb[34].mxu0 %vm3691_vm11, %v25465_v35 }
 0x728   :  { %18635 = vmatpush1.bf16.msra.mxu0 %v18634_v41  ;;  %9964 = vmatprep.mubr.f32.mxu0 %v25407_v14  ;;  %v10147_v41 = vsel %vm2731_vm8, %v20943_v19, %v20962_v6 }
 0x729   :  { %18637 = vmatprep.subr.bf16.mxu0 %v18636_v15 }
 0x72b   :  { %18039 = vmatmul.mubr.msk.f32.gmra.mrb[36].mxu0 %vm3691_vm11, %v25476_v55 }
 0x72c   :  { %9970 = vmatprep.mubr.f32.mxu0 %v25407_v14 }
 0x72f   :  { %18040 = vmatmul.mubr.msk.f32.gmra.mrb[38].mxu0 %vm3691_vm11, %v25486_v22 }
 0x730   :  { %10041 = vmatprep.mubr.f32.mxu0 %v25407_v14 }
 0x733   :  { %18041 = vmatmul.mubr.msk.f32.vlgmr.msra.gmra.mrb[40].mxu0 %vm3691_vm11, %v25451_v51  ;;  %v20956_v51 = vpop.permute.xlu1 %20955 }
 0x734   :  { %18639 = vmatpush1.bf16.msra.mxu0 %v18638_v29  ;;  %10047 = vmatprep.mubr.f32.mxu0 %v25407_v14  ;;  %v20958_v7 = vunpack.i.h.bf16 %v20956_v51  ;;  %v20957_v47 = vunpack.i.l.bf16 %v20956_v51 }
 0x735   :  { %18641 = vmatprep.subr.bf16.mxu0 %v18640_v32 }
 0x736   :  { %v10161_v34 = vsel %vm2731_vm8, %v20957_v47, %v20958_v7 }
 0x737   :  { %18042 = vmatmul.mubr.msk.f32.gmra.mrb[42].mxu0 %vm3691_vm11, %v25465_v35  ;;  %v10150_v35 = vsel %vm2731_vm8, %v20918_v53, %v20947_v16  ;;  %v20963_v53 = vunpack.i.h.bf16 %v20961_v30  ;;  %v18648_v49 = vpack.c.bf16 %v10161_v34, %v10156_v11  ;;  %v20966_v42 = vpop.permute.xlu1 %20965 }
 0x738   :  { %18643 = vmatpush1.bf16.msra.mxu0 %v18642_v59  ;;  %10053 = vmatprep.mubr.f32.mxu0 %v25407_v14  ;;  %v18646_v13 = vpack.c.bf16 %v10150_v35, %v10145_v39  ;;  %v20968_v61 = vunpack.i.h.bf16 %v20966_v42  ;;  %v20967_v15 = vunpack.i.l.bf16 %v20966_v42 }
 0x739   :  { %18645 = vmatprep.subr.bf16.mxu0 %v18644_v3  ;;  %v18652_v21 = vpack.c.bf16 %v20963_v53, %v20962_v6  ;;  %v10152_v20 = vsel %vm2731_vm8, %v20948_v26, %v20963_v53  ;;  %v10544_v26 = vsel %vm3098_vm9, %v20972_v38, %v20973_v24 }
 0x73a   :  { %v18654_v56 = vpack.c.bf16 %v10152_v20, %v10147_v41  ;;  %v10157_v5 = vsel %vm2731_vm8, %v20953_v40, %v20967_v15  ;;  %v10162_v52 = vsel %vm2731_vm8, %v20958_v7, %v20968_v61  ;;  %v18656_v60 = vpack.c.bf16 %v20968_v61, %v20967_v15 }
 0x73b   :  { %18043 = vmatmul.mubr.msk.f32.gmra.mrb[44].mxu0 %vm3691_vm11, %v25476_v55  ;;  %v25563_v55 = vld [vmem:[%s28075_s6 + $0xe0] sm:$0xff]  ;;  %v25590_v1 = vpop.permute.xlu1 %20975  ;;  %v18658_v37 = vpack.c.bf16 %v10162_v52, %v10157_v5  ;;  %v18063_v5 = vld [vmem:[%s28075_s6 + $0x110] sm:$0xff] }
 0x73c   :  { %10059 = vmatprep.mubr.f32.mxu0 %v25407_v14  ;;  %v20978_v10 = vunpack.i.h.bf16 %v25590_v1  ;;  %v20977_v23 = vunpack.i.l.bf16 %v25590_v1 }
 0x73e   :  { %v10549_v43 = vsel %vm3098_vm9, %v20977_v23, %v20978_v10 }
 0x73f   :  { %18044 = vmatmul.mubr.msk.f32.gmra.mrb[46].mxu0 %vm3691_vm11, %v25486_v22  ;;  %v10160_v22 = vsel %vm2731_vm8, %v20933_v8, %v20957_v47  ;;  %v25611_v62 = vpop.permute.xlu1 %20985  ;;  %v20981_v8 = vpop.permute.xlu0 %20980  ;;  %v18660_v50 = vpack.c.bf16 %v10549_v43, %v10544_v26 }
 0x740   :  { %10263 = vmatprep.mubr.f32.mxu0 %v25407_v14  ;;  %v18650_v63 = vpack.c.bf16 %v10160_v22, %v10155_v45  ;;  %v20988_v19 = vunpack.i.h.bf16 %v25611_v62  ;;  %v20987_v25 = vunpack.i.l.bf16 %v25611_v62  ;;  %v20983_v29 = vunpack.i.h.bf16 %v20981_v8  ;;  %v18064_v62 = vld [vmem:[%s28075_s6 + $0x118] sm:$0xff] }
 0x741   :  { %v20982_v46 = vunpack.i.l.bf16 %v20981_v8 }
 0x742   :  { %v10548_v2 = vsel %vm3098_vm9, %v20983_v29, %v20977_v23  ;;  %v10554_v7 = vsel %vm3098_vm9, %v20987_v25, %v20988_v19  ;;  %v25725_v29 = vpack.i.bf16 %v25407_v14, %v25407_v14 }
 0x743   :  { %18049 = vmatmul.mubr.msk.f32.vlgmr.msra.gmra.mrb[24].mxu0 %vm3691_vm11, %v25563_v55  ;;  %v20996_v16 = vpop.permute.xlu1 %20995  ;;  %v20991_v58 = vpop.permute.xlu0 %20990  ;;  %v10543_v47 = vsel %vm3098_vm9, %v20982_v46, %v20972_v38 }
 0x744   :  { %18647 = vmatpush1.bf16.msra.mxu0 %v18646_v13  ;;  %10269 = vmatprep.mubr.f32.mxu0 %v25407_v14  ;;  %v20993_v54 = vunpack.i.h.bf16 %v20991_v58  ;;  %v20992_v32 = vunpack.i.l.bf16 %v20991_v58  ;;  %v20998_v28 = vunpack.i.h.bf16 %v20996_v16  ;;  %v20997_v3 = vunpack.i.l.bf16 %v20996_v16 }
 0x745   :  { %18649 = vmatprep.subr.bf16.mxu0 %v18648_v49  ;;  %v18662_v35 = vpack.c.bf16 %v10548_v2, %v10543_v47  ;;  %21030 = vrot.lane.b32.xlu0 %v25725_v29, %s22031_s23 }
 0x746   :  { %v10559_v30 = vsel %vm3098_vm9, %v20992_v32, %v20993_v54  ;;  %v10558_v34 = vsel %vm3098_vm9, %v20998_v28, %v20992_v32  ;;  %v10553_v39 = vsel %vm3098_vm9, %v20997_v3, %v20987_v25 }
 0x747   :  { %18050 = vmatmul.mubr.msk.f32.gmra.mrb[26].mxu0 %vm3691_vm11, %v25577_v4  ;;  %v25634_v12 = vpop.permute.xlu1 %21005  ;;  %v25637_v59 = vpop.permute.xlu0 %21000  ;;  %v18664_v13 = vpack.c.bf16 %v10559_v30, %v10554_v7  ;;  %v18666_v53 = vpack.c.bf16 %v10558_v34, %v10553_v39 }
 0x748   :  { %18651 = vmatpush1.bf16.msra.mxu0 %v18650_v63  ;;  %10275 = vmatprep.mubr.f32.mxu0 %v25407_v14  ;;  %v21008_v51 = vunpack.i.h.bf16 %v25634_v12  ;;  %v21007_v33 = vunpack.i.l.bf16 %v25634_v12  ;;  %v21003_v40 = vunpack.i.h.bf16 %v25637_v59  ;;  %v21002_v18 = vunpack.i.l.bf16 %v25637_v59 }
 0x749   :  { %18653 = vmatprep.subr.bf16.mxu0 %v18652_v21 }
 0x74a   :  { %v10551_v11 = vsel %vm3098_vm9, %v21007_v33, %v21008_v51  ;;  %v10546_v6 = vsel %vm3098_vm9, %v21002_v18, %v21003_v40  ;;  %v10545_v61 = vsel %vm3098_vm9, %v20973_v24, %v21002_v18 }
 0x74b   :  { %18051 = vmatmul.mubr.msk.f32.gmra.mrb[28].mxu0 %vm3691_vm11, %v25588_v17  ;;  %v18668_v22 = vpack.c.bf16 %v10551_v11, %v10546_v6  ;;  %v21011_v49 = vpop.permute.xlu0 %21010 }
 0x74c   :  { %10281 = vmatprep.mubr.f32.mxu0 %v25407_v14  ;;  %v21013_v63 = vunpack.i.h.bf16 %v21011_v49  ;;  %v21012_v21 = vunpack.i.l.bf16 %v21011_v49 }
 0x74e   :  { %v10556_v1 = vsel %vm3098_vm9, %v21012_v21, %v21013_v63  ;;  %v10555_v27 = vsel %vm3098_vm9, %v20988_v19, %v21012_v21 }
 0x74f   :  { %18052 = vmatmul.mubr.msk.f32.gmra.mrb[30].mxu0 %vm3691_vm11, %v25598_v48  ;;  %v21021_v41 = vpop.permute.xlu0 %21020 }
 0x750   :  { %10352 = vmatprep.mubr.f32.mxu0 %v25407_v14  ;;  %v21022_v23 = vunpack.i.l.bf16 %v21021_v41 }
 0x753   :  { %18053 = vmatmul.mubr.msk.f32.vlgmr.msra.gmra.mrb[32].mxu0 %vm3691_vm11, %v25563_v55  ;;  %v25729_v46 = vpop.permute.xlu0 %7249 }
 0x754   :  { %18655 = vmatpush1.bf16.msra.mxu0 %v18654_v56  ;;  %10358 = vmatprep.mubr.f32.mxu0 %v25407_v14  ;;  %v18062_v56 = vld [vmem:[%s28075_s6 + $0x108] sm:$0xff] }
 0x755   :  { %18657 = vmatprep.subr.bf16.mxu0 %v18656_v60  ;;  %v10547_v60 = vsel %vm3098_vm9, %v21003_v40, %v21022_v23 }
 0x757   :  { %18054 = vmatmul.mubr.msk.f32.gmra.mrb[34].mxu0 %vm3691_vm11, %v25577_v4 }
 0x758   :  { %18659 = vmatpush1.bf16.msra.mxu0 %v18658_v37  ;;  %10364 = vmatprep.mubr.f32.mxu0 %v25407_v14 }
 0x759   :  { %18661 = vmatprep.subr.bf16.mxu0 %v18660_v50 }
 0x75b   :  { %18055 = vmatmul.mubr.msk.f32.gmra.mrb[36].mxu0 %vm3691_vm11, %v25588_v17 }
 0x75c   :  { %10370 = vmatprep.mubr.f32.mxu0 %v25407_v14 }
 0x75f   :  { %18056 = vmatmul.mubr.msk.f32.gmra.mrb[38].mxu0 %vm3691_vm11, %v25598_v48 }
 0x760   :  { %10441 = vmatprep.mubr.f32.mxu0 %v25407_v14 }
 0x763   :  { %18057 = vmatmul.mubr.msk.f32.vlgmr.msra.gmra.mrb[40].mxu0 %vm3691_vm11, %v25563_v55  ;;  %v21016_v55 = vpop.permute.xlu1 %21015 }
 0x764   :  { %18663 = vmatpush1.bf16.msra.mxu0 %v18662_v35  ;;  %10447 = vmatprep.mubr.f32.mxu0 %v25407_v14  ;;  %v21018_v45 = vunpack.i.h.bf16 %v21016_v55  ;;  %v21017_v42 = vunpack.i.l.bf16 %v21016_v55  ;;  %v25743_v35 = vpop.permute.xlu0 %7259 }
 0x765   :  { %18665 = vmatprep.subr.bf16.mxu0 %v18664_v13 }
 0x766   :  { %v10561_v20 = vsel %vm3098_vm9, %v21017_v42, %v21018_v45 }
 0x767   :  { %18058 = vmatmul.mubr.msk.f32.gmra.mrb[42].mxu0 %vm3691_vm11, %v25577_v4  ;;  %v10550_v4 = vsel %vm3098_vm9, %v20978_v10, %v21007_v33  ;;  %v21023_v10 = vunpack.i.h.bf16 %v21021_v41  ;;  %v18672_v38 = vpack.c.bf16 %v10561_v20, %v10556_v1  ;;  %v21026_v52 = vpop.permute.xlu1 %21025 }
 0x768   :  { %18667 = vmatpush1.bf16.msra.mxu0 %v18666_v53  ;;  %10453 = vmatprep.mubr.f32.mxu0 %v25407_v14  ;;  %v18670_v15 = vpack.c.bf16 %v10550_v4, %v10545_v61  ;;  %v21028_v37 = vunpack.i.h.bf16 %v21026_v52  ;;  %v21027_v26 = vunpack.i.l.bf16 %v21026_v52 }
 0x769   :  { %18669 = vmatprep.subr.bf16.mxu0 %v18668_v22  ;;  %v18676_v8 = vpack.c.bf16 %v21023_v10, %v21022_v23  ;;  %v10552_v43 = vsel %vm3098_vm9, %v21008_v51, %v21023_v10 }
 0x76a   :  { %v18678_v16 = vpack.c.bf16 %v10552_v43, %v10547_v60  ;;  %v10557_v50 = vsel %vm3098_vm9, %v21013_v63, %v21027_v26  ;;  %v10562_v58 = vsel %vm3098_vm9, %v21018_v45, %v21028_v37  ;;  %v18680_v19 = vpack.c.bf16 %v21028_v37, %v21027_v26 }
 0x76b   :  { %18059 = vmatmul.mubr.msk.f32.gmra.mrb[44].mxu0 %vm3691_vm11, %v25588_v17  ;;  %v18061_v17 = vld [vmem:[%s28075_s6 + $0x100] sm:$0xff]  ;;  %v18682_v25 = vpack.c.bf16 %v10562_v58, %v10557_v50  ;;  %v25733_v28 = vpop.permute.xlu1 %7254 }
 0x76c   :  { %10459 = vmatprep.mubr.f32.mxu0 %v25407_v14 }
 0x76f   :  { %18060 = vmatmul.mubr.msk.f32.gmra.mrb[46].mxu0 %vm3691_vm11, %v25598_v48  ;;  %v10560_v48 = vsel %vm3098_vm9, %v20993_v54, %v21017_v42  ;;  %v25765_v42 = vpop.permute.xlu1 %7264 }
 0x770   :  { %10663 = vmatprep.mubr.f32.mxu0 %v25407_v14  ;;  %v18674_v24 = vpack.c.bf16 %v10560_v48, %v10555_v27 }
 0x773   :  { %18065 = vmatmul.mubr.msk.f32.vlgmr.msra.gmra.mrb[24].mxu0 %vm3691_vm11, %v18061_v17 }
 0x774   :  { %18671 = vmatpush1.bf16.msra.mxu0 %v18670_v15  ;;  %10669 = vmatprep.mubr.f32.mxu0 %v25407_v14 }
 0x775   :  { %18673 = vmatprep.subr.bf16.mxu0 %v18672_v38 }
 0x777   :  { %18066 = vmatmul.mubr.msk.f32.gmra.mrb[26].mxu0 %vm3691_vm11, %v18062_v56 }
 0x778   :  { %18675 = vmatpush1.bf16.msra.mxu0 %v18674_v24  ;;  %10675 = vmatprep.mubr.f32.mxu0 %v25407_v14 }
 0x779   :  { %18677 = vmatprep.subr.bf16.mxu0 %v18676_v8 }
 0x77b   :  { %18067 = vmatmul.mubr.msk.f32.gmra.mrb[28].mxu0 %vm3691_vm11, %v18063_v5 }
 0x77c   :  { %10681 = vmatprep.mubr.f32.mxu0 %v25407_v14 }
 0x77f   :  { %18068 = vmatmul.mubr.msk.f32.gmra.mrb[30].mxu0 %vm3691_vm11, %v18064_v62 }
 0x780   :  { %10752 = vmatprep.mubr.f32.mxu0 %v25407_v14 }
 0x783   :  { %18069 = vmatmul.mubr.msk.f32.vlgmr.msra.gmra.mrb[32].mxu0 %vm3691_vm11, %v18061_v17 }
 0x784   :  { %18679 = vmatpush1.bf16.msra.mxu0 %v18678_v16  ;;  %10758 = vmatprep.mubr.f32.mxu0 %v25407_v14 }
 0x785   :  { %18681 = vmatprep.subr.bf16.mxu0 %v18680_v19 }
 0x787   :  { %18070 = vmatmul.mubr.msk.f32.gmra.mrb[34].mxu0 %vm3691_vm11, %v18062_v56 }
 0x788   :  { %18683 = vmatpush1.bf16.msra.mxu0 %v18682_v25  ;;  %10764 = vmatprep.mubr.f32.mxu0 %v25407_v14 }
 0x78b   :  { %18071 = vmatmul.mubr.msk.f32.gmra.mrb[36].mxu0 %vm3691_vm11, %v18063_v5 }
 0x78c   :  { %10770 = vmatprep.mubr.f32.mxu0 %v25407_v14 }
 0x78f   :  { %18072 = vmatmul.mubr.msk.f32.gmra.mrb[38].mxu0 %vm3691_vm11, %v18064_v62 }
 0x790   :  { %10841 = vmatprep.mubr.f32.mxu0 %v25407_v14 }
 0x793   :  { %18073 = vmatmul.mubr.msk.f32.vlgmr.msra.gmra.mrb[40].mxu0 %vm3691_vm11, %v18061_v17 }
 0x794   :  { %10847 = vmatprep.mubr.f32.mxu0 %v25407_v14 }
 0x797   :  { %18074 = vmatmul.mubr.msk.f32.gmra.mrb[42].mxu0 %vm3691_vm11, %v18062_v56 }
 0x798   :  { %10853 = vmatprep.mubr.f32.mxu0 %v25407_v14 }
 0x79b   :  { %18075 = vmatmul.mubr.msk.f32.gmra.mrb[44].mxu0 %vm3691_vm11, %v18063_v5 }
 0x79c   :  { %10859 = vmatprep.mubr.f32.mxu0 %v25407_v14 }
 0x79f   :  { %18076 = vmatmul.mubr.msk.f32.gmra.mrb[46].mxu0 %vm3691_vm11, %v18064_v62 }
 0x7a0   :  { %14895 = vmatprep.mubr.f32.mxu0 %v25407_v14 }
 0x846   :  { %v10665_v12 = vpop.f32.mrb[24].mxu0 }
 0x847   :  { %v19174_v54 = vadd.f32 %v10665_v12, %v25729_v46  ;;  %v10667_v32 = vpop.f32.mrb[25].mxu0 }
 0x848   :  { %v19175_v2 = vadd.f32 %v10667_v32, %v25729_v46 }
 0x849   :  { %v10890_v59 = vmax.f32 %v19174_v54, 0.0 }
 0x84a   :  { %v10891_v3 = vmax.f32 %v19175_v2, 0.0  ;;  %v10671_v51 = vpop.f32.mrb[26].mxu0 }
 0x84b   :  { %v25736_v33 = vmul.f32 %v10890_v59, %v23033_v0  ;;  %v19176_v14 = vadd.f32 %v10671_v51, %v25733_v28  ;;  %v10673_v7 = vpop.f32.mrb[27].mxu0 }
 0x84c   :  { %v25740_v47 = vmul.f32 %v10891_v3, %v23037_v9  ;;  %v19177_v40 = vadd.f32 %v10673_v7, %v25733_v28 }
 0x84d   :  { %v10896_v18 = vmax.f32 %v19176_v14, 0.0 }
 0x84e   :  { %v10897_v30 = vmax.f32 %v19177_v40, 0.0  ;;  %v10677_v34 = vpop.f32.mrb[28].mxu0  ;;  %v25747_v39 = vpack.i.bf16 %v25740_v47, %v25736_v33 }
 0x84f   :  { %v25750_v13 = vmul.f32 %v10896_v18, %v23033_v0  ;;  %v19178_v11 = vadd.f32 %v10677_v34, %v25743_v35  ;;  %v10679_v53 = vpop.f32.mrb[29].mxu0 }
 0x850   :  { %v25754_v6 = vmul.f32 %v10897_v30, %v23037_v9  ;;  %v19179_v22 = vadd.f32 %v10679_v53, %v25743_v35  ;;  %21035 = vrot.lane.b32.xlu0 %v25747_v39, %s22031_s23 }
 0x851   :  { %v10902_v55 = vmax.f32 %v19178_v11, 0.0  ;;  %v25761_v49 = vpack.i.bf16 %v25750_v13, %v25736_v33 }
 0x852   :  { %v10903_v63 = vmax.f32 %v19179_v22, 0.0  ;;  %v10683_v21 = vpop.f32.mrb[30].mxu0  ;;  %v25769_v4 = vpack.i.bf16 %v25754_v6, %v25750_v13 }
 0x853   :  { %v25774_v17 = vmul.f32 %v10902_v55, %v23033_v0  ;;  %v19180_v20 = vadd.f32 %v10683_v21, %v25765_v42  ;;  %v10685_v61 = vpop.f32.mrb[31].mxu0 }
 0x854   :  { %v25778_v15 = vmul.f32 %v10903_v63, %v23037_v9  ;;  %v19181_v1 = vadd.f32 %v10685_v61, %v25765_v42  ;;  %21040 = vrot.lane.b32.xlu1 %v25769_v4, %s22031_s23 }
 0x855   :  { %v10908_v10 = vmax.f32 %v19180_v20, 0.0 }
 0x856   :  { %v10909_v23 = vmax.f32 %v19181_v1, 0.0  ;;  %v10754_v48 = vpop.f32.mrb[32].mxu0  ;;  %v25785_v38 = vpack.i.bf16 %v25778_v15, %v25774_v17 }
 0x857   :  { %v25788_v56 = vmul.f32 %v10908_v10, %v23033_v0  ;;  %v19182_v27 = vadd.f32 %v10754_v48, %v25729_v46  ;;  %v10756_v24 = vpop.f32.mrb[33].mxu0 }
 0x858   :  { %v25792_v8 = vmul.f32 %v10909_v23, %v23037_v9  ;;  %v19183_v5 = vadd.f32 %v10756_v24, %v25729_v46  ;;  %21045 = vrot.lane.b32.xlu1 %v25785_v38, %s22031_s23 }
 0x859   :  { %v10892_v52 = vmax.f32 %v19182_v27, 0.0  ;;  %v25799_v62 = vpack.i.bf16 %v25788_v56, %v25774_v17 }
 0x85a   :  { %v10893_v43 = vmax.f32 %v19183_v5, 0.0  ;;  %v10760_v37 = vpop.f32.mrb[34].mxu0  ;;  %v25805_v26 = vpack.i.bf16 %v25792_v8, %v25788_v56 }
 0x85b   :  { %v25810_v50 = vmul.f32 %v10892_v52, %v23054_v31  ;;  %v19184_v58 = vadd.f32 %v10760_v37, %v25733_v28  ;;  %v10762_v19 = vpop.f32.mrb[35].mxu0 }
 0x85c   :  { %v25814_v25 = vmul.f32 %v10893_v43, %v23062_v36  ;;  %v19185_v12 = vadd.f32 %v10762_v19, %v25733_v28  ;;  %21055 = vrot.lane.b32.xlu1 %v25725_v29, %s22031_s23  ;;  %21050 = vrot.lane.b32.xlu0 %v25805_v26, %s22031_s23 }
 0x85d   :  { %v10898_v54 = vmax.f32 %v19184_v58, 0.0  ;;  %v25823_v32 = vpack.i.bf16 %v25810_v50, %v25740_v47 }
 0x85e   :  { %v10899_v2 = vmax.f32 %v19185_v12, 0.0  ;;  %v10766_v59 = vpop.f32.mrb[36].mxu0  ;;  %v25827_v3 = vpack.i.bf16 %v25814_v25, %v25810_v50 }
 0x85f   :  { %v25830_v51 = vmul.f32 %v10898_v54, %v23054_v31  ;;  %v19186_v14 = vadd.f32 %v10766_v59, %v25743_v35  ;;  %v10768_v7 = vpop.f32.mrb[37].mxu0 }
 0x860   :  { %v25834_v40 = vmul.f32 %v10899_v2, %v23062_v36  ;;  %v19187_v18 = vadd.f32 %v10768_v7, %v25743_v35  ;;  %21060 = vrot.lane.b32.xlu0 %v25827_v3, %s22031_s23 }
 0x861   :  { %v10904_v30 = vmax.f32 %v19186_v14, 0.0  ;;  %v25841_v34 = vpack.i.bf16 %v25830_v51, %v25754_v6 }
 0x862   :  { %v10905_v53 = vmax.f32 %v19187_v18, 0.0  ;;  %v10772_v22 = vpop.f32.mrb[38].mxu0  ;;  %v25847_v55 = vpack.i.bf16 %v25834_v40, %v25830_v51 }
 0x863   :  { %v25852_v21 = vmul.f32 %v10904_v30, %v23054_v31  ;;  %v19188_v20 = vadd.f32 %v10772_v22, %v25765_v42  ;;  %v10774_v61 = vpop.f32.mrb[39].mxu0 }
 0x864   :  { %v25856_v1 = vmul.f32 %v10905_v53, %v23062_v36  ;;  %v19189_v10 = vadd.f32 %v10774_v61, %v25765_v42  ;;  %21065 = vrot.lane.b32.xlu1 %v25847_v55, %s22031_s23 }
 0x865   :  { %v10910_v23 = vmax.f32 %v19188_v20, 0.0  ;;  %v25863_v48 = vpack.i.bf16 %v25852_v21, %v25778_v15 }
 0x866   :  { %v10911_v27 = vmax.f32 %v19189_v10, 0.0  ;;  %v10843_v24 = vpop.f32.mrb[40].mxu0  ;;  %v25867_v5 = vpack.i.bf16 %v25856_v1, %v25852_v21 }
 0x867   :  { %v25870_v52 = vmul.f32 %v10910_v23, %v23054_v31  ;;  %v19190_v43 = vadd.f32 %v10843_v24, %v25729_v46  ;;  %v10845_v37 = vpop.f32.mrb[41].mxu0 }
 0x868   :  { %v25874_v58 = vmul.f32 %v10911_v27, %v23062_v36  ;;  %v19191_v19 = vadd.f32 %v10845_v37, %v25729_v46  ;;  %21070 = vrot.lane.b32.xlu0 %v25867_v5, %s22031_s23 }
 0x869   :  { %v10894_v12 = vmax.f32 %v19190_v43, 0.0  ;;  %v25881_v54 = vpack.i.bf16 %v25870_v52, %v25792_v8 }
 0x86a   :  { %v10895_v59 = vmax.f32 %v19191_v19, 0.0  ;;  %v10849_v14 = vpop.f32.mrb[42].mxu0  ;;  %v25887_v7 = vpack.i.bf16 %v25874_v58, %v25870_v52 }
 0x86b   :  { %v25892_v18 = vmul.f32 %v10894_v12, %v23143_v44  ;;  %v19192_v30 = vadd.f32 %v10849_v14, %v25733_v28  ;;  %v10851_v53 = vpop.f32.mrb[43].mxu0 }
 0x86c   :  { %v10919_v22 = vmul.f32 %v10895_v59, %v28114_v57  ;;  %v19193_v20 = vadd.f32 %v10851_v53, %v25733_v28  ;;  %21075 = vrot.lane.b32.xlu1 %v25887_v7, %s22031_s23 }
 0x86d   :  { %v10900_v61 = vmax.f32 %v19192_v30, 0.0  ;;  %v25901_v10 = vpack.i.bf16 %v25892_v18, %v25814_v25 }
 0x86e   :  { %10943 = vst.msk [vmem:[#allocation2 + $0x30] sm:$0xff] %vm3503_vm10, %v10919_v22  ;;  %v10901_v23 = vmax.f32 %v19193_v20, 0.0  ;;  %v10855_v27 = vpop.f32.mrb[44].mxu0 }
 0x86f   :  { %v25905_v24 = vmul.f32 %v10900_v61, %v23143_v44  ;;  %v19194_v43 = vadd.f32 %v10855_v27, %v25743_v35  ;;  %v10857_v37 = vpop.f32.mrb[45].mxu0 }
 0x870   :  { %v10925_v28 = vmul.f32 %v10901_v23, %v28114_v57  ;;  %v19195_v19 = vadd.f32 %v10857_v37, %v25743_v35 }
 0x871   :  { %v10906_v12 = vmax.f32 %v19194_v43, 0.0  ;;  %v21079_v59 = vpack.i.bf16 %v25905_v24, %v25892_v18  ;;  %v25914_v14 = vpack.i.bf16 %v25905_v24, %v25834_v40 }
 0x872   :  { %10949 = vst.msk [vmem:[#allocation2 + $0x68] sm:$0xff] %vm3503_vm10, %v10925_v28  ;;  %v10907_v53 = vmax.f32 %v19195_v19, 0.0  ;;  %v10861_v22 = vpop.f32.mrb[46].mxu0 }
 0x873   :  { %v25920_v20 = vmul.f32 %v10906_v12, %v23143_v44  ;;  %v19196_v35 = vadd.f32 %v10861_v22, %v25765_v42  ;;  %v10863_v61 = vpop.f32.mrb[47].mxu0  ;;  %21080 = vrot.lane.b32.xlu0 %v21079_v59, %s22031_s23 }
 0x874   :  { %v10931_v23 = vmul.f32 %v10907_v53, %v28114_v57  ;;  %v19197_v27 = vadd.f32 %v10863_v61, %v25765_v42 }
 0x875   :  { %v10912_v43 = vmax.f32 %v19196_v35, 0.0  ;;  %v25928_v37 = vpack.i.bf16 %v25920_v20, %v25856_v1  ;;  %v25939_v42 = vld [vmem:[#allocation2 + $0x30] sm:$0xff] }
 0x876   :  { %10955 = vst.msk [vmem:[#allocation2 + $0xa0] sm:$0xff] %vm3503_vm10, %v10931_v23  ;;  %v10913_v28 = vmax.f32 %v19197_v27, 0.0 }
 0x877   :  { %v25932_v19 = vmul.f32 %v10912_v43, %v23143_v44  ;;  %21090 = vrot.lane.b32.xlu0 %v25747_v39, %s22032_s26 }
 0x878   :  { %v10937_v12 = vmul.f32 %v10913_v28, %v28114_v57 }
 0x879   :  { %v21084_v53 = vpack.i.bf16 %v25932_v19, %v25920_v20  ;;  %v25941_v22 = vld [vmem:[#allocation2 + $0x68] sm:$0xff]  ;;  %v25945_v35 = vpack.i.bf16 %v25932_v19, %v25874_v58 }
 0x87a   :  { %10961 = vst.msk [vmem:[#allocation2 + $0xd8] sm:$0xff] %vm3503_vm10, %v10937_v12  ;;  %v25952_v23 = vpack.i.bf16 %v25941_v22, %v25939_v42 }
 0x87b   :  { %21100 = vrot.lane.b32.xlu0 %v25725_v29, %s22032_s26  ;;  %21085 = vrot.lane.b32.xlu1 %v21084_v53, %s22031_s23 }
 0x87d   :  { %v25963_v43 = vld [vmem:[#allocation2 + $0xa0] sm:$0xff] }
 0x87f   :  { %21110 = vrot.lane.b32.xlu0 %v25805_v26, %s22032_s26  ;;  %21095 = vrot.lane.b32.xlu1 %v25769_v4, %s22032_s26 }
 0x881   :  { %v25965_v28 = vld [vmem:[#allocation2 + $0xd8] sm:$0xff] }
 0x882   :  { %v25969_v12 = vpack.i.bf16 %v25965_v28, %v25963_v43 }
 0x883   :  { %21120 = vrot.lane.b32.xlu0 %v25827_v3, %s22032_s26  ;;  %21105 = vrot.lane.b32.xlu1 %v25785_v38, %s22032_s26 }
 0x887   :  { %21130 = vrot.lane.b32.xlu0 %v25867_v5, %s22032_s26  ;;  %21115 = vrot.lane.b32.xlu1 %v25725_v29, %s22032_s26 }
 0x88b   :  { %21140 = vrot.lane.b32.xlu0 %v21079_v59, %s22032_s26  ;;  %21125 = vrot.lane.b32.xlu1 %v25847_v55, %s22032_s26 }
 0x88f   :  { %21150 = vrot.lane.b32.xlu0 %v25747_v39, %s22033_s27  ;;  %21135 = vrot.lane.b32.xlu1 %v25887_v7, %s22032_s26 }
 0x893   :  { %21160 = vrot.lane.b32.xlu0 %v25725_v29, %s22033_s27  ;;  %21145 = vrot.lane.b32.xlu1 %v21084_v53, %s22032_s26 }
 0x897   :  { %21170 = vrot.lane.b32.xlu0 %v25805_v26, %s22033_s27  ;;  %21155 = vrot.lane.b32.xlu1 %v25769_v4, %s22033_s27 }
 0x89b   :  { %21180 = vrot.lane.b32.xlu0 %v25827_v3, %s22033_s27  ;;  %21165 = vrot.lane.b32.xlu1 %v25785_v38, %s22033_s27 }
 0x89f   :  { %21190 = vrot.lane.b32.xlu0 %v25867_v5, %s22033_s27  ;;  %21175 = vrot.lane.b32.xlu1 %v25725_v29, %s22033_s27 }
 0x8a3   :  { %21200 = vrot.lane.b32.xlu0 %v21079_v59, %s22033_s27  ;;  %21185 = vrot.lane.b32.xlu1 %v25847_v55, %s22033_s27 }
 0x8a7   :  { %21210 = vrot.lane.b32.xlu0 %v25747_v39, %s22034_s30  ;;  %21195 = vrot.lane.b32.xlu1 %v25887_v7, %s22033_s27  ;;  %v21259_v39 = vpack.i.bf16 %v25939_v42, %v25892_v18 }
 0x8ab   :  { %21220 = vrot.lane.b32.xlu0 %v25725_v29, %s22034_s30  ;;  %21205 = vrot.lane.b32.xlu1 %v21084_v53, %s22033_s27  ;;  %v21274_v53 = vpack.i.bf16 %v25965_v28, %v25932_v19 }
 0x8af   :  { %21230 = vrot.lane.b32.xlu0 %v25805_v26, %s22034_s30  ;;  %21215 = vrot.lane.b32.xlu1 %v25769_v4, %s22034_s30  ;;  %v21031_v4 = vpop.permute.xlu0 %21030  ;;  %v21269_v26 = vpack.i.bf16 %v25963_v43, %v25920_v20 }
 0x8b3   :  { %21240 = vrot.lane.b32.xlu0 %v25827_v3, %s22034_s30  ;;  %21225 = vrot.lane.b32.xlu1 %v25785_v38, %s22034_s30  ;;  %v21033_v3 = vunpack.i.h.bf16 %v21031_v4 }
 0x8b7   :  { %21250 = vrot.lane.b32.xlu0 %v25867_v5, %s22034_s30  ;;  %21235 = vrot.lane.b32.xlu1 %v25725_v29, %s22034_s30  ;;  %v21264_v29 = vpack.i.bf16 %v25941_v22, %v25905_v24 }
 0x8bb   :  { %21260 = vrot.lane.b32.xlu0 %v21259_v39, %s22034_s30  ;;  %21245 = vrot.lane.b32.xlu1 %v25847_v55, %s22034_s30  ;;  %v21032_v55 = vunpack.i.l.bf16 %v21031_v4 }
 0x8bf   :  { %21270 = vrot.lane.b32.xlu0 %v21269_v26, %s22034_s30  ;;  %21255 = vrot.lane.b32.xlu1 %v25887_v7, %s22034_s30 }
 0x8c2   :  { %v21036_v38 = vpop.permute.xlu0 %21035 }
 0x8c3   :  { %21280 = vrot.lane.b32.xlu0 %v25823_v32, %s22035_s15  ;;  %21265 = vrot.lane.b32.xlu1 %v21264_v29, %s22034_s30  ;;  %v21038_v5 = vunpack.i.h.bf16 %v21036_v38  ;;  %v21037_v59 = vunpack.i.l.bf16 %v21036_v38 }
 0x8c5   :  { %v11086_v7 = vsel %vm167_vm0, %v21032_v55, %v21037_v59  ;;  %v11087_v29 = vsel %vm167_vm0, %v21037_v59, %v21038_v5 }
 0x8c6   :  { %v21041_v39 = vpop.permute.xlu1 %21040 }
 0x8c7   :  { %v21043_v26 = vunpack.i.h.bf16 %v21041_v39  ;;  %v21042_v61 = vunpack.i.l.bf16 %v21041_v39  ;;  %21290 = vrot.lane.b32.xlu0 %v25761_v49, %s22035_s15  ;;  %21275 = vrot.lane.b32.xlu1 %v21274_v53, %s22034_s30 }
 0x8c9   :  { %v11091_v30 = vsel %vm167_vm0, %v21033_v3, %v21042_v61  ;;  %v11092_v4 = vsel %vm167_vm0, %v21042_v61, %v21043_v26 }
 0x8ca   :  { %v26049_v38 = vpop.permute.xlu1 %21045  ;;  %v18684_v27 = vpack.c.bf16 %v11092_v4, %v11087_v29  ;;  %v18686_v2 = vpack.c.bf16 %v11091_v30, %v11086_v7 }
 0x8cb   :  { %21300 = vrot.lane.b32.xlu0 %v25881_v54, %s22035_s15  ;;  %21285 = vrot.lane.b32.xlu1 %v25841_v34, %s22035_s15  ;;  %v21048_v53 = vunpack.i.h.bf16 %v26049_v38  ;;  %v21047_v55 = vunpack.i.l.bf16 %v26049_v38 }
 0x8cc   :  { %18685 = vmatprep.subr.bf16.mxu1 %v18684_v27 }
 0x8cd   :  { %18687 = vmatpush1.bf16.msra.mxu1 %v18686_v2  ;;  %v11097_v7 = vsel %vm167_vm0, %v21047_v55, %v21048_v53 }
 0x8ce   :  { %v21056_v3 = vpop.permute.xlu1 %21055  ;;  %v21051_v59 = vpop.permute.xlu0 %21050 }
 0x8cf   :  { %v21058_v39 = vunpack.i.h.bf16 %v21056_v3  ;;  %v21057_v61 = vunpack.i.l.bf16 %v21056_v3  ;;  %v21053_v46 = vunpack.i.h.bf16 %v21051_v59  ;;  %v21052_v11 = vunpack.i.l.bf16 %v21051_v59  ;;  %21310 = vrot.lane.b32.xlu0 %v25901_v10, %s22035_s15  ;;  %21295 = vrot.lane.b32.xlu1 %v25863_v48, %s22035_s15 }
 0x8d1   :  { %v11096_v30 = vsel %vm167_vm0, %v21057_v61, %v21047_v55  ;;  %v11101_v27 = vsel %vm167_vm0, %v21058_v39, %v21052_v11  ;;  %v11102_v2 = vsel %vm167_vm0, %v21052_v11, %v21053_v46  ;;  %v26076_v11 = vld [vmem:[%s28077_s8] sm:$0xff] }
 0x8d2   :  { %v26065_v29 = vpop.permute.xlu0 %21060  ;;  %v18688_v4 = vpack.c.bf16 %v11102_v2, %v11097_v7  ;;  %v18690_v38 = vpack.c.bf16 %v11101_v27, %v11096_v30  ;;  %v26086_v7 = vld [vmem:[#allocation2] sm:$0xff]  ;;  %v26092_v2 = vld [vmem:[%s28077_s8 + $0x8] sm:$0xff] }
 0x8d3   :  { %21320 = vrot.lane.b32.xlu0 %v25928_v37, %s22035_s15  ;;  %21305 = vrot.lane.b32.xlu1 %v25799_v62, %s22035_s15  ;;  %v21063_v3 = vunpack.i.h.bf16 %v26065_v29  ;;  %v21062_v59 = vunpack.i.l.bf16 %v26065_v29 }
 0x8d4   :  { %18689 = vmatprep.subr.bf16.mxu1 %v18688_v4 }
 0x8d5   :  { %18691 = vmatpush1.bf16.msra.mxu1 %v18690_v38  ;;  %v11088_v30 = vsel %vm167_vm0, %v21038_v5, %v21062_v59  ;;  %v11089_v29 = vsel %vm167_vm0, %v21062_v59, %v21063_v3  ;;  %v26106_v59 = vld [vmem:[%s28077_s8 + $0x10] sm:$0xff] }
 0x8d6   :  { %v21066_v55 = vpop.permute.xlu1 %21065 }
 0x8d7   :  { %v21068_v39 = vunpack.i.h.bf16 %v21066_v55  ;;  %v21067_v61 = vunpack.i.l.bf16 %v21066_v55  ;;  %21330 = vrot.lane.b32.xlu0 %v25952_v23, %s22035_s15  ;;  %21315 = vrot.lane.b32.xlu1 %v25914_v14, %s22035_s15 }
 0x8d8   :  { %18077 = vmatmul.mubr.msk.f32.vlgmr.msra.gmra.mrb[32].mxu1 %vm3691_vm11, %v26076_v11 }
 0x8d9   :  { %v11093_v27 = vsel %vm167_vm0, %v21043_v26, %v21067_v61  ;;  %11212 = vmatprep.mubr.f32.mxu1 %v26086_v7  ;;  %v11094_v4 = vsel %vm167_vm0, %v21067_v61, %v21068_v39 }
 0x8da   :  { %v21071_v38 = vpop.permute.xlu0 %21070  ;;  %v18692_v55 = vpack.c.bf16 %v11094_v4, %v11089_v29  ;;  %v18694_v63 = vpack.c.bf16 %v11093_v27, %v11088_v30  ;;  %v26120_v4 = vld [vmem:[%s28077_s8 + $0x18] sm:$0xff] }
 0x8db   :  { %21340 = vrot.lane.b32.xlu0 %v25823_v32, %s22036_s0  ;;  %21325 = vrot.lane.b32.xlu1 %v25945_v35, %s22035_s15  ;;  %v21073_v5 = vunpack.i.h.bf16 %v21071_v38  ;;  %v21072_v26 = vunpack.i.l.bf16 %v21071_v38 }
 0x8dc   :  { %18078 = vmatmul.mubr.msk.f32.gmra.mrb[34].mxu1 %vm3691_vm11, %v26092_v2  ;;  %18693 = vmatprep.subr.bf16.mxu1 %v18692_v55 }
 0x8dd   :  { %18695 = vmatpush1.bf16.msra.mxu1 %v18694_v63  ;;  %11218 = vmatprep.mubr.f32.mxu1 %v26086_v7  ;;  %v11098_v63 = vsel %vm167_vm0, %v21048_v53, %v21072_v26  ;;  %v11099_v38 = vsel %vm167_vm0, %v21072_v26, %v21073_v5 }
 0x8de   :  { %v21076_v61 = vpop.permute.xlu1 %21075 }
 0x8df   :  { %v21078_v30 = vunpack.i.h.bf16 %v21076_v61  ;;  %v21077_v27 = vunpack.i.l.bf16 %v21076_v61  ;;  %21350 = vrot.lane.b32.xlu0 %v25761_v49, %s22036_s0  ;;  %21335 = vrot.lane.b32.xlu1 %v25969_v12, %s22035_s15 }
 0x8e0   :  { %18079 = vmatmul.mubr.msk.f32.gmra.mrb[36].mxu1 %vm3691_vm11, %v26106_v59 }
 0x8e1   :  { %v11103_v29 = vsel %vm167_vm0, %v21053_v46, %v21077_v27  ;;  %11224 = vmatprep.mubr.f32.mxu1 %v26086_v7  ;;  %v11104_v55 = vsel %vm167_vm0, %v21077_v27, %v21078_v30 }
 0x8e2   :  { %v18696_v61 = vpack.c.bf16 %v11104_v55, %v11099_v38  ;;  %v18698_v60 = vpack.c.bf16 %v11103_v29, %v11098_v63 }
 0x8e3   :  { %21360 = vrot.lane.b32.xlu0 %v25881_v54, %s22036_s0  ;;  %21345 = vrot.lane.b32.xlu1 %v25841_v34, %s22036_s0 }
 0x8e4   :  { %18080 = vmatmul.mubr.msk.f32.gmra.mrb[38].mxu1 %vm3691_vm11, %v26120_v4  ;;  %18697 = vmatprep.subr.bf16.mxu1 %v18696_v61 }
 0x8e5   :  { %18699 = vmatpush1.bf16.msra.mxu1 %v18698_v60  ;;  %v21081_v46 = vpop.permute.xlu0 %21080  ;;  %11295 = vmatprep.mubr.f32.mxu1 %v26086_v7 }
 0x8e6   :  { %v21083_v53 = vunpack.i.h.bf16 %v21081_v46  ;;  %v21082_v26 = vunpack.i.l.bf16 %v21081_v46 }
 0x8e7   :  { %21370 = vrot.lane.b32.xlu0 %v25901_v10, %s22036_s0  ;;  %21355 = vrot.lane.b32.xlu1 %v25863_v48, %s22036_s0 }
 0x8e8   :  { %v11095_v27 = vsel %vm167_vm0, %v21068_v39, %v21083_v53  ;;  %v11090_v63 = vsel %vm167_vm0, %v21063_v3, %v21082_v26  ;;  %18081 = vmatmul.mubr.msk.f32.vlgmr.msra.gmra.mrb[40].mxu1 %vm3691_vm11, %v26076_v11  ;;  %v18700_v29 = vpack.c.bf16 %v21083_v53, %v21082_v26 }
 0x8e9   :  { %v26139_v60 = vpop.permute.xlu0 %21090  ;;  %11301 = vmatprep.mubr.f32.mxu1 %v26086_v7  ;;  %v18702_v38 = vpack.c.bf16 %v11095_v27, %v11090_v63 }
 0x8ea   :  { %18701 = vmatprep.subr.bf16.mxu1 %v18700_v29  ;;  %v28091_v46 = vunpack.i.h.bf16 %v26139_v60  ;;  %v21092_v53 = vunpack.i.l.bf16 %v26139_v60 }
 0x8eb   :  { %18703 = vmatpush1.bf16.msra.mxu1 %v18702_v38  ;;  %21380 = vrot.lane.b32.xlu0 %v25928_v37, %s22036_s0 }
 0x8ec   :  { %21365 = vrot.lane.b32.xlu1 %v25799_v62, %s22036_s0  ;;  %18082 = vmatmul.mubr.msk.f32.gmra.mrb[42].mxu1 %vm3691_vm11, %v26092_v2 }
 0x8ed   :  { %v21101_v3 = vpop.permute.xlu0 %21100  ;;  %v21086_v39 = vpop.permute.xlu1 %21085  ;;  %11307 = vmatprep.mubr.f32.mxu1 %v26086_v7 }
 0x8ee   :  { %v21088_v55 = vunpack.i.h.bf16 %v21086_v39  ;;  %v21087_v61 = vunpack.i.l.bf16 %v21086_v39  ;;  %v21103_v26 = vunpack.i.h.bf16 %v21101_v3  ;;  %v21102_v29 = vunpack.i.l.bf16 %v21101_v3 }
 0x8ef   :  { %21390 = vrot.lane.b32.xlu0 %v25952_v23, %s22036_s0 }
 0x8f0   :  { %v11105_v27 = vsel %vm167_vm0, %v21078_v30, %v21088_v55  ;;  %v11100_v63 = vsel %vm167_vm0, %v21073_v5, %v21087_v61  ;;  %21375 = vrot.lane.b32.xlu1 %v25914_v14, %s22036_s0  ;;  %18083 = vmatmul.mubr.msk.f32.gmra.mrb[44].mxu1 %vm3691_vm11, %v26106_v59  ;;  %v18704_v16 = vpack.c.bf16 %v21088_v55, %v21087_v61 }
 0x8f1   :  { %v26159_v38 = vpop.permute.xlu0 %21110  ;;  %v26161_v39 = vpop.permute.xlu1 %21095  ;;  %11313 = vmatprep.mubr.f32.mxu1 %v26086_v7  ;;  %v18706_v45 = vpack.c.bf16 %v11105_v27, %v11100_v63  ;;  %v11487_v5 = vsel %vm536_vm3, %v21092_v53, %v28091_v46  ;;  %v11486_v61 = vsel %vm536_vm3, %v21102_v29, %v21092_v53 }
 0x8f2   :  { %v28094_v41 = vunpack.i.h.bf16 %v26161_v39  ;;  %v21097_v30 = vunpack.i.l.bf16 %v26161_v39  ;;  %18705 = vmatprep.subr.bf16.mxu1 %v18704_v16  ;;  %v28093_v3 = vunpack.i.h.bf16 %v26159_v38  ;;  %v21112_v57 = vunpack.i.l.bf16 %v26159_v38 }
 0x8f3   :  { %21400 = vrot.lane.b32.xlu0 %v25823_v32, %s22037_s18  ;;  %18707 = vmatpush1.bf16.msra.mxu1 %v18706_v45 }
 0x8f4   :  { %v11491_v55 = vsel %vm536_vm3, %v21103_v26, %v21097_v30  ;;  %21385 = vrot.lane.b32.xlu1 %v25945_v35, %s22036_s0  ;;  %v11492_v16 = vsel %vm536_vm3, %v21097_v30, %v28094_v41  ;;  %18084 = vmatmul.mubr.msk.f32.gmra.mrb[46].mxu1 %vm3691_vm11, %v26120_v4  ;;  %v11502_v29 = vsel %vm536_vm3, %v21112_v57, %v28093_v3 }
 0x8f5   :  { %v26182_v27 = vpop.permute.xlu1 %21105  ;;  %v18708_v63 = vpack.c.bf16 %v11492_v16, %v11487_v5  ;;  %11384 = vmatprep.mubr.f32.mxu1 %v26086_v7  ;;  %v18710_v45 = vpack.c.bf16 %v11491_v55, %v11486_v61  ;;  %v26197_v30 = vpop.permute.xlu0 %21120 }
 0x8f6   :  { %v28092_v46 = vunpack.i.h.bf16 %v26182_v27  ;;  %v21107_v26 = vunpack.i.l.bf16 %v26182_v27 }
 0x8f7   :  { %21410 = vrot.lane.b32.xlu0 %v25761_v49, %s22037_s18  ;;  %18709 = vmatprep.subr.bf16.mxu1 %v18708_v63  ;;  %v28095_v63 = vunpack.i.h.bf16 %v26197_v30 }
 0x8f8   :  { %21395 = vrot.lane.b32.xlu1 %v25969_v12, %s22036_s0  ;;  %v11497_v53 = vsel %vm536_vm3, %v21107_v26, %v28092_v46  ;;  %18085 = vmatmul.mubr.msk.f32.vlgmr.msra.gmra.mrb[48].mxu1 %vm3691_vm11, %v26076_v11  ;;  %v21122_v46 = vunpack.i.l.bf16 %v26197_v30 }
 0x8f9   :  { %v21116_v5 = vpop.permute.xlu1 %21115  ;;  %v18712_v55 = vpack.c.bf16 %v11502_v29, %v11497_v53  ;;  %18711 = vmatpush1.bf16.msra.mxu1 %v18710_v45  ;;  %11390 = vmatprep.mubr.f32.mxu1 %v26086_v7 }
 0x8fa   :  { %v21118_v16 = vunpack.i.h.bf16 %v21116_v5  ;;  %v21117_v61 = vunpack.i.l.bf16 %v21116_v5 }
 0x8fb   :  { %21420 = vrot.lane.b32.xlu0 %v25881_v54, %s22037_s18  ;;  %18713 = vmatprep.subr.bf16.mxu1 %v18712_v55 }
 0x8fc   :  { %v11501_v3 = vsel %vm536_vm3, %v21118_v16, %v21112_v57  ;;  %v11496_v41 = vsel %vm536_vm3, %v21117_v61, %v21107_v26  ;;  %21405 = vrot.lane.b32.xlu1 %v25841_v34, %s22037_s18  ;;  %18086 = vmatmul.mubr.msk.f32.gmra.mrb[50].mxu1 %vm3691_vm11, %v26092_v2  ;;  %v26219_v57 = vpop.permute.xlu0 %21130  ;;  %v11489_v2 = vsel %vm536_vm3, %v21122_v46, %v28095_v63  ;;  %v28128_v63 = vunpack.i.h.bf16 %v26159_v38 }
 0x8fd   :  { %v26212_v11 = vpop.permute.xlu1 %21125  ;;  %v18714_v45 = vpack.c.bf16 %v11501_v3, %v11496_v41  ;;  %11396 = vmatprep.mubr.f32.mxu1 %v26086_v7  ;;  %v21133_v16 = vunpack.i.h.bf16 %v26219_v57  ;;  %v21132_v61 = vunpack.i.l.bf16 %v26219_v57 }
 0x8fe   :  { %v21128_v53 = vunpack.i.h.bf16 %v26212_v11  ;;  %v21127_v29 = vunpack.i.l.bf16 %v26212_v11 }
 0x8ff   :  { %21430 = vrot.lane.b32.xlu0 %v25901_v10, %s22037_s18  ;;  %18715 = vmatpush1.bf16.msra.mxu1 %v18714_v45 }
 0x900   :  { %21415 = vrot.lane.b32.xlu1 %v25863_v48, %s22037_s18  ;;  %v11494_v41 = vsel %vm536_vm3, %v21127_v29, %v21128_v53  ;;  %18087 = vmatmul.mubr.msk.f32.gmra.mrb[52].mxu1 %vm3691_vm11, %v26106_v59  ;;  %v28126_v59 = vunpack.i.h.bf16 %v26161_v39  ;;  %v21141_v45 = vpop.permute.xlu0 %21140 }
 0x901   :  { %v26229_v3 = vpop.permute.xlu1 %21135  ;;  %v18716_v26 = vpack.c.bf16 %v11494_v41, %v11489_v2  ;;  %11402 = vmatprep.mubr.f32.mxu1 %v26086_v7  ;;  %v26249_v2 = vld [vmem:[%s28077_s8 + $0x20] sm:$0xff]  ;;  %v28127_v41 = vunpack.i.h.bf16 %v26139_v60 }
 0x902   :  { %v21138_v5 = vunpack.i.h.bf16 %v26229_v3  ;;  %v21137_v55 = vunpack.i.l.bf16 %v26229_v3  ;;  %v11493_v11 = vsel %vm536_vm3, %v28126_v59, %v21127_v29  ;;  %v11499_v29 = vsel %vm536_vm3, %v21132_v61, %v21133_v16 }
 0x903   :  { %21440 = vrot.lane.b32.xlu0 %v25928_v37, %s22037_s18  ;;  %18717 = vmatprep.subr.bf16.mxu1 %v18716_v26  ;;  %v11488_v39 = vsel %vm536_vm3, %v28127_v41, %v21122_v46  ;;  %v21143_v26 = vunpack.i.h.bf16 %v21141_v45  ;;  %v21142_v59 = vunpack.i.l.bf16 %v21141_v45  ;;  %v26271_v46 = vld [vmem:[%s28077_s8 + $0x28] sm:$0xff] }
 0x904   :  { %21425 = vrot.lane.b32.xlu1 %v25799_v62, %s22037_s18  ;;  %18088 = vmatmul.mubr.msk.f32.gmra.mrb[54].mxu1 %vm3691_vm11, %v26120_v4  ;;  %v11504_v57 = vsel %vm536_vm3, %v21137_v55, %v21138_v5  ;;  %v18718_v4 = vpack.c.bf16 %v11493_v11, %v11488_v39  ;;  %v11503_v44 = vsel %vm536_vm3, %v28128_v63, %v21137_v55  ;;  %v28129_v11 = vunpack.i.h.bf16 %v26182_v27  ;;  %v26286_v27 = vld [vmem:[%s28077_s8 + $0x30] sm:$0xff]  ;;  %v26302_v55 = vpop.permute.xlu0 %21150 }
 0x905   :  { %11606 = vmatprep.mubr.f32.mxu1 %v26086_v7  ;;  %v18720_v60 = vpack.c.bf16 %v11504_v57, %v11499_v29  ;;  %v21146_v41 = vpop.permute.xlu1 %21145  ;;  %v18724_v63 = vpack.c.bf16 %v21143_v26, %v21142_v59  ;;  %v11495_v57 = vsel %vm536_vm3, %v21128_v53, %v21143_v26 }
 0x906   :  { %v11498_v45 = vsel %vm536_vm3, %v28129_v11, %v21132_v61  ;;  %v21148_v39 = vunpack.i.h.bf16 %v21146_v41 }
 0x907   :  { %21450 = vrot.lane.b32.xlu0 %v25952_v23, %s22037_s18  ;;  %v18722_v38 = vpack.c.bf16 %v11503_v44, %v11498_v45 }
 0x908   :  { %21435 = vrot.lane.b32.xlu1 %v25914_v14, %s22037_s18  ;;  %18093 = vmatmul.mubr.msk.f32.vlgmr.msra.gmra.mrb[32].mxu1 %vm3691_vm11, %v26249_v2  ;;  %v21161_v26 = vpop.permute.xlu0 %21160  ;;  %v11505_v11 = vsel %vm536_vm3, %v21138_v5, %v21148_v39 }
 0x909   :  { %18719 = vmatpush1.bf16.msra.mxu1 %v18718_v4  ;;  %11612 = vmatprep.mubr.f32.mxu1 %v26086_v7  ;;  %v26292_v44 = vpop.permute.xlu1 %21155  ;;  %v21147_v4 = vunpack.i.l.bf16 %v21146_v41 }
 0x90a   :  { %18721 = vmatprep.subr.bf16.mxu1 %v18720_v60  ;;  %v21158_v29 = vunpack.i.h.bf16 %v26292_v44  ;;  %v21157_v60 = vunpack.i.l.bf16 %v26292_v44 }
 0x90b   :  { %21460 = vrot.lane.b32.xlu0 %v25823_v32, %s22038_s19  ;;  %v26300_v32 = vld [vmem:[%s28077_s8 + $0x38] sm:$0xff]  ;;  %v18728_v45 = vpack.c.bf16 %v21148_v39, %v21147_v4 }
 0x90c   :  { %21445 = vrot.lane.b32.xlu1 %v25945_v35, %s22037_s18  ;;  %18094 = vmatmul.mubr.msk.f32.gmra.mrb[34].mxu1 %vm3691_vm11, %v26271_v46  ;;  %v26345_v41 = vpop.permute.xlu0 %21170 }
 0x90d   :  { %18723 = vmatpush1.bf16.msra.mxu1 %v18722_v38  ;;  %11618 = vmatprep.mubr.f32.mxu1 %v26086_v7 }
 0x90e   :  { %18725 = vmatprep.subr.bf16.mxu1 %v18724_v63 }
 0x90f   :  { %21470 = vrot.lane.b32.xlu0 %v25761_v49, %s22038_s19  ;;  %v28130_v49 = vunpack.i.h.bf16 %v26197_v30  ;;  %v21152_v30 = vunpack.i.l.bf16 %v26302_v55 }
 0x910   :  { %21455 = vrot.lane.b32.xlu1 %v25969_v12, %s22037_s18  ;;  %18095 = vmatmul.mubr.msk.f32.gmra.mrb[36].mxu1 %vm3691_vm11, %v26286_v27 }
 0x911   :  { %11624 = vmatprep.mubr.f32.mxu1 %v26086_v7  ;;  %v11490_v61 = vsel %vm536_vm3, %v28130_v49, %v21142_v59  ;;  %v11500_v59 = vsel %vm536_vm3, %v21133_v16, %v21147_v4  ;;  %v21162_v49 = vunpack.i.l.bf16 %v21161_v26  ;;  %v26369_v4 = vpop.permute.xlu0 %21180 }
 0x912   :  { %v18726_v53 = vpack.c.bf16 %v11495_v57, %v11490_v61  ;;  %v10964_v57 = vld [vmem:[%s28078_s9 + $0x10] sm:$0xff] }
 0x913   :  { %21480 = vrot.lane.b32.xlu0 %v25881_v54, %s22038_s19  ;;  %v26317_v54 = vpop.permute.xlu1 %21165 }
 0x914   :  { %21465 = vrot.lane.b32.xlu1 %v25841_v34, %s22038_s19  ;;  %18096 = vmatmul.mubr.msk.f32.gmra.mrb[38].mxu1 %vm3691_vm11, %v26300_v32  ;;  %v21153_v34 = vunpack.i.h.bf16 %v26302_v55  ;;  %v21168_v38 = vunpack.i.h.bf16 %v26317_v54  ;;  %v21167_v63 = vunpack.i.l.bf16 %v26317_v54  ;;  %v26431_v55 = vld [vmem:[%s28077_s8 + $0x48] sm:$0xff]  ;;  %v26452_v54 = vld [vmem:[%s28077_s8 + $0x58] sm:$0xff] }
 0x915   :  { %11695 = vmatprep.mubr.f32.mxu1 %v26086_v7 }
 0x916   :  { %v11887_v3 = vsel %vm903_vm4, %v21152_v30, %v21153_v34 }
 0x917   :  { %21490 = vrot.lane.b32.xlu0 %v25901_v10, %s22038_s19  ;;  %v11892_v10 = vsel %vm903_vm4, %v21157_v60, %v21158_v29  ;;  %v21176_v5 = vpop.permute.xlu1 %21175 }
 0x918   :  { %21475 = vrot.lane.b32.xlu1 %v25863_v48, %s22038_s19  ;;  %18097 = vmatmul.mubr.msk.f32.vlgmr.msra.gmra.mrb[40].mxu1 %vm3691_vm11, %v26249_v2  ;;  %v18730_v48 = vpack.c.bf16 %v11505_v11, %v11500_v59  ;;  %v18732_v16 = vpack.c.bf16 %v11892_v10, %v11887_v3  ;;  %v21182_v10 = vunpack.i.l.bf16 %v26369_v4 }
 0x919   :  { %18727 = vmatpush1.bf16.msra.mxu1 %v18726_v53  ;;  %11701 = vmatprep.mubr.f32.mxu1 %v26086_v7  ;;  %v21178_v53 = vunpack.i.h.bf16 %v21176_v5 }
 0x91a   :  { %18729 = vmatprep.subr.bf16.mxu1 %v18728_v45  ;;  %v11886_v45 = vsel %vm903_vm4, %v21162_v49, %v21152_v30  ;;  %v10963_v30 = vld [vmem:[%s28078_s9 + $0x8] sm:$0xff] }
 0x91b   :  { %21500 = vrot.lane.b32.xlu0 %v25928_v37, %s22038_s19  ;;  %v21163_v37 = vunpack.i.h.bf16 %v21161_v26  ;;  %v26359_v61 = vpop.permute.xlu1 %21185  ;;  %v21177_v26 = vunpack.i.l.bf16 %v21176_v5 }
 0x91c   :  { %21485 = vrot.lane.b32.xlu1 %v25799_v62, %s22038_s19  ;;  %18098 = vmatmul.mubr.msk.f32.gmra.mrb[42].mxu1 %vm3691_vm11, %v26271_v46  ;;  %v10962_v62 = vld [vmem:[%s28078_s9] sm:$0xff]  ;;  %v21188_v59 = vunpack.i.h.bf16 %v26359_v61  ;;  %v21187_v11 = vunpack.i.l.bf16 %v26359_v61 }
 0x91d   :  { %18731 = vmatpush1.bf16.msra.mxu1 %v18730_v48  ;;  %11707 = vmatprep.mubr.f32.mxu1 %v26086_v7  ;;  %v11891_v39 = vsel %vm903_vm4, %v21163_v37, %v21157_v60  ;;  %v21183_v60 = vunpack.i.h.bf16 %v26369_v4 }
 0x91e   :  { %18733 = vmatprep.subr.bf16.mxu1 %v18732_v16  ;;  %v18734_v48 = vpack.c.bf16 %v11891_v39, %v11886_v45  ;;  %v11896_v16 = vsel %vm903_vm4, %v21177_v26, %v21167_v63  ;;  %v11893_v26 = vsel %vm903_vm4, %v21158_v29, %v21187_v11 }
 0x91f   :  { %21510 = vrot.lane.b32.xlu0 %v25952_v23, %s22038_s19  ;;  %v21172_v23 = vunpack.i.l.bf16 %v26345_v41  ;;  %v11889_v37 = vsel %vm903_vm4, %v21182_v10, %v21183_v60  ;;  %v21196_v49 = vpop.permute.xlu1 %21195 }
 0x920   :  { %21495 = vrot.lane.b32.xlu1 %v25914_v14, %s22038_s19  ;;  %18099 = vmatmul.mubr.msk.f32.gmra.mrb[44].mxu1 %vm3691_vm11, %v26286_v27  ;;  %v21173_v14 = vunpack.i.h.bf16 %v26345_v41  ;;  %v21197_v39 = vunpack.i.l.bf16 %v21196_v49 }
 0x921   :  { %11713 = vmatprep.mubr.f32.mxu1 %v26086_v7  ;;  %v11901_v5 = vsel %vm903_vm4, %v21178_v53, %v21172_v23 }
 0x922   :  { %v11902_v3 = vsel %vm903_vm4, %v21172_v23, %v21173_v14  ;;  %v21191_v23 = vpop.permute.xlu0 %21190 }
 0x923   :  { %10968 = vperm.xlu0 %20048, %v10962_v62   ;;  %v18738_v62 = vpack.c.bf16 %v11901_v5, %v11896_v16  ;;  %v21192_v53 = vunpack.i.l.bf16 %v21191_v23 }
 0x924   :  { %21505 = vrot.lane.b32.xlu1 %v25945_v35, %s22038_s19  ;;  %18100 = vmatmul.mubr.msk.f32.gmra.mrb[46].mxu1 %vm3691_vm11, %v26300_v32  ;;  %v11897_v35 = vsel %vm903_vm4, %v21167_v63, %v21168_v38  ;;  %v10965_v63 = vld [vmem:[%s28078_s9 + $0x18] sm:$0xff] }
 0x925   :  { %11784 = vmatprep.mubr.f32.mxu1 %v26086_v7  ;;  %v18736_v41 = vpack.c.bf16 %v11902_v3, %v11897_v35 }
 0x926   :  { %v21201_v35 = vpop.permute.xlu0 %21200 }
 0x927   :  { %10978 = vperm.xlu0 %20048, %v10964_v57   ;;  %v21198_v57 = vunpack.i.h.bf16 %v21196_v49  ;;  %v21202_v3 = vunpack.i.l.bf16 %v21201_v35 }
 0x928   :  { %21515 = vrot.lane.b32.xlu1 %v25969_v12, %s22038_s19  ;;  %18101 = vmatmul.mubr.msk.f32.vlgmr.msra.gmra.mrb[48].mxu1 %vm3691_vm11, %v26249_v2  ;;  %v11894_v12 = vsel %vm903_vm4, %v21187_v11, %v21188_v59  ;;  %v21203_v11 = vunpack.i.h.bf16 %v21201_v35 }
 0x929   :  { %18735 = vmatpush1.bf16.msra.mxu1 %v18734_v48  ;;  %11790 = vmatprep.mubr.f32.mxu1 %v26086_v7  ;;  %v18740_v2 = vpack.c.bf16 %v11894_v12, %v11889_v37  ;;  %v11904_v45 = vsel %vm903_vm4, %v21197_v39, %v21198_v57  ;;  %v11888_v48 = vsel %vm903_vm4, %v21153_v34, %v21182_v10  ;;  %v21206_v10 = vpop.permute.xlu1 %21205 }
 0x92a   :  { %18737 = vmatprep.subr.bf16.mxu1 %v18736_v41  ;;  %v18742_v44 = vpack.c.bf16 %v11893_v26, %v11888_v48  ;;  %v11898_v34 = vsel %vm903_vm4, %v21168_v38, %v21192_v53  ;;  %v26442_v41 = vld [vmem:[%s28077_s8 + $0x50] sm:$0xff]  ;;  %v26454_v38 = vpop.permute.xlu0 %21210  ;;  %v11890_v12 = vsel %vm903_vm4, %v21183_v60, %v21202_v3  ;;  %v21208_v37 = vunpack.i.h.bf16 %v21206_v10 }
 0x92b   :  { %v21213_v4 = vunpack.i.h.bf16 %v26454_v38  ;;  %v21212_v60 = vunpack.i.l.bf16 %v26454_v38 }
 0x92c   :  { %10973 = vperm.xlu1 %20047, %v10963_v30   ;;  %18102 = vmatmul.mubr.msk.f32.gmra.mrb[50].mxu1 %vm3691_vm11, %v26271_v46  ;;  %v21193_v46 = vunpack.i.h.bf16 %v21191_v23 }
 0x92d   :  { %18739 = vmatpush1.bf16.msra.mxu1 %v18738_v62  ;;  %11796 = vmatprep.mubr.f32.mxu1 %v26086_v7  ;;  %v26444_v30 = vpop.permute.xlu1 %21215  ;;  %v11895_v62 = vsel %vm903_vm4, %v21188_v59, %v21203_v11  ;;  %v12351_v48 = vsel %vm1280_vm5, %v21212_v60, %v21213_v4 }
 0x92e   :  { %18741 = vmatprep.subr.bf16.mxu1 %v18740_v2  ;;  %v11899_v29 = vsel %vm903_vm4, %v21192_v53, %v21193_v46  ;;  %v21207_v2 = vunpack.i.l.bf16 %v21206_v10  ;;  %v21217_v49 = vunpack.i.l.bf16 %v26444_v30  ;;  %v18750_v61 = vpack.c.bf16 %v11895_v62, %v11890_v12 }
 0x92f   :  { %v18744_v5 = vpack.c.bf16 %v11904_v45, %v11899_v29  ;;  %v11905_v53 = vsel %vm903_vm4, %v21198_v57, %v21208_v37 }
 0x930   :  { %10983 = vperm.xlu1 %20047, %v10965_v63   ;;  %18103 = vmatmul.mubr.msk.f32.gmra.mrb[52].mxu1 %vm3691_vm11, %v26286_v27  ;;  %v26417_v27 = vld [vmem:[%s28077_s8 + $0x40] sm:$0xff]  ;;  %v21218_v63 = vunpack.i.h.bf16 %v26444_v30  ;;  %v11900_v59 = vsel %vm903_vm4, %v21193_v46, %v21207_v2  ;;  %v18752_v26 = vpack.c.bf16 %v21208_v37, %v21207_v2 }
 0x931   :  { %11802 = vmatprep.mubr.f32.mxu1 %v26086_v7  ;;  %v26467_v23 = vpop.permute.xlu1 %21225  ;;  %v18754_v45 = vpack.c.bf16 %v11905_v53, %v11900_v59 }
 0x932   :  { %v12357_v35 = vsel %vm1280_vm5, %v21217_v49, %v21218_v63 }
 0x933   :  { %v18756_v57 = vpack.c.bf16 %v12357_v35, %v12351_v48 }
 0x934   :  { %18104 = vmatmul.mubr.msk.f32.gmra.mrb[54].mxu1 %vm3691_vm11, %v26300_v32  ;;  %v11903_v32 = vsel %vm903_vm4, %v21173_v14, %v21197_v39  ;;  %v18748_v14 = vpack.c.bf16 %v21203_v11, %v21202_v3  ;;  %v21221_v39 = vpop.permute.xlu0 %21220  ;;  %v21228_v11 = vunpack.i.h.bf16 %v26467_v23  ;;  %v21227_v3 = vunpack.i.l.bf16 %v26467_v23 }
 0x935   :  { %12006 = vmatprep.mubr.f32.mxu1 %v26086_v7  ;;  %v18746_v16 = vpack.c.bf16 %v11903_v32, %v11898_v34  ;;  %v21236_v46 = vpop.permute.xlu1 %21235  ;;  %v21223_v29 = vunpack.i.h.bf16 %v21221_v39  ;;  %v21222_v32 = vunpack.i.l.bf16 %v21221_v39 }
 0x936   :  { %v21238_v12 = vunpack.i.h.bf16 %v21236_v46  ;;  %v21237_v62 = vunpack.i.l.bf16 %v21236_v46 }
 0x937   :  { %v12350_v39 = vsel %vm1280_vm5, %v21222_v32, %v21212_v60 }
 0x938   :  { %18109 = vmatmul.mubr.msk.f32.vlgmr.msra.gmra.mrb[32].mxu1 %vm3691_vm11, %v26417_v27 }
 0x939   :  { %18743 = vmatpush1.bf16.msra.mxu1 %v18742_v44  ;;  %12012 = vmatprep.mubr.f32.mxu1 %v26086_v7  ;;  %v26485_v44 = vpop.permute.xlu0 %21230 }
 0x93a   :  { %18745 = vmatprep.subr.bf16.mxu1 %v18744_v5  ;;  %v26492_v5 = vpop.permute.xlu1 %21245  ;;  %v21233_v34 = vunpack.i.h.bf16 %v26485_v44  ;;  %v21232_v10 = vunpack.i.l.bf16 %v26485_v44 }
 0x93b   :  { %v21248_v37 = vunpack.i.h.bf16 %v26492_v5  ;;  %v21247_v2 = vunpack.i.l.bf16 %v26492_v5 }
 0x93c   :  { %18110 = vmatmul.mubr.msk.f32.gmra.mrb[34].mxu1 %vm3691_vm11, %v26431_v55  ;;  %v12368_v35 = vsel %vm1280_vm5, %v21238_v12, %v21232_v10 }
 0x93d   :  { %18747 = vmatpush1.bf16.msra.mxu1 %v18746_v16  ;;  %12018 = vmatprep.mubr.f32.mxu1 %v26086_v7  ;;  %v12356_v16 = vsel %vm1280_vm5, %v21223_v29, %v21217_v49  ;;  %v12359_v60 = vsel %vm1280_vm5, %v21247_v2, %v21248_v37 }
 0x93e   :  { %18749 = vmatprep.subr.bf16.mxu1 %v18748_v14  ;;  %v26497_v14 = vpop.permute.xlu0 %21240  ;;  %v18758_v53 = vpack.c.bf16 %v12356_v16, %v12350_v39  ;;  %v21256_v44 = vpop.permute.xlu1 %21255 }
 0x93f   :  { %v21243_v49 = vunpack.i.h.bf16 %v26497_v14  ;;  %v21242_v59 = vunpack.i.l.bf16 %v26497_v14  ;;  %v21257_v32 = vunpack.i.l.bf16 %v21256_v44  ;;  %v28131_v14 = vpack.c.bf16 %v25754_v6, %v25740_v47 }
 0x940   :  { %18111 = vmatmul.mubr.msk.f32.gmra.mrb[36].mxu1 %vm3691_vm11, %v26442_v41  ;;  %v28133_v47 = vpack.c.bf16 %v25792_v8, %v25778_v15  ;;  %v28134_v6 = vpack.c.bf16 %v25788_v56, %v25774_v17  ;;  %v26620_v17 = vld [vmem:[%s28077_s8 + $0x88] sm:$0xff]  ;;  %v28137_v15 = vpack.c.bf16 %v25874_v58, %v25856_v1  ;;  %v28138_v56 = vpack.c.bf16 %v25870_v52, %v25852_v21  ;;  %v26634_v8 = vld [vmem:[%s28077_s8 + $0x90] sm:$0xff] }
 0x941   :  { %12024 = vmatprep.mubr.f32.mxu1 %v26086_v7 }
 0x944   :  { %18112 = vmatmul.mubr.msk.f32.gmra.mrb[38].mxu1 %vm3691_vm11, %v26452_v54 }
 0x945   :  { %12095 = vmatprep.mubr.f32.mxu1 %v26086_v7 }
 0x948   :  { %18113 = vmatmul.mubr.msk.f32.vlgmr.msra.gmra.mrb[40].mxu1 %vm3691_vm11, %v26417_v27 }
 0x949   :  { %18751 = vmatpush1.bf16.msra.mxu1 %v18750_v61  ;;  %12101 = vmatprep.mubr.f32.mxu1 %v26086_v7  ;;  %v12363_v61 = vsel %vm1280_vm5, %v21227_v3, %v21228_v11 }
 0x94a   :  { %18753 = vmatprep.subr.bf16.mxu1 %v18752_v26  ;;  %v12369_v26 = vsel %vm1280_vm5, %v21232_v10, %v21233_v34  ;;  %v21266_v10 = vpop.permute.xlu1 %21265 }
 0x94b   :  { %v18760_v48 = vpack.c.bf16 %v12369_v26, %v12363_v61  ;;  %v21268_v61 = vunpack.i.h.bf16 %v21266_v10  ;;  %v21267_v39 = vunpack.i.l.bf16 %v21266_v10  ;;  %v12352_v26 = vsel %vm1280_vm5, %v21213_v4, %v21242_v59 }
 0x94c   :  { %18114 = vmatmul.mubr.msk.f32.gmra.mrb[42].mxu1 %vm3691_vm11, %v26431_v55 }
 0x94d   :  { %18755 = vmatpush1.bf16.msra.mxu1 %v18754_v45  ;;  %12107 = vmatprep.mubr.f32.mxu1 %v26086_v7  ;;  %v12362_v45 = vsel %vm1280_vm5, %v21237_v62, %v21227_v3  ;;  %v21258_v3 = vunpack.i.h.bf16 %v21256_v44  ;;  %v12361_v38 = vsel %vm1280_vm5, %v21267_v39, %v21268_v61  ;;  %v12360_v10 = vsel %vm1280_vm5, %v21248_v37, %v21267_v39 }
 0x94e   :  { %18757 = vmatprep.subr.bf16.mxu1 %v18756_v57  ;;  %v18762_v46 = vpack.c.bf16 %v12368_v35, %v12362_v45  ;;  %v12353_v57 = vsel %vm1280_vm5, %v21242_v59, %v21243_v49 }
 0x94f   :  { %v18764_v29 = vpack.c.bf16 %v12359_v60, %v12353_v57  ;;  %v21276_v57 = vpop.permute.xlu1 %21275 }
 0x950   :  { %18115 = vmatmul.mubr.msk.f32.gmra.mrb[44].mxu1 %vm3691_vm11, %v26442_v41  ;;  %v21278_v23 = vunpack.i.h.bf16 %v21276_v57 }
 0x951   :  { %12113 = vmatprep.mubr.f32.mxu1 %v26086_v7 }
 0x954   :  { %18116 = vmatmul.mubr.msk.f32.gmra.mrb[46].mxu1 %vm3691_vm11, %v26452_v54 }
 0x955   :  { %12184 = vmatprep.mubr.f32.mxu1 %v26086_v7 }
 0x958   :  { %18117 = vmatmul.mubr.msk.f32.vlgmr.msra.gmra.mrb[48].mxu1 %vm3691_vm11, %v26417_v27  ;;  %v21251_v27 = vpop.permute.xlu0 %21250 }
 0x959   :  { %18759 = vmatpush1.bf16.msra.mxu1 %v18758_v53  ;;  %12190 = vmatprep.mubr.f32.mxu1 %v26086_v7  ;;  %v21253_v16 = vunpack.i.h.bf16 %v21251_v27  ;;  %v21252_v12 = vunpack.i.l.bf16 %v21251_v27  ;;  %v12371_v53 = vsel %vm1280_vm5, %v21257_v32, %v21258_v3 }
 0x95a   :  { %18761 = vmatprep.subr.bf16.mxu1 %v18760_v48  ;;  %v18122_v48 = vld [vmem:[%s28077_s8 + $0x68] sm:$0xff] }
 0x95b   :  { %v12364_v4 = vsel %vm1280_vm5, %v21228_v11, %v21252_v12  ;;  %v21277_v11 = vunpack.i.l.bf16 %v21276_v57 }
 0x95c   :  { %18118 = vmatmul.mubr.msk.f32.gmra.mrb[50].mxu1 %vm3691_vm11, %v26431_v55  ;;  %v21261_v62 = vpop.permute.xlu0 %21260  ;;  %v12358_v55 = vsel %vm1280_vm5, %v21218_v63, %v21247_v2  ;;  %v12365_v2 = vsel %vm1280_vm5, %v21252_v12, %v21253_v16 }
 0x95d   :  { %18763 = vmatpush1.bf16.msra.mxu1 %v18762_v46  ;;  %12196 = vmatprep.mubr.f32.mxu1 %v26086_v7  ;;  %v21263_v30 = vunpack.i.h.bf16 %v21261_v62  ;;  %v21262_v35 = vunpack.i.l.bf16 %v21261_v62  ;;  %v18766_v63 = vpack.c.bf16 %v12358_v55, %v12352_v26  ;;  %v18768_v45 = vpack.c.bf16 %v12371_v53, %v12365_v2  ;;  %v18123_v46 = vld [vmem:[%s28077_s8 + $0x70] sm:$0xff] }
 0x95e   :  { %18765 = vmatprep.subr.bf16.mxu1 %v18764_v29  ;;  %v18124_v29 = vld [vmem:[%s28077_s8 + $0x78] sm:$0xff]  ;;  %v12373_v12 = vsel %vm1280_vm5, %v21277_v11, %v21278_v23  ;;  %v12372_v53 = vsel %vm1280_vm5, %v21258_v3, %v21277_v11  ;;  %v28135_v3 = vpack.c.bf16 %v25834_v40, %v25814_v25  ;;  %v26639_v25 = vpop.permute.xlu1 %21285  ;;  %v28141_v26 = vpack.c.bf16 %v25965_v28, %v25963_v43 }
 0x95f   :  { %v12354_v62 = vsel %vm1280_vm5, %v21243_v49, %v21262_v35  ;;  %v28132_v49 = vpack.c.bf16 %v25750_v13, %v25736_v33  ;;  %v26609_v33 = vld [vmem:[%s28077_s8 + $0x80] sm:$0xff]  ;;  %v28136_v13 = vpack.c.bf16 %v25830_v51, %v25810_v50  ;;  %v28139_v50 = vpack.c.bf16 %v25941_v22, %v25939_v42  ;;  %v26647_v51 = vld [vmem:[%s28077_s8 + $0x98] sm:$0xff] }
 0x960   :  { %18119 = vmatmul.mubr.msk.f32.gmra.mrb[52].mxu1 %vm3691_vm11, %v26442_v41  ;;  %v18121_v41 = vld [vmem:[%s28077_s8 + $0x60] sm:$0xff]  ;;  %v21271_v44 = vpop.permute.xlu0 %21270  ;;  %v18774_v55 = vpack.c.bf16 %v12360_v10, %v12354_v62  ;;  %v21288_v21 = vunpack.i.h.bf16 %v26639_v25  ;;  %v21287_v1 = vunpack.i.l.bf16 %v26639_v25 }
 0x961   :  { %12202 = vmatprep.mubr.f32.mxu1 %v26086_v7  ;;  %v21273_v27 = vunpack.i.h.bf16 %v21271_v44  ;;  %v26707_v10 = vld [vmem:[#allocation2] sm:$0xff] }
 0x962   :  { %v26656_v52 = vpop.permute.xlu1 %21295 }
 0x963   :  { %v21298_v43 = vunpack.i.h.bf16 %v26656_v52  ;;  %v21297_v28 = vunpack.i.l.bf16 %v26656_v52  ;;  %v26764_v52 = vld [vmem:[%s28077_s8 + $0xb8] sm:$0xff] }
 0x964   :  { %18120 = vmatmul.mubr.msk.f32.gmra.mrb[54].mxu1 %vm3691_vm11, %v26452_v54  ;;  %v12370_v54 = vsel %vm1280_vm5, %v21233_v34, %v21257_v32  ;;  %v12355_v34 = vsel %vm1280_vm5, %v21262_v35, %v21263_v30  ;;  %v21272_v32 = vunpack.i.l.bf16 %v21271_v44  ;;  %v26649_v40 = vpop.permute.xlu0 %21280 }
 0x965   :  { %12474 = vmatprep.mubr.f32.mxu1 %v26086_v7  ;;  %v18770_v59 = vpack.c.bf16 %v12370_v54, %v12364_v4  ;;  %v18772_v60 = vpack.c.bf16 %v12361_v38, %v12355_v34  ;;  %v21283_v58 = vunpack.i.h.bf16 %v26649_v40  ;;  %v21282_v42 = vunpack.i.l.bf16 %v26649_v40 }
 0x966   :  { %v12367_v61 = vsel %vm1280_vm5, %v21272_v32, %v21273_v27  ;;  %v12366_v37 = vsel %vm1280_vm5, %v21253_v16, %v21272_v32  ;;  %v28140_v16 = vpack.c.bf16 %v25905_v24, %v25892_v18  ;;  %v21306_v35 = vpop.permute.xlu1 %21305  ;;  %v28142_v24 = vpack.c.bf16 %v25932_v19, %v25920_v20 }
 0x967   :  { %v18776_v5 = vpack.c.bf16 %v12373_v12, %v12367_v61  ;;  %v18778_v39 = vpack.c.bf16 %v12372_v53, %v12366_v37  ;;  %v13063_v30 = vsel %vm1997_vm6, %v21282_v42, %v21283_v58  ;;  %v21308_v4 = vunpack.i.h.bf16 %v21306_v35 }
 0x968   :  { %18125 = vmatmul.mubr.msk.f32.vlgmr.msra.gmra.mrb[32].mxu1 %vm3691_vm11, %v18121_v41  ;;  %v21291_v22 = vpop.permute.xlu0 %21290 }
 0x969   :  { %18767 = vmatpush1.bf16.msra.mxu1 %v18766_v63  ;;  %12480 = vmatprep.mubr.f32.mxu1 %v26086_v7  ;;  %v21293_v2 = vunpack.i.h.bf16 %v21291_v22  ;;  %v21292_v54 = vunpack.i.l.bf16 %v21291_v22 }
 0x96a   :  { %18769 = vmatprep.subr.bf16.mxu1 %v18768_v45  ;;  %v26686_v45 = vpop.permute.xlu1 %21315 }
 0x96b   :  { %v13067_v19 = vsel %vm1997_vm6, %v21293_v2, %v21287_v1  ;;  %v21318_v34 = vunpack.i.h.bf16 %v26686_v45  ;;  %v13062_v57 = vsel %vm1997_vm6, %v21292_v54, %v21282_v42  ;;  %v26754_v42 = vld [vmem:[%s28077_s8 + $0xb0] sm:$0xff] }
 0x96c   :  { %18126 = vmatmul.mubr.msk.f32.gmra.mrb[34].mxu1 %vm3691_vm11, %v18122_v48  ;;  %v21301_v63 = vpop.permute.xlu0 %21300  ;;  %v18806_v11 = vpack.c.bf16 %v13067_v19, %v13062_v57 }
 0x96d   :  { %18771 = vmatpush1.bf16.msra.mxu1 %v18770_v59  ;;  %12486 = vmatprep.mubr.f32.mxu1 %v26086_v7  ;;  %v21302_v20 = vunpack.i.l.bf16 %v21301_v63  ;;  %v21307_v59 = vunpack.i.l.bf16 %v21306_v35 }
 0x96e   :  { %18773 = vmatprep.subr.bf16.mxu1 %v18772_v60  ;;  %v21317_v60 = vunpack.i.l.bf16 %v26686_v45  ;;  %v21326_v53 = vpop.permute.xlu1 %21325 }
 0x96f   :  { %v13077_v27 = vsel %vm1997_vm6, %v21308_v4, %v21302_v20  ;;  %v13072_v32 = vsel %vm1997_vm6, %v21307_v59, %v21297_v28  ;;  %v21328_v37 = vunpack.i.h.bf16 %v21326_v53 }
 0x970   :  { %18127 = vmatmul.mubr.msk.f32.gmra.mrb[36].mxu1 %vm3691_vm11, %v18123_v46  ;;  %v26689_v38 = vpop.permute.xlu0 %21310  ;;  %v13070_v12 = vsel %vm1997_vm6, %v21317_v60, %v21318_v34  ;;  %v18810_v62 = vpack.c.bf16 %v13077_v27, %v13072_v32 }
 0x971   :  { %12492 = vmatprep.mubr.f32.mxu1 %v26086_v7  ;;  %v21313_v44 = vunpack.i.h.bf16 %v26689_v38  ;;  %v21312_v23 = vunpack.i.l.bf16 %v26689_v38 }
 0x974   :  { %18128 = vmatmul.mubr.msk.f32.gmra.mrb[38].mxu1 %vm3691_vm11, %v18124_v29 }
 0x975   :  { %12563 = vmatprep.mubr.f32.mxu1 %v26086_v7 }
 0x978   :  { %18129 = vmatmul.mubr.msk.f32.vlgmr.msra.gmra.mrb[40].mxu1 %vm3691_vm11, %v18121_v41 }
 0x979   :  { %18775 = vmatpush1.bf16.msra.mxu1 %v18774_v55  ;;  %12569 = vmatprep.mubr.f32.mxu1 %v26086_v7  ;;  %v13065_v55 = vsel %vm1997_vm6, %v21312_v23, %v21313_v44 }
 0x97a   :  { %18777 = vmatprep.subr.bf16.mxu1 %v18776_v5  ;;  %v18812_v61 = vpack.c.bf16 %v13070_v12, %v13065_v55  ;;  %v21321_v5 = vpop.permute.xlu0 %21320 }
 0x97c   :  { %18130 = vmatmul.mubr.msk.f32.gmra.mrb[42].mxu1 %vm3691_vm11, %v18122_v48 }
 0x97d   :  { %18779 = vmatpush1.bf16.msra.mxu1 %v18778_v39  ;;  %12575 = vmatprep.mubr.f32.mxu1 %v26086_v7  ;;  %v21327_v39 = vunpack.i.l.bf16 %v21326_v53 }
 0x97e   :  { %18781 = vmatprep.subr.bf16.mxu1 %v28131_v14  ;;  %v21323_v14 = vunpack.i.h.bf16 %v21321_v5 }
 0x980   :  { %18131 = vmatmul.mubr.msk.f32.gmra.mrb[44].mxu1 %vm3691_vm11, %v18123_v46 }
 0x981   :  { %12581 = vmatprep.mubr.f32.mxu1 %v26086_v7 }
 0x984   :  { %18132 = vmatmul.mubr.msk.f32.gmra.mrb[46].mxu1 %vm3691_vm11, %v18124_v29 }
 0x985   :  { %12652 = vmatprep.mubr.f32.mxu1 %v26086_v7 }
 0x988   :  { %18133 = vmatmul.mubr.msk.f32.vlgmr.msra.gmra.mrb[48].mxu1 %vm3691_vm11, %v18121_v41  ;;  %v13068_v41 = vsel %vm1997_vm6, %v21287_v1, %v21288_v21 }
 0x989   :  { %18783 = vmatpush1.bf16.msra.mxu1 %v28132_v49  ;;  %12658 = vmatprep.mubr.f32.mxu1 %v26086_v7  ;;  %v18804_v18 = vpack.c.bf16 %v13068_v41, %v13063_v30  ;;  %v21322_v49 = vunpack.i.l.bf16 %v21321_v5 }
 0x98a   :  { %18785 = vmatprep.subr.bf16.mxu1 %v28133_v47  ;;  %v13069_v47 = vsel %vm1997_vm6, %v21288_v21, %v21317_v60  ;;  %v21336_v21 = vpop.permute.xlu1 %21335 }
 0x98b   :  { %v13074_v40 = vsel %vm1997_vm6, %v21298_v43, %v21322_v49  ;;  %v21338_v30 = vunpack.i.h.bf16 %v21336_v21  ;;  %v21337_v35 = vunpack.i.l.bf16 %v21336_v21 }
 0x98c   :  { %18134 = vmatmul.mubr.msk.f32.gmra.mrb[50].mxu1 %vm3691_vm11, %v18122_v48  ;;  %v21303_v48 = vunpack.i.h.bf16 %v21301_v63 }
 0x98d   :  { %18787 = vmatpush1.bf16.msra.mxu1 %v28134_v6  ;;  %12664 = vmatprep.mubr.f32.mxu1 %v26086_v7  ;;  %v21331_v6 = vpop.permute.xlu0 %21330  ;;  %v13076_v45 = vsel %vm1997_vm6, %v21323_v14, %v21337_v35 }
 0x98e   :  { %18789 = vmatprep.subr.bf16.mxu1 %v28135_v3  ;;  %v26729_v3 = vld [vmem:[%s28077_s8 + $0xa0] sm:$0xff]  ;;  %v26756_v22 = vpop.permute.xlu1 %21345 }
 0x990   :  { %18135 = vmatmul.mubr.msk.f32.gmra.mrb[52].mxu1 %vm3691_vm11, %v18123_v46  ;;  %v13073_v46 = vsel %vm1997_vm6, %v21297_v28, %v21298_v43 }
 0x991   :  { %12670 = vmatprep.mubr.f32.mxu1 %v26086_v7 }
 0x992   :  { %v26777_v63 = vpop.permute.xlu1 %21355 }
 0x993   :  { %v21357_v57 = vunpack.i.l.bf16 %v26777_v63 }
 0x994   :  { %18136 = vmatmul.mubr.msk.f32.gmra.mrb[54].mxu1 %vm3691_vm11, %v18124_v29  ;;  %v13078_v29 = vsel %vm1997_vm6, %v21302_v20, %v21303_v48  ;;  %v18824_v20 = vpack.c.bf16 %v21338_v30, %v21337_v35 }
 0x995   :  { %12782 = vmatprep.mubr.f32.mxu1 %v26086_v7 }
 0x996   :  { %v21366_v59 = vpop.permute.xlu1 %21365 }
 0x997   :  { %v21368_v12 = vunpack.i.h.bf16 %v21366_v59 }
 0x998   :  { %18141 = vmatmul.mubr.msk.f32.vlgmr.msra.gmra.mrb[32].mxu1 %vm3691_vm11, %v26609_v33 }
 0x999   :  { %18791 = vmatpush1.bf16.msra.mxu1 %v28136_v13  ;;  %12788 = vmatprep.mubr.f32.mxu1 %v26086_v7  ;;  %v13064_v13 = vsel %vm1997_vm6, %v21283_v58, %v21312_v23 }
 0x99a   :  { %18793 = vmatprep.subr.bf16.mxu1 %v28137_v15  ;;  %v13075_v15 = vsel %vm1997_vm6, %v21322_v49, %v21323_v14 }
 0x99c   :  { %18142 = vmatmul.mubr.msk.f32.gmra.mrb[34].mxu1 %vm3691_vm11, %v26620_v17 }
 0x99d   :  { %18795 = vmatpush1.bf16.msra.mxu1 %v28138_v56  ;;  %12794 = vmatprep.mubr.f32.mxu1 %v26086_v7  ;;  %v21333_v56 = vunpack.i.h.bf16 %v21331_v6 }
 0x99e   :  { %18797 = vmatprep.subr.bf16.mxu1 %v28139_v50  ;;  %v13079_v50 = vsel %vm1997_vm6, %v21303_v48, %v21327_v39  ;;  %v13081_v48 = vsel %vm1997_vm6, %v21328_v37, %v21338_v30 }
 0x99f   :  { %v18818_v1 = vpack.c.bf16 %v13079_v50, %v13074_v40  ;;  %v18826_v38 = vpack.c.bf16 %v13081_v48, %v13076_v45 }
 0x9a0   :  { %18143 = vmatmul.mubr.msk.f32.gmra.mrb[36].mxu1 %vm3691_vm11, %v26634_v8 }
 0x9a1   :  { %12800 = vmatprep.mubr.f32.mxu1 %v26086_v7 }
 0x9a4   :  { %18144 = vmatmul.mubr.msk.f32.gmra.mrb[38].mxu1 %vm3691_vm11, %v26647_v51 }
 0x9a5   :  { %12871 = vmatprep.mubr.f32.mxu1 %v26086_v7 }
 0x9a8   :  { %18145 = vmatmul.mubr.msk.f32.vlgmr.msra.gmra.mrb[40].mxu1 %vm3691_vm11, %v26609_v33 }
 0x9a9   :  { %18799 = vmatpush1.bf16.msra.mxu1 %v28140_v16  ;;  %12877 = vmatprep.mubr.f32.mxu1 %v26086_v7  ;;  %v26766_v16 = vpop.permute.xlu0 %21340 }
 0x9aa   :  { %18801 = vmatprep.subr.bf16.mxu1 %v28141_v26  ;;  %v13071_v26 = vsel %vm1997_vm6, %v21318_v34, %v21333_v56  ;;  %v21343_v43 = vunpack.i.h.bf16 %v26766_v16  ;;  %v21342_v28 = vunpack.i.l.bf16 %v26766_v16  ;;  %v26855_v16 = vld [vmem:[%s28077_s8 + $0xc8] sm:$0xff] }
 0x9ac   :  { %18146 = vmatmul.mubr.msk.f32.gmra.mrb[42].mxu1 %vm3691_vm11, %v26620_v17  ;;  %v13463_v4 = vsel %vm2364_vm7, %v21342_v28, %v21343_v43 }
 0x9ad   :  { %18803 = vmatpush1.bf16.msra.mxu1 %v28142_v24  ;;  %12883 = vmatprep.mubr.f32.mxu1 %v26086_v7  ;;  %v21347_v24 = vunpack.i.l.bf16 %v26756_v22  ;;  %v21351_v54 = vpop.permute.xlu0 %21350 }
 0x9ae   :  { %18805 = vmatprep.subr.bf16.mxu1 %v18804_v18  ;;  %v21348_v18 = vunpack.i.h.bf16 %v26756_v22  ;;  %v21352_v23 = vunpack.i.l.bf16 %v21351_v54 }
 0x9b0   :  { %18147 = vmatmul.mubr.msk.f32.gmra.mrb[44].mxu1 %vm3691_vm11, %v26634_v8  ;;  %v13468_v19 = vsel %vm2364_vm7, %v21347_v24, %v21348_v18  ;;  %v13462_v5 = vsel %vm2364_vm7, %v21352_v23, %v21342_v28 }
 0x9b1   :  { %12889 = vmatprep.mubr.f32.mxu1 %v26086_v7  ;;  %v18828_v34 = vpack.c.bf16 %v13468_v19, %v13463_v4  ;;  %v21361_v60 = vpop.permute.xlu0 %21360 }
 0x9b2   :  { %v21362_v27 = vunpack.i.l.bf16 %v21361_v60 }
 0x9b4   :  { %18148 = vmatmul.mubr.msk.f32.gmra.mrb[46].mxu1 %vm3691_vm11, %v26647_v51 }
 0x9b5   :  { %12960 = vmatprep.mubr.f32.mxu1 %v26086_v7  ;;  %v18808_v7 = vpack.c.bf16 %v13078_v29, %v13073_v46  ;;  %v21358_v46 = vunpack.i.h.bf16 %v26777_v63  ;;  %v21363_v29 = vunpack.i.h.bf16 %v21361_v60  ;;  %v26876_v63 = vld [vmem:[%s28077_s8 + $0xd8] sm:$0xff] }
 0x9b7   :  { %v13473_v53 = vsel %vm2364_vm7, %v21357_v57, %v21358_v46  ;;  %v13478_v49 = vsel %vm2364_vm7, %v21362_v27, %v21363_v29 }
 0x9b8   :  { %18149 = vmatmul.mubr.msk.f32.vlgmr.msra.gmra.mrb[48].mxu1 %vm3691_vm11, %v26609_v33  ;;  %v13080_v33 = vsel %vm1997_vm6, %v21327_v39, %v21328_v37 }
 0x9b9   :  { %18807 = vmatpush1.bf16.msra.mxu1 %v18806_v11  ;;  %12966 = vmatprep.mubr.f32.mxu1 %v26707_v10  ;;  %v18816_v25 = vpack.c.bf16 %v13080_v33, %v13075_v15  ;;  %v26800_v11 = vpop.permute.xlu1 %21375  ;;  %v18832_v33 = vpack.c.bf16 %v13478_v49, %v13473_v53 }
 0x9ba   :  { %18809 = vmatprep.subr.bf16.mxu1 %v18808_v7  ;;  %v26803_v7 = vpop.permute.xlu0 %21370  ;;  %v21378_v55 = vunpack.i.h.bf16 %v26800_v11 }
 0x9bb   :  { %v21373_v37 = vunpack.i.h.bf16 %v26803_v7  ;;  %v21372_v39 = vunpack.i.l.bf16 %v26803_v7 }
 0x9bc   :  { %18150 = vmatmul.mubr.msk.f32.gmra.mrb[50].mxu1 %vm3691_vm11, %v26620_v17  ;;  %v18814_v17 = vpack.c.bf16 %v13069_v47, %v13064_v13  ;;  %v13477_v47 = vsel %vm2364_vm7, %v21368_v12, %v21362_v27 }
 0x9bd   :  { %18811 = vmatpush1.bf16.msra.mxu1 %v18810_v62  ;;  %12972 = vmatprep.mubr.f32.mxu1 %v26707_v10  ;;  %v21367_v62 = vunpack.i.l.bf16 %v21366_v59  ;;  %v13465_v15 = vsel %vm2364_vm7, %v21372_v39, %v21373_v37 }
 0x9be   :  { %18813 = vmatprep.subr.bf16.mxu1 %v18812_v61  ;;  %v21377_v61 = vunpack.i.l.bf16 %v26800_v11 }
 0x9c0   :  { %18151 = vmatmul.mubr.msk.f32.gmra.mrb[52].mxu1 %vm3691_vm11, %v26634_v8  ;;  %v21332_v8 = vunpack.i.l.bf16 %v21331_v6  ;;  %v13472_v6 = vsel %vm2364_vm7, %v21367_v62, %v21357_v57  ;;  %v13470_v13 = vsel %vm2364_vm7, %v21377_v61, %v21378_v55 }
 0x9c1   :  { %12978 = vmatprep.mubr.f32.mxu1 %v26707_v10 }
 0x9c2   :  { %v18820_v58 = vpack.c.bf16 %v21333_v56, %v21332_v8  ;;  %v13066_v41 = vsel %vm1997_vm6, %v21313_v44, %v21332_v8  ;;  %v21353_v44 = vunpack.i.h.bf16 %v21351_v54  ;;  %v18836_v56 = vpack.c.bf16 %v13470_v13, %v13465_v15  ;;  %v21381_v8 = vpop.permute.xlu0 %21380  ;;  %v26866_v54 = vld [vmem:[%s28077_s8 + $0xd0] sm:$0xff] }
 0x9c3   :  { %v18822_v2 = vpack.c.bf16 %v13071_v26, %v13066_v41  ;;  %v21383_v40 = vunpack.i.h.bf16 %v21381_v8  ;;  %v21382_v21 = vunpack.i.l.bf16 %v21381_v8  ;;  %v13464_v41 = vsel %vm2364_vm7, %v21343_v43, %v21372_v39 }
 0x9c4   :  { %18152 = vmatmul.mubr.msk.f32.gmra.mrb[54].mxu1 %vm3691_vm11, %v26647_v51  ;;  %v26743_v51 = vld [vmem:[%s28077_s8 + $0xa8] sm:$0xff]  ;;  %v13467_v32 = vsel %vm2364_vm7, %v21353_v44, %v21347_v24 }
 0x9c5   :  { %13182 = vmatprep.mubr.f32.mxu1 %v26707_v10  ;;  %v18830_v14 = vpack.c.bf16 %v13467_v32, %v13462_v5  ;;  %v13475_v26 = vsel %vm2364_vm7, %v21382_v21, %v21383_v40  ;;  %v13474_v24 = vsel %vm2364_vm7, %v21358_v46, %v21382_v21 }
 0x9c8   :  { %18157 = vmatmul.mubr.msk.f32.vlgmr.msra.gmra.mrb[32].mxu1 %vm3691_vm11, %v26729_v3 }
 0x9c9   :  { %18815 = vmatpush1.bf16.msra.mxu1 %v18814_v17  ;;  %13188 = vmatprep.mubr.f32.mxu1 %v26707_v10  ;;  %v18834_v17 = vpack.c.bf16 %v13477_v47, %v13472_v6 }
 0x9ca   :  { %18817 = vmatprep.subr.bf16.mxu1 %v18816_v25 }
 0x9cc   :  { %18158 = vmatmul.mubr.msk.f32.gmra.mrb[34].mxu1 %vm3691_vm11, %v26743_v51 }
 0x9cd   :  { %18819 = vmatpush1.bf16.msra.mxu1 %v18818_v1  ;;  %13194 = vmatprep.mubr.f32.mxu1 %v26707_v10  ;;  %v21391_v1 = vpop.permute.xlu0 %21390 }
 0x9ce   :  { %18821 = vmatprep.subr.bf16.mxu1 %v18820_v58  ;;  %v26841_v58 = vld [vmem:[%s28077_s8 + $0xc0] sm:$0xff]  ;;  %v21393_v30 = vunpack.i.h.bf16 %v21391_v1  ;;  %v21392_v35 = vunpack.i.l.bf16 %v21391_v1 }
 0x9d0   :  { %18159 = vmatmul.mubr.msk.f32.gmra.mrb[36].mxu1 %vm3691_vm11, %v26754_v42  ;;  %v13471_v19 = vsel %vm2364_vm7, %v21378_v55, %v21393_v30 }
 0x9d1   :  { %13200 = vmatprep.mubr.f32.mxu1 %v26707_v10  ;;  %v26878_v48 = vpop.permute.xlu0 %21400 }
 0x9d2   :  { %v21403_v46 = vunpack.i.h.bf16 %v26878_v48  ;;  %v21402_v57 = vunpack.i.l.bf16 %v26878_v48  ;;  %v26967_v48 = vld [vmem:[%s28077_s8 + $0xe8] sm:$0xff] }
 0x9d4   :  { %18160 = vmatmul.mubr.msk.f32.gmra.mrb[38].mxu1 %vm3691_vm11, %v26764_v52  ;;  %v13863_v12 = vsel %vm2731_vm8, %v21402_v57, %v21403_v46 }
 0x9d5   :  { %13271 = vmatprep.mubr.f32.mxu1 %v26707_v10  ;;  %v21411_v23 = vpop.permute.xlu0 %21410 }
 0x9d6   :  { %v21412_v39 = vunpack.i.l.bf16 %v21411_v23 }
 0x9d8   :  { %18161 = vmatmul.mubr.msk.f32.vlgmr.msra.gmra.mrb[40].mxu1 %vm3691_vm11, %v26729_v3  ;;  %v13862_v8 = vsel %vm2731_vm8, %v21412_v39, %v21402_v57 }
 0x9d9   :  { %18823 = vmatpush1.bf16.msra.mxu1 %v18822_v2  ;;  %13277 = vmatprep.mubr.f32.mxu1 %v26707_v10  ;;  %v18844_v2 = vpack.c.bf16 %v21393_v30, %v21392_v35 }
 0x9da   :  { %18825 = vmatprep.subr.bf16.mxu1 %v18824_v20  ;;  %v13466_v20 = vsel %vm2364_vm7, %v21373_v37, %v21392_v35  ;;  %v21413_v37 = vunpack.i.h.bf16 %v21411_v23  ;;  %v26978_v23 = vld [vmem:[%s28077_s8 + $0xf0] sm:$0xff] }
 0x9db   :  { %v18846_v44 = vpack.c.bf16 %v13471_v19, %v13466_v20 }
 0x9dc   :  { %18162 = vmatmul.mubr.msk.f32.gmra.mrb[42].mxu1 %vm3691_vm11, %v26743_v51 }
 0x9dd   :  { %18827 = vmatpush1.bf16.msra.mxu1 %v18826_v38  ;;  %13283 = vmatprep.mubr.f32.mxu1 %v26707_v10 }
 0x9de   :  { %18829 = vmatprep.subr.bf16.mxu1 %v18828_v34 }
 0x9e0   :  { %18163 = vmatmul.mubr.msk.f32.gmra.mrb[44].mxu1 %vm3691_vm11, %v26754_v42 }
 0x9e1   :  { %13289 = vmatprep.mubr.f32.mxu1 %v26707_v10 }
 0x9e4   :  { %18164 = vmatmul.mubr.msk.f32.gmra.mrb[46].mxu1 %vm3691_vm11, %v26764_v52 }
 0x9e5   :  { %13360 = vmatprep.mubr.f32.mxu1 %v26707_v10 }
 0x9e8   :  { %18165 = vmatmul.mubr.msk.f32.vlgmr.msra.gmra.mrb[48].mxu1 %vm3691_vm11, %v26729_v3  ;;  %v21386_v3 = vpop.permute.xlu1 %21385 }
 0x9e9   :  { %18831 = vmatpush1.bf16.msra.mxu1 %v18830_v14  ;;  %13366 = vmatprep.mubr.f32.mxu1 %v26707_v10  ;;  %v21388_v50 = vunpack.i.h.bf16 %v21386_v3  ;;  %v21387_v25 = vunpack.i.l.bf16 %v21386_v3 }
 0x9ea   :  { %18833 = vmatprep.subr.bf16.mxu1 %v18832_v33 }
 0x9ec   :  { %18166 = vmatmul.mubr.msk.f32.gmra.mrb[50].mxu1 %vm3691_vm11, %v26743_v51  ;;  %v13469_v51 = vsel %vm2364_vm7, %v21348_v18, %v21377_v61  ;;  %v21396_v43 = vpop.permute.xlu1 %21395  ;;  %v21421_v61 = vpop.permute.xlu0 %21420 }
 0x9ed   :  { %18835 = vmatpush1.bf16.msra.mxu1 %v18834_v17  ;;  %13372 = vmatprep.mubr.f32.mxu1 %v26707_v10  ;;  %v18838_v22 = vpack.c.bf16 %v13469_v51, %v13464_v41  ;;  %v21398_v38 = vunpack.i.h.bf16 %v21396_v43  ;;  %v21397_v4 = vunpack.i.l.bf16 %v21396_v43  ;;  %v21423_v49 = vunpack.i.h.bf16 %v21421_v61 }
 0x9ee   :  { %18837 = vmatprep.subr.bf16.mxu1 %v18836_v56  ;;  %v21422_v47 = vunpack.i.l.bf16 %v21421_v61 }
 0x9ef   :  { %v13476_v11 = vsel %vm2364_vm7, %v21383_v40, %v21397_v4  ;;  %v18848_v27 = vpack.c.bf16 %v21398_v38, %v21397_v4 }
 0x9f0   :  { %18167 = vmatmul.mubr.msk.f32.gmra.mrb[52].mxu1 %vm3691_vm11, %v26754_v42  ;;  %v13480_v42 = vsel %vm2364_vm7, %v21387_v25, %v21388_v50  ;;  %v26868_v45 = vpop.permute.xlu1 %21405  ;;  %v26915_v33 = vpop.permute.xlu0 %21430  ;;  %v13878_v21 = vsel %vm2731_vm8, %v21422_v47, %v21423_v49 }
 0x9f1   :  { %13378 = vmatprep.mubr.f32.mxu1 %v26707_v10  ;;  %v18840_v18 = vpack.c.bf16 %v13480_v42, %v13475_v26  ;;  %v21408_v59 = vunpack.i.h.bf16 %v26868_v45  ;;  %v21407_v34 = vunpack.i.l.bf16 %v26868_v45 }
 0x9f3   :  { %v13868_v32 = vsel %vm2731_vm8, %v21407_v34, %v21408_v59  ;;  %v13867_v6 = vsel %vm2731_vm8, %v21413_v37, %v21407_v34 }
 0x9f4   :  { %18168 = vmatmul.mubr.msk.f32.gmra.mrb[54].mxu1 %vm3691_vm11, %v26764_v52  ;;  %v13479_v52 = vsel %vm2364_vm7, %v21363_v29, %v21387_v25  ;;  %v26889_v60 = vpop.permute.xlu1 %21415  ;;  %v13481_v29 = vsel %vm2364_vm7, %v21388_v50, %v21398_v38  ;;  %v18852_v55 = vpack.c.bf16 %v13868_v32, %v13863_v12  ;;  %v21433_v50 = vunpack.i.h.bf16 %v26915_v33  ;;  %v21441_v35 = vpop.permute.xlu0 %21440 }
 0x9f5   :  { %13582 = vmatprep.mubr.f32.mxu1 %v26707_v10  ;;  %v18842_v28 = vpack.c.bf16 %v13479_v52, %v13474_v24  ;;  %v18850_v7 = vpack.c.bf16 %v13481_v29, %v13476_v11  ;;  %v21418_v53 = vunpack.i.h.bf16 %v26889_v60  ;;  %v21417_v5 = vunpack.i.l.bf16 %v26889_v60  ;;  %v26988_v60 = vld [vmem:[%s28077_s8 + $0xf8] sm:$0xff] }
 0x9f6   :  { %v21432_v25 = vunpack.i.l.bf16 %v26915_v33  ;;  %v18854_v40 = vpack.c.bf16 %v13867_v6, %v13862_v8  ;;  %v21443_v24 = vunpack.i.h.bf16 %v21441_v35  ;;  %v21442_v43 = vunpack.i.l.bf16 %v21441_v35 }
 0x9f7   :  { %v13873_v3 = vsel %vm2731_vm8, %v21417_v5, %v21418_v53 }
 0x9f8   :  { %18173 = vmatmul.mubr.msk.f32.vlgmr.msra.gmra.mrb[32].mxu1 %vm3691_vm11, %v26841_v58  ;;  %v21426_v62 = vpop.permute.xlu1 %21425  ;;  %v18856_v42 = vpack.c.bf16 %v13878_v21, %v13873_v3  ;;  %v13865_v26 = vsel %vm2731_vm8, %v21432_v25, %v21433_v50  ;;  %v13864_v20 = vsel %vm2731_vm8, %v21403_v46, %v21432_v25  ;;  %v13875_v19 = vsel %vm2731_vm8, %v21442_v43, %v21443_v24 }
 0x9f9   :  { %18839 = vmatpush1.bf16.msra.mxu1 %v18838_v22  ;;  %13588 = vmatprep.mubr.f32.mxu1 %v26707_v10  ;;  %v21428_v13 = vunpack.i.h.bf16 %v21426_v62  ;;  %v21427_v17 = vunpack.i.l.bf16 %v21426_v62  ;;  %v13874_v34 = vsel %vm2731_vm8, %v21418_v53, %v21442_v43 }
 0x9fa   :  { %18841 = vmatprep.subr.bf16.mxu1 %v18840_v18 }
 0x9fb   :  { %v13877_v51 = vsel %vm2731_vm8, %v21428_v13, %v21422_v47  ;;  %v13872_v1 = vsel %vm2731_vm8, %v21427_v17, %v21417_v5 }
 0x9fc   :  { %18174 = vmatmul.mubr.msk.f32.gmra.mrb[34].mxu1 %vm3691_vm11, %v26855_v16  ;;  %v26912_v14 = vpop.permute.xlu1 %21435  ;;  %v18858_v22 = vpack.c.bf16 %v13877_v51, %v13872_v1 }
 0x9fd   :  { %18843 = vmatpush1.bf16.msra.mxu1 %v18842_v28  ;;  %13594 = vmatprep.mubr.f32.mxu1 %v26707_v10  ;;  %v21438_v15 = vunpack.i.h.bf16 %v26912_v14  ;;  %v21437_v56 = vunpack.i.l.bf16 %v26912_v14  ;;  %v21451_v28 = vpop.permute.xlu0 %21450 }
 0x9fe   :  { %18845 = vmatprep.subr.bf16.mxu1 %v18844_v2  ;;  %v26953_v2 = vld [vmem:[%s28077_s8 + $0xe0] sm:$0xff]  ;;  %v21453_v38 = vunpack.i.h.bf16 %v21451_v28  ;;  %v21452_v4 = vunpack.i.l.bf16 %v21451_v28 }
 0x9ff   :  { %v13870_v41 = vsel %vm2731_vm8, %v21437_v56, %v21438_v15 }
 0xa00   :  { %18175 = vmatmul.mubr.msk.f32.gmra.mrb[36].mxu1 %vm3691_vm11, %v26866_v54  ;;  %v18860_v30 = vpack.c.bf16 %v13870_v41, %v13865_v26  ;;  %v13871_v32 = vsel %vm2731_vm8, %v21438_v15, %v21453_v38 }
 0xa01   :  { %13600 = vmatprep.mubr.f32.mxu1 %v26707_v10  ;;  %v26990_v29 = vpop.permute.xlu0 %21460 }
 0xa02   :  { %v21463_v53 = vunpack.i.h.bf16 %v26990_v29  ;;  %v21462_v5 = vunpack.i.l.bf16 %v26990_v29 }
 0xa04   :  { %18176 = vmatmul.mubr.msk.f32.gmra.mrb[38].mxu1 %vm3691_vm11, %v26876_v63  ;;  %v14263_v13 = vsel %vm3098_vm9, %v21462_v5, %v21463_v53 }
 0xa05   :  { %13671 = vmatprep.mubr.f32.mxu1 %v26707_v10  ;;  %v21471_v39 = vpop.permute.xlu0 %21470 }
 0xa06   :  { %v21472_v25 = vunpack.i.l.bf16 %v21471_v39 }
 0xa08   :  { %18177 = vmatmul.mubr.msk.f32.vlgmr.msra.gmra.mrb[40].mxu1 %vm3691_vm11, %v26841_v58  ;;  %v14262_v35 = vsel %vm3098_vm9, %v21472_v25, %v21462_v5 }
 0xa09   :  { %18847 = vmatpush1.bf16.msra.mxu1 %v18846_v44  ;;  %13677 = vmatprep.mubr.f32.mxu1 %v26707_v10  ;;  %v18868_v44 = vpack.c.bf16 %v21453_v38, %v21452_v4 }
 0xa0a   :  { %18849 = vmatprep.subr.bf16.mxu1 %v18848_v27  ;;  %v13866_v27 = vsel %vm2731_vm8, %v21433_v50, %v21452_v4  ;;  %v21473_v50 = vunpack.i.h.bf16 %v21471_v39 }
 0xa0b   :  { %v18870_v37 = vpack.c.bf16 %v13871_v32, %v13866_v27 }
 0xa0c   :  { %18178 = vmatmul.mubr.msk.f32.gmra.mrb[42].mxu1 %vm3691_vm11, %v26855_v16 }
 0xa0d   :  { %18851 = vmatpush1.bf16.msra.mxu1 %v18850_v7  ;;  %13683 = vmatprep.mubr.f32.mxu1 %v26707_v10 }
 0xa0e   :  { %18853 = vmatprep.subr.bf16.mxu1 %v18852_v55 }
 0xa10   :  { %18179 = vmatmul.mubr.msk.f32.gmra.mrb[44].mxu1 %vm3691_vm11, %v26866_v54 }
 0xa11   :  { %13689 = vmatprep.mubr.f32.mxu1 %v26707_v10 }
 0xa14   :  { %18180 = vmatmul.mubr.msk.f32.gmra.mrb[46].mxu1 %vm3691_vm11, %v26876_v63 }
 0xa15   :  { %13760 = vmatprep.mubr.f32.mxu1 %v26707_v10 }
 0xa18   :  { %18181 = vmatmul.mubr.msk.f32.vlgmr.msra.gmra.mrb[48].mxu1 %vm3691_vm11, %v26841_v58  ;;  %v21446_v58 = vpop.permute.xlu1 %21445 }
 0xa19   :  { %18855 = vmatpush1.bf16.msra.mxu1 %v18854_v40  ;;  %13766 = vmatprep.mubr.f32.mxu1 %v26707_v10  ;;  %v21448_v52 = vunpack.i.h.bf16 %v21446_v58  ;;  %v21447_v18 = vunpack.i.l.bf16 %v21446_v58 }
 0xa1a   :  { %18857 = vmatprep.subr.bf16.mxu1 %v18856_v42 }
 0xa1c   :  { %18182 = vmatmul.mubr.msk.f32.gmra.mrb[50].mxu1 %vm3691_vm11, %v26855_v16  ;;  %v13869_v16 = vsel %vm2731_vm8, %v21408_v59, %v21437_v56  ;;  %v21456_v46 = vpop.permute.xlu1 %21455  ;;  %v21481_v56 = vpop.permute.xlu0 %21480 }
 0xa1d   :  { %18859 = vmatpush1.bf16.msra.mxu1 %v18858_v22  ;;  %13772 = vmatprep.mubr.f32.mxu1 %v26707_v10  ;;  %v18862_v45 = vpack.c.bf16 %v13869_v16, %v13864_v20  ;;  %v21458_v7 = vunpack.i.h.bf16 %v21456_v46  ;;  %v21457_v12 = vunpack.i.l.bf16 %v21456_v46  ;;  %v21483_v21 = vunpack.i.h.bf16 %v21481_v56 }
 0xa1e   :  { %18861 = vmatprep.subr.bf16.mxu1 %v18860_v30  ;;  %v21482_v51 = vunpack.i.l.bf16 %v21481_v56 }
 0xa1f   :  { %v13876_v14 = vsel %vm2731_vm8, %v21443_v24, %v21457_v12  ;;  %v18872_v47 = vpack.c.bf16 %v21458_v7, %v21457_v12 }
 0xa20   :  { %18183 = vmatmul.mubr.msk.f32.gmra.mrb[52].mxu1 %vm3691_vm11, %v26866_v54  ;;  %v13880_v54 = vsel %vm2731_vm8, %v21447_v18, %v21448_v52  ;;  %v26980_v11 = vpop.permute.xlu1 %21465  ;;  %v27027_v42 = vpop.permute.xlu0 %21490  ;;  %v14278_v43 = vsel %vm3098_vm9, %v21482_v51, %v21483_v21 }
 0xa21   :  { %13778 = vmatprep.mubr.f32.mxu1 %v26707_v10  ;;  %v18864_v59 = vpack.c.bf16 %v13880_v54, %v13875_v19  ;;  %v21468_v62 = vunpack.i.h.bf16 %v26980_v11  ;;  %v21467_v55 = vunpack.i.l.bf16 %v26980_v11 }
 0xa23   :  { %v14268_v6 = vsel %vm3098_vm9, %v21467_v55, %v21468_v62  ;;  %v14267_v1 = vsel %vm3098_vm9, %v21473_v50, %v21467_v55  ;;  %v18202_v55 = vld [vmem:[%s28077_s8 + $0x108] sm:$0xff] }
 0xa24   :  { %18184 = vmatmul.mubr.msk.f32.gmra.mrb[54].mxu1 %vm3691_vm11, %v26876_v63  ;;  %v13879_v63 = vsel %vm2731_vm8, %v21423_v49, %v21447_v18  ;;  %v27001_v61 = vpop.permute.xlu1 %21475  ;;  %v13881_v49 = vsel %vm2731_vm8, %v21448_v52, %v21458_v7  ;;  %v18876_v15 = vpack.c.bf16 %v14268_v6, %v14263_v13  ;;  %v21493_v52 = vunpack.i.h.bf16 %v27027_v42  ;;  %v21501_v4 = vpop.permute.xlu0 %21500 }
 0xa25   :  { %13982 = vmatprep.mubr.f32.mxu1 %v26707_v10  ;;  %v18866_v57 = vpack.c.bf16 %v13879_v63, %v13874_v34  ;;  %v18874_v33 = vpack.c.bf16 %v13881_v49, %v13876_v14  ;;  %v21478_v3 = vunpack.i.h.bf16 %v27001_v61  ;;  %v21477_v8 = vunpack.i.l.bf16 %v27001_v61  ;;  %v18204_v61 = vld [vmem:[%s28077_s8 + $0x118] sm:$0xff] }
 0xa26   :  { %v21492_v18 = vunpack.i.l.bf16 %v27027_v42  ;;  %v18878_v24 = vpack.c.bf16 %v14267_v1, %v14262_v35  ;;  %v21503_v34 = vunpack.i.h.bf16 %v21501_v4  ;;  %v21502_v46 = vunpack.i.l.bf16 %v21501_v4 }
 0xa27   :  { %v14273_v58 = vsel %vm3098_vm9, %v21477_v8, %v21478_v3 }
 0xa28   :  { %18189 = vmatmul.mubr.msk.f32.vlgmr.msra.gmra.mrb[32].mxu1 %vm3691_vm11, %v26953_v2  ;;  %v21486_v17 = vpop.permute.xlu1 %21485  ;;  %v18880_v54 = vpack.c.bf16 %v14278_v43, %v14273_v58  ;;  %v14265_v19 = vsel %vm3098_vm9, %v21492_v18, %v21493_v52  ;;  %v14264_v27 = vsel %vm3098_vm9, %v21463_v53, %v21492_v18  ;;  %v14275_v11 = vsel %vm3098_vm9, %v21502_v46, %v21503_v34 }
 0xa29   :  { %18863 = vmatpush1.bf16.msra.mxu1 %v18862_v45  ;;  %13988 = vmatprep.mubr.f32.mxu1 %v26707_v10  ;;  %v21488_v41 = vunpack.i.h.bf16 %v21486_v17  ;;  %v21487_v22 = vunpack.i.l.bf16 %v21486_v17  ;;  %v14274_v29 = vsel %vm3098_vm9, %v21478_v3, %v21502_v46  ;;  %v27114_v3 = vpack.i.bf16 %v26707_v10, %v26707_v10 }
 0xa2a   :  { %18865 = vmatprep.subr.bf16.mxu1 %v18864_v59 }
 0xa2b   :  { %v14277_v16 = vsel %vm3098_vm9, %v21488_v41, %v21482_v51  ;;  %v14272_v28 = vsel %vm3098_vm9, %v21487_v22, %v21477_v8  ;;  %21520 = vrot.lane.b32.xlu0 %v27114_v3, %s22031_s23  ;;  %21525 = vrot.lane.b32.xlu1 %v27114_v3, %s22031_s23 }
 0xa2c   :  { %18190 = vmatmul.mubr.msk.f32.gmra.mrb[34].mxu1 %vm3691_vm11, %v26967_v48  ;;  %v27024_v40 = vpop.permute.xlu1 %21495  ;;  %v18882_v45 = vpack.c.bf16 %v14277_v16, %v14272_v28 }
 0xa2d   :  { %18867 = vmatpush1.bf16.msra.mxu1 %v18866_v57  ;;  %13994 = vmatprep.mubr.f32.mxu1 %v26707_v10  ;;  %v21498_v26 = vunpack.i.h.bf16 %v27024_v40  ;;  %v21497_v30 = vunpack.i.l.bf16 %v27024_v40  ;;  %v21511_v57 = vpop.permute.xlu0 %21510 }
 0xa2e   :  { %18869 = vmatprep.subr.bf16.mxu1 %v18868_v44  ;;  %v18201_v44 = vld [vmem:[%s28077_s8 + $0x100] sm:$0xff]  ;;  %v21513_v7 = vunpack.i.h.bf16 %v21511_v57  ;;  %v21512_v12 = vunpack.i.l.bf16 %v21511_v57 }
 0xa2f   :  { %v14270_v20 = vsel %vm3098_vm9, %v21497_v30, %v21498_v26 }
 0xa30   :  { %18191 = vmatmul.mubr.msk.f32.gmra.mrb[36].mxu1 %vm3691_vm11, %v26978_v23  ;;  %v18884_v38 = vpack.c.bf16 %v14270_v20, %v14265_v19  ;;  %v18892_v5 = vpack.c.bf16 %v21513_v7, %v21512_v12  ;;  %v14266_v14 = vsel %vm3098_vm9, %v21493_v52, %v21512_v12  ;;  %v14271_v49 = vsel %vm3098_vm9, %v21498_v26, %v21513_v7 }
 0xa31   :  { %14000 = vmatprep.mubr.f32.mxu1 %v26707_v10  ;;  %v27120_v8 = vpop.permute.xlu0 %10968 }
 0xa34   :  { %18192 = vmatmul.mubr.msk.f32.gmra.mrb[38].mxu1 %vm3691_vm11, %v26988_v60 }
 0xa35   :  { %14071 = vmatprep.mubr.f32.mxu1 %v26707_v10  ;;  %v27134_v52 = vpop.permute.xlu0 %10978 }
 0xa38   :  { %18193 = vmatmul.mubr.msk.f32.vlgmr.msra.gmra.mrb[40].mxu1 %vm3691_vm11, %v26953_v2 }
 0xa39   :  { %18871 = vmatpush1.bf16.msra.mxu1 %v18870_v37  ;;  %14077 = vmatprep.mubr.f32.mxu1 %v26707_v10  ;;  %v18203_v37 = vld [vmem:[%s28077_s8 + $0x110] sm:$0xff] }
 0xa3a   :  { %18873 = vmatprep.subr.bf16.mxu1 %v18872_v47 }
 0xa3c   :  { %18194 = vmatmul.mubr.msk.f32.gmra.mrb[42].mxu1 %vm3691_vm11, %v26967_v48 }
 0xa3d   :  { %18875 = vmatpush1.bf16.msra.mxu1 %v18874_v33  ;;  %14083 = vmatprep.mubr.f32.mxu1 %v26707_v10  ;;  %v18894_v33 = vpack.c.bf16 %v14271_v49, %v14266_v14 }
 0xa3e   :  { %18877 = vmatprep.subr.bf16.mxu1 %v18876_v15 }
 0xa40   :  { %18195 = vmatmul.mubr.msk.f32.gmra.mrb[44].mxu1 %vm3691_vm11, %v26978_v23 }
 0xa41   :  { %14089 = vmatprep.mubr.f32.mxu1 %v26707_v10 }
 0xa44   :  { %18196 = vmatmul.mubr.msk.f32.gmra.mrb[46].mxu1 %vm3691_vm11, %v26988_v60 }
 0xa45   :  { %14160 = vmatprep.mubr.f32.mxu1 %v26707_v10 }
 0xa48   :  { %18197 = vmatmul.mubr.msk.f32.vlgmr.msra.gmra.mrb[48].mxu1 %vm3691_vm11, %v26953_v2  ;;  %v21506_v2 = vpop.permute.xlu1 %21505 }
 0xa49   :  { %18879 = vmatpush1.bf16.msra.mxu1 %v18878_v24  ;;  %14166 = vmatprep.mubr.f32.mxu1 %v26707_v10  ;;  %v21508_v63 = vunpack.i.h.bf16 %v21506_v2  ;;  %v21507_v59 = vunpack.i.l.bf16 %v21506_v2 }
 0xa4a   :  { %18881 = vmatprep.subr.bf16.mxu1 %v18880_v54 }
 0xa4c   :  { %18198 = vmatmul.mubr.msk.f32.gmra.mrb[50].mxu1 %vm3691_vm11, %v26967_v48  ;;  %v14269_v48 = vsel %vm3098_vm9, %v21468_v62, %v21497_v30  ;;  %v21516_v39 = vpop.permute.xlu1 %21515 }
 0xa4d   :  { %18883 = vmatpush1.bf16.msra.mxu1 %v18882_v45  ;;  %14172 = vmatprep.mubr.f32.mxu1 %v26707_v10  ;;  %v18886_v32 = vpack.c.bf16 %v14269_v48, %v14264_v27  ;;  %v21518_v47 = vunpack.i.h.bf16 %v21516_v39  ;;  %v21517_v6 = vunpack.i.l.bf16 %v21516_v39 }
 0xa4e   :  { %18885 = vmatprep.subr.bf16.mxu1 %v18884_v38 }
 0xa4f   :  { %v14276_v13 = vsel %vm3098_vm9, %v21503_v34, %v21517_v6  ;;  %v14281_v17 = vsel %vm3098_vm9, %v21508_v63, %v21518_v47  ;;  %v18896_v15 = vpack.c.bf16 %v21518_v47, %v21517_v6 }
 0xa50   :  { %18199 = vmatmul.mubr.msk.f32.gmra.mrb[52].mxu1 %vm3691_vm11, %v26978_v23  ;;  %v14280_v23 = vsel %vm3098_vm9, %v21507_v59, %v21508_v63  ;;  %v18898_v56 = vpack.c.bf16 %v14281_v17, %v14276_v13  ;;  %v27124_v1 = vpop.permute.xlu1 %10973 }
 0xa51   :  { %14178 = vmatprep.mubr.f32.mxu1 %v26707_v10  ;;  %v18888_v62 = vpack.c.bf16 %v14280_v23, %v14275_v11 }
 0xa54   :  { %18200 = vmatmul.mubr.msk.f32.gmra.mrb[54].mxu1 %vm3691_vm11, %v26988_v60  ;;  %v14279_v60 = vsel %vm3098_vm9, %v21483_v21, %v21507_v59  ;;  %v27156_v4 = vpop.permute.xlu1 %10983 }
 0xa55   :  { %14382 = vmatprep.mubr.f32.mxu1 %v26707_v10  ;;  %v18890_v53 = vpack.c.bf16 %v14279_v60, %v14274_v29 }
 0xa58   :  { %18205 = vmatmul.mubr.msk.f32.vlgmr.msra.gmra.mrb[32].mxu1 %vm3691_vm11, %v18201_v44 }
 0xa59   :  { %18887 = vmatpush1.bf16.msra.mxu1 %v18886_v32  ;;  %14388 = vmatprep.mubr.f32.mxu1 %v26707_v10 }
 0xa5a   :  { %18889 = vmatprep.subr.bf16.mxu1 %v18888_v62 }
 0xa5c   :  { %18206 = vmatmul.mubr.msk.f32.gmra.mrb[34].mxu1 %vm3691_vm11, %v18202_v55 }
 0xa5d   :  { %18891 = vmatpush1.bf16.msra.mxu1 %v18890_v53  ;;  %14394 = vmatprep.mubr.f32.mxu1 %v26707_v10 }
 0xa5e   :  { %18893 = vmatprep.subr.bf16.mxu1 %v18892_v5 }
 0xa60   :  { %18207 = vmatmul.mubr.msk.f32.gmra.mrb[36].mxu1 %vm3691_vm11, %v18203_v37 }
 0xa61   :  { %14400 = vmatprep.mubr.f32.mxu1 %v26707_v10 }
 0xa64   :  { %18208 = vmatmul.mubr.msk.f32.gmra.mrb[38].mxu1 %vm3691_vm11, %v18204_v61 }
 0xa65   :  { %14471 = vmatprep.mubr.f32.mxu1 %v26707_v10 }
 0xa68   :  { %18209 = vmatmul.mubr.msk.f32.vlgmr.msra.gmra.mrb[40].mxu1 %vm3691_vm11, %v18201_v44 }
 0xa69   :  { %18895 = vmatpush1.bf16.msra.mxu1 %v18894_v33  ;;  %14477 = vmatprep.mubr.f32.mxu1 %v26707_v10 }
 0xa6a   :  { %18897 = vmatprep.subr.bf16.mxu1 %v18896_v15 }
 0xa6c   :  { %18210 = vmatmul.mubr.msk.f32.gmra.mrb[42].mxu1 %vm3691_vm11, %v18202_v55 }
 0xa6d   :  { %18899 = vmatpush1.bf16.msra.mxu1 %v18898_v56  ;;  %14483 = vmatprep.mubr.f32.mxu1 %v26707_v10 }
 0xa70   :  { %18211 = vmatmul.mubr.msk.f32.gmra.mrb[44].mxu1 %vm3691_vm11, %v18203_v37 }
 0xa71   :  { %14489 = vmatprep.mubr.f32.mxu1 %v26707_v10 }
 0xa74   :  { %18212 = vmatmul.mubr.msk.f32.gmra.mrb[46].mxu1 %vm3691_vm11, %v18204_v61 }
 0xa75   :  { %14560 = vmatprep.mubr.f32.mxu1 %v26707_v10 }
 0xa78   :  { %18213 = vmatmul.mubr.msk.f32.vlgmr.msra.gmra.mrb[48].mxu1 %vm3691_vm11, %v18201_v44 }
 0xa79   :  { %14566 = vmatprep.mubr.f32.mxu1 %v26707_v10 }
 0xa7c   :  { %18214 = vmatmul.mubr.msk.f32.gmra.mrb[50].mxu1 %vm3691_vm11, %v18202_v55 }
 0xa7d   :  { %14572 = vmatprep.mubr.f32.mxu1 %v26707_v10 }
 0xa80   :  { %18215 = vmatmul.mubr.msk.f32.gmra.mrb[52].mxu1 %vm3691_vm11, %v18203_v37 }
 0xa81   :  { %14578 = vmatprep.mubr.f32.mxu1 %v26707_v10 }
 0xa84   :  { %18216 = vmatmul.mubr.msk.f32.gmra.mrb[54].mxu1 %vm3691_vm11, %v18204_v61 }
 0xb2b   :  { %v14384_v50 = vpop.f32.mrb[32].mxu1 }
 0xb2c   :  { %v19198_v25 = vadd.f32 %v14384_v50, %v27120_v8  ;;  %v14386_v40 = vpop.f32.mrb[33].mxu1 }
 0xb2d   :  { %v19199_v21 = vadd.f32 %v14386_v40, %v27120_v8 }
 0xb2e   :  { %v14609_v51 = vmax.f32 %v19198_v25, 0.0 }
 0xb2f   :  { %v14610_v42 = vmax.f32 %v19199_v21, 0.0  ;;  %v14390_v10 = vpop.f32.mrb[34].mxu1 }
 0xb30   :  { %v27127_v41 = vmul.f32 %v14609_v51, %v23033_v0  ;;  %v19200_v22 = vadd.f32 %v14390_v10, %v27124_v1  ;;  %v14392_v26 = vpop.f32.mrb[35].mxu1 }
 0xb31   :  { %v27131_v30 = vmul.f32 %v14610_v42, %v23037_v9  ;;  %v19201_v58 = vadd.f32 %v14392_v26, %v27124_v1 }
 0xb32   :  { %v14615_v35 = vmax.f32 %v19200_v22, 0.0 }
 0xb33   :  { %v14616_v18 = vmax.f32 %v19201_v58, 0.0  ;;  %v14396_v24 = vpop.f32.mrb[36].mxu1  ;;  %v27138_v43 = vpack.i.bf16 %v27131_v30, %v27127_v41 }
 0xb34   :  { %v27141_v16 = vmul.f32 %v14615_v35, %v23033_v0  ;;  %v19202_v28 = vadd.f32 %v14396_v24, %v27134_v52  ;;  %v14398_v54 = vpop.f32.mrb[37].mxu1 }
 0xb35   :  { %v27145_v20 = vmul.f32 %v14616_v18, %v23037_v9  ;;  %v19203_v45 = vadd.f32 %v14398_v54, %v27134_v52  ;;  %21530 = vrot.lane.b32.xlu0 %v27138_v43, %s22031_s23 }
 0xb36   :  { %v14621_v19 = vmax.f32 %v19202_v28, 0.0  ;;  %v27152_v38 = vpack.i.bf16 %v27141_v16, %v27127_v41  ;;  %v18998_v2 = vpack.c.bf16 %v27141_v16, %v27127_v41 }
 0xb37   :  { %v14622_v63 = vmax.f32 %v19203_v45, 0.0  ;;  %v14402_v59 = vpop.f32.mrb[38].mxu1  ;;  %v27160_v34 = vpack.i.bf16 %v27145_v20, %v27141_v16  ;;  %v18996_v46 = vpack.c.bf16 %v27145_v20, %v27131_v30 }
 0xb38   :  { %v27165_v48 = vmul.f32 %v14621_v19, %v23033_v0  ;;  %v19204_v57 = vadd.f32 %v14402_v59, %v27156_v4  ;;  %v14404_v44 = vpop.f32.mrb[39].mxu1 }
 0xb39   :  { %v27169_v23 = vmul.f32 %v14622_v63, %v23037_v9  ;;  %v19205_v27 = vadd.f32 %v14404_v44, %v27156_v4  ;;  %21535 = vrot.lane.b32.xlu1 %v27160_v34, %s22031_s23 }
 0xb3a   :  { %v14627_v32 = vmax.f32 %v19204_v57, 0.0 }
 0xb3b   :  { %v14628_v11 = vmax.f32 %v19205_v27, 0.0  ;;  %v14473_v7 = vpop.f32.mrb[40].mxu1  ;;  %v27176_v12 = vpack.i.bf16 %v27169_v23, %v27165_v48 }
 0xb3c   :  { %v27179_v60 = vmul.f32 %v14627_v32, %v23033_v0  ;;  %v19206_v62 = vadd.f32 %v14473_v7, %v27120_v8  ;;  %v14475_v55 = vpop.f32.mrb[41].mxu1 }
 0xb3d   :  { %v27183_v29 = vmul.f32 %v14628_v11, %v23037_v9  ;;  %v19207_v53 = vadd.f32 %v14475_v55, %v27120_v8  ;;  %21540 = vrot.lane.b32.xlu1 %v27176_v12, %s22031_s23 }
 0xb3e   :  { %v14611_v5 = vmax.f32 %v19206_v62, 0.0  ;;  %v27190_v37 = vpack.i.bf16 %v27179_v60, %v27165_v48 }
 0xb3f   :  { %v14612_v39 = vmax.f32 %v19207_v53, 0.0  ;;  %v14479_v61 = vpop.f32.mrb[42].mxu1  ;;  %v27196_v14 = vpack.i.bf16 %v27183_v29, %v27179_v60 }
 0xb40   :  { %v27201_v49 = vmul.f32 %v14611_v5, %v23054_v31  ;;  %v19208_v47 = vadd.f32 %v14479_v61, %v27124_v1  ;;  %v14481_v6 = vpop.f32.mrb[43].mxu1 }
 0xb41   :  { %v27205_v33 = vmul.f32 %v14612_v39, %v23062_v36  ;;  %v19209_v13 = vadd.f32 %v14481_v6, %v27124_v1  ;;  %21545 = vrot.lane.b32.xlu0 %v27196_v14, %s22031_s23 }
 0xb42   :  { %v14617_v17 = vmax.f32 %v19208_v47, 0.0  ;;  %v27212_v15 = vpack.i.bf16 %v27201_v49, %v27131_v30  ;;  %v28146_v30 = vpack.c.bf16 %v27179_v60, %v27165_v48 }
 0xb43   :  { %v14618_v56 = vmax.f32 %v19209_v13, 0.0  ;;  %v14485_v50 = vpop.f32.mrb[44].mxu1  ;;  %v27216_v25 = vpack.i.bf16 %v27205_v33, %v27201_v49 }
 0xb44   :  { %v27219_v40 = vmul.f32 %v14617_v17, %v23054_v31  ;;  %v19210_v21 = vadd.f32 %v14485_v50, %v27134_v52  ;;  %v14487_v51 = vpop.f32.mrb[45].mxu1 }
 0xb45   :  { %v27223_v42 = vmul.f32 %v14618_v56, %v23062_v36  ;;  %v19211_v10 = vadd.f32 %v14487_v51, %v27134_v52  ;;  %21550 = vrot.lane.b32.xlu0 %v27216_v25, %s22031_s23 }
 0xb46   :  { %v14623_v22 = vmax.f32 %v19210_v21, 0.0  ;;  %v27230_v26 = vpack.i.bf16 %v27219_v40, %v27145_v20  ;;  %v28144_v21 = vld [vmem:[#allocation5_spill] sm:$0xff] }
 0xb47   :  { %v14624_v35 = vmax.f32 %v19211_v10, 0.0  ;;  %v14491_v18 = vpop.f32.mrb[46].mxu1  ;;  %v27236_v24 = vpack.i.bf16 %v27223_v42, %v27219_v40  ;;  %v18232_v20 = vld [vmem:[%s28079_s10 + $0x8] sm:$0x3]  ;;  %v28147_v41 = vpack.c.bf16 %v27223_v42, %v27205_v33 }
 0xb48   :  { %v27241_v54 = vmul.f32 %v14623_v22, %v23054_v31  ;;  %v19212_v45 = vadd.f32 %v14491_v18, %v27156_v4  ;;  %v14493_v19 = vpop.f32.mrb[47].mxu1 }
 0xb49   :  { %v27245_v63 = vmul.f32 %v14624_v35, %v23062_v36  ;;  %v19213_v59 = vadd.f32 %v14493_v19, %v27156_v4  ;;  %21555 = vrot.lane.b32.xlu1 %v27236_v24, %s22031_s23 }
 0xb4a   :  { %v14629_v57 = vmax.f32 %v19212_v45, 0.0  ;;  %v27252_v44 = vpack.i.bf16 %v27241_v54, %v27169_v23 }
 0xb4b   :  { %v14630_v27 = vmax.f32 %v19213_v59, 0.0  ;;  %v14562_v32 = vpop.f32.mrb[48].mxu1  ;;  %v27256_v11 = vpack.i.bf16 %v27245_v63, %v27241_v54 }
 0xb4c   :  { %v27259_v7 = vmul.f32 %v14629_v57, %v23054_v31  ;;  %v19214_v62 = vadd.f32 %v14562_v32, %v27120_v8  ;;  %v14564_v55 = vpop.f32.mrb[49].mxu1 }
 0xb4d   :  { %v27263_v53 = vmul.f32 %v14630_v27, %v23062_v36  ;;  %v19215_v5 = vadd.f32 %v14564_v55, %v27120_v8  ;;  %21560 = vrot.lane.b32.xlu0 %v27256_v11, %s22031_s23  ;;  %v28143_v8 = vld [vmem:[#allocation6_spill] sm:$0xff] }
 0xb4e   :  { %v14613_v39 = vmax.f32 %v19214_v62, 0.0  ;;  %v27270_v61 = vpack.i.bf16 %v27259_v7, %v27183_v29 }
 0xb4f   :  { %v14614_v47 = vmax.f32 %v19215_v5, 0.0  ;;  %v14568_v6 = vpop.f32.mrb[50].mxu1  ;;  %v27276_v13 = vpack.i.bf16 %v27263_v53, %v27259_v7  ;;  %v28149_v48 = vpack.c.bf16 %v27263_v53, %v27245_v63 }
 0xb50   :  { %v27281_v17 = vmul.f32 %v14613_v39, %v28143_v8  ;;  %v19216_v56 = vadd.f32 %v14568_v6, %v27124_v1  ;;  %v14570_v50 = vpop.f32.mrb[51].mxu1 }
 0xb51   :  { %v14638_v51 = vmul.f32 %v14614_v47, %v28144_v21  ;;  %v19217_v10 = vadd.f32 %v14570_v50, %v27124_v1  ;;  %21565 = vrot.lane.b32.xlu1 %v27276_v13, %s22031_s23 }
 0xb52   :  { %v14619_v22 = vmax.f32 %v19216_v56, 0.0  ;;  %v27290_v35 = vpack.i.bf16 %v27281_v17, %v27205_v33 }
 0xb53   :  { %14662 = vst.msk [vmem:[#allocation3 + $0x30] sm:$0xff] %vm3503_vm10, %v14638_v51  ;;  %v14620_v18 = vmax.f32 %v19217_v10, 0.0  ;;  %v14574_v45 = vpop.f32.mrb[52].mxu1 }
 0xb54   :  { %v27294_v19 = vmul.f32 %v14619_v22, %v28143_v8  ;;  %v19218_v59 = vadd.f32 %v14574_v45, %v27134_v52  ;;  %v14576_v57 = vpop.f32.mrb[53].mxu1 }
 0xb55   :  { %v14644_v1 = vmul.f32 %v14620_v18, %v28144_v21  ;;  %v19219_v27 = vadd.f32 %v14576_v57, %v27134_v52  ;;  %21580 = vrot.lane.b32.xlu1 %v27160_v34, %s22032_s26 }
 0xb56   :  { %v14625_v32 = vmax.f32 %v19218_v59, 0.0  ;;  %v21569_v62 = vpack.i.bf16 %v27294_v19, %v27281_v17  ;;  %v27305_v55 = vpack.i.bf16 %v27294_v19, %v27223_v42  ;;  %v28150_v42 = vpack.c.bf16 %v27259_v7, %v27241_v54 }
 0xb57   :  { %14668 = vst.msk [vmem:[#allocation3 + $0x68] sm:$0xff] %vm3503_vm10, %v14644_v1  ;;  %v14626_v39 = vmax.f32 %v19219_v27, 0.0  ;;  %v14580_v47 = vpop.f32.mrb[54].mxu1 }
 0xb58   :  { %v27311_v52 = vmul.f32 %v14625_v32, %v28143_v8  ;;  %v19220_v6 = vadd.f32 %v14580_v47, %v27156_v4  ;;  %v14582_v56 = vpop.f32.mrb[55].mxu1  ;;  %21570 = vrot.lane.b32.xlu0 %v21569_v62, %s22031_s23 }
 0xb59   :  { %v14650_v50 = vmul.f32 %v14626_v39, %v28144_v21  ;;  %v19221_v51 = vadd.f32 %v14582_v56, %v27156_v4 }
 0xb5a   :  { %v14631_v10 = vmax.f32 %v19220_v6, 0.0  ;;  %v27319_v22 = vpack.i.bf16 %v27311_v52, %v27245_v63  ;;  %v27330_v4 = vld [vmem:[#allocation3 + $0x30] sm:$0xff] }
 0xb5b   :  { %14674 = vst.msk [vmem:[#allocation3 + $0xa0] sm:$0xff] %vm3503_vm10, %v14650_v50  ;;  %v14632_v18 = vmax.f32 %v19221_v51, 0.0 }
 0xb5c   :  { %v27323_v45 = vmul.f32 %v14631_v10, %v28143_v8  ;;  %21575 = vrot.lane.b32.xlu0 %v27138_v43, %s22032_s26 }
 0xb5d   :  { %v14656_v59 = vmul.f32 %v14632_v18, %v28144_v21 }
 0xb5e   :  { %v21589_v57 = vpack.i.bf16 %v27323_v45, %v27311_v52  ;;  %v27332_v1 = vld [vmem:[#allocation3 + $0x68] sm:$0xff]  ;;  %v27336_v27 = vpack.i.bf16 %v27323_v45, %v27263_v53 }
 0xb5f   :  { %14680 = vst.msk [vmem:[#allocation3 + $0xd8] sm:$0xff] %vm3503_vm10, %v14656_v59  ;;  %v27343_v32 = vpack.i.bf16 %v27332_v1, %v27330_v4 }
 0xb60   :  { %21585 = vrot.lane.b32.xlu0 %v27114_v3, %s22032_s26  ;;  %21590 = vrot.lane.b32.xlu1 %v21589_v57, %s22031_s23 }
 0xb62   :  { %v27354_v39 = vld [vmem:[#allocation3 + $0xa0] sm:$0xff] }
 0xb64   :  { %21600 = vrot.lane.b32.xlu0 %v27196_v14, %s22032_s26  ;;  %21595 = vrot.lane.b32.xlu1 %v27176_v12, %s22032_s26 }
 0xb66   :  { %v27356_v47 = vld [vmem:[#allocation3 + $0xd8] sm:$0xff] }
 0xb67   :  { %v27360_v6 = vpack.i.bf16 %v27356_v47, %v27354_v39 }
 0xb68   :  { %21610 = vrot.lane.b32.xlu0 %v27216_v25, %s22032_s26  ;;  %21605 = vrot.lane.b32.xlu1 %v27114_v3, %s22032_s26 }
 0xb6c   :  { %21620 = vrot.lane.b32.xlu0 %v27256_v11, %s22032_s26  ;;  %21615 = vrot.lane.b32.xlu1 %v27236_v24, %s22032_s26 }
 0xb70   :  { %21630 = vrot.lane.b32.xlu0 %v21569_v62, %s22032_s26  ;;  %21625 = vrot.lane.b32.xlu1 %v27276_v13, %s22032_s26 }
 0xb74   :  { %21635 = vrot.lane.b32.xlu0 %v27138_v43, %s22033_s27  ;;  %21640 = vrot.lane.b32.xlu1 %v27160_v34, %s22033_s27 }
 0xb78   :  { %21645 = vrot.lane.b32.xlu0 %v27114_v3, %s22033_s27  ;;  %21650 = vrot.lane.b32.xlu1 %v21589_v57, %s22032_s26 }
 0xb7c   :  { %21660 = vrot.lane.b32.xlu0 %v27196_v14, %s22033_s27  ;;  %21655 = vrot.lane.b32.xlu1 %v27176_v12, %s22033_s27 }
 0xb80   :  { %21670 = vrot.lane.b32.xlu0 %v27216_v25, %s22033_s27  ;;  %21665 = vrot.lane.b32.xlu1 %v27114_v3, %s22033_s27 }
 0xb84   :  { %21680 = vrot.lane.b32.xlu0 %v27256_v11, %s22033_s27  ;;  %21675 = vrot.lane.b32.xlu1 %v27236_v24, %s22033_s27 }
 0xb88   :  { %21690 = vrot.lane.b32.xlu0 %v21569_v62, %s22033_s27  ;;  %21685 = vrot.lane.b32.xlu1 %v27276_v13, %s22033_s27 }
 0xb8c   :  { %21695 = vrot.lane.b32.xlu0 %v27138_v43, %s22034_s30  ;;  %21700 = vrot.lane.b32.xlu1 %v27160_v34, %s22034_s30  ;;  %v21749_v43 = vpack.i.bf16 %v27330_v4, %v27281_v17  ;;  %v21521_v34 = vpop.permute.xlu0 %21520 }
 0xb90   :  { %21705 = vrot.lane.b32.xlu0 %v27114_v3, %s22034_s30  ;;  %21710 = vrot.lane.b32.xlu1 %v21589_v57, %s22033_s27 }
 0xb94   :  { %21720 = vrot.lane.b32.xlu0 %v27196_v14, %s22034_s30  ;;  %21715 = vrot.lane.b32.xlu1 %v27176_v12, %s22034_s30  ;;  %v21759_v12 = vpack.i.bf16 %v27354_v39, %v27311_v52  ;;  %v21526_v14 = vpop.permute.xlu1 %21525 }
 0xb98   :  { %21730 = vrot.lane.b32.xlu0 %v27216_v25, %s22034_s30  ;;  %21725 = vrot.lane.b32.xlu1 %v27114_v3, %s22034_s30  ;;  %v21754_v3 = vpack.i.bf16 %v27332_v1, %v27294_v19  ;;  %v21764_v25 = vpack.i.bf16 %v27356_v47, %v27323_v45 }
 0xb9c   :  { %21740 = vrot.lane.b32.xlu0 %v27256_v11, %s22034_s30  ;;  %21735 = vrot.lane.b32.xlu1 %v27236_v24, %s22034_s30  ;;  %v21523_v11 = vunpack.i.h.bf16 %v21521_v34 }
 0xba0   :  { %21750 = vrot.lane.b32.xlu0 %v21749_v43, %s22034_s30  ;;  %21745 = vrot.lane.b32.xlu1 %v27276_v13, %s22034_s30  ;;  %v21522_v13 = vunpack.i.l.bf16 %v21521_v34 }
 0xba4   :  { %21760 = vrot.lane.b32.xlu0 %v21759_v12, %s22034_s30  ;;  %21755 = vrot.lane.b32.xlu1 %v21754_v3, %s22034_s30 }
 0xba7   :  { %v21531_v24 = vpop.permute.xlu0 %21530 }
 0xba8   :  { %21770 = vrot.lane.b32.xlu0 %v27212_v15, %s22035_s15  ;;  %21765 = vrot.lane.b32.xlu1 %v21764_v25, %s22034_s30  ;;  %v21533_v62 = vunpack.i.h.bf16 %v21531_v24  ;;  %v21532_v50 = vunpack.i.l.bf16 %v21531_v24  ;;  %v21528_v24 = vunpack.i.h.bf16 %v21526_v14 }
 0xbaa   :  { %v14784_v59 = vsel %vm167_vm0, %v21522_v13, %v21532_v50  ;;  %v14785_v43 = vsel %vm167_vm0, %v21532_v50, %v21533_v62 }
 0xbab   :  { %v21536_v51 = vpop.permute.xlu1 %21535 }
 0xbac   :  { %v21538_v10 = vunpack.i.h.bf16 %v21536_v51  ;;  %v21537_v18 = vunpack.i.l.bf16 %v21536_v51  ;;  %21780 = vrot.lane.b32.xlu0 %v27152_v38, %s22035_s15  ;;  %21775 = vrot.lane.b32.xlu1 %v27230_v26, %s22035_s15  ;;  %v21527_v51 = vunpack.i.l.bf16 %v21526_v14 }
 0xbae   :  { %v14789_v57 = vsel %vm167_vm0, %v21523_v11, %v21537_v18  ;;  %v14790_v12 = vsel %vm167_vm0, %v21537_v18, %v21538_v10 }
 0xbaf   :  { %v18902_v34 = vpack.c.bf16 %v14789_v57, %v14784_v59  ;;  %v21541_v3 = vpop.permute.xlu1 %21540  ;;  %v18900_v25 = vpack.c.bf16 %v14790_v12, %v14785_v43 }
 0xbb0   :  { %21790 = vrot.lane.b32.xlu0 %v27270_v61, %s22035_s15  ;;  %21785 = vrot.lane.b32.xlu1 %v27252_v44, %s22035_s15  ;;  %v21543_v8 = vunpack.i.h.bf16 %v21541_v3  ;;  %v21542_v13 = vunpack.i.l.bf16 %v21541_v3 }
 0xbb1   :  { %18901 = vmatprep.subr.bf16.mxu0 %v18900_v25 }
 0xbb2   :  { %18903 = vmatpush1.bf16.msra.mxu0 %v18902_v34  ;;  %v14794_v18 = vsel %vm167_vm0, %v21527_v51, %v21542_v13  ;;  %v14795_v57 = vsel %vm167_vm0, %v21542_v13, %v21543_v8 }
 0xbb3   :  { %v21546_v11 = vpop.permute.xlu0 %21545 }
 0xbb4   :  { %v21548_v56 = vunpack.i.h.bf16 %v21546_v11  ;;  %v21547_v50 = vunpack.i.l.bf16 %v21546_v11  ;;  %21800 = vrot.lane.b32.xlu0 %v27290_v35, %s22035_s15  ;;  %21795 = vrot.lane.b32.xlu1 %v27190_v37, %s22035_s15 }
 0xbb6   :  { %v14799_v59 = vsel %vm167_vm0, %v21528_v24, %v21547_v50  ;;  %v14800_v14 = vsel %vm167_vm0, %v21547_v50, %v21548_v56  ;;  %v27459_v24 = vld [vmem:[%s28079_s10] sm:$0x3] }
 0xbb7   :  { %v18906_v43 = vpack.c.bf16 %v14799_v59, %v14794_v18  ;;  %v21551_v12 = vpop.permute.xlu0 %21550  ;;  %v18904_v34 = vpack.c.bf16 %v14800_v14, %v14795_v57  ;;  %v27471_v14 = vld [vmem:[#allocation2] sm:$0xff] }
 0xbb8   :  { %21810 = vrot.lane.b32.xlu0 %v27319_v22, %s22035_s15  ;;  %21805 = vrot.lane.b32.xlu1 %v27305_v55, %s22035_s15  ;;  %v21553_v3 = vunpack.i.h.bf16 %v21551_v12  ;;  %v21552_v25 = vunpack.i.l.bf16 %v21551_v12 }
 0xbb9   :  { %18905 = vmatprep.subr.bf16.mxu0 %v18904_v34 }
 0xbba   :  { %18907 = vmatpush1.bf16.msra.mxu0 %v18906_v43  ;;  %v14786_v50 = vsel %vm167_vm0, %v21533_v62, %v21552_v25  ;;  %v14787_v59 = vsel %vm167_vm0, %v21552_v25, %v21553_v3 }
 0xbbb   :  { %v21556_v51 = vpop.permute.xlu1 %21555 }
 0xbbc   :  { %v21558_v13 = vunpack.i.h.bf16 %v21556_v51  ;;  %v21557_v11 = vunpack.i.l.bf16 %v21556_v51  ;;  %21820 = vrot.lane.b32.xlu0 %v27343_v32, %s22035_s15  ;;  %21815 = vrot.lane.b32.xlu1 %v27336_v27, %s22035_s15 }
 0xbbd   :  { %18217 = vmatmul.mubr.msk.f32.vlgmr.msra.gmra.mrb[48].mxu0 %vm3691_vm11, %v27459_v24 }
 0xbbe   :  { %v14791_v18 = vsel %vm167_vm0, %v21538_v10, %v21557_v11  ;;  %v14792_v57 = vsel %vm167_vm0, %v21557_v11, %v21558_v13  ;;  %14966 = vmatprep.mubr.f32.mxu0 %v27471_v14 }
 0xbbf   :  { %v18910_v43 = vpack.c.bf16 %v14791_v18, %v14786_v50  ;;  %v21561_v12 = vpop.permute.xlu0 %21560  ;;  %v18908_v34 = vpack.c.bf16 %v14792_v57, %v14787_v59 }
 0xbc0   :  { %21825 = vrot.lane.b32.xlu0 %v27212_v15, %s22036_s0  ;;  %21830 = vrot.lane.b32.xlu1 %v27230_v26, %s22036_s0  ;;  %v21563_v62 = vunpack.i.h.bf16 %v21561_v12  ;;  %v21562_v10 = vunpack.i.l.bf16 %v21561_v12 }
 0xbc1   :  { %18909 = vmatprep.subr.bf16.mxu0 %v18908_v34 }
 0xbc2   :  { %18911 = vmatpush1.bf16.msra.mxu0 %v18910_v43  ;;  %v14796_v50 = vsel %vm167_vm0, %v21543_v8, %v21562_v10  ;;  %v14797_v59 = vsel %vm167_vm0, %v21562_v10, %v21563_v62 }
 0xbc3   :  { %v21566_v25 = vpop.permute.xlu1 %21565 }
 0xbc4   :  { %v21568_v51 = vunpack.i.h.bf16 %v21566_v25  ;;  %v21567_v11 = vunpack.i.l.bf16 %v21566_v25  ;;  %21835 = vrot.lane.b32.xlu0 %v27152_v38, %s22036_s0  ;;  %21840 = vrot.lane.b32.xlu1 %v27360_v6, %s22035_s15 }
 0xbc6   :  { %v14801_v18 = vsel %vm167_vm0, %v21548_v56, %v21567_v11  ;;  %v14802_v57 = vsel %vm167_vm0, %v21567_v11, %v21568_v51 }
 0xbc7   :  { %v18914_v34 = vpack.c.bf16 %v14801_v18, %v14796_v50  ;;  %v18912_v12 = vpack.c.bf16 %v14802_v57, %v14797_v59  ;;  %v27498_v11 = vpop.permute.xlu1 %21580 }
 0xbc8   :  { %21850 = vrot.lane.b32.xlu0 %v27270_v61, %s22036_s0  ;;  %21845 = vrot.lane.b32.xlu1 %v27252_v44, %s22036_s0  ;;  %v21582_v59 = vunpack.i.l.bf16 %v27498_v11 }
 0xbc9   :  { %18913 = vmatprep.subr.bf16.mxu0 %v18912_v12 }
 0xbca   :  { %18915 = vmatpush1.bf16.msra.mxu0 %v18914_v34  ;;  %v21571_v43 = vpop.permute.xlu0 %21570 }
 0xbcb   :  { %v21573_v25 = vunpack.i.h.bf16 %v21571_v43  ;;  %v21572_v5 = vunpack.i.l.bf16 %v21571_v43 }
 0xbcc   :  { %21860 = vrot.lane.b32.xlu0 %v27290_v35, %s22036_s0  ;;  %21855 = vrot.lane.b32.xlu1 %v27190_v37, %s22036_s0 }
 0xbcd   :  { %v14793_v8 = vsel %vm167_vm0, %v21558_v13, %v21573_v25  ;;  %v14788_v56 = vsel %vm167_vm0, %v21553_v3, %v21572_v5  ;;  %v18916_v10 = vpack.c.bf16 %v21573_v25, %v21572_v5  ;;  %18218 = vmatmul.mubr.msk.f32.vlgmr.msra.gmra.mrb[50].mxu0 %vm3691_vm11, %v27459_v24  ;;  %v21583_v5 = vunpack.i.h.bf16 %v27498_v11 }
 0xbce   :  { %v18918_v50 = vpack.c.bf16 %v14793_v8, %v14788_v56  ;;  %v27500_v18 = vpop.permute.xlu0 %21575  ;;  %15037 = vmatprep.mubr.f32.mxu0 %v27471_v14 }
 0xbcf   :  { %18917 = vmatprep.subr.bf16.mxu0 %v18916_v10  ;;  %v21578_v13 = vunpack.i.h.bf16 %v27500_v18  ;;  %v21577_v3 = vunpack.i.l.bf16 %v27500_v18 }
 0xbd0   :  { %18919 = vmatpush1.bf16.msra.mxu0 %v18918_v50  ;;  %21870 = vrot.lane.b32.xlu0 %v27319_v22, %s22036_s0 }
 0xbd1   :  { %21865 = vrot.lane.b32.xlu1 %v27305_v55, %s22036_s0  ;;  %v15101_v11 = vsel %vm536_vm3, %v21577_v3, %v21578_v13 }
 0xbd2   :  { %v21586_v57 = vpop.permute.xlu0 %21585  ;;  %v21591_v34 = vpop.permute.xlu1 %21590 }
 0xbd3   :  { %v21593_v12 = vunpack.i.h.bf16 %v21591_v34  ;;  %v21592_v43 = vunpack.i.l.bf16 %v21591_v34  ;;  %v21588_v25 = vunpack.i.h.bf16 %v21586_v57  ;;  %v21587_v8 = vunpack.i.l.bf16 %v21586_v57 }
 0xbd4   :  { %21880 = vrot.lane.b32.xlu0 %v27343_v32, %s22036_s0  ;;  %v15106_v57 = vsel %vm536_vm3, %v21582_v59, %v21583_v5 }
 0xbd5   :  { %v14803_v56 = vsel %vm167_vm0, %v21568_v51, %v21593_v12  ;;  %v14798_v10 = vsel %vm167_vm0, %v21563_v62, %v21592_v43  ;;  %21875 = vrot.lane.b32.xlu1 %v27336_v27, %s22036_s0  ;;  %v18920_v50 = vpack.c.bf16 %v21593_v12, %v21592_v43  ;;  %v15105_v51 = vsel %vm536_vm3, %v21588_v25, %v21582_v59 }
 0xbd6   :  { %v18922_v21 = vpack.c.bf16 %v14803_v56, %v14798_v10  ;;  %v21601_v31 = vpop.permute.xlu0 %21600  ;;  %v21596_v34 = vpop.permute.xlu1 %21595  ;;  %v15100_v62 = vsel %vm536_vm3, %v21587_v8, %v21577_v3  ;;  %v18924_v9 = vpack.c.bf16 %v15106_v57, %v15101_v11 }
 0xbd7   :  { %v21603_v36 = vunpack.i.h.bf16 %v21601_v31  ;;  %v21602_v58 = vunpack.i.l.bf16 %v21601_v31  ;;  %v21598_v28 = vunpack.i.h.bf16 %v21596_v34  ;;  %v21597_v0 = vunpack.i.l.bf16 %v21596_v34  ;;  %18921 = vmatprep.subr.bf16.mxu0 %v18920_v50 }
 0xbd8   :  { %21885 = vrot.lane.b32.xlu0 %v27212_v15, %s22037_s18  ;;  %18923 = vmatpush1.bf16.msra.mxu0 %v18922_v21  ;;  %v18926_v59 = vpack.c.bf16 %v15105_v51, %v15100_v62 }
 0xbd9   :  { %21890 = vrot.lane.b32.xlu1 %v27230_v26, %s22037_s18  ;;  %v15111_v12 = vsel %vm536_vm3, %v21597_v0, %v21598_v28  ;;  %v15116_v43 = vsel %vm536_vm3, %v21602_v58, %v21603_v36  ;;  %18925 = vmatprep.subr.bf16.mxu0 %v18924_v9 }
 0xbda   :  { %v21611_v31 = vpop.permute.xlu0 %21610  ;;  %v21606_v56 = vpop.permute.xlu1 %21605  ;;  %v18928_v10 = vpack.c.bf16 %v15116_v43, %v15111_v12 }
 0xbdb   :  { %v21608_v25 = vunpack.i.h.bf16 %v21606_v56  ;;  %v21607_v3 = vunpack.i.l.bf16 %v21606_v56  ;;  %18219 = vmatmul.mubr.msk.f32.vlgmr.msra.gmra.mrb[52].mxu0 %vm3691_vm11, %v27459_v24  ;;  %v21613_v21 = vunpack.i.h.bf16 %v21611_v31  ;;  %v21612_v8 = vunpack.i.l.bf16 %v21611_v31 }
 0xbdc   :  { %21895 = vrot.lane.b32.xlu0 %v27152_v38, %s22037_s18  ;;  %18927 = vmatpush1.bf16.msra.mxu0 %v18926_v59 }
 0xbdd   :  { %v15115_v11 = vsel %vm536_vm3, %v21608_v25, %v21602_v58  ;;  %v15110_v50 = vsel %vm536_vm3, %v21607_v3, %v21597_v0  ;;  %21900 = vrot.lane.b32.xlu1 %v27360_v6, %s22036_s0  ;;  %18929 = vmatprep.subr.bf16.mxu0 %v18928_v10  ;;  %v15103_v0 = vsel %vm536_vm3, %v21612_v8, %v21613_v21 }
 0xbde   :  { %v18930_v9 = vpack.c.bf16 %v15115_v11, %v15110_v50  ;;  %v21621_v34 = vpop.permute.xlu0 %21620  ;;  %v21616_v57 = vpop.permute.xlu1 %21615  ;;  %15211 = vmatprep.mubr.f32.mxu0 %v27471_v14  ;;  %v15102_v12 = vsel %vm536_vm3, %v21578_v13, %v21612_v8  ;;  %v27551_v11 = vld [vmem:[%s28079_s10 + $0x2] sm:$0x3] }
 0xbdf   :  { %v21618_v51 = vunpack.i.h.bf16 %v21616_v57  ;;  %v21617_v62 = vunpack.i.l.bf16 %v21616_v57  ;;  %v21622_v43 = vunpack.i.l.bf16 %v21621_v34  ;;  %v21623_v59 = vunpack.i.h.bf16 %v21621_v34 }
 0xbe0   :  { %21910 = vrot.lane.b32.xlu0 %v27270_v61, %s22037_s18  ;;  %18931 = vmatpush1.bf16.msra.mxu0 %v18930_v9 }
 0xbe1   :  { %v15107_v24 = vsel %vm536_vm3, %v21583_v5, %v21617_v62  ;;  %21905 = vrot.lane.b32.xlu1 %v27252_v44, %s22037_s18  ;;  %v15108_v58 = vsel %vm536_vm3, %v21617_v62, %v21618_v51  ;;  %v15112_v8 = vsel %vm536_vm3, %v21598_v28, %v21622_v43 }
 0xbe2   :  { %v21631_v31 = vpop.permute.xlu0 %21630  ;;  %v21626_v56 = vpop.permute.xlu1 %21625  ;;  %v18932_v10 = vpack.c.bf16 %v15108_v58, %v15103_v0  ;;  %v18934_v25 = vpack.c.bf16 %v15107_v24, %v15102_v12  ;;  %v15113_v24 = vsel %vm536_vm3, %v21622_v43, %v21623_v59 }
 0xbe3   :  { %v21628_v3 = vunpack.i.h.bf16 %v21626_v56  ;;  %v21627_v5 = vunpack.i.l.bf16 %v21626_v56  ;;  %v21633_v18 = vunpack.i.h.bf16 %v21631_v31  ;;  %v21632_v50 = vunpack.i.l.bf16 %v21631_v31  ;;  %18221 = vmatmul.mubr.msk.f32.vlgmr.msra.gmra.mrb[48].mxu0 %vm3691_vm11, %v27551_v11 }
 0xbe4   :  { %21920 = vrot.lane.b32.xlu0 %v27290_v35, %s22037_s18  ;;  %18933 = vmatprep.subr.bf16.mxu0 %v18932_v10 }
 0xbe5   :  { %v15117_v13 = vsel %vm536_vm3, %v21603_v36, %v21627_v5  ;;  %21915 = vrot.lane.b32.xlu1 %v27190_v37, %s22037_s18  ;;  %v15118_v57 = vsel %vm536_vm3, %v21627_v5, %v21628_v3  ;;  %18935 = vmatpush1.bf16.msra.mxu0 %v18934_v25  ;;  %v15104_v28 = vsel %vm536_vm3, %v21613_v21, %v21632_v50 }
 0xbe6   :  { %v27561_v9 = vpop.permute.xlu0 %21635  ;;  %v27563_v34 = vpop.permute.xlu1 %21640  ;;  %v18938_v62 = vpack.c.bf16 %v15117_v13, %v15112_v8  ;;  %15282 = vmatprep.mubr.f32.mxu0 %v27471_v14  ;;  %v18936_v36 = vpack.c.bf16 %v15118_v57, %v15113_v24  ;;  %v15109_v0 = vsel %vm536_vm3, %v21618_v51, %v21633_v18  ;;  %v18940_v58 = vpack.c.bf16 %v21633_v18, %v21632_v50 }
 0xbe7   :  { %v21638_v12 = vunpack.i.h.bf16 %v27561_v9  ;;  %v21637_v31 = vunpack.i.l.bf16 %v27561_v9  ;;  %v21643_v43 = vunpack.i.h.bf16 %v27563_v34  ;;  %v21642_v56 = vunpack.i.l.bf16 %v27563_v34 }
 0xbe8   :  { %21930 = vrot.lane.b32.xlu0 %v27319_v22, %s22037_s18  ;;  %18937 = vmatprep.subr.bf16.mxu0 %v18936_v36  ;;  %v18942_v13 = vpack.c.bf16 %v15109_v0, %v15104_v28 }
 0xbe9   :  { %21925 = vrot.lane.b32.xlu1 %v27305_v55, %s22037_s18  ;;  %18939 = vmatpush1.bf16.msra.mxu0 %v18938_v62  ;;  %v15417_v36 = vsel %vm903_vm4, %v21637_v31, %v21638_v12 }
 0xbea   :  { %v21646_v10 = vpop.permute.xlu0 %21645  ;;  %v21651_v25 = vpop.permute.xlu1 %21650  ;;  %18941 = vmatprep.subr.bf16.mxu0 %v18940_v58 }
 0xbeb   :  { %v21653_v5 = vunpack.i.h.bf16 %v21651_v25  ;;  %v21652_v21 = vunpack.i.l.bf16 %v21651_v25  ;;  %v21648_v51 = vunpack.i.h.bf16 %v21646_v10  ;;  %v21647_v18 = vunpack.i.l.bf16 %v21646_v10 }
 0xbec   :  { %21940 = vrot.lane.b32.xlu0 %v27343_v32, %s22037_s18  ;;  %18222 = vmatmul.mubr.msk.f32.vlgmr.msra.gmra.mrb[50].mxu0 %vm3691_vm11, %v27551_v11 }
 0xbed   :  { %v15114_v50 = vsel %vm536_vm3, %v21623_v59, %v21652_v21  ;;  %v15119_v8 = vsel %vm536_vm3, %v21628_v3, %v21653_v5  ;;  %21935 = vrot.lane.b32.xlu1 %v27336_v27, %s22037_s18  ;;  %v18944_v34 = vpack.c.bf16 %v21653_v5, %v21652_v21  ;;  %v15422_v59 = vsel %vm903_vm4, %v21642_v56, %v21643_v43 }
 0xbee   :  { %v18946_v57 = vpack.c.bf16 %v15119_v8, %v15114_v50  ;;  %v27586_v62 = vpop.permute.xlu0 %21660  ;;  %v27588_v24 = vpop.permute.xlu1 %21655  ;;  %18943 = vmatpush1.bf16.msra.mxu0 %v18942_v13  ;;  %15353 = vmatprep.mubr.f32.mxu0 %v27471_v14  ;;  %v15416_v10 = vsel %vm903_vm4, %v21647_v18, %v21637_v31  ;;  %v15421_v25 = vsel %vm903_vm4, %v21648_v51, %v21642_v56 }
 0xbef   :  { %v21663_v3 = vunpack.i.h.bf16 %v27586_v62  ;;  %v21662_v28 = vunpack.i.l.bf16 %v27586_v62  ;;  %v21658_v0 = vunpack.i.h.bf16 %v27588_v24  ;;  %v21657_v58 = vunpack.i.l.bf16 %v27588_v24  ;;  %18945 = vmatprep.subr.bf16.mxu0 %v18944_v34 }
 0xbf0   :  { %21945 = vrot.lane.b32.xlu0 %v27212_v15, %s22038_s19  ;;  %v18948_v13 = vpack.c.bf16 %v15422_v59, %v15417_v36  ;;  %v18950_v24 = vpack.c.bf16 %v15421_v25, %v15416_v10 }
 0xbf1   :  { %21950 = vrot.lane.b32.xlu1 %v27230_v26, %s22038_s19  ;;  %v15427_v62 = vsel %vm903_vm4, %v21657_v58, %v21658_v0  ;;  %v15432_v34 = vsel %vm903_vm4, %v21662_v28, %v21663_v3 }
 0xbf2   :  { %v21671_v5 = vpop.permute.xlu0 %21670  ;;  %v21666_v21 = vpop.permute.xlu1 %21665  ;;  %18947 = vmatpush1.bf16.msra.mxu0 %v18946_v57  ;;  %v18952_v57 = vpack.c.bf16 %v15432_v34, %v15427_v62 }
 0xbf3   :  { %v21668_v50 = vunpack.i.h.bf16 %v21666_v21  ;;  %v21667_v8 = vunpack.i.l.bf16 %v21666_v21  ;;  %18949 = vmatprep.subr.bf16.mxu0 %v18948_v13  ;;  %v21673_v15 = vunpack.i.h.bf16 %v21671_v5  ;;  %v21672_v31 = vunpack.i.l.bf16 %v21671_v5 }
 0xbf4   :  { %21955 = vrot.lane.b32.xlu0 %v27152_v38, %s22038_s19 }
 0xbf5   :  { %v15431_v56 = vsel %vm903_vm4, %v21668_v50, %v21662_v28  ;;  %v15426_v26 = vsel %vm903_vm4, %v21667_v8, %v21657_v58  ;;  %21960 = vrot.lane.b32.xlu1 %v27360_v6, %s22037_s18  ;;  %18223 = vmatmul.mubr.msk.f32.vlgmr.msra.gmra.mrb[52].mxu0 %vm3691_vm11, %v27551_v11  ;;  %v15419_v11 = vsel %vm903_vm4, %v21672_v31, %v21673_v15 }
 0xbf6   :  { %v21681_v51 = vpop.permute.xlu0 %21680  ;;  %v21676_v18 = vpop.permute.xlu1 %21675  ;;  %v18954_v36 = vpack.c.bf16 %v15431_v56, %v15426_v26  ;;  %18951 = vmatpush1.bf16.msra.mxu0 %v18950_v24  ;;  %15527 = vmatprep.mubr.f32.mxu0 %v27471_v14  ;;  %v15418_v58 = vsel %vm903_vm4, %v21638_v12, %v21672_v31 }
 0xbf7   :  { %v21678_v59 = vunpack.i.h.bf16 %v21676_v18  ;;  %v21677_v10 = vunpack.i.l.bf16 %v21676_v18  ;;  %18953 = vmatprep.subr.bf16.mxu0 %v18952_v57  ;;  %v21682_v25 = vunpack.i.l.bf16 %v21681_v51  ;;  %v21683_v50 = vunpack.i.h.bf16 %v21681_v51 }
 0xbf8   :  { %21970 = vrot.lane.b32.xlu0 %v27270_v61, %s22038_s19 }
 0xbf9   :  { %v15423_v38 = vsel %vm903_vm4, %v21643_v43, %v21677_v10  ;;  %21965 = vrot.lane.b32.xlu1 %v27252_v44, %s22038_s19  ;;  %v15424_v28 = vsel %vm903_vm4, %v21677_v10, %v21678_v59  ;;  %v27629_v44 = vld [vmem:[%s28079_s10 + $0x4] sm:$0x3]  ;;  %v15428_v12 = vsel %vm903_vm4, %v21658_v0, %v21682_v25 }
 0xbfa   :  { %v21691_v5 = vpop.permute.xlu0 %21690  ;;  %v21686_v21 = vpop.permute.xlu1 %21685  ;;  %v18956_v13 = vpack.c.bf16 %v15424_v28, %v15419_v11  ;;  %v18958_v8 = vpack.c.bf16 %v15423_v38, %v15418_v58  ;;  %18955 = vmatpush1.bf16.msra.mxu0 %v18954_v36 }
 0xbfb   :  { %v21688_v61 = vunpack.i.h.bf16 %v21686_v21  ;;  %v21687_v43 = vunpack.i.l.bf16 %v21686_v21  ;;  %v21693_v62 = vunpack.i.h.bf16 %v21691_v5  ;;  %v21692_v34 = vunpack.i.l.bf16 %v21691_v5 }
 0xbfc   :  { %21980 = vrot.lane.b32.xlu0 %v27290_v35, %s22038_s19  ;;  %18957 = vmatprep.subr.bf16.mxu0 %v18956_v13  ;;  %v15429_v35 = vsel %vm903_vm4, %v21682_v25, %v21683_v50 }
 0xbfd   :  { %v15433_v9 = vsel %vm903_vm4, %v21663_v3, %v21687_v43  ;;  %21975 = vrot.lane.b32.xlu1 %v27190_v37, %s22038_s19  ;;  %18225 = vmatmul.mubr.msk.f32.vlgmr.msra.gmra.mrb[48].mxu0 %vm3691_vm11, %v27629_v44  ;;  %v15434_v56 = vsel %vm903_vm4, %v21687_v43, %v21688_v61  ;;  %v15420_v3 = vsel %vm903_vm4, %v21673_v15, %v21692_v34 }
 0xbfe   :  { %v27639_v24 = vpop.permute.xlu0 %21695  ;;  %v27641_v31 = vpop.permute.xlu1 %21700  ;;  %v18962_v26 = vpack.c.bf16 %v15433_v9, %v15428_v12  ;;  %18959 = vmatpush1.bf16.msra.mxu0 %v18958_v8  ;;  %15598 = vmatprep.mubr.f32.mxu0 %v27471_v14  ;;  %v15425_v37 = vsel %vm903_vm4, %v21678_v59, %v21693_v62  ;;  %v18960_v0 = vpack.c.bf16 %v15434_v56, %v15429_v35 }
 0xbff   :  { %v21698_v51 = vunpack.i.h.bf16 %v27639_v24  ;;  %v21697_v18 = vunpack.i.l.bf16 %v27639_v24  ;;  %v21703_v57 = vunpack.i.h.bf16 %v27641_v31  ;;  %v21702_v36 = vunpack.i.l.bf16 %v27641_v31 }
 0xc00   :  { %21990 = vrot.lane.b32.xlu0 %v27319_v22, %s22038_s19  ;;  %v18964_v10 = vpack.c.bf16 %v21693_v62, %v21692_v34  ;;  %18961 = vmatprep.subr.bf16.mxu0 %v18960_v0  ;;  %v18966_v22 = vpack.c.bf16 %v15425_v37, %v15420_v3 }
 0xc01   :  { %21985 = vrot.lane.b32.xlu1 %v27305_v55, %s22038_s19  ;;  %v14681_v55 = vld [vmem:[%s28080_s11] sm:$0x3]  ;;  %v15797_v25 = vsel %vm1280_vm5, %v21697_v18, %v21698_v51  ;;  %v15803_v5 = vsel %vm1280_vm5, %v21702_v36, %v21703_v57 }
 0xc02   :  { %v21706_v15 = vpop.permute.xlu0 %21705  ;;  %v21711_v38 = vpop.permute.xlu1 %21710  ;;  %18963 = vmatpush1.bf16.msra.mxu0 %v18962_v26  ;;  %v18972_v35 = vpack.c.bf16 %v15803_v5, %v15797_v25 }
 0xc03   :  { %v21713_v59 = vunpack.i.h.bf16 %v21711_v38  ;;  %v21712_v11 = vunpack.i.l.bf16 %v21711_v38  ;;  %18965 = vmatprep.subr.bf16.mxu0 %v18964_v10  ;;  %v21707_v21 = vunpack.i.l.bf16 %v21706_v15 }
 0xc04   :  { %22000 = vrot.lane.b32.xlu0 %v27343_v32, %s22038_s19  ;;  %v21708_v32 = vunpack.i.h.bf16 %v21706_v15 }
 0xc05   :  { %v15430_v28 = vsel %vm903_vm4, %v21683_v50, %v21712_v11  ;;  %v15435_v58 = vsel %vm903_vm4, %v21688_v61, %v21713_v59  ;;  %21995 = vrot.lane.b32.xlu1 %v27336_v27, %s22038_s19  ;;  %v18968_v13 = vpack.c.bf16 %v21713_v59, %v21712_v11  ;;  %18226 = vmatmul.mubr.msk.f32.vlgmr.msra.gmra.mrb[50].mxu0 %vm3691_vm11, %v27629_v44 }
 0xc06   :  { %v18970_v50 = vpack.c.bf16 %v15435_v58, %v15430_v28  ;;  %v21721_v27 = vpop.permute.xlu0 %21720  ;;  %v21716_v8 = vpop.permute.xlu1 %21715  ;;  %18967 = vmatpush1.bf16.msra.mxu0 %v18966_v22  ;;  %15669 = vmatprep.mubr.f32.mxu0 %v27471_v14  ;;  %v15796_v9 = vsel %vm1280_vm5, %v21707_v21, %v21697_v18  ;;  %v15802_v12 = vsel %vm1280_vm5, %v21708_v32, %v21702_v36 }
 0xc07   :  { %v21723_v61 = vunpack.i.h.bf16 %v21721_v27  ;;  %v21722_v43 = vunpack.i.l.bf16 %v21721_v27  ;;  %v21718_v62 = vunpack.i.h.bf16 %v21716_v8  ;;  %v21717_v34 = vunpack.i.l.bf16 %v21716_v8  ;;  %18969 = vmatprep.subr.bf16.mxu0 %v18968_v13 }
 0xc08   :  { %14684 = vperm.xlu0 %20048, %v14681_v55   ;;  %v18974_v59 = vpack.c.bf16 %v15802_v12, %v15796_v9  ;;  %v18228_v12 = vld [vmem:[%s28079_s10 + $0x6] sm:$0x3] }
 0xc09   :  { %22005 = vrot.lane.b32.xlu1 %v27360_v6, %s22038_s19  ;;  %v15809_v0 = vsel %vm1280_vm5, %v21717_v34, %v21718_v62  ;;  %v15815_v10 = vsel %vm1280_vm5, %v21722_v43, %v21723_v61 }
 0xc0a   :  { %v21731_v56 = vpop.permute.xlu0 %21730  ;;  %v21726_v26 = vpop.permute.xlu1 %21725  ;;  %18971 = vmatpush1.bf16.msra.mxu0 %v18970_v50  ;;  %v18976_v22 = vpack.c.bf16 %v15815_v10, %v15809_v0 }
 0xc0b   :  { %v21728_v3 = vunpack.i.h.bf16 %v21726_v26  ;;  %v21727_v37 = vunpack.i.l.bf16 %v21726_v26  ;;  %v21733_v15 = vunpack.i.h.bf16 %v21731_v56  ;;  %v21732_v38 = vunpack.i.l.bf16 %v21731_v56  ;;  %18973 = vmatprep.subr.bf16.mxu0 %v18972_v35 }
 0xc0d   :  { %v15814_v6 = vsel %vm1280_vm5, %v21728_v3, %v21722_v43  ;;  %v15808_v18 = vsel %vm1280_vm5, %v21727_v37, %v21717_v34  ;;  %18227 = vmatmul.mubr.msk.f32.vlgmr.msra.gmra.mrb[52].mxu0 %vm3691_vm11, %v27629_v44  ;;  %v15799_v25 = vsel %vm1280_vm5, %v21732_v38, %v21733_v15  ;;  %v15798_v13 = vsel %vm1280_vm5, %v21698_v51, %v21732_v38 }
 0xc0e   :  { %v21741_v36 = vpop.permute.xlu0 %21740  ;;  %v21736_v11 = vpop.permute.xlu1 %21735  ;;  %v18978_v28 = vpack.c.bf16 %v15814_v6, %v15808_v18  ;;  %18975 = vmatpush1.bf16.msra.mxu0 %v18974_v59  ;;  %15911 = vmatprep.mubr.f32.mxu0 %v27471_v14 }
 0xc0f   :  { %v21738_v58 = vunpack.i.h.bf16 %v21736_v11  ;;  %v21737_v55 = vunpack.i.l.bf16 %v21736_v11  ;;  %18977 = vmatprep.subr.bf16.mxu0 %v18976_v22  ;;  %v21743_v5 = vunpack.i.h.bf16 %v21741_v36  ;;  %v21742_v32 = vunpack.i.l.bf16 %v21741_v36 }
 0xc11   :  { %v15804_v21 = vsel %vm1280_vm5, %v21703_v57, %v21737_v55  ;;  %v15805_v44 = vsel %vm1280_vm5, %v21737_v55, %v21738_v58  ;;  %v15811_v24 = vsel %vm1280_vm5, %v21742_v32, %v21743_v5  ;;  %v15810_v26 = vsel %vm1280_vm5, %v21718_v62, %v21742_v32 }
 0xc12   :  { %v21751_v50 = vpop.permute.xlu0 %21750  ;;  %v21746_v27 = vpop.permute.xlu1 %21745  ;;  %v18980_v8 = vpack.c.bf16 %v15805_v44, %v15799_v25  ;;  %v18982_v43 = vpack.c.bf16 %v15804_v21, %v15798_v13  ;;  %18979 = vmatpush1.bf16.msra.mxu0 %v18978_v28 }
 0xc13   :  { %v21748_v34 = vunpack.i.h.bf16 %v21746_v27  ;;  %v21747_v9 = vunpack.i.l.bf16 %v21746_v27  ;;  %v21753_v31 = vunpack.i.h.bf16 %v21751_v50  ;;  %v21752_v56 = vunpack.i.l.bf16 %v21751_v50 }
 0xc14   :  { %18981 = vmatprep.subr.bf16.mxu0 %v18980_v8 }
 0xc15   :  { %v15816_v57 = vsel %vm1280_vm5, %v21723_v61, %v21747_v9  ;;  %v15817_v51 = vsel %vm1280_vm5, %v21747_v9, %v21748_v34  ;;  %18229 = vmatmul.mubr.msk.f32.vlgmr.msra.gmra.mrb[48].mxu0 %vm3691_vm11, %v18228_v12  ;;  %v15801_v61 = vsel %vm1280_vm5, %v21752_v56, %v21753_v31  ;;  %v15800_v36 = vsel %vm1280_vm5, %v21733_v15, %v21752_v56 }
 0xc16   :  { %v21761_v35 = vpop.permute.xlu0 %21760  ;;  %v21756_v3 = vpop.permute.xlu1 %21755  ;;  %v18984_v37 = vpack.c.bf16 %v15817_v51, %v15811_v24  ;;  %v18986_v0 = vpack.c.bf16 %v15816_v57, %v15810_v26  ;;  %18983 = vmatpush1.bf16.msra.mxu0 %v18982_v43  ;;  %15982 = vmatprep.mubr.f32.mxu0 %v27471_v14  ;;  %v28145_v31 = vpack.c.bf16 %v27183_v29, %v27169_v23 }
 0xc17   :  { %v21758_v10 = vunpack.i.h.bf16 %v21756_v3  ;;  %v21757_v38 = vunpack.i.l.bf16 %v21756_v3  ;;  %v21763_v59 = vunpack.i.h.bf16 %v21761_v35  ;;  %v21762_v6 = vunpack.i.l.bf16 %v21761_v35 }
 0xc18   :  { %18985 = vmatprep.subr.bf16.mxu0 %v18984_v37  ;;  %v28152_v35 = vpack.c.bf16 %v27294_v19, %v27281_v17  ;;  %v28153_v3 = vpack.c.bf16 %v27356_v47, %v27354_v39  ;;  %v28154_v39 = vpack.c.bf16 %v27323_v45, %v27311_v52 }
 0xc19   :  { %v15806_v18 = vsel %vm1280_vm5, %v21738_v58, %v21757_v38  ;;  %v15807_v62 = vsel %vm1280_vm5, %v21757_v38, %v21758_v10  ;;  %v15813_v44 = vsel %vm1280_vm5, %v21762_v6, %v21763_v59  ;;  %v15812_v58 = vsel %vm1280_vm5, %v21743_v5, %v21762_v6 }
 0xc1a   :  { %v27706_v11 = vpop.permute.xlu0 %21770  ;;  %v21766_v22 = vpop.permute.xlu1 %21765  ;;  %v18988_v28 = vpack.c.bf16 %v15807_v62, %v15801_v61  ;;  %v18990_v55 = vpack.c.bf16 %v15806_v18, %v15800_v36  ;;  %18987 = vmatpush1.bf16.msra.mxu0 %v18986_v0 }
 0xc1b   :  { %v21768_v25 = vunpack.i.h.bf16 %v21766_v22  ;;  %v21767_v32 = vunpack.i.l.bf16 %v21766_v22  ;;  %v21772_v63 = vunpack.i.l.bf16 %v27706_v11 }
 0xc1c   :  { %18989 = vmatprep.subr.bf16.mxu0 %v18988_v28 }
 0xc1d   :  { %v15818_v21 = vsel %vm1280_vm5, %v21748_v34, %v21767_v32  ;;  %v15819_v13 = vsel %vm1280_vm5, %v21767_v32, %v21768_v25  ;;  %18230 = vmatmul.mubr.msk.f32.vlgmr.msra.gmra.mrb[50].mxu0 %vm3691_vm11, %v18228_v12 }
 0xc1e   :  { %v21781_v15 = vpop.permute.xlu0 %21780  ;;  %v27713_v50 = vpop.permute.xlu1 %21775  ;;  %v18992_v27 = vpack.c.bf16 %v15819_v13, %v15813_v44  ;;  %v18994_v8 = vpack.c.bf16 %v15818_v21, %v15812_v58  ;;  %18991 = vmatpush1.bf16.msra.mxu0 %v18990_v55  ;;  %16053 = vmatprep.mubr.f32.mxu0 %v27471_v14 }
 0xc1f   :  { %v21778_v23 = vunpack.i.h.bf16 %v27713_v50  ;;  %v21777_v60 = vunpack.i.l.bf16 %v27713_v50  ;;  %v21782_v53 = vunpack.i.l.bf16 %v21781_v15 }
 0xc20   :  { %18993 = vmatprep.subr.bf16.mxu0 %v18992_v27 }
 0xc21   :  { %v16346_v26 = vsel %vm1997_vm6, %v21777_v60, %v21778_v23  ;;  %v16340_v37 = vsel %vm1997_vm6, %v21782_v53, %v21772_v63 }
 0xc22   :  { %v27716_v43 = vpop.permute.xlu0 %21790  ;;  %v27718_v34 = vpop.permute.xlu1 %21785  ;;  %18995 = vmatpush1.bf16.msra.mxu0 %v18994_v8 }
 0xc23   :  { %18997 = vmatprep.subr.bf16.mxu0 %v18996_v46  ;;  %v28148_v46 = vpack.c.bf16 %v27219_v40, %v27201_v49  ;;  %v28151_v49 = vpack.c.bf16 %v27332_v1, %v27330_v4  ;;  %v21773_v40 = vunpack.i.h.bf16 %v27706_v11  ;;  %v21793_v54 = vunpack.i.h.bf16 %v27716_v43 }
 0xc24   :  { %v21792_v7 = vunpack.i.l.bf16 %v27716_v43  ;;  %v21788_v4 = vunpack.i.h.bf16 %v27718_v34  ;;  %v21787_v1 = vunpack.i.l.bf16 %v27718_v34 }
 0xc25   :  { %18231 = vmatmul.mubr.msk.f32.vlgmr.msra.gmra.mrb[52].mxu0 %vm3691_vm11, %v18228_v12  ;;  %v21783_v12 = vunpack.i.h.bf16 %v21781_v15  ;;  %v16341_v0 = vsel %vm1997_vm6, %v21772_v63, %v21773_v40 }
 0xc26   :  { %v27724_v5 = vpop.permute.xlu0 %21800  ;;  %v21796_v9 = vpop.permute.xlu1 %21795  ;;  %18999 = vmatpush1.bf16.msra.mxu0 %v18998_v2  ;;  %16135 = vmatprep.mubr.f32.mxu0 %v27471_v14  ;;  %v19020_v17 = vpack.c.bf16 %v16346_v26, %v16341_v0  ;;  %v16351_v47 = vsel %vm1997_vm6, %v21787_v1, %v21788_v4  ;;  %v16356_v62 = vsel %vm1997_vm6, %v21792_v7, %v21793_v54 }
 0xc27   :  { %19001 = vmatprep.subr.bf16.mxu0 %v28145_v31  ;;  %v16345_v10 = vsel %vm1997_vm6, %v21783_v12, %v21777_v60  ;;  %v21798_v38 = vunpack.i.h.bf16 %v21796_v9  ;;  %v21797_v61 = vunpack.i.l.bf16 %v21796_v9  ;;  %v21803_v11 = vunpack.i.h.bf16 %v27724_v5 }
 0xc28   :  { %v19022_v36 = vpack.c.bf16 %v16345_v10, %v16340_v37  ;;  %v21802_v22 = vunpack.i.l.bf16 %v27724_v5  ;;  %v19024_v45 = vpack.c.bf16 %v16356_v62, %v16351_v47  ;;  %v27827_v5 = vld [vmem:[%s28079_s10 + $0xa] sm:$0x3] }
 0xc29   :  { %v16355_v28 = vsel %vm1997_vm6, %v21798_v38, %v21792_v7  ;;  %v16350_v55 = vsel %vm1997_vm6, %v21797_v61, %v21787_v1 }
 0xc2a   :  { %v27733_v56 = vpop.permute.xlu0 %21810  ;;  %v27735_v57 = vpop.permute.xlu1 %21805  ;;  %19003 = vmatpush1.bf16.msra.mxu0 %v28146_v30  ;;  %v19026_v13 = vpack.c.bf16 %v16355_v28, %v16350_v55  ;;  %v16343_v50 = vsel %vm1997_vm6, %v21802_v22, %v21803_v11  ;;  %v16342_v31 = vsel %vm1997_vm6, %v21773_v40, %v21802_v22 }
 0xc2b   :  { %19005 = vmatprep.subr.bf16.mxu0 %v28147_v41  ;;  %v21808_v19 = vunpack.i.h.bf16 %v27735_v57  ;;  %v21807_v18 = vunpack.i.l.bf16 %v27735_v57  ;;  %v21813_v58 = vunpack.i.h.bf16 %v27733_v56  ;;  %v21812_v15 = vunpack.i.l.bf16 %v27733_v56 }
 0xc2d   :  { %18233 = vmatmul.mubr.msk.f32.vlgmr.msra.gmra.mrb[48].mxu0 %vm3691_vm11, %v18232_v20  ;;  %v16348_v44 = vsel %vm1997_vm6, %v21807_v18, %v21808_v19  ;;  %v16347_v27 = vsel %vm1997_vm6, %v21778_v23, %v21807_v18 }
 0xc2e   :  { %v27747_v16 = vpop.permute.xlu0 %21820  ;;  %v27749_v2 = vpop.permute.xlu1 %21815  ;;  %19007 = vmatpush1.bf16.msra.mxu0 %v28148_v46  ;;  %16206 = vmatprep.mubr.f32.mxu0 %v27471_v14  ;;  %v19028_v43 = vpack.c.bf16 %v16348_v44, %v16343_v50  ;;  %v19030_v57 = vpack.c.bf16 %v16347_v27, %v16342_v31 }
 0xc2f   :  { %19009 = vmatprep.subr.bf16.mxu0 %v28149_v48  ;;  %v21818_v32 = vunpack.i.h.bf16 %v27749_v2  ;;  %v21817_v21 = vunpack.i.l.bf16 %v27749_v2  ;;  %v21822_v56 = vunpack.i.l.bf16 %v27747_v16  ;;  %v21823_v41 = vunpack.i.h.bf16 %v27747_v16 }
 0xc30   :  { %v16352_v48 = vsel %vm1997_vm6, %v21788_v4, %v21812_v15 }
 0xc31   :  { %v16358_v9 = vsel %vm1997_vm6, %v21817_v21, %v21818_v32  ;;  %v16357_v30 = vsel %vm1997_vm6, %v21793_v54, %v21817_v21  ;;  %v16344_v60 = vsel %vm1997_vm6, %v21803_v11, %v21822_v56  ;;  %v16349_v53 = vsel %vm1997_vm6, %v21808_v19, %v21823_v41 }
 0xc32   :  { %v27760_v29 = vpop.permute.xlu0 %21825  ;;  %v27762_v33 = vpop.permute.xlu1 %21830  ;;  %19011 = vmatpush1.bf16.msra.mxu0 %v28150_v42  ;;  %v19034_v42 = vpack.c.bf16 %v16357_v30, %v16352_v48  ;;  %v19036_v12 = vpack.c.bf16 %v21823_v41, %v21822_v56  ;;  %v19038_v1 = vpack.c.bf16 %v16349_v53, %v16344_v60 }
 0xc33   :  { %19013 = vmatprep.subr.bf16.mxu0 %v28151_v49  ;;  %v21828_v49 = vunpack.i.h.bf16 %v27760_v29  ;;  %v21827_v16 = vunpack.i.l.bf16 %v27760_v29  ;;  %v21833_v40 = vunpack.i.h.bf16 %v27762_v33  ;;  %v21832_v63 = vunpack.i.l.bf16 %v27762_v33  ;;  %v27922_v29 = vld [vmem:[#allocation2] sm:$0xff] }
 0xc35   :  { %18234 = vmatmul.mubr.msk.f32.vlgmr.msra.gmra.mrb[50].mxu0 %vm3691_vm11, %v18232_v20  ;;  %v16657_v33 = vsel %vm2364_vm7, %v21827_v16, %v21828_v49 }
 0xc36   :  { %v27773_v24 = vpop.permute.xlu0 %21835  ;;  %v27775_v51 = vpop.permute.xlu1 %21840  ;;  %19015 = vmatpush1.bf16.msra.mxu0 %v28152_v35  ;;  %16277 = vmatprep.mubr.f32.mxu0 %v27471_v14 }
 0xc37   :  { %19017 = vmatprep.subr.bf16.mxu0 %v28153_v3  ;;  %v21843_v26 = vunpack.i.h.bf16 %v27775_v51  ;;  %v21842_v54 = vunpack.i.l.bf16 %v27775_v51  ;;  %v21838_v35 = vunpack.i.h.bf16 %v27773_v24  ;;  %v16662_v3 = vsel %vm2364_vm7, %v21832_v63, %v21833_v40 }
 0xc38   :  { %v21837_v37 = vunpack.i.l.bf16 %v27773_v24  ;;  %v19044_v47 = vpack.c.bf16 %v16662_v3, %v16657_v33 }
 0xc39   :  { %v16354_v0 = vsel %vm1997_vm6, %v21813_v58, %v21842_v54  ;;  %v16359_v51 = vsel %vm1997_vm6, %v21818_v32, %v21843_v26  ;;  %v19040_v10 = vpack.c.bf16 %v21843_v26, %v21842_v54 }
 0xc3a   :  { %v27792_v59 = vpop.permute.xlu0 %21850  ;;  %v27794_v6 = vpop.permute.xlu1 %21845  ;;  %19019 = vmatpush1.bf16.msra.mxu0 %v28154_v39  ;;  %v19042_v39 = vpack.c.bf16 %v16359_v51, %v16354_v0  ;;  %v16656_v62 = vsel %vm2364_vm7, %v21837_v37, %v21827_v16 }
 0xc3b   :  { %19021 = vmatprep.subr.bf16.mxu0 %v19020_v17  ;;  %v21853_v61 = vunpack.i.h.bf16 %v27792_v59  ;;  %v21852_v17 = vunpack.i.l.bf16 %v27792_v59  ;;  %v21848_v19 = vunpack.i.h.bf16 %v27794_v6  ;;  %v21847_v18 = vunpack.i.l.bf16 %v27794_v6 }
 0xc3d   :  { %18235 = vmatmul.mubr.msk.f32.vlgmr.msra.gmra.mrb[52].mxu0 %vm3691_vm11, %v18232_v20  ;;  %v16353_v20 = vsel %vm1997_vm6, %v21812_v15, %v21813_v58  ;;  %v16667_v55 = vsel %vm2364_vm7, %v21847_v18, %v21848_v19 }
 0xc3e   :  { %v27808_v25 = vpop.permute.xlu0 %21860  ;;  %v27810_v52 = vpop.permute.xlu1 %21855  ;;  %19023 = vmatpush1.bf16.msra.mxu0 %v19022_v36  ;;  %16451 = vmatprep.mubr.f32.mxu0 %v27471_v14  ;;  %v19032_v46 = vpack.c.bf16 %v16358_v9, %v16353_v20  ;;  %v16661_v36 = vsel %vm2364_vm7, %v21838_v35, %v21832_v63 }
 0xc3f   :  { %19025 = vmatprep.subr.bf16.mxu0 %v19024_v45  ;;  %v21858_v11 = vunpack.i.h.bf16 %v27810_v52  ;;  %v21857_v59 = vunpack.i.l.bf16 %v27810_v52  ;;  %v16672_v45 = vsel %vm2364_vm7, %v21852_v17, %v21853_v61  ;;  %v19046_v21 = vpack.c.bf16 %v16661_v36, %v16656_v62 }
 0xc40   :  { %v21863_v44 = vunpack.i.h.bf16 %v27808_v25  ;;  %v19048_v15 = vpack.c.bf16 %v16672_v45, %v16667_v55 }
 0xc41   :  { %v16671_v52 = vsel %vm2364_vm7, %v21858_v11, %v21852_v17  ;;  %v16666_v58 = vsel %vm2364_vm7, %v21857_v59, %v21847_v18 }
 0xc42   :  { %v27820_v8 = vpop.permute.xlu0 %21870  ;;  %19027 = vmatpush1.bf16.msra.mxu0 %v19026_v13  ;;  %v21862_v13 = vunpack.i.l.bf16 %v27808_v25  ;;  %v19050_v25 = vpack.c.bf16 %v16671_v52, %v16666_v58 }
 0xc43   :  { %v27822_v34 = vpop.permute.xlu1 %21865  ;;  %19029 = vmatprep.subr.bf16.mxu0 %v19028_v43  ;;  %v21873_v9 = vunpack.i.h.bf16 %v27820_v8  ;;  %v21872_v31 = vunpack.i.l.bf16 %v27820_v8 }
 0xc44   :  { %v21868_v22 = vunpack.i.h.bf16 %v27822_v34  ;;  %v21867_v6 = vunpack.i.l.bf16 %v27822_v34  ;;  %v16658_v8 = vsel %vm2364_vm7, %v21828_v49, %v21862_v13 }
 0xc45   :  { %18237 = vmatmul.mubr.msk.f32.vlgmr.msra.gmra.mrb[48].mxu0 %vm3691_vm11, %v27827_v5  ;;  %v16669_v60 = vsel %vm2364_vm7, %v21872_v31, %v21873_v9 }
 0xc46   :  { %v27837_v2 = vpop.permute.xlu0 %21880  ;;  %19031 = vmatpush1.bf16.msra.mxu0 %v19030_v57  ;;  %16522 = vmatprep.mubr.f32.mxu0 %v27471_v14  ;;  %v16664_v34 = vsel %vm2364_vm7, %v21867_v6, %v21868_v22  ;;  %v16663_v56 = vsel %vm2364_vm7, %v21833_v40, %v21867_v6  ;;  %v16668_v40 = vsel %vm2364_vm7, %v21848_v19, %v21872_v31 }
 0xc47   :  { %v27840_v23 = vpop.permute.xlu1 %21875  ;;  %19033 = vmatprep.subr.bf16.mxu0 %v19032_v46  ;;  %v21882_v46 = vunpack.i.l.bf16 %v27837_v2  ;;  %v19054_v48 = vpack.c.bf16 %v16663_v56, %v16658_v8 }
 0xc48   :  { %v21878_v50 = vunpack.i.h.bf16 %v27840_v23  ;;  %v21877_v27 = vunpack.i.l.bf16 %v27840_v23 }
 0xc49   :  { %v16660_v49 = vsel %vm2364_vm7, %v21863_v44, %v21882_v46 }
 0xc4a   :  { %v27851_v7 = vpop.permute.xlu0 %21885  ;;  %19035 = vmatpush1.bf16.msra.mxu0 %v19034_v42  ;;  %v16674_v41 = vsel %vm2364_vm7, %v21877_v27, %v21878_v50  ;;  %v16673_v23 = vsel %vm2364_vm7, %v21853_v61, %v21877_v27  ;;  %v21883_v42 = vunpack.i.h.bf16 %v27837_v2 }
 0xc4b   :  { %v27853_v4 = vpop.permute.xlu1 %21890  ;;  %19037 = vmatprep.subr.bf16.mxu0 %v19036_v12  ;;  %v19056_v16 = vpack.c.bf16 %v16674_v41, %v16669_v60  ;;  %v19058_v63 = vpack.c.bf16 %v16673_v23, %v16668_v40  ;;  %v21888_v2 = vunpack.i.h.bf16 %v27851_v7  ;;  %v21887_v26 = vunpack.i.l.bf16 %v27851_v7 }
 0xc4c   :  { %v21893_v54 = vunpack.i.h.bf16 %v27853_v4  ;;  %v16665_v35 = vsel %vm2364_vm7, %v21868_v22, %v21883_v42  ;;  %v19060_v33 = vpack.c.bf16 %v21883_v42, %v21882_v46  ;;  %v27985_v46 = vld [vmem:[%s28079_s10 + $0xe] sm:$0x3] }
 0xc4d   :  { %18238 = vmatmul.mubr.msk.f32.vlgmr.msra.gmra.mrb[50].mxu0 %vm3691_vm11, %v27827_v5  ;;  %v19062_v0 = vpack.c.bf16 %v16665_v35, %v16660_v49 }
 0xc4e   :  { %v27865_v38 = vpop.permute.xlu0 %21895  ;;  %19039 = vmatpush1.bf16.msra.mxu0 %v19038_v1  ;;  %16593 = vmatprep.mubr.f32.mxu0 %v27471_v14  ;;  %v21892_v1 = vunpack.i.l.bf16 %v27853_v4 }
 0xc4f   :  { %v27871_v24 = vpop.permute.xlu1 %21900  ;;  %19041 = vmatprep.subr.bf16.mxu0 %v19040_v10  ;;  %v21898_v51 = vunpack.i.h.bf16 %v27865_v38  ;;  %v16973_v10 = vsel %vm2731_vm8, %v21887_v26, %v21888_v2  ;;  %v21897_v4 = vunpack.i.l.bf16 %v27865_v38 }
 0xc50   :  { %v21903_v3 = vunpack.i.h.bf16 %v27871_v24  ;;  %v21902_v37 = vunpack.i.l.bf16 %v27871_v24  ;;  %v16978_v61 = vsel %vm2731_vm8, %v21892_v1, %v21893_v54 }
 0xc51   :  { %v19068_v59 = vpack.c.bf16 %v16978_v61, %v16973_v10  ;;  %v16972_v22 = vsel %vm2731_vm8, %v21897_v4, %v21887_v26  ;;  %v16977_v6 = vsel %vm2731_vm8, %v21898_v51, %v21892_v1 }
 0xc52   :  { %19043 = vmatpush1.bf16.msra.mxu0 %v19042_v39  ;;  %v27884_v32 = vpop.permute.xlu0 %21910  ;;  %v16670_v17 = vsel %vm2364_vm7, %v21873_v9, %v21902_v37  ;;  %v16675_v19 = vsel %vm2364_vm7, %v21878_v50, %v21903_v3  ;;  %v19064_v18 = vpack.c.bf16 %v21903_v3, %v21902_v37  ;;  %v19070_v58 = vpack.c.bf16 %v16977_v6, %v16972_v22 }
 0xc53   :  { %v27880_v28 = vpop.permute.xlu1 %21905  ;;  %19045 = vmatprep.subr.bf16.mxu0 %v19044_v47  ;;  %v21913_v47 = vunpack.i.h.bf16 %v27884_v32  ;;  %v21912_v62 = vunpack.i.l.bf16 %v27884_v32  ;;  %v19066_v11 = vpack.c.bf16 %v16675_v19, %v16670_v17 }
 0xc54   :  { %v21908_v36 = vunpack.i.h.bf16 %v27880_v28  ;;  %v21907_v38 = vunpack.i.l.bf16 %v27880_v28 }
 0xc55   :  { %18239 = vmatmul.mubr.msk.f32.vlgmr.msra.gmra.mrb[52].mxu0 %vm3691_vm11, %v27827_v5  ;;  %v16659_v5 = vsel %vm2364_vm7, %v21862_v13, %v21863_v44  ;;  %v16988_v44 = vsel %vm2731_vm8, %v21912_v62, %v21913_v47 }
 0xc56   :  { %19047 = vmatpush1.bf16.msra.mxu0 %v19046_v21  ;;  %16767 = vmatprep.mubr.f32.mxu0 %v27471_v14  ;;  %v27902_v57 = vpop.permute.xlu0 %21920  ;;  %v19052_v30 = vpack.c.bf16 %v16664_v34, %v16659_v5  ;;  %v27909_v14 = vld [vmem:[%s28079_s10 + $0xc] sm:$0x3]  ;;  %v16983_v28 = vsel %vm2731_vm8, %v21907_v38, %v21908_v36 }
 0xc57   :  { %v27894_v43 = vpop.permute.xlu1 %21915  ;;  %19049 = vmatprep.subr.bf16.mxu0 %v19048_v15  ;;  %v21923_v15 = vunpack.i.h.bf16 %v27902_v57  ;;  %v21922_v50 = vunpack.i.l.bf16 %v27902_v57  ;;  %v19072_v34 = vpack.c.bf16 %v16988_v44, %v16983_v28 }
 0xc58   :  { %v21918_v55 = vunpack.i.h.bf16 %v27894_v43  ;;  %v21917_v45 = vunpack.i.l.bf16 %v27894_v43 }
 0xc59   :  { %v16974_v23 = vsel %vm2731_vm8, %v21888_v2, %v21922_v50 }
 0xc5a   :  { %19051 = vmatpush1.bf16.msra.mxu0 %v19050_v25  ;;  %v27926_v53 = vpop.permute.xlu0 %21930  ;;  %v16987_v27 = vsel %vm2731_vm8, %v21918_v55, %v21912_v62  ;;  %v16982_v43 = vsel %vm2731_vm8, %v21917_v45, %v21907_v38 }
 0xc5b   :  { %v27904_v20 = vpop.permute.xlu1 %21925  ;;  %19053 = vmatprep.subr.bf16.mxu0 %v19052_v30  ;;  %v19074_v5 = vpack.c.bf16 %v16987_v27, %v16982_v43  ;;  %v21933_v56 = vunpack.i.h.bf16 %v27926_v53  ;;  %v21932_v57 = vunpack.i.l.bf16 %v27926_v53  ;;  %v16975_v30 = vsel %vm2731_vm8, %v21922_v50, %v21923_v15 }
 0xc5c   :  { %v21928_v32 = vunpack.i.h.bf16 %v27904_v20  ;;  %v21927_v21 = vunpack.i.l.bf16 %v27904_v20 }
 0xc5d   :  { %18241 = vmatmul.mubr.msk.f32.vlgmr.msra.gmra.mrb[48].mxu0 %vm3691_vm11, %v27909_v14  ;;  %v16985_v40 = vsel %vm2731_vm8, %v21932_v57, %v21933_v56  ;;  %v16984_v53 = vsel %vm2731_vm8, %v21908_v36, %v21932_v57 }
 0xc5e   :  { %19055 = vmatpush1.bf16.msra.mxu0 %v19054_v48  ;;  %16838 = vmatprep.mubr.f32.mxu0 %v27922_v29  ;;  %v27945_v39 = vpop.permute.xlu0 %21940  ;;  %v16980_v31 = vsel %vm2731_vm8, %v21927_v21, %v21928_v32  ;;  %v16979_v20 = vsel %vm2731_vm8, %v21893_v54, %v21927_v21 }
 0xc5f   :  { %v27928_v12 = vpop.permute.xlu1 %21935  ;;  %19057 = vmatprep.subr.bf16.mxu0 %v19056_v16  ;;  %v19076_v8 = vpack.c.bf16 %v16980_v31, %v16975_v30  ;;  %v21942_v60 = vunpack.i.l.bf16 %v27945_v39  ;;  %v19078_v42 = vpack.c.bf16 %v16979_v20, %v16974_v23  ;;  %v21943_v49 = vunpack.i.h.bf16 %v27945_v39 }
 0xc60   :  { %v21938_v25 = vunpack.i.h.bf16 %v27928_v12  ;;  %v21937_v9 = vunpack.i.l.bf16 %v27928_v12 }
 0xc61   :  { %v16976_v7 = vsel %vm2731_vm8, %v21923_v15, %v21942_v60  ;;  %v16981_v3 = vsel %vm2731_vm8, %v21928_v32, %v21943_v49  ;;  %v19084_v37 = vpack.c.bf16 %v21943_v49, %v21942_v60 }
 0xc62   :  { %19059 = vmatpush1.bf16.msra.mxu0 %v19058_v63  ;;  %v27964_v13 = vpop.permute.xlu0 %21945  ;;  %v16990_v48 = vsel %vm2731_vm8, %v21937_v9, %v21938_v25  ;;  %v16989_v16 = vsel %vm2731_vm8, %v21913_v47, %v21937_v9  ;;  %v19086_v10 = vpack.c.bf16 %v16981_v3, %v16976_v7 }
 0xc63   :  { %19061 = vmatprep.subr.bf16.mxu0 %v19060_v33  ;;  %v27947_v24 = vpop.permute.xlu1 %21950  ;;  %v19080_v63 = vpack.c.bf16 %v16990_v48, %v16985_v40  ;;  %v19082_v12 = vpack.c.bf16 %v16989_v16, %v16984_v53  ;;  %v21948_v54 = vunpack.i.h.bf16 %v27964_v13  ;;  %v21947_v1 = vunpack.i.l.bf16 %v27964_v13 }
 0xc64   :  { %v21953_v35 = vunpack.i.h.bf16 %v27947_v24  ;;  %v21952_v33 = vunpack.i.l.bf16 %v27947_v24 }
 0xc65   :  { %18242 = vmatmul.mubr.msk.f32.vlgmr.msra.gmra.mrb[50].mxu0 %vm3691_vm11, %v27909_v14  ;;  %v17289_v4 = vsel %vm3098_vm9, %v21947_v1, %v21948_v54 }
 0xc66   :  { %19063 = vmatpush1.bf16.msra.mxu0 %v19062_v0  ;;  %16909 = vmatprep.mubr.f32.mxu0 %v27922_v29  ;;  %v17294_v17 = vsel %vm3098_vm9, %v21952_v33, %v21953_v35 }
 0xc67   :  { %19065 = vmatprep.subr.bf16.mxu0 %v19064_v18  ;;  %v21961_v52 = vpop.permute.xlu1 %21960  ;;  %v19092_v6 = vpack.c.bf16 %v17294_v17, %v17289_v4 }
 0xc68   :  { %v21963_v0 = vunpack.i.h.bf16 %v21961_v52  ;;  %v21962_v51 = vunpack.i.l.bf16 %v21961_v52 }
 0xc6a   :  { %19067 = vmatpush1.bf16.msra.mxu0 %v19066_v11  ;;  %v16986_v18 = vsel %vm2731_vm8, %v21933_v56, %v21962_v51  ;;  %v16991_v39 = vsel %vm2731_vm8, %v21938_v25, %v21963_v0  ;;  %v19088_v24 = vpack.c.bf16 %v21963_v0, %v21962_v51 }
 0xc6b   :  { %19069 = vmatprep.subr.bf16.mxu0 %v19068_v59  ;;  %v27980_v41 = vpop.permute.xlu1 %21965  ;;  %v19090_v22 = vpack.c.bf16 %v16991_v39, %v16986_v18 }
 0xc6c   :  { %v21968_v11 = vunpack.i.h.bf16 %v27980_v41  ;;  %v21967_v59 = vunpack.i.l.bf16 %v27980_v41 }
 0xc6d   :  { %18243 = vmatmul.mubr.msk.f32.vlgmr.msra.gmra.mrb[52].mxu0 %vm3691_vm11, %v27909_v14  ;;  %v21956_v14 = vpop.permute.xlu0 %21955 }
 0xc6e   :  { %19071 = vmatpush1.bf16.msra.mxu0 %v19070_v58  ;;  %17083 = vmatprep.mubr.f32.mxu0 %v27922_v29  ;;  %v21958_v61 = vunpack.i.h.bf16 %v21956_v14  ;;  %v21957_v19 = vunpack.i.l.bf16 %v21956_v14  ;;  %v17299_v52 = vsel %vm3098_vm9, %v21967_v59, %v21968_v11 }
 0xc6f   :  { %19073 = vmatprep.subr.bf16.mxu0 %v19072_v34  ;;  %v21976_v26 = vpop.permute.xlu1 %21975 }
 0xc70   :  { %v17288_v55 = vsel %vm3098_vm9, %v21957_v19, %v21947_v1  ;;  %v17293_v45 = vsel %vm3098_vm9, %v21958_v61, %v21952_v33  ;;  %v21978_v32 = vunpack.i.h.bf16 %v21976_v26  ;;  %v21977_v21 = vunpack.i.l.bf16 %v21976_v26 }
 0xc71   :  { %v28000_v2 = vpop.permute.xlu0 %21970  ;;  %v19094_v27 = vpack.c.bf16 %v17293_v45, %v17288_v55 }
 0xc72   :  { %19075 = vmatpush1.bf16.msra.mxu0 %v19074_v5  ;;  %v21973_v36 = vunpack.i.h.bf16 %v28000_v2  ;;  %v21972_v38 = vunpack.i.l.bf16 %v28000_v2  ;;  %v17298_v9 = vsel %vm3098_vm9, %v21977_v21, %v21967_v59 }
 0xc73   :  { %19077 = vmatprep.subr.bf16.mxu0 %v19076_v8  ;;  %v28015_v62 = vpop.permute.xlu1 %21985 }
 0xc74   :  { %v21988_v28 = vunpack.i.h.bf16 %v28015_v62  ;;  %v21987_v44 = vunpack.i.l.bf16 %v28015_v62  ;;  %v17304_v58 = vsel %vm3098_vm9, %v21972_v38, %v21973_v36  ;;  %v17303_v25 = vsel %vm3098_vm9, %v21978_v32, %v21972_v38 }
 0xc75   :  { %18245 = vmatmul.mubr.msk.f32.vlgmr.msra.gmra.mrb[48].mxu0 %vm3691_vm11, %v27985_v46  ;;  %v28013_v47 = vpop.permute.xlu0 %21980  ;;  %v19096_v31 = vpack.c.bf16 %v17304_v58, %v17299_v52  ;;  %v19098_v30 = vpack.c.bf16 %v17303_v25, %v17298_v9 }
 0xc76   :  { %19079 = vmatpush1.bf16.msra.mxu0 %v19078_v42  ;;  %17154 = vmatprep.mubr.f32.mxu0 %v27922_v29  ;;  %v21983_v43 = vunpack.i.h.bf16 %v28013_v47  ;;  %v21982_v34 = vunpack.i.l.bf16 %v28013_v47  ;;  %v17296_v57 = vsel %vm3098_vm9, %v21987_v44, %v21988_v28  ;;  %v17295_v8 = vsel %vm3098_vm9, %v21953_v35, %v21987_v44 }
 0xc77   :  { %19081 = vmatprep.subr.bf16.mxu0 %v19080_v63  ;;  %v21996_v50 = vpop.permute.xlu1 %21995 }
 0xc78   :  { %v21998_v5 = vunpack.i.h.bf16 %v21996_v50  ;;  %v21997_v56 = vunpack.i.l.bf16 %v21996_v50  ;;  %v17291_v41 = vsel %vm3098_vm9, %v21982_v34, %v21983_v43  ;;  %v17290_v42 = vsel %vm3098_vm9, %v21948_v54, %v21982_v34 }
 0xc79   :  { %v21991_v15 = vpop.permute.xlu0 %21990  ;;  %v19100_v23 = vpack.c.bf16 %v17296_v57, %v17291_v41  ;;  %v19102_v16 = vpack.c.bf16 %v17295_v8, %v17290_v42 }
 0xc7a   :  { %19083 = vmatpush1.bf16.msra.mxu0 %v19082_v12  ;;  %v21993_v20 = vunpack.i.h.bf16 %v21991_v15  ;;  %v21992_v14 = vunpack.i.l.bf16 %v21991_v15  ;;  %v17306_v60 = vsel %vm3098_vm9, %v21997_v56, %v21998_v5  ;;  %v17305_v53 = vsel %vm3098_vm9, %v21973_v36, %v21997_v56 }
 0xc7b   :  { %19085 = vmatprep.subr.bf16.mxu0 %v19084_v37  ;;  %v22006_v12 = vpop.permute.xlu1 %22005 }
 0xc7c   :  { %v17301_v49 = vsel %vm3098_vm9, %v21992_v14, %v21993_v20  ;;  %v17300_v2 = vsel %vm3098_vm9, %v21968_v11, %v21992_v14  ;;  %v22008_v35 = vunpack.i.h.bf16 %v22006_v12  ;;  %v22007_v33 = vunpack.i.l.bf16 %v22006_v12  ;;  %v28155_v11 = vld [vmem:[#allocation4_spill] sm:$0xff] }
 0xc7d   :  { %18246 = vmatmul.mubr.msk.f32.vlgmr.msra.gmra.mrb[50].mxu0 %vm3691_vm11, %v27985_v46  ;;  %v22001_v48 = vpop.permute.xlu0 %22000  ;;  %v19104_v7 = vpack.c.bf16 %v17306_v60, %v17301_v49  ;;  %v19106_v26 = vpack.c.bf16 %v17305_v53, %v17300_v2 }
 0xc7e   :  { %19087 = vmatpush1.bf16.msra.mxu0 %v19086_v10  ;;  %17225 = vmatprep.mubr.f32.mxu0 %v27922_v29  ;;  %v22002_v40 = vunpack.i.l.bf16 %v22001_v48  ;;  %v22003_v63 = vunpack.i.h.bf16 %v22001_v48  ;;  %v17302_v37 = vsel %vm3098_vm9, %v21993_v20, %v22007_v33  ;;  %v17307_v0 = vsel %vm3098_vm9, %v21998_v5, %v22008_v35 }
 0xc7f   :  { %19089 = vmatprep.subr.bf16.mxu0 %v19088_v24  ;;  %v19112_v51 = vpack.c.bf16 %v22008_v35, %v22007_v33  ;;  %v19114_v10 = vpack.c.bf16 %v17307_v0, %v17302_v37 }
 0xc80   :  { %v17292_v13 = vsel %vm3098_vm9, %v21983_v43, %v22002_v40  ;;  %v17297_v54 = vsel %vm3098_vm9, %v21988_v28, %v22003_v63  ;;  %v19108_v1 = vpack.c.bf16 %v22003_v63, %v22002_v40 }
 0xc81   :  { %v19110_v3 = vpack.c.bf16 %v17297_v54, %v17292_v13 }
 0xc82   :  { %19091 = vmatpush1.bf16.msra.mxu0 %v19090_v22 }
 0xc83   :  { %19093 = vmatprep.subr.bf16.mxu0 %v19092_v6 }
 0xc85   :  { %18247 = vmatmul.mubr.msk.f32.vlgmr.msra.gmra.mrb[52].mxu0 %vm3691_vm11, %v27985_v46  ;;  %v18248_v46 = vld [vmem:[%s28079_s10 + $0x10] sm:$0x3] }
 0xc86   :  { %19095 = vmatpush1.bf16.msra.mxu0 %v19094_v27  ;;  %17399 = vmatprep.mubr.f32.mxu0 %v27922_v29 }
 0xc87   :  { %19097 = vmatprep.subr.bf16.mxu0 %v19096_v31  ;;  %v14685_v61 = vpop.permute.xlu0 %14684 }
 0xc8a   :  { %19099 = vmatpush1.bf16.msra.mxu0 %v19098_v30 }
 0xc8b   :  { %19101 = vmatprep.subr.bf16.mxu0 %v19100_v23 }
 0xc8d   :  { %18249 = vmatmul.mubr.msk.f32.vlgmr.msra.gmra.mrb[48].mxu0 %vm3691_vm11, %v18248_v46 }
 0xc8e   :  { %19103 = vmatpush1.bf16.msra.mxu0 %v19102_v16  ;;  %17470 = vmatprep.mubr.f32.mxu0 %v27922_v29 }
 0xc8f   :  { %19105 = vmatprep.subr.bf16.mxu0 %v19104_v7 }
 0xc92   :  { %19107 = vmatpush1.bf16.msra.mxu0 %v19106_v26 }
 0xc93   :  { %19109 = vmatprep.subr.bf16.mxu0 %v19108_v1 }
 0xc95   :  { %18250 = vmatmul.mubr.msk.f32.vlgmr.msra.gmra.mrb[50].mxu0 %vm3691_vm11, %v18248_v46 }
 0xc96   :  { %19111 = vmatpush1.bf16.msra.mxu0 %v19110_v3  ;;  %17541 = vmatprep.mubr.f32.mxu0 %v27922_v29 }
 0xc97   :  { %19113 = vmatprep.subr.bf16.mxu0 %v19112_v51 }
 0xc9a   :  { %19115 = vmatpush1.bf16.msra.mxu0 %v19114_v10 }
 0xc9d   :  { %18251 = vmatmul.mubr.msk.f32.vlgmr.msra.gmra.mrb[52].mxu0 %vm3691_vm11, %v18248_v46 }
 0xd60   :  { %v17401_v4 = vpop.f32.mrb[48].mxu0 }
 0xd61   :  { %v19222_v17 = vadd.f32 %v17401_v4, %v14685_v61  ;;  %v17403_v19 = vpop.f32.mrb[49].mxu0 }
 0xd62   :  { %v19223_v18 = vadd.f32 %v17403_v19, %v14685_v61 }
 0xd64   :  { %v17560_v39 = vcombine.low %v19222_v17, %v19223_v18 }
 0xd66   :  { %v17568_v59 = vrot.slane %v17560_v39, %v28155_v11 }
 0xd68   :  { %v17472_v24 = vpop.f32.mrb[50].mxu0 }
 0xd69   :  { %v19224_v47 = vadd.f32 %v17472_v24, %v14685_v61  ;;  %v17474_v62 = vpop.f32.mrb[51].mxu0 }
 0xd6a   :  { %v19225_v36 = vadd.f32 %v17474_v62, %v14685_v61 }
 0xd6c   :  { %v17561_v38 = vcombine.low %v19224_v47, %v19225_v36 }
 0xd6e   :  { %v17575_v29 = vrot.slane %v17561_v38, %v28155_v11 }
 0xd70   :  { %v17576_v22 = vcombine.low %v17568_v59, %v17575_v29  ;;  %v17543_v6 = vpop.f32.mrb[52].mxu0 }
 0xd71   :  { %v19226_v55 = vadd.f32 %v17543_v6, %v14685_v61  ;;  %v17545_v45 = vpop.f32.mrb[53].mxu0 }
 0xd72   :  { %17587 = vst [vmem:[%s28081_s12] sm:$0xff] %v17576_v22  ;;  %v19227_v32 = vadd.f32 %v17545_v45, %v14685_v61 }
 0xd74   :  { %v17577_v21 = vcombine.low %v19226_v55, %v19227_v32 }
 0xd76   :  { %v17584_v28 = vrot.slane %v17577_v21, %v28155_v11 }
 0xd78   :  { %17590 = vst.msk [vmem:[%s28081_s12 + $0x8] sm:$0xf] %vm17589_vm13, %v17584_v28 }

</bundles_post_ra>
